<compile_context>
chip_gen: v7x
topology: tpu7x:2x2x1
jax: 0.10.0
libtpu: 0.0.40
codegen_flags: <defaults>
</compile_context>

<pallas_src>
import functools

import numpy as np
import jax
import jax.numpy as jnp
from jax.experimental import pallas as pl
from jax.experimental.pallas import tpu as pltpu


# ---------------------------------------------------------------------------
# Fused valid-conv (banded GEMM) + bias + ReLU + 2x2/stride-2 max-pool kernel.
# One grid step = one image.
# ---------------------------------------------------------------------------
def _conv_relu_pool_kernel(x_ref, wb_ref, bt_ref, phe_ref, pho_ref,
                           swe_ref, swo_ref, o_ref, *, KH, OH):
    # x_ref:  (H, W*Cin)            row-flattened image
    # wb_ref: (KH, W*Cin, OW*Cout)  banded conv weights
    # bt_ref: (1, OW*Cout)          bias tiled across output columns
    # phe/pho: (OH2, OH)            one-hot even/odd row selectors (H pool)
    # swe/swo: (OW*Cout, OW2*Cout)  one-hot even/odd col selectors (W pool)
    # o_ref:  (OH2, OW2*Cout)
    acc = jnp.dot(x_ref[0:OH, :], wb_ref[0],
                  preferred_element_type=jnp.float32)
    for ki in range(1, KH):
        acc = acc + jnp.dot(x_ref[ki:ki + OH, :], wb_ref[ki],
                            preferred_element_type=jnp.float32)
    y = jnp.maximum(acc + bt_ref[...], 0.0)                     # bias + ReLU
    yh = jnp.maximum(                                           # pool along H
        jnp.dot(phe_ref[...], y, preferred_element_type=jnp.float32),
        jnp.dot(pho_ref[...], y, preferred_element_type=jnp.float32))
    out = jnp.maximum(                                          # pool along W
        jnp.dot(yh, swe_ref[...], preferred_element_type=jnp.float32),
        jnp.dot(yh, swo_ref[...], preferred_element_type=jnp.float32))
    o_ref[...] = out.astype(o_ref.dtype)


def conv_relu_pool_pallas(x, layer):
    """x: (B, H, W*Cin) f32 row-flat; returns (B, OH//2, (OW//2)*Cout)."""
    B, H, WC = x.shape
    wb = layer["wb"]
    KH, _, OWC = wb.shape
    bt, phe, pho, swe, swo = (layer["bt"], layer["phe"], layer["pho"],
                              layer["swe"], layer["swo"])
    OH2, OH = phe.shape
    OW2C = swe.shape[1]
    kernel = functools.partial(_conv_relu_pool_kernel, KH=KH, OH=OH)
    return pl.pallas_call(
        kernel,
        out_shape=jax.ShapeDtypeStruct((B, OH2, OW2C), jnp.float32),
        grid=(B,),
        in_specs=[
            pl.BlockSpec((None, H, WC), lambda i: (i, 0, 0)),
            pl.BlockSpec((KH, WC, OWC), lambda i: (0, 0, 0)),
            pl.BlockSpec((1, OWC), lambda i: (0, 0)),
            pl.BlockSpec((OH2, OH), lambda i: (0, 0)),
            pl.BlockSpec((OH2, OH), lambda i: (0, 0)),
            pl.BlockSpec((OWC, OW2C), lambda i: (0, 0)),
            pl.BlockSpec((OWC, OW2C), lambda i: (0, 0)),
        ],
        out_specs=pl.BlockSpec((None, OH2, OW2C), lambda i: (i, 0, 0)),
        compiler_params=pltpu.CompilerParams(dimension_semantics=("parallel",)),
    )(x, wb, bt, phe, pho, swe, swo)


# ---------------------------------------------------------------------------
# Fused fc1+ReLU+fc2+ReLU+fc3 kernel (all weights resident in VMEM).
# ---------------------------------------------------------------------------
def _mlp_kernel(x_ref, w1_ref, b1_ref, w2_ref, b2_ref, w3_ref, b3_ref, o_ref):
    h = jnp.dot(x_ref[...], w1_ref[...],
                preferred_element_type=jnp.float32) + b1_ref[...]
    h = jnp.maximum(h, 0.0)
    h = jnp.dot(h, w2_ref[...],
                preferred_element_type=jnp.float32) + b2_ref[...]
    h = jnp.maximum(h, 0.0)
    out = jnp.dot(h, w3_ref[...],
                  preferred_element_type=jnp.float32) + b3_ref[...]
    o_ref[...] = out.astype(o_ref.dtype)


def mlp_pallas(x, w1, b1, w2, b2, w3, b3):
    """x: (B, K1); weights already in (K, N) layout."""
    B, K1 = x.shape
    N1, N2, N3 = w1.shape[1], w2.shape[1], w3.shape[1]
    TM = 256 if (B % 256 == 0) else B       # tile batch when large, else 1 block
    return pl.pallas_call(
        _mlp_kernel,
        out_shape=jax.ShapeDtypeStruct((B, N3), jnp.float32),
        grid=(B // TM,),
        in_specs=[
            pl.BlockSpec((TM, K1), lambda i: (i, 0)),
            pl.BlockSpec((K1, N1), lambda i: (0, 0)),
            pl.BlockSpec((1, N1), lambda i: (0, 0)),
            pl.BlockSpec((N1, N2), lambda i: (0, 0)),
            pl.BlockSpec((1, N2), lambda i: (0, 0)),
            pl.BlockSpec((N2, N3), lambda i: (0, 0)),
            pl.BlockSpec((1, N3), lambda i: (0, 0)),
        ],
        out_specs=pl.BlockSpec((TM, N3), lambda i: (i, 0)),
        compiler_params=pltpu.CompilerParams(dimension_semantics=("parallel",)),
    )(x, w1, b1.reshape(1, N1), w2, b2.reshape(1, N2), w3, b3.reshape(1, N3))


# ---------------------------------------------------------------------------
# Forward pass
# ---------------------------------------------------------------------------
def lenet_forward(p, x_nchw):
    B, C, H, W = x_nchw.shape
    x = jnp.transpose(x_nchw, (0, 2, 3, 1)).reshape(B, H, W * C)   # row-flat (h, w*c)
    y = conv_relu_pool_pallas(x, p["c1"])        # (B, 30, 30*6)
    y = conv_relu_pool_pallas(y, p["c2"])        # (B, 13, 13*16)
    y = y.reshape(B, -1)                         # NHWC flatten; fc1 cols pre-permuted
    return mlp_pallas(y, p["fc1_w"], p["fc1_b"], p["fc2_w"], p["fc2_b"],
                      p["fc3_w"], p["fc3_b"])


# ---------------------------------------------------------------------------
# Parameters: PyTorch-layout init + one-time kernel-layout preparation.
# ---------------------------------------------------------------------------
def init_params(key, classes):
    ks = jax.random.split(key, 5)

    def conv_xavier(k, shape):                     # xavier_normal_ for convs
        cout, cin, kh, kw = shape
        std = (2.0 / ((cin + cout) * kh * kw)) ** 0.5
        return std * jax.random.normal(k, shape, jnp.float32)

    def lin_normal(k, shape):                      # normal(0, 0.1) for Linear
        return 0.1 * jax.random.normal(k, shape, jnp.float32)

    return {
        "conv1_w": conv_xavier(ks[0], (6, 3, 5, 5)),
        "conv1_b": jnp.zeros((6,), jnp.float32),
        "conv2_w": conv_xavier(ks[1], (16, 6, 5, 5)),
        "conv2_b": jnp.zeros((16,), jnp.float32),
        "fc1_w": lin_normal(ks[2], (240, 16 * 13 * 13)),
        "fc1_b": jnp.zeros((240,), jnp.float32),
        "fc2_w": lin_normal(ks[3], (84, 240)),
        "fc2_b": jnp.zeros((84,), jnp.float32),
        "fc3_w": lin_normal(ks[4], (classes, 84)),
        "fc3_b": jnp.zeros((classes,), jnp.float32),
    }


def _band_weights(w, w_in):
    """(Cout,Cin,KH,KW) -> (KH, W*Cin, OW*Cout) band matrices (host-side, one-time)."""
    w = np.asarray(jax.device_get(w)).astype(np.float32)
    cout, cin, kh, kw = w.shape
    ow = w_in - kw + 1
    wb = np.zeros((kh, w_in * cin, ow * cout), np.float32)
    for ki in range(kh):
        for kj in range(kw):
            blk = w[:, :, ki, kj].T                       # (cin, cout)
            for o in range(ow):
                wi = o + kj
                wb[ki, wi * cin:(wi + 1) * cin, o * cout:(o + 1) * cout] = blk
    return jnp.asarray(wb)


def _pool_selectors(oh, ow, cout):
    """Constant 0/1 matrices implementing the 2x2/stride-2 max-pool via MXU."""
    oh2, ow2 = oh // 2, ow // 2
    phe = np.zeros((oh2, oh), np.float32)
    pho = np.zeros((oh2, oh), np.float32)
    phe[np.arange(oh2), 2 * np.arange(oh2)] = 1.0
    pho[np.arange(oh2), 2 * np.arange(oh2) + 1] = 1.0
    swe = np.zeros((ow * cout, ow2 * cout), np.float32)
    swo = np.zeros((ow * cout, ow2 * cout), np.float32)
    cols = np.arange(cout)
    for q in range(ow2):
        swe[(2 * q) * cout + cols, q * cout + cols] = 1.0
        swo[(2 * q + 1) * cout + cols, q * cout + cols] = 1.0
    return (jnp.asarray(phe), jnp.asarray(pho),
            jnp.asarray(swe), jnp.asarray(swo))


def _prep_conv_layer(w, b, w_in):
    cout, cin, kh, kw = w.shape
    oh, ow = w_in - kh + 1, w_in - kw + 1
    phe, pho, swe, swo = _pool_selectors(oh, ow, cout)
    return {
        "wb": _band_weights(w, w_in),
        "bt": jnp.tile(jnp.asarray(b, jnp.float32), ow).reshape(1, ow * cout),
        "phe": phe, "pho": pho, "swe": swe, "swo": swo,
    }


def prepare_params(params, img_hw=64):
    """One-time re-layout of the PyTorch-layout weights for the kernels."""
    c1 = _prep_conv_layer(params["conv1_w"], params["conv1_b"], img_hw)
    hw2 = (img_hw - 4) // 2                     # 30
    c2 = _prep_conv_layer(params["conv2_w"], params["conv2_b"], hw2)

    # fc1: permute input columns from NCHW-flatten (c,h,w) to NHWC-flatten
    # (h,w,c), then transpose to (K, N) so the kernel GEMM needs no .T.
    fc1_w = params["fc1_w"]
    n1 = fc1_w.shape[0]
    cout2 = params["conv2_w"].shape[0]
    hw3 = (hw2 - 4) // 2                        # 13
    fc1_w = fc1_w.reshape(n1, cout2, hw3, hw3).transpose(0, 2, 3, 1).reshape(n1, -1)

    return {
        "c1": c1, "c2": c2,
        "fc1_w": jnp.transpose(fc1_w),            "fc1_b": params["fc1_b"],
        "fc2_w": jnp.transpose(params["fc2_w"]),  "fc2_b": params["fc2_b"],
        "fc3_w": jnp.transpose(params["fc3_w"]),  "fc3_b": params["fc3_b"],
    }


# ---------------------------------------------------------------------------
# Pure-JAX reference (PyTorch semantics) for correctness validation.
# ---------------------------------------------------------------------------
def reference_forward(params, x):
    hi = jax.lax.Precision.HIGHEST

    def conv(x, w, b):
        y = jax.lax.conv_general_dilated(
            x, w, (1, 1), "VALID",
            dimension_numbers=("NCHW", "OIHW", "NCHW"), precision=hi)
        return jnp.maximum(y + b[None, :, None, None], 0.0)

    def pool(x):
        return jax.lax.reduce_window(x, -jnp.inf, jax.lax.max,
                                     (1, 1, 2, 2), (1, 1, 2, 2), "VALID")

    y = pool(conv(x, params["conv1_w"], params["conv1_b"]))
    y = pool(conv(y, params["conv2_w"], params["conv2_b"]))
    y = y.reshape(y.shape[0], -1)
    y = jnp.maximum(jnp.dot(y, params["fc1_w"].T, precision=hi) + params["fc1_b"], 0.0)
    y = jnp.maximum(jnp.dot(y, params["fc2_w"].T, precision=hi) + params["fc2_b"], 0.0)
    return jnp.dot(y, params["fc3_w"].T, precision=hi) + params["fc3_b"]


if __name__ == "__main__":
    classes = 10
    key = jax.random.PRNGKey(0)
    pkey, xkey = jax.random.split(key)
    raw_params = init_params(pkey, classes)
    params = prepare_params(raw_params)
    # fc1 expects 16*13*13 features => input spatial size must be 3x64x64.
    x = jax.random.normal(xkey, (2, 3, 64, 64), jnp.float32)
    out = jax.jit(lenet_forward)(params, x)
    out = jax.block_until_ready(out)
    assert out.shape == (2, classes)
    ref = jax.block_until_ready(reference_forward(raw_params, x))
    if not np.allclose(np.asarray(out), np.asarray(ref), rtol=1e-2, atol=1e-2):
        raise AssertionError("Pallas LeNet output mismatch vs reference")
    print("KERNEL_OK")
</pallas_src>

<mosaic_0001>
module attributes {stable_mosaic.version = 11 : i64} {
  func.func @_conv_relu_pool_kernel(%arg0: i32, %arg1: memref<1x30x180xf32, #tpu.memory_space<vmem>>, %arg2: memref<5x180x416xf32, #tpu.memory_space<vmem>>, %arg3: memref<1x416xf32, #tpu.memory_space<vmem>>, %arg4: memref<13x26xf32, #tpu.memory_space<vmem>>, %arg5: memref<13x26xf32, #tpu.memory_space<vmem>>, %arg6: memref<416x208xf32, #tpu.memory_space<vmem>>, %arg7: memref<416x208xf32, #tpu.memory_space<vmem>>, %arg8: memref<1x13x208xf32, #tpu.memory_space<vmem>>) attributes {dimension_semantics = [#tpu.dimension_semantics<parallel>], iteration_bounds = array<i64: 2>, scalar_prefetch = 0 : i64, scratch_operands = 0 : i64, tpu.core_type = #tpu.core_type<tc>, window_params = [{transform_indices = @transform_0, window_bounds = array<i64: 1, 30, 180>}, {pipeline_mode = #tpu.pipeline_mode<synchronous>, transform_indices = @transform_1, window_bounds = array<i64: 5, 180, 416>}, {pipeline_mode = #tpu.pipeline_mode<synchronous>, transform_indices = @transform_2, window_bounds = array<i64: 1, 416>}, {pipeline_mode = #tpu.pipeline_mode<synchronous>, transform_indices = @transform_3, window_bounds = array<i64: 13, 26>}, {pipeline_mode = #tpu.pipeline_mode<synchronous>, transform_indices = @transform_4, window_bounds = array<i64: 13, 26>}, {pipeline_mode = #tpu.pipeline_mode<synchronous>, transform_indices = @transform_5, window_bounds = array<i64: 416, 208>}, {pipeline_mode = #tpu.pipeline_mode<synchronous>, transform_indices = @transform_6, window_bounds = array<i64: 416, 208>}, {transform_indices = @transform_7, window_bounds = array<i64: 1, 13, 208>}]} {
    %c0 = arith.constant 0 : index
    %c0_0 = arith.constant 0 : index
    %c0_1 = arith.constant 0 : index
    %0 = vector.load %arg1[%c0, %c0_0, %c0_1] : memref<1x30x180xf32, #tpu.memory_space<vmem>>, vector<1x26x180xf32>
    %1 = vector.shape_cast %0 : vector<1x26x180xf32> to vector<26x180xf32>
    %c0_2 = arith.constant 0 : index
    %c0_3 = arith.constant 0 : index
    %c0_4 = arith.constant 0 : index
    %2 = vector.load %arg2[%c0_2, %c0_3, %c0_4] : memref<5x180x416xf32, #tpu.memory_space<vmem>>, vector<1x180x416xf32>
    %3 = vector.shape_cast %2 : vector<1x180x416xf32> to vector<180x416xf32>
    %cst = arith.constant dense<0.000000e+00> : vector<26x416xf32>
    %4 = tpu.matmul %1, %3, %cst {dimension_numbers = #tpu.dot_dimension_numbers<[1], [0], [0], [1], [0, 0, 1, 1], [], []>} : vector<26x180xf32>, vector<180x416xf32>, vector<26x416xf32> -> vector<26x416xf32>
    %c0_5 = arith.constant 0 : index
    %c1 = arith.constant 1 : index
    %c0_6 = arith.constant 0 : index
    %5 = vector.load %arg1[%c0_5, %c1, %c0_6] : memref<1x30x180xf32, #tpu.memory_space<vmem>>, vector<1x26x180xf32>
    %6 = vector.shape_cast %5 : vector<1x26x180xf32> to vector<26x180xf32>
    %c1_7 = arith.constant 1 : index
    %c0_8 = arith.constant 0 : index
    %c0_9 = arith.constant 0 : index
    %7 = vector.load %arg2[%c1_7, %c0_8, %c0_9] : memref<5x180x416xf32, #tpu.memory_space<vmem>>, vector<1x180x416xf32>
    %8 = vector.shape_cast %7 : vector<1x180x416xf32> to vector<180x416xf32>
    %cst_10 = arith.constant dense<0.000000e+00> : vector<26x416xf32>
    %9 = tpu.matmul %6, %8, %cst_10 {dimension_numbers = #tpu.dot_dimension_numbers<[1], [0], [0], [1], [0, 0, 1, 1], [], []>} : vector<26x180xf32>, vector<180x416xf32>, vector<26x416xf32> -> vector<26x416xf32>
    %10 = arith.addf %4, %9 : vector<26x416xf32>
    %c0_11 = arith.constant 0 : index
    %c2 = arith.constant 2 : index
    %c0_12 = arith.constant 0 : index
    %11 = vector.load %arg1[%c0_11, %c2, %c0_12] : memref<1x30x180xf32, #tpu.memory_space<vmem>>, vector<1x26x180xf32>
    %12 = vector.shape_cast %11 : vector<1x26x180xf32> to vector<26x180xf32>
    %c2_13 = arith.constant 2 : index
    %c0_14 = arith.constant 0 : index
    %c0_15 = arith.constant 0 : index
    %13 = vector.load %arg2[%c2_13, %c0_14, %c0_15] : memref<5x180x416xf32, #tpu.memory_space<vmem>>, vector<1x180x416xf32>
    %14 = vector.shape_cast %13 : vector<1x180x416xf32> to vector<180x416xf32>
    %cst_16 = arith.constant dense<0.000000e+00> : vector<26x416xf32>
    %15 = tpu.matmul %12, %14, %cst_16 {dimension_numbers = #tpu.dot_dimension_numbers<[1], [0], [0], [1], [0, 0, 1, 1], [], []>} : vector<26x180xf32>, vector<180x416xf32>, vector<26x416xf32> -> vector<26x416xf32>
    %16 = arith.addf %10, %15 : vector<26x416xf32>
    %c0_17 = arith.constant 0 : index
    %c3 = arith.constant 3 : index
    %c0_18 = arith.constant 0 : index
    %17 = vector.load %arg1[%c0_17, %c3, %c0_18] : memref<1x30x180xf32, #tpu.memory_space<vmem>>, vector<1x26x180xf32>
    %18 = vector.shape_cast %17 : vector<1x26x180xf32> to vector<26x180xf32>
    %c3_19 = arith.constant 3 : index
    %c0_20 = arith.constant 0 : index
    %c0_21 = arith.constant 0 : index
    %19 = vector.load %arg2[%c3_19, %c0_20, %c0_21] : memref<5x180x416xf32, #tpu.memory_space<vmem>>, vector<1x180x416xf32>
    %20 = vector.shape_cast %19 : vector<1x180x416xf32> to vector<180x416xf32>
    %cst_22 = arith.constant dense<0.000000e+00> : vector<26x416xf32>
    %21 = tpu.matmul %18, %20, %cst_22 {dimension_numbers = #tpu.dot_dimension_numbers<[1], [0], [0], [1], [0, 0, 1, 1], [], []>} : vector<26x180xf32>, vector<180x416xf32>, vector<26x416xf32> -> vector<26x416xf32>
    %22 = arith.addf %16, %21 : vector<26x416xf32>
    %c0_23 = arith.constant 0 : index
    %c4 = arith.constant 4 : index
    %c0_24 = arith.constant 0 : index
    %23 = vector.load %arg1[%c0_23, %c4, %c0_24] : memref<1x30x180xf32, #tpu.memory_space<vmem>>, vector<1x26x180xf32>
    %24 = vector.shape_cast %23 : vector<1x26x180xf32> to vector<26x180xf32>
    %c4_25 = arith.constant 4 : index
    %c0_26 = arith.constant 0 : index
    %c0_27 = arith.constant 0 : index
    %25 = vector.load %arg2[%c4_25, %c0_26, %c0_27] : memref<5x180x416xf32, #tpu.memory_space<vmem>>, vector<1x180x416xf32>
    %26 = vector.shape_cast %25 : vector<1x180x416xf32> to vector<180x416xf32>
    %cst_28 = arith.constant dense<0.000000e+00> : vector<26x416xf32>
    %27 = tpu.matmul %24, %26, %cst_28 {dimension_numbers = #tpu.dot_dimension_numbers<[1], [0], [0], [1], [0, 0, 1, 1], [], []>} : vector<26x180xf32>, vector<180x416xf32>, vector<26x416xf32> -> vector<26x416xf32>
    %28 = arith.addf %22, %27 : vector<26x416xf32>
    %c0_29 = arith.constant 0 : index
    %c0_30 = arith.constant 0 : index
    %29 = vector.load %arg3[%c0_29, %c0_30] : memref<1x416xf32, #tpu.memory_space<vmem>>, vector<1x416xf32>
    %30 = vector.broadcast %29 : vector<1x416xf32> to vector<26x416xf32>
    %31 = arith.addf %28, %30 : vector<26x416xf32>
    %cst_31 = arith.constant 0.000000e+00 : f32
    %32 = vector.broadcast %cst_31 : f32 to vector<26x416xf32>
    %33 = arith.maximumf %31, %32 : vector<26x416xf32>
    %c0_32 = arith.constant 0 : index
    %c0_33 = arith.constant 0 : index
    %34 = vector.load %arg4[%c0_32, %c0_33] : memref<13x26xf32, #tpu.memory_space<vmem>>, vector<13x26xf32>
    %cst_34 = arith.constant dense<0.000000e+00> : vector<13x416xf32>
    %35 = tpu.matmul %34, %33, %cst_34 {dimension_numbers = #tpu.dot_dimension_numbers<[1], [0], [0], [1], [0, 0, 1, 1], [], []>} : vector<13x26xf32>, vector<26x416xf32>, vector<13x416xf32> -> vector<13x416xf32>
    %c0_35 = arith.constant 0 : index
    %c0_36 = arith.constant 0 : index
    %36 = vector.load %arg5[%c0_35, %c0_36] : memref<13x26xf32, #tpu.memory_space<vmem>>, vector<13x26xf32>
    %cst_37 = arith.constant dense<0.000000e+00> : vector<13x416xf32>
    %37 = tpu.matmul %36, %33, %cst_37 {dimension_numbers = #tpu.dot_dimension_numbers<[1], [0], [0], [1], [0, 0, 1, 1], [], []>} : vector<13x26xf32>, vector<26x416xf32>, vector<13x416xf32> -> vector<13x416xf32>
    %38 = arith.maximumf %35, %37 : vector<13x416xf32>
    %c0_38 = arith.constant 0 : index
    %c0_39 = arith.constant 0 : index
    %39 = vector.load %arg6[%c0_38, %c0_39] : memref<416x208xf32, #tpu.memory_space<vmem>>, vector<416x208xf32>
    %cst_40 = arith.constant dense<0.000000e+00> : vector<13x208xf32>
    %40 = tpu.matmul %38, %39, %cst_40 {dimension_numbers = #tpu.dot_dimension_numbers<[1], [0], [0], [1], [0, 0, 1, 1], [], []>} : vector<13x416xf32>, vector<416x208xf32>, vector<13x208xf32> -> vector<13x208xf32>
    %c0_41 = arith.constant 0 : index
    %c0_42 = arith.constant 0 : index
    %41 = vector.load %arg7[%c0_41, %c0_42] : memref<416x208xf32, #tpu.memory_space<vmem>>, vector<416x208xf32>
    %cst_43 = arith.constant dense<0.000000e+00> : vector<13x208xf32>
    %42 = tpu.matmul %38, %41, %cst_43 {dimension_numbers = #tpu.dot_dimension_numbers<[1], [0], [0], [1], [0, 0, 1, 1], [], []>} : vector<13x416xf32>, vector<416x208xf32>, vector<13x208xf32> -> vector<13x208xf32>
    %43 = arith.maximumf %40, %42 : vector<13x208xf32>
    %c0_44 = arith.constant 0 : index
    %c0_45 = arith.constant 0 : index
    %c0_46 = arith.constant 0 : index
    %44 = vector.load %arg8[%c0_44, %c0_45, %c0_46] : memref<1x13x208xf32, #tpu.memory_space<vmem>>, vector<1x13x208xf32>
    %45 = vector.shape_cast %44 : vector<1x13x208xf32> to vector<13x208xf32>
    %46 = vector.shape_cast %43 : vector<13x208xf32> to vector<1x13x208xf32>
    tpu.vector_store %arg8[%c0_44, %c0_45, %c0_46], %46 {strides = array<i32>} : memref<1x13x208xf32, #tpu.memory_space<vmem>>, vector<1x13x208xf32>,
    return
  }
  func.func @transform_0(%arg0: i32) -> (i32, i32, i32) {
    %c0_i32 = arith.constant 0 : i32
    %c0_i32_0 = arith.constant 0 : i32
    %c0_i32_1 = arith.constant 0 : i32
    return %arg0, %c0_i32, %c0_i32_0 : i32, i32, i32
  }
  func.func @transform_1(%arg0: i32) -> (i32, i32, i32) {
    %c0_i32 = arith.constant 0 : i32
    %c0_i32_0 = arith.constant 0 : i32
    %c0_i32_1 = arith.constant 0 : i32
    %c0_i32_2 = arith.constant 0 : i32
    return %c0_i32, %c0_i32_0, %c0_i32_1 : i32, i32, i32
  }
  func.func @transform_2(%arg0: i32) -> (i32, i32) {
    %c0_i32 = arith.constant 0 : i32
    %c0_i32_0 = arith.constant 0 : i32
    %c0_i32_1 = arith.constant 0 : i32
    return %c0_i32, %c0_i32_0 : i32, i32
  }
  func.func @transform_3(%arg0: i32) -> (i32, i32) {
    %c0_i32 = arith.constant 0 : i32
    %c0_i32_0 = arith.constant 0 : i32
    %c0_i32_1 = arith.constant 0 : i32
    return %c0_i32, %c0_i32_0 : i32, i32
  }
  func.func @transform_4(%arg0: i32) -> (i32, i32) {
    %c0_i32 = arith.constant 0 : i32
    %c0_i32_0 = arith.constant 0 : i32
    %c0_i32_1 = arith.constant 0 : i32
    return %c0_i32, %c0_i32_0 : i32, i32
  }
  func.func @transform_5(%arg0: i32) -> (i32, i32) {
    %c0_i32 = arith.constant 0 : i32
    %c0_i32_0 = arith.constant 0 : i32
    %c0_i32_1 = arith.constant 0 : i32
    return %c0_i32, %c0_i32_0 : i32, i32
  }
  func.func @transform_6(%arg0: i32) -> (i32, i32) {
    %c0_i32 = arith.constant 0 : i32
    %c0_i32_0 = arith.constant 0 : i32
    %c0_i32_1 = arith.constant 0 : i32
    return %c0_i32, %c0_i32_0 : i32, i32
  }
  func.func @transform_7(%arg0: i32) -> (i32, i32, i32) {
    %c0_i32 = arith.constant 0 : i32
    %c0_i32_0 = arith.constant 0 : i32
    %c0_i32_1 = arith.constant 0 : i32
    return %arg0, %c0_i32, %c0_i32_0 : i32, i32, i32
  }
}

module attributes {stable_mosaic.version = 11 : i64} {
  func.func @_conv_relu_pool_kernel(%arg0: i32, %arg1: memref<1x64x192xf32, #tpu.memory_space<vmem>>, %arg2: memref<5x192x360xf32, #tpu.memory_space<vmem>>, %arg3: memref<1x360xf32, #tpu.memory_space<vmem>>, %arg4: memref<30x60xf32, #tpu.memory_space<vmem>>, %arg5: memref<30x60xf32, #tpu.memory_space<vmem>>, %arg6: memref<360x180xf32, #tpu.memory_space<vmem>>, %arg7: memref<360x180xf32, #tpu.memory_space<vmem>>, %arg8: memref<1x30x180xf32, #tpu.memory_space<vmem>>) attributes {dimension_semantics = [#tpu.dimension_semantics<parallel>], iteration_bounds = array<i64: 2>, scalar_prefetch = 0 : i64, scratch_operands = 0 : i64, tpu.core_type = #tpu.core_type<tc>, window_params = [{transform_indices = @transform_0, window_bounds = array<i64: 1, 64, 192>}, {pipeline_mode = #tpu.pipeline_mode<synchronous>, transform_indices = @transform_1, window_bounds = array<i64: 5, 192, 360>}, {pipeline_mode = #tpu.pipeline_mode<synchronous>, transform_indices = @transform_2, window_bounds = array<i64: 1, 360>}, {pipeline_mode = #tpu.pipeline_mode<synchronous>, transform_indices = @transform_3, window_bounds = array<i64: 30, 60>}, {pipeline_mode = #tpu.pipeline_mode<synchronous>, transform_indices = @transform_4, window_bounds = array<i64: 30, 60>}, {pipeline_mode = #tpu.pipeline_mode<synchronous>, transform_indices = @transform_5, window_bounds = array<i64: 360, 180>}, {pipeline_mode = #tpu.pipeline_mode<synchronous>, transform_indices = @transform_6, window_bounds = array<i64: 360, 180>}, {transform_indices = @transform_7, window_bounds = array<i64: 1, 30, 180>}]} {
    %c0 = arith.constant 0 : index
    %c0_0 = arith.constant 0 : index
    %c0_1 = arith.constant 0 : index
    %0 = vector.load %arg1[%c0, %c0_0, %c0_1] : memref<1x64x192xf32, #tpu.memory_space<vmem>>, vector<1x60x192xf32>
    %1 = vector.shape_cast %0 : vector<1x60x192xf32> to vector<60x192xf32>
    %c0_2 = arith.constant 0 : index
    %c0_3 = arith.constant 0 : index
    %c0_4 = arith.constant 0 : index
    %2 = vector.load %arg2[%c0_2, %c0_3, %c0_4] : memref<5x192x360xf32, #tpu.memory_space<vmem>>, vector<1x192x360xf32>
    %3 = vector.shape_cast %2 : vector<1x192x360xf32> to vector<192x360xf32>
    %cst = arith.constant dense<0.000000e+00> : vector<60x360xf32>
    %4 = tpu.matmul %1, %3, %cst {dimension_numbers = #tpu.dot_dimension_numbers<[1], [0], [0], [1], [0, 0, 1, 1], [], []>} : vector<60x192xf32>, vector<192x360xf32>, vector<60x360xf32> -> vector<60x360xf32>
    %c0_5 = arith.constant 0 : index
    %c1 = arith.constant 1 : index
    %c0_6 = arith.constant 0 : index
    %5 = vector.load %arg1[%c0_5, %c1, %c0_6] : memref<1x64x192xf32, #tpu.memory_space<vmem>>, vector<1x60x192xf32>
    %6 = vector.shape_cast %5 : vector<1x60x192xf32> to vector<60x192xf32>
    %c1_7 = arith.constant 1 : index
    %c0_8 = arith.constant 0 : index
    %c0_9 = arith.constant 0 : index
    %7 = vector.load %arg2[%c1_7, %c0_8, %c0_9] : memref<5x192x360xf32, #tpu.memory_space<vmem>>, vector<1x192x360xf32>
    %8 = vector.shape_cast %7 : vector<1x192x360xf32> to vector<192x360xf32>
    %cst_10 = arith.constant dense<0.000000e+00> : vector<60x360xf32>
    %9 = tpu.matmul %6, %8, %cst_10 {dimension_numbers = #tpu.dot_dimension_numbers<[1], [0], [0], [1], [0, 0, 1, 1], [], []>} : vector<60x192xf32>, vector<192x360xf32>, vector<60x360xf32> -> vector<60x360xf32>
    %10 = arith.addf %4, %9 : vector<60x360xf32>
    %c0_11 = arith.constant 0 : index
    %c2 = arith.constant 2 : index
    %c0_12 = arith.constant 0 : index
    %11 = vector.load %arg1[%c0_11, %c2, %c0_12] : memref<1x64x192xf32, #tpu.memory_space<vmem>>, vector<1x60x192xf32>
    %12 = vector.shape_cast %11 : vector<1x60x192xf32> to vector<60x192xf32>
    %c2_13 = arith.constant 2 : index
    %c0_14 = arith.constant 0 : index
    %c0_15 = arith.constant 0 : index
    %13 = vector.load %arg2[%c2_13, %c0_14, %c0_15] : memref<5x192x360xf32, #tpu.memory_space<vmem>>, vector<1x192x360xf32>
    %14 = vector.shape_cast %13 : vector<1x192x360xf32> to vector<192x360xf32>
    %cst_16 = arith.constant dense<0.000000e+00> : vector<60x360xf32>
    %15 = tpu.matmul %12, %14, %cst_16 {dimension_numbers = #tpu.dot_dimension_numbers<[1], [0], [0], [1], [0, 0, 1, 1], [], []>} : vector<60x192xf32>, vector<192x360xf32>, vector<60x360xf32> -> vector<60x360xf32>
    %16 = arith.addf %10, %15 : vector<60x360xf32>
    %c0_17 = arith.constant 0 : index
    %c3 = arith.constant 3 : index
    %c0_18 = arith.constant 0 : index
    %17 = vector.load %arg1[%c0_17, %c3, %c0_18] : memref<1x64x192xf32, #tpu.memory_space<vmem>>, vector<1x60x192xf32>
    %18 = vector.shape_cast %17 : vector<1x60x192xf32> to vector<60x192xf32>
    %c3_19 = arith.constant 3 : index
    %c0_20 = arith.constant 0 : index
    %c0_21 = arith.constant 0 : index
    %19 = vector.load %arg2[%c3_19, %c0_20, %c0_21] : memref<5x192x360xf32, #tpu.memory_space<vmem>>, vector<1x192x360xf32>
    %20 = vector.shape_cast %19 : vector<1x192x360xf32> to vector<192x360xf32>
    %cst_22 = arith.constant dense<0.000000e+00> : vector<60x360xf32>
    %21 = tpu.matmul %18, %20, %cst_22 {dimension_numbers = #tpu.dot_dimension_numbers<[1], [0], [0], [1], [0, 0, 1, 1], [], []>} : vector<60x192xf32>, vector<192x360xf32>, vector<60x360xf32> -> vector<60x360xf32>
    %22 = arith.addf %16, %21 : vector<60x360xf32>
    %c0_23 = arith.constant 0 : index
    %c4 = arith.constant 4 : index
    %c0_24 = arith.constant 0 : index
    %23 = vector.load %arg1[%c0_23, %c4, %c0_24] : memref<1x64x192xf32, #tpu.memory_space<vmem>>, vector<1x60x192xf32>
    %24 = vector.shape_cast %23 : vector<1x60x192xf32> to vector<60x192xf32>
    %c4_25 = arith.constant 4 : index
    %c0_26 = arith.constant 0 : index
    %c0_27 = arith.constant 0 : index
    %25 = vector.load %arg2[%c4_25, %c0_26, %c0_27] : memref<5x192x360xf32, #tpu.memory_space<vmem>>, vector<1x192x360xf32>
    %26 = vector.shape_cast %25 : vector<1x192x360xf32> to vector<192x360xf32>
    %cst_28 = arith.constant dense<0.000000e+00> : vector<60x360xf32>
    %27 = tpu.matmul %24, %26, %cst_28 {dimension_numbers = #tpu.dot_dimension_numbers<[1], [0], [0], [1], [0, 0, 1, 1], [], []>} : vector<60x192xf32>, vector<192x360xf32>, vector<60x360xf32> -> vector<60x360xf32>
    %28 = arith.addf %22, %27 : vector<60x360xf32>
    %c0_29 = arith.constant 0 : index
    %c0_30 = arith.constant 0 : index
    %29 = vector.load %arg3[%c0_29, %c0_30] : memref<1x360xf32, #tpu.memory_space<vmem>>, vector<1x360xf32>
    %30 = vector.broadcast %29 : vector<1x360xf32> to vector<60x360xf32>
    %31 = arith.addf %28, %30 : vector<60x360xf32>
    %cst_31 = arith.constant 0.000000e+00 : f32
    %32 = vector.broadcast %cst_31 : f32 to vector<60x360xf32>
    %33 = arith.maximumf %31, %32 : vector<60x360xf32>
    %c0_32 = arith.constant 0 : index
    %c0_33 = arith.constant 0 : index
    %34 = vector.load %arg4[%c0_32, %c0_33] : memref<30x60xf32, #tpu.memory_space<vmem>>, vector<30x60xf32>
    %cst_34 = arith.constant dense<0.000000e+00> : vector<30x360xf32>
    %35 = tpu.matmul %34, %33, %cst_34 {dimension_numbers = #tpu.dot_dimension_numbers<[1], [0], [0], [1], [0, 0, 1, 1], [], []>} : vector<30x60xf32>, vector<60x360xf32>, vector<30x360xf32> -> vector<30x360xf32>
    %c0_35 = arith.constant 0 : index
    %c0_36 = arith.constant 0 : index
    %36 = vector.load %arg5[%c0_35, %c0_36] : memref<30x60xf32, #tpu.memory_space<vmem>>, vector<30x60xf32>
    %cst_37 = arith.constant dense<0.000000e+00> : vector<30x360xf32>
    %37 = tpu.matmul %36, %33, %cst_37 {dimension_numbers = #tpu.dot_dimension_numbers<[1], [0], [0], [1], [0, 0, 1, 1], [], []>} : vector<30x60xf32>, vector<60x360xf32>, vector<30x360xf32> -> vector<30x360xf32>
    %38 = arith.maximumf %35, %37 : vector<30x360xf32>
    %c0_38 = arith.constant 0 : index
    %c0_39 = arith.constant 0 : index
    %39 = vector.load %arg6[%c0_38, %c0_39] : memref<360x180xf32, #tpu.memory_space<vmem>>, vector<360x180xf32>
    %cst_40 = arith.constant dense<0.000000e+00> : vector<30x180xf32>
    %40 = tpu.matmul %38, %39, %cst_40 {dimension_numbers = #tpu.dot_dimension_numbers<[1], [0], [0], [1], [0, 0, 1, 1], [], []>} : vector<30x360xf32>, vector<360x180xf32>, vector<30x180xf32> -> vector<30x180xf32>
    %c0_41 = arith.constant 0 : index
    %c0_42 = arith.constant 0 : index
    %41 = vector.load %arg7[%c0_41, %c0_42] : memref<360x180xf32, #tpu.memory_space<vmem>>, vector<360x180xf32>
    %cst_43 = arith.constant dense<0.000000e+00> : vector<30x180xf32>
    %42 = tpu.matmul %38, %41, %cst_43 {dimension_numbers = #tpu.dot_dimension_numbers<[1], [0], [0], [1], [0, 0, 1, 1], [], []>} : vector<30x360xf32>, vector<360x180xf32>, vector<30x180xf32> -> vector<30x180xf32>
    %43 = arith.maximumf %40, %42 : vector<30x180xf32>
    %c0_44 = arith.constant 0 : index
    %c0_45 = arith.constant 0 : index
    %c0_46 = arith.constant 0 : index
    %44 = vector.load %arg8[%c0_44, %c0_45, %c0_46] : memref<1x30x180xf32, #tpu.memory_space<vmem>>, vector<1x30x180xf32>
    %45 = vector.shape_cast %44 : vector<1x30x180xf32> to vector<30x180xf32>
    %46 = vector.shape_cast %43 : vector<30x180xf32> to vector<1x30x180xf32>
    tpu.vector_store %arg8[%c0_44, %c0_45, %c0_46], %46 {strides = array<i32>} : memref<1x30x180xf32, #tpu.memory_space<vmem>>, vector<1x30x180xf32>,
    return
  }
  func.func @transform_0(%arg0: i32) -> (i32, i32, i32) {
    %c0_i32 = arith.constant 0 : i32
    %c0_i32_0 = arith.constant 0 : i32
    %c0_i32_1 = arith.constant 0 : i32
    return %arg0, %c0_i32, %c0_i32_0 : i32, i32, i32
  }
  func.func @transform_1(%arg0: i32) -> (i32, i32, i32) {
    %c0_i32 = arith.constant 0 : i32
    %c0_i32_0 = arith.constant 0 : i32
    %c0_i32_1 = arith.constant 0 : i32
    %c0_i32_2 = arith.constant 0 : i32
    return %c0_i32, %c0_i32_0, %c0_i32_1 : i32, i32, i32
  }
  func.func @transform_2(%arg0: i32) -> (i32, i32) {
    %c0_i32 = arith.constant 0 : i32
    %c0_i32_0 = arith.constant 0 : i32
    %c0_i32_1 = arith.constant 0 : i32
    return %c0_i32, %c0_i32_0 : i32, i32
  }
  func.func @transform_3(%arg0: i32) -> (i32, i32) {
    %c0_i32 = arith.constant 0 : i32
    %c0_i32_0 = arith.constant 0 : i32
    %c0_i32_1 = arith.constant 0 : i32
    return %c0_i32, %c0_i32_0 : i32, i32
  }
  func.func @transform_4(%arg0: i32) -> (i32, i32) {
    %c0_i32 = arith.constant 0 : i32
    %c0_i32_0 = arith.constant 0 : i32
    %c0_i32_1 = arith.constant 0 : i32
    return %c0_i32, %c0_i32_0 : i32, i32
  }
  func.func @transform_5(%arg0: i32) -> (i32, i32) {
    %c0_i32 = arith.constant 0 : i32
    %c0_i32_0 = arith.constant 0 : i32
    %c0_i32_1 = arith.constant 0 : i32
    return %c0_i32, %c0_i32_0 : i32, i32
  }
  func.func @transform_6(%arg0: i32) -> (i32, i32) {
    %c0_i32 = arith.constant 0 : i32
    %c0_i32_0 = arith.constant 0 : i32
    %c0_i32_1 = arith.constant 0 : i32
    return %c0_i32, %c0_i32_0 : i32, i32
  }
  func.func @transform_7(%arg0: i32) -> (i32, i32, i32) {
    %c0_i32 = arith.constant 0 : i32
    %c0_i32_0 = arith.constant 0 : i32
    %c0_i32_1 = arith.constant 0 : i32
    return %arg0, %c0_i32, %c0_i32_0 : i32, i32, i32
  }
}

module attributes {stable_mosaic.version = 11 : i64} {
  func.func @_mlp_kernel(%arg0: i32, %arg1: memref<2x2704xf32, #tpu.memory_space<vmem>>, %arg2: memref<2704x240xf32, #tpu.memory_space<vmem>>, %arg3: memref<1x240xf32, #tpu.memory_space<vmem>>, %arg4: memref<240x84xf32, #tpu.memory_space<vmem>>, %arg5: memref<1x84xf32, #tpu.memory_space<vmem>>, %arg6: memref<84x10xf32, #tpu.memory_space<vmem>>, %arg7: memref<1x10xf32, #tpu.memory_space<vmem>>, %arg8: memref<2x10xf32, #tpu.memory_space<vmem>>) attributes {dimension_semantics = [#tpu.dimension_semantics<parallel>], iteration_bounds = array<i64: 1>, scalar_prefetch = 0 : i64, scratch_operands = 0 : i64, tpu.core_type = #tpu.core_type<tc>, window_params = [{transform_indices = @transform_0, window_bounds = array<i64: 2, 2704>}, {pipeline_mode = #tpu.pipeline_mode<synchronous>, transform_indices = @transform_1, window_bounds = array<i64: 2704, 240>}, {pipeline_mode = #tpu.pipeline_mode<synchronous>, transform_indices = @transform_2, window_bounds = array<i64: 1, 240>}, {pipeline_mode = #tpu.pipeline_mode<synchronous>, transform_indices = @transform_3, window_bounds = array<i64: 240, 84>}, {pipeline_mode = #tpu.pipeline_mode<synchronous>, transform_indices = @transform_4, window_bounds = array<i64: 1, 84>}, {pipeline_mode = #tpu.pipeline_mode<synchronous>, transform_indices = @transform_5, window_bounds = array<i64: 84, 10>}, {pipeline_mode = #tpu.pipeline_mode<synchronous>, transform_indices = @transform_6, window_bounds = array<i64: 1, 10>}, {transform_indices = @transform_7, window_bounds = array<i64: 2, 10>}]} {
    %c0 = arith.constant 0 : index
    %c0_0 = arith.constant 0 : index
    %0 = vector.load %arg1[%c0, %c0_0] : memref<2x2704xf32, #tpu.memory_space<vmem>>, vector<2x2704xf32>
    %c0_1 = arith.constant 0 : index
    %c0_2 = arith.constant 0 : index
    %1 = vector.load %arg2[%c0_1, %c0_2] : memref<2704x240xf32, #tpu.memory_space<vmem>>, vector<2704x240xf32>
    %cst = arith.constant dense<0.000000e+00> : vector<2x240xf32>
    %2 = tpu.matmul %0, %1, %cst {dimension_numbers = #tpu.dot_dimension_numbers<[1], [0], [0], [1], [0, 0, 1, 1], [], []>} : vector<2x2704xf32>, vector<2704x240xf32>, vector<2x240xf32> -> vector<2x240xf32>
    %c0_3 = arith.constant 0 : index
    %c0_4 = arith.constant 0 : index
    %3 = vector.load %arg3[%c0_3, %c0_4] : memref<1x240xf32, #tpu.memory_space<vmem>>, vector<1x240xf32>
    %4 = vector.broadcast %3 : vector<1x240xf32> to vector<2x240xf32>
    %5 = arith.addf %2, %4 : vector<2x240xf32>
    %cst_5 = arith.constant 0.000000e+00 : f32
    %6 = vector.broadcast %cst_5 : f32 to vector<2x240xf32>
    %7 = arith.maximumf %5, %6 : vector<2x240xf32>
    %c0_6 = arith.constant 0 : index
    %c0_7 = arith.constant 0 : index
    %8 = vector.load %arg4[%c0_6, %c0_7] : memref<240x84xf32, #tpu.memory_space<vmem>>, vector<240x84xf32>
    %cst_8 = arith.constant dense<0.000000e+00> : vector<2x84xf32>
    %9 = tpu.matmul %7, %8, %cst_8 {dimension_numbers = #tpu.dot_dimension_numbers<[1], [0], [0], [1], [0, 0, 1, 1], [], []>} : vector<2x240xf32>, vector<240x84xf32>, vector<2x84xf32> -> vector<2x84xf32>
    %c0_9 = arith.constant 0 : index
    %c0_10 = arith.constant 0 : index
    %10 = vector.load %arg5[%c0_9, %c0_10] : memref<1x84xf32, #tpu.memory_space<vmem>>, vector<1x84xf32>
    %11 = vector.broadcast %10 : vector<1x84xf32> to vector<2x84xf32>
    %12 = arith.addf %9, %11 : vector<2x84xf32>
    %cst_11 = arith.constant 0.000000e+00 : f32
    %13 = vector.broadcast %cst_11 : f32 to vector<2x84xf32>
    %14 = arith.maximumf %12, %13 : vector<2x84xf32>
    %c0_12 = arith.constant 0 : index
    %c0_13 = arith.constant 0 : index
    %15 = vector.load %arg6[%c0_12, %c0_13] : memref<84x10xf32, #tpu.memory_space<vmem>>, vector<84x10xf32>
    %cst_14 = arith.constant dense<0.000000e+00> : vector<2x10xf32>
    %16 = tpu.matmul %14, %15, %cst_14 {dimension_numbers = #tpu.dot_dimension_numbers<[1], [0], [0], [1], [0, 0, 1, 1], [], []>} : vector<2x84xf32>, vector<84x10xf32>, vector<2x10xf32> -> vector<2x10xf32>
    %c0_15 = arith.constant 0 : index
    %c0_16 = arith.constant 0 : index
    %17 = vector.load %arg7[%c0_15, %c0_16] : memref<1x10xf32, #tpu.memory_space<vmem>>, vector<1x10xf32>
    %18 = vector.broadcast %17 : vector<1x10xf32> to vector<2x10xf32>
    %19 = arith.addf %16, %18 : vector<2x10xf32>
    %c0_17 = arith.constant 0 : index
    %c0_18 = arith.constant 0 : index
    %20 = vector.load %arg8[%c0_17, %c0_18] : memref<2x10xf32, #tpu.memory_space<vmem>>, vector<2x10xf32>
    tpu.vector_store %arg8[%c0_17, %c0_18], %19 {strides = array<i32>} : memref<2x10xf32, #tpu.memory_space<vmem>>, vector<2x10xf32>,
    return
  }
  func.func @transform_0(%arg0: i32) -> (i32, i32) {
    %c0_i32 = arith.constant 0 : i32
    %c0_i32_0 = arith.constant 0 : i32
    return %arg0, %c0_i32 : i32, i32
  }
  func.func @transform_1(%arg0: i32) -> (i32, i32) {
    %c0_i32 = arith.constant 0 : i32
    %c0_i32_0 = arith.constant 0 : i32
    %c0_i32_1 = arith.constant 0 : i32
    return %c0_i32, %c0_i32_0 : i32, i32
  }
  func.func @transform_2(%arg0: i32) -> (i32, i32) {
    %c0_i32 = arith.constant 0 : i32
    %c0_i32_0 = arith.constant 0 : i32
    %c0_i32_1 = arith.constant 0 : i32
    return %c0_i32, %c0_i32_0 : i32, i32
  }
  func.func @transform_3(%arg0: i32) -> (i32, i32) {
    %c0_i32 = arith.constant 0 : i32
    %c0_i32_0 = arith.constant 0 : i32
    %c0_i32_1 = arith.constant 0 : i32
    return %c0_i32, %c0_i32_0 : i32, i32
  }
  func.func @transform_4(%arg0: i32) -> (i32, i32) {
    %c0_i32 = arith.constant 0 : i32
    %c0_i32_0 = arith.constant 0 : i32
    %c0_i32_1 = arith.constant 0 : i32
    return %c0_i32, %c0_i32_0 : i32, i32
  }
  func.func @transform_5(%arg0: i32) -> (i32, i32) {
    %c0_i32 = arith.constant 0 : i32
    %c0_i32_0 = arith.constant 0 : i32
    %c0_i32_1 = arith.constant 0 : i32
    return %c0_i32, %c0_i32_0 : i32, i32
  }
  func.func @transform_6(%arg0: i32) -> (i32, i32) {
    %c0_i32 = arith.constant 0 : i32
    %c0_i32_0 = arith.constant 0 : i32
    %c0_i32_1 = arith.constant 0 : i32
    return %c0_i32, %c0_i32_0 : i32, i32
  }
  func.func @transform_7(%arg0: i32) -> (i32, i32) {
    %c0_i32 = arith.constant 0 : i32
    %c0_i32_0 = arith.constant 0 : i32
    return %arg0, %c0_i32 : i32, i32
  }
}

</mosaic_0001>

<bundles_post_ra>
// kernel: lenet_forward.3
= control target key start
LH: loop header
LB: loop body
LE: loop exit
PB: predicated region body
PF: predicated region fallthrough
CT: control target
= control target key end

     0   :  { %12 = vsyncpa [#allocation3], 0  ;;  %s5734_s0 = inlined_call_operand.vmem [shape: f32[2,64,192], index: 0, kind: input, shape index: {}]   ;;  %s5735_s1 = inlined_call_operand.hbm [shape: f32[5,192,360], index: 1, kind: input, shape index: {}]   ;;  %s5736_s2 = inlined_call_operand.hbm [shape: f32[1,360], index: 2, kind: input, shape index: {}]   ;;  %s5737_s3 = inlined_call_operand.hbm [shape: f32[30,60], index: 3, kind: input, shape index: {}]   ;;  %s5738_s4 = inlined_call_operand.hbm [shape: f32[30,60], index: 4, kind: input, shape index: {}]   ;;  %s5739_s5 = inlined_call_operand.vmem [shape: f32[360,180], index: 5, kind: input, shape index: {}]   ;;  %s5740_s6 = inlined_call_operand.vmem [shape: f32[360,180], index: 6, kind: input, shape index: {}]   ;;  %s5741_s7 = inlined_call_operand.vmem [shape: f32[2,30,180], index: 7, kind: output, shape index: {}]  }
   0x1   :  { %13 = vsyncpa [#allocation5], 0 }
   0x2   :  { %14 = vsyncpa [#allocation8], 0  ;;  %s4489_s24 = smov 0  }
   0x3 LB: > { %s4438_s25 = smov [#allocation4]   ;;  %s4495_s27 = sadd.s32 4294967295, %s4436_s24   ;;  %s4436_s24 = sphi %s4489_s24, %s20_s24  }
   0x4   : > { %s229_s26 = sshll.u32 %s4438_s25, 4  ;;  %p3293_p0 = scmp.ge.s32.totalorder %s4436_s24, 1  ;;  %s230_s26 = int_to_ptr.vmem [resolvable:$true] %s229_s26 }
   0x5   : > { %p203_p1 = scmp.lt.s32.totalorder %s4436_s24, 3  ;;  %p5742_p2 = scmp.eq.s32.totalorder %s4495_s27, 0 }
   0x6   : > { %s4439_s29 = smov [#allocation2]   ;;  %s4440_s9 = smov [#allocation6]  }
   0x7   : > { %p4500_p3 = pnand %p3293_p0, %p203_p1  ;;  %s215_s30 = sshll.u32 %s4439_s29, 4  ;;  %s4506_s30 = int_to_ptr.vmem [resolvable:$true] %s215_s30 }
   0x8   : > { %s239_s10 = sshll.u32 %s4440_s9, 4  ;;  %s4306_s13 = scalar_lea.hbm %s5736_s2, 48  ;;  %s4514_s10 = int_to_ptr.vmem [resolvable:$true] %s239_s10 }
   0x9   : > { %s5744_s28 = scalar_select %p4500_p3, 1, 0 }
   0xa   : > { %p4254_p4 = pneg %p4500_p3  ;;  %p4307_p6 = scmp.ne.s32.totalorder %s5736_s2, %s4306_s13 }
   0xb   : > { %p4313_p10 = scmp.lt.u32.totalorder %s4306_s13, %s5736_s2 }
   0xc   : > { %p4510_p5 = pnand %p5742_p2, %p4254_p4 }
   0xe   : > { %p4524_p7 = pneg %p4510_p5 }
  0x10   : > { %p4309_p8 = pnand %p4524_p7, %p4307_p6 }
  0x12   : > { %p4310_p9 = pneg %p4309_p8 }
  0x14   : > { %p4315_p11 = pnand %p4313_p10, %p4310_p9 }
  0x16   : > { %4318 = shalt.err (!%p4315_p11)
}
  0x17   : > { %s4319_s19 = scalar_lea.vmem %s230_s26, 48  ;;  %s4326_s20 = scalar_lea.vmem %s230_s26, 64 }
  0x18   : > { %p4320_p12 = scmp.ne.s32.totalorder %s230_s26, %s4319_s19  ;;  %p4327_p1 = scmp.lt.s32.totalorder %s230_s26, %s230_s26 }
  0x19   : > { %p4328_p4 = scmp.lt.s32.totalorder %s4326_s20, %s4319_s19 }
  0x1a   : > { %p4322_p13 = pnand %p4320_p12, %p4524_p7 }
  0x1b   : > { %p4329_p2 = por %p4328_p4, %p4327_p1 }
  0x1c   : > { %p4323_p0 = pneg %p4322_p13 }
  0x1e   : > { %p4330_p3 = pnand %p4329_p2, %p4323_p0 }
  0x20   : > { %4333 = shalt.err (!%p4330_p3)
}
  0x21   : > { %4260 = dma.hbm_to_vmem [thread:$0]  (!%p4510_p5), %s5736_s2, 48, %s230_s26, [#allocation5]  }
  0x22   : > { %s4334_s29 = scalar_lea.hbm %s5735_s1, 46080 }
  0x23   : > { %p4335_p6 = scmp.ne.s32.totalorder %s5735_s1, %s4334_s29  ;;  %p4341_p2 = scmp.lt.u32.totalorder %s4334_s29, %s5735_s1 }
  0x25   : > { %p4337_p8 = pnand %p4335_p6, %p4524_p7 }
  0x27   : > { %p4338_p9 = pneg %p4337_p8 }
  0x29   : > { %p4343_p3 = pnand %p4341_p2, %p4338_p9 }
  0x2b   : > { %4346 = shalt.err (!%p4343_p3)
}
  0x2c   : > { %s4347_s26 = scalar_lea.vmem %s4506_s30, 46080  ;;  %p4355_p13 = scmp.lt.s32.totalorder %s4506_s30, %s4506_s30 }
  0x2d   : > { %p4348_p10 = scmp.ne.s32.totalorder %s4506_s30, %s4347_s26  ;;  %p4356_p0 = scmp.lt.s32.totalorder %s4347_s26, %s4347_s26 }
  0x2f   : > { %p4350_p11 = pnand %p4348_p10, %p4524_p7  ;;  %p4357_p1 = por %p4356_p0, %p4355_p13 }
  0x31   : > { %p4351_p12 = pneg %p4350_p11 }
  0x33   : > { %p4358_p4 = pnand %p4357_p1, %p4351_p12 }
  0x35   : > { %4361 = shalt.err (!%p4358_p4)
}
  0x36   : > { %s4441_s14 = smov 384   ;;  %s4442_s15 = smov 24  }
  0x37   : > { %4257 = dma.hbm_to_vmem [thread:$0]  (!%p4510_p5), %s5735_s1, 46080, %s4506_s30, [#allocation3], %s4441_s14, %s4441_s14, %s4442_s15  }
  0x38   : > { %s4362_s21 = scalar_lea.hbm %s5737_s3, 512 }
  0x39   : > { %p4363_p6 = scmp.ne.s32.totalorder %s5737_s3, %s4362_s21  ;;  %p4369_p2 = scmp.lt.u32.totalorder %s4362_s21, %s5737_s3 }
  0x3b   : > { %p4365_p8 = pnand %p4363_p6, %p4524_p7 }
  0x3d   : > { %p4366_p9 = pneg %p4365_p8 }
  0x3f   : > { %p4371_p3 = pnand %p4369_p2, %p4366_p9 }
  0x41   : > { %4374 = shalt.err (!%p4371_p3)
}
  0x42   : > { %s4375_s30 = scalar_lea.vmem %s4514_s10, 512  ;;  %p4383_p13 = scmp.lt.s32.totalorder %s4514_s10, %s4514_s10 }
  0x43   : > { %p4376_p10 = scmp.ne.s32.totalorder %s4514_s10, %s4375_s30  ;;  %p4384_p0 = scmp.lt.s32.totalorder %s4375_s30, %s4375_s30 }
  0x45   : > { %p4378_p11 = pnand %p4376_p10, %p4524_p7  ;;  %p4385_p1 = por %p4384_p0, %p4383_p13 }
  0x47   : > { %p4379_p12 = pneg %p4378_p11 }
  0x49   : > { %p4386_p4 = pnand %p4385_p1, %p4379_p12 }
  0x4b   : > { %4389 = shalt.err (!%p4386_p4)
}
  0x4c   : > { %s4443_s9 = smov 128   ;;  %s4444_s11 = smov 8  }
  0x4d   : > { %4263 = dma.hbm_to_vmem [thread:$0]  (!%p4510_p5), %s5737_s3, 512, %s4514_s10, [#allocation5], %s4443_s9, %s4443_s9, %s4444_s11  }
  0x4e   : > { %s4445_s26 = smov [#allocation7]   ;;  %s4390_s18 = scalar_lea.hbm %s5738_s4, 512 }
  0x4f   : > { %s252_s14 = sshll.u32 %s4445_s26, 4  ;;  %p4391_p6 = scmp.ne.s32.totalorder %s5738_s4, %s4390_s18  ;;  %s253_s14 = int_to_ptr.vmem [resolvable:$true] %s252_s14 }
  0x50   : > { %p4397_p2 = scmp.lt.u32.totalorder %s4390_s18, %s5738_s4 }
  0x51   : > { %p4393_p8 = pnand %p4391_p6, %p4524_p7 }
  0x53   : > { %p4394_p9 = pneg %p4393_p8 }
  0x55   : > { %p4399_p3 = pnand %p4397_p2, %p4394_p9 }
  0x57   : > { %4402 = shalt.err (!%p4399_p3)
}
  0x58   : > { %s4403_s10 = scalar_lea.vmem %s253_s14, 512  ;;  %p4411_p13 = scmp.lt.s32.totalorder %s253_s14, %s253_s14 }
  0x59   : > { %p4404_p10 = scmp.ne.s32.totalorder %s253_s14, %s4403_s10  ;;  %p4412_p0 = scmp.lt.s32.totalorder %s4403_s10, %s4403_s10 }
  0x5b   : > { %p4406_p11 = pnand %p4404_p10, %p4524_p7  ;;  %p4413_p1 = por %p4412_p0, %p4411_p13 }
  0x5d   : > { %p4407_p12 = pneg %p4406_p11 }
  0x5f   : > { %p4414_p4 = pnand %p4413_p1, %p4407_p12 }
  0x61   : > { %4417 = shalt.err (!%p4414_p4)
}
  0x62   : > { %4266 = dma.hbm_to_vmem [thread:$0]  (!%p4510_p5), %s5738_s4, 512, %s253_s14, [#allocation8], %s4443_s9, %s4443_s9, %s4444_s11  }
  0x63   : > { %p5747_p6 = scmp.ne.s32.totalorder %s5744_s28, 0 }
  0x64   : > { %p5748_p8 = scmp.eq.s32.totalorder (!%p5747_p6), %s4495_s27, 0 }
  0x65   : > { %282 = sbr.rel (%p5747_p6) target bundleno = 1097 (0x449), region = 48 }
  0x6c   : > { %4423 = dma.done.wait (%p5748_p8), [#allocation3], 46080   ;;  %p5749_p7 = pmov %p5748_p8 }
  0x6e   : > { %4425 = vsyncadd (%p5749_p7), [#allocation3], 4294921216  ;;  %p5750_p9 = pmov %p5749_p7 }
  0x6f   : > { %p5751_p2 = pmov %p5749_p7 }
  0x70   : > { %4427 = dma.done.wait (%p5750_p9), [#allocation5], 560  }
  0x71   : > { %4429 = vsyncadd (%p5751_p2), [#allocation5], 4294966736  ;;  %p5752_p3 = pmov %p5751_p2 }
  0x72   : > { %p5753_p5 = pmov %p5751_p2 }
  0x73   : > { %4431 = dma.done.wait (%p5752_p3), [#allocation8], 512  }
  0x74   : > { %4433 = vsyncadd (%p5753_p5), [#allocation8], 4294966784  ;;  %v4446_v0 = vmov 0.0|0.0   ;;  %v430_v1 = vld [vmem:[#allocation2 + $0x248] sm:$0xff]  ;;  %v433_v2 = vld [vmem:[#allocation2 + $0x260] sm:$0xff]  ;;  %p326_p10 = scmp.lt.s32.totalorder %s4495_s27, 1 }
  0x75   : > { %3538 = vmatprep.subr.bf16.mxu1 %v4446_v0  ;;  %v431_v3 = vld [vmem:[#allocation2 + $0x250] sm:$0xff]  ;;  %v3490_v4 = vpack.c.bf16 %v433_v2, %v430_v1  ;;  %v434_v5 = vld [vmem:[#allocation2 + $0x268] sm:$0xff]  ;;  %v429_v6 = vld [vmem:[#allocation2 + $0x240] sm:$0xff]  ;;  %vm517_vm0 = vcmask 1046528   ;;  %vm556_vm1 = vcmask 523264   ;;  %vm1108_vm2 = vcmask 1045504  }
  0x76   : > { %v432_v7 = vld [vmem:[#allocation2 + $0x258] sm:$0xff]  ;;  %v3539_v8 = vpack.c.bf16 %v434_v5, %v431_v3  ;;  %v439_v11 = vld [vmem:[#allocation2 + $0x290] sm:$0xff]  ;;  %v437_v12 = vld [vmem:[#allocation2 + $0x280] sm:$0xff]  ;;  %s5757_s27 = smov (!%p326_p10, %s4495_s27), 1  ;;  %vm1486_vm3 = vcmask 1044480   ;;  %vm1864_vm4 = vcmask 1043456  }
  0x77   : > { %v3492_v9 = vpack.c.bf16 %v432_v7, %v429_v6  ;;  %v436_v10 = vld [vmem:[#allocation2 + $0x278] sm:$0xff]  ;;  %3491 = vmatprep.subr.bf16.mxu0 %v3490_v4  ;;  %v435_v15 = vld [vmem:[#allocation2 + $0x270] sm:$0xff]  ;;  %v438_v16 = vld [vmem:[#allocation2 + $0x288] sm:$0xff]  ;;  %s3420_s28 = sshll.u32 %s5757_s27, 7  ;;  %vm2230_vm5 = vcmask 490496   ;;  %vm4448_vm6 = vmmov 1  }
  0x78   : > { %v3494_v13 = vpack.c.bf16 %v439_v11, %v436_v10  ;;  %v440_v14 = vld [vmem:[#allocation2 + $0x298] sm:$0xff]  ;;  %3540 = vmatpush1.bf16.msra.mxu1 %v3539_v8  ;;  %v3496_v18 = vpack.c.bf16 %v438_v16, %v435_v15  ;;  %v442_v19 = vld [vmem:[#allocation2 + $0x2a8] sm:$0xff]  ;;  %v445_v20 = vld [vmem:[#allocation2 + $0x2c0] sm:$0xff]  ;;  %s4634_s29 = scalar_lea.vmem %s5734_s0, %s3420_s28  ;;  %vm2718_vm8 = vcmask 850944   ;;  %s3421_s12 = sshll.u32 %s5757_s27, 6  ;;  %vm3186_vm9 = vcmask 424960  }
  0x79   : > { %3493 = vmatpush1.bf16.msra.mxu0 %v3492_v9  ;;  %v3542_v17 = vpack.c.bf16 %v440_v14, %v437_v12  ;;  %v443_v21 = vld [vmem:[#allocation2 + $0x2b0] sm:$0xff]  ;;  %3541 = vmatprep.subr.bf16.mxu1 %v4446_v0  ;;  %v3498_v22 = vpack.c.bf16 %v445_v20, %v442_v19  ;;  %v446_v23 = vld [vmem:[#allocation2 + $0x2c8] sm:$0xff]  ;;  %v441_v24 = vld [vmem:[#allocation2 + $0x2a0] sm:$0xff]  ;;  %s5718_s14 = scalar_lea.vmem %s5741_s7, %s3421_s12  ;;  %vm3193_vm10 = vcmask 422912  }
  0x7a   : > { %3495 = vmatprep.subr.bf16.mxu0 %v3494_v13  ;;  %v444_v25 = vld [vmem:[#allocation2 + $0x2b8] sm:$0xff]  ;;  %v451_v27 = vld [vmem:[#allocation2 + $0x2f0] sm:$0xff]  ;;  %v3545_v28 = vpack.c.bf16 %v446_v23, %v443_v21  ;;  %v449_v30 = vld [vmem:[#allocation2 + $0x2e0] sm:$0xff] }
  0x7b   : > { %v448_v26 = vld [vmem:[#allocation2 + $0x2d8] sm:$0xff]  ;;  %v3500_v29 = vpack.c.bf16 %v444_v25, %v441_v24  ;;  %v447_v33 = vld [vmem:[#allocation2 + $0x2d0] sm:$0xff]  ;;  %v450_v34 = vld [vmem:[#allocation2 + $0x2e8] sm:$0xff] }
  0x7c   : > { %3543 = vmatpush1.bf16.msra.mxu1 %v3542_v17  ;;  %v3502_v31 = vpack.c.bf16 %v451_v27, %v448_v26  ;;  %v452_v32 = vld [vmem:[#allocation2 + $0x2f8] sm:$0xff]  ;;  %v454_v35 = vld [vmem:[#allocation2 + $0x308] sm:$0xff]  ;;  %v457_v36 = vld [vmem:[#allocation2 + $0x320] sm:$0xff]  ;;  %v3504_v38 = vpack.c.bf16 %v450_v34, %v447_v33 }
  0x7d   : > { %3497 = vmatpush1.bf16.msra.mxu0 %v3496_v18  ;;  %3544 = vmatprep.subr.bf16.mxu1 %v4446_v0  ;;  %v3548_v37 = vpack.c.bf16 %v452_v32, %v449_v30  ;;  %v455_v39 = vld [vmem:[#allocation2 + $0x310] sm:$0xff]  ;;  %v3506_v40 = vpack.c.bf16 %v457_v36, %v454_v35  ;;  %v458_v41 = vld [vmem:[#allocation2 + $0x328] sm:$0xff]  ;;  %v453_v42 = vld [vmem:[#allocation2 + $0x300] sm:$0xff] }
  0x7e   : > { %3499 = vmatprep.subr.bf16.mxu0 %v3498_v22  ;;  %v456_v43 = vld [vmem:[#allocation2 + $0x318] sm:$0xff]  ;;  %v463_v45 = vld [vmem:[#allocation2 + $0x350] sm:$0xff]  ;;  %v3551_v46 = vpack.c.bf16 %v458_v41, %v455_v39  ;;  %v461_v48 = vld [vmem:[#allocation2 + $0x340] sm:$0xff] }
  0x7f   : > { %v460_v44 = vld [vmem:[#allocation2 + $0x338] sm:$0xff]  ;;  %v3508_v47 = vpack.c.bf16 %v456_v43, %v453_v42  ;;  %v459_v51 = vld [vmem:[#allocation2 + $0x330] sm:$0xff]  ;;  %v462_v52 = vld [vmem:[#allocation2 + $0x348] sm:$0xff] }
  0x80   : > { %3546 = vmatpush1.bf16.msra.mxu1 %v3545_v28  ;;  %v3510_v49 = vpack.c.bf16 %v463_v45, %v460_v44  ;;  %v464_v50 = vld [vmem:[#allocation2 + $0x358] sm:$0xff]  ;;  %v466_v53 = vld [vmem:[#allocation2 + $0x368] sm:$0xff]  ;;  %v469_v54 = vld [vmem:[#allocation2 + $0x380] sm:$0xff]  ;;  %v3512_v56 = vpack.c.bf16 %v462_v52, %v459_v51 }
  0x81   : > { %3501 = vmatpush1.bf16.msra.mxu0 %v3500_v29  ;;  %3547 = vmatprep.subr.bf16.mxu1 %v4446_v0  ;;  %v3554_v55 = vpack.c.bf16 %v464_v50, %v461_v48  ;;  %v467_v57 = vld [vmem:[#allocation2 + $0x370] sm:$0xff]  ;;  %v3514_v58 = vpack.c.bf16 %v469_v54, %v466_v53  ;;  %v470_v59 = vld [vmem:[#allocation2 + $0x388] sm:$0xff]  ;;  %v465_v60 = vld [vmem:[#allocation2 + $0x360] sm:$0xff] }
  0x82   : > { %3503 = vmatprep.subr.bf16.mxu0 %v3502_v31  ;;  %v468_v61 = vld [vmem:[#allocation2 + $0x378] sm:$0xff]  ;;  %v475_v63 = vld [vmem:[#allocation2 + $0x3b0] sm:$0xff]  ;;  %v3557_v1 = vpack.c.bf16 %v470_v59, %v467_v57  ;;  %v473_v3 = vld [vmem:[#allocation2 + $0x3a0] sm:$0xff] }
  0x83   : > { %v472_v62 = vld [vmem:[#allocation2 + $0x398] sm:$0xff]  ;;  %v3516_v2 = vpack.c.bf16 %v468_v61, %v465_v60  ;;  %v425_v5 = vld [vmem:[%s4634_s29 + $0x8] sm:$0xfe]  ;;  %v471_v8 = vld [vmem:[#allocation2 + $0x390] sm:$0xff] }
  0x84   : > { %3549 = vmatpush1.bf16.msra.mxu1 %v3548_v37  ;;  %v4637_v4 = vld [vmem:[%s4634_s29 + $0x18] sm:$0xff]  ;;  %v3518_v6 = vpack.c.bf16 %v475_v63, %v472_v62  ;;  %v474_v9 = vld [vmem:[#allocation2 + $0x3a8] sm:$0xff]  ;;  %v521_v10 = vrot.slane %v425_v5, 1  ;;  %v481_v13 = vld [vmem:[#allocation2 + $0x3e0] sm:$0xff] }
  0x85   : > { %3505 = vmatpush1.bf16.msra.mxu0 %v3504_v38  ;;  %3550 = vmatprep.subr.bf16.mxu1 %v4446_v0  ;;  %v476_v7 = vld [vmem:[#allocation2 + $0x3b8] sm:$0xff]  ;;  %v522_v11 = vrot.slane %v4637_v4, 1  ;;  %v478_v12 = vld [vmem:[#allocation2 + $0x3c8] sm:$0xff]  ;;  %v3520_v16 = vpack.c.bf16 %v474_v9, %v471_v8  ;;  %v479_v17 = vld [vmem:[#allocation2 + $0x3d0] sm:$0xff] }
  0x86   : > { %3507 = vmatprep.subr.bf16.mxu0 %v3506_v40  ;;  %v3560_v15 = vpack.c.bf16 %v476_v7, %v473_v3  ;;  %v3522_v18 = vpack.c.bf16 %v481_v13, %v478_v12  ;;  %v482_v19 = vld [vmem:[#allocation2 + $0x3e8] sm:$0xff]  ;;  %v477_v20 = vld [vmem:[#allocation2 + $0x3c0] sm:$0xff]  ;;  %v480_v21 = vld [vmem:[#allocation2 + $0x3d8] sm:$0xff] }
  0x87   : > { %v523_v14 = vsel %vm517_vm0, %v521_v10, %v522_v11  ;;  %v484_v22 = vld [vmem:[#allocation2 + $0x3f8] sm:$0xff]  ;;  %v487_v23 = vld [vmem:[#allocation2 + $0x410] sm:$0xff]  ;;  %v3563_v24 = vpack.c.bf16 %v482_v19, %v479_v17  ;;  %v3524_v25 = vpack.c.bf16 %v480_v21, %v477_v20  ;;  %v485_v26 = vld [vmem:[#allocation2 + $0x400] sm:$0xff] }
  0x88   : > { %3552 = vmatpush1.bf16.msra.mxu1 %v3551_v46  ;;  %3316 = vmatprep.mubr.msk.f32.mxu1 %vm556_vm1, %v523_v14  ;;  %v3526_v27 = vpack.c.bf16 %v487_v23, %v484_v22  ;;  %v488_v28 = vld [vmem:[#allocation2 + $0x418] sm:$0xff]  ;;  %v483_v29 = vld [vmem:[#allocation2 + $0x3f0] sm:$0xff]  ;;  %v486_v30 = vld [vmem:[#allocation2 + $0x408] sm:$0xff] }
  0x89   : > { %3509 = vmatpush1.bf16.msra.mxu0 %v3508_v47  ;;  %3553 = vmatprep.subr.bf16.mxu1 %v4446_v0  ;;  %v490_v31 = vld [vmem:[#allocation2 + $0x428] sm:$0xff]  ;;  %v493_v32 = vld [vmem:[#allocation2 + $0x440] sm:$0xff]  ;;  %v3566_v33 = vpack.c.bf16 %v488_v28, %v485_v26  ;;  %v3528_v34 = vpack.c.bf16 %v486_v30, %v483_v29  ;;  %v491_v35 = vld [vmem:[#allocation2 + $0x430] sm:$0xff] }
  0x8a   : > { %3511 = vmatprep.subr.bf16.mxu0 %v3510_v49  ;;  %3308 = vmatprep.mubr.msk.f32.mxu0 %vm556_vm1, %v523_v14  ;;  %v3530_v36 = vpack.c.bf16 %v493_v32, %v490_v31  ;;  %v494_v37 = vld [vmem:[#allocation2 + $0x448] sm:$0xff]  ;;  %v489_v38 = vld [vmem:[#allocation2 + $0x420] sm:$0xff]  ;;  %v492_v39 = vld [vmem:[#allocation2 + $0x438] sm:$0xff] }
  0x8b   : > { %v496_v40 = vld [vmem:[#allocation2 + $0x458] sm:$0xff]  ;;  %v499_v41 = vld [vmem:[#allocation2 + $0x470] sm:$0xff]  ;;  %v3569_v42 = vpack.c.bf16 %v494_v37, %v491_v35  ;;  %v3532_v43 = vpack.c.bf16 %v492_v39, %v489_v38  ;;  %v497_v44 = vld [vmem:[#allocation2 + $0x460] sm:$0xff] }
  0x8c   : > { %3555 = vmatpush1.bf16.msra.mxu1 %v3554_v55  ;;  %v500_v45 = vld [vmem:[#allocation2 + $0x478] sm:$0xff]  ;;  %v495_v46 = vld [vmem:[#allocation2 + $0x450] sm:$0xff]  ;;  %v3534_v47 = vpack.c.bf16 %v499_v41, %v496_v40  ;;  %v498_v48 = vld [vmem:[#allocation2 + $0x468] sm:$0xff] }
  0x8d   : > { %3513 = vmatpush1.bf16.msra.mxu0 %v3512_v56  ;;  %3556 = vmatprep.subr.bf16.mxu1 %v4446_v0  ;;  %v4652_v49 = vld [vmem:[%s4634_s29 + $0x10] sm:$0xff]  ;;  %v424_v50 = vld [vmem:[%s4634_s29] sm:$0xfe]  ;;  %v353_v51 = vld [vmem:[#allocation2 + $0x8] sm:$0xff]  ;;  %v3572_v53 = vpack.c.bf16 %v500_v45, %v497_v44  ;;  %v3536_v54 = vpack.c.bf16 %v498_v48, %v495_v46 }
  0x8e   : > { %3515 = vmatprep.subr.bf16.mxu0 %v3514_v58  ;;  %v356_v52 = vld [vmem:[#allocation2 + $0x20] sm:$0xff]  ;;  %v518_v55 = vrot.slane %v424_v50, 1  ;;  %v519_v56 = vrot.slane %v4652_v49, 1  ;;  %v354_v57 = vld [vmem:[#allocation2 + $0x10] sm:$0xff]  ;;  %v357_v58 = vld [vmem:[#allocation2 + $0x28] sm:$0xff] }
  0x8f   : > { %v4657_v59 = vld [vmem:[%s4634_s29 + $0x28] sm:$0xff]  ;;  %v3574_v60 = vpack.c.bf16 %v356_v52, %v353_v51  ;;  %v352_v61 = vld [vmem:[#allocation2] sm:$0xff]  ;;  %v355_v62 = vld [vmem:[#allocation2 + $0x18] sm:$0xff] }
  0x90   : > { %3558 = vmatpush1.bf16.msra.mxu1 %v3557_v1  ;;  %v4661_v63 = vld [vmem:[%s4634_s29 + $0x20] sm:$0xff]  ;;  %v359_v1 = vld [vmem:[#allocation2 + $0x38] sm:$0xff]  ;;  %v526_v3 = vrot.slane %v4657_v59, 1  ;;  %v520_v5 = vsel %vm517_vm0, %v518_v55, %v519_v56  ;;  %v3576_v7 = vpack.c.bf16 %v355_v62, %v352_v61  ;;  %v358_v14 = vld [vmem:[#allocation2 + $0x30] sm:$0xff] }
  0x91   : > { %3517 = vmatpush1.bf16.msra.mxu0 %v3516_v2  ;;  %3559 = vmatprep.subr.bf16.mxu1 %v4446_v0  ;;  %v362_v2 = vld [vmem:[#allocation2 + $0x50] sm:$0xff]  ;;  %v360_v8 = vld [vmem:[#allocation2 + $0x40] sm:$0xff]  ;;  %v363_v9 = vld [vmem:[#allocation2 + $0x58] sm:$0xff]  ;;  %v524_v10 = vrot.slane %v4661_v63, 1 }
  0x92   : > { %3519 = vmatprep.subr.bf16.mxu0 %v3518_v6  ;;  %v3623_v6 = vpack.c.bf16 %v357_v58, %v354_v57  ;;  %v4667_v12 = vld [vmem:[%s4634_s29 + $0x38] sm:$0xff]  ;;  %v3578_v13 = vpack.c.bf16 %v362_v2, %v359_v1  ;;  %v365_v17 = vld [vmem:[#allocation2 + $0x68] sm:$0xff]  ;;  %v527_v19 = vsel %vm517_vm0, %v522_v11, %v526_v3  ;;  %v3626_v21 = vpack.c.bf16 %v363_v9, %v360_v8  ;;  %v366_v23 = vld [vmem:[#allocation2 + $0x70] sm:$0xff] }
  0x93   : > { %v530_v20 = vrot.slane %v4667_v12, 1  ;;  %v364_v11 = vld [vmem:[#allocation2 + $0x60] sm:$0xff]  ;;  %v367_v29 = vld [vmem:[#allocation2 + $0x78] sm:$0xff]  ;;  %v374_v32 = vld [vmem:[#allocation2 + $0xb0] sm:$0xff] }
  0x94   : > { %3561 = vmatpush1.bf16.msra.mxu1 %v3560_v15  ;;  %v361_v15 = vld [vmem:[#allocation2 + $0x48] sm:$0xff]  ;;  %v4684_v30 = vld [vmem:[%s4634_s29 + $0x40] sm:$0xff]  ;;  %v371_v31 = vld [vmem:[#allocation2 + $0x98] sm:$0xff] }
  0x95   : > { %3521 = vmatpush1.bf16.msra.mxu0 %v3520_v16  ;;  %3562 = vmatprep.subr.bf16.mxu1 %v4446_v0  ;;  %v4671_v16 = vld [vmem:[%s4634_s29 + $0x30] sm:$0xff]  ;;  %v3580_v22 = vpack.c.bf16 %v361_v15, %v358_v14  ;;  %v372_v37 = vld [vmem:[#allocation2 + $0xa0] sm:$0xff]  ;;  %v375_v38 = vld [vmem:[#allocation2 + $0xb8] sm:$0xff]  ;;  %v532_v40 = vrot.slane %v4684_v30, 1 }
  0x96   : > { %3523 = vmatprep.subr.bf16.mxu0 %v3522_v18  ;;  %v368_v18 = vld [vmem:[#allocation2 + $0x80] sm:$0xff]  ;;  %v528_v26 = vrot.slane %v4671_v16, 1  ;;  %v4693_v41 = vld [vmem:[%s4634_s29 + $0x58] sm:$0xff]  ;;  %v373_v44 = vld [vmem:[#allocation2 + $0xa8] sm:$0xff]  ;;  %v3632_v51 = vpack.c.bf16 %v375_v38, %v372_v37 }
  0x97   : > { %v3582_v28 = vpack.c.bf16 %v368_v18, %v365_v17  ;;  %v4697_v45 = vld [vmem:[%s4634_s29 + $0x50] sm:$0xff]  ;;  %v377_v46 = vld [vmem:[#allocation2 + $0xc8] sm:$0xff]  ;;  %v538_v50 = vrot.slane %v4693_v41, 1  ;;  %v379_v61 = vld [vmem:[#allocation2 + $0xd8] sm:$0xff] }
  0x98   : > { %3564 = vmatpush1.bf16.msra.mxu1 %v3563_v24  ;;  %v369_v24 = vld [vmem:[#allocation2 + $0x88] sm:$0xff]  ;;  %v529_v39 = vsel %vm517_vm0, %v524_v10, %v528_v26  ;;  %v533_v55 = vsel %vm517_vm0, %v528_v26, %v532_v40  ;;  %v4710_v62 = vld [vmem:[%s4634_s29 + $0x60] sm:$0xff]  ;;  %v383_v1 = vld [vmem:[#allocation2 + $0xf8] sm:$0xff] }
  0x99   : > { %3525 = vmatpush1.bf16.msra.mxu0 %v3524_v25  ;;  %3565 = vmatprep.subr.bf16.mxu1 %v4446_v0  ;;  %v525_v25 = vsel %vm517_vm0, %v519_v56, %v524_v10  ;;  %v3629_v35 = vpack.c.bf16 %v369_v24, %v366_v23  ;;  %v536_v56 = vrot.slane %v4697_v45, 1  ;;  %v4706_v57 = vld [vmem:[%s4634_s29 + $0x68] sm:$0xff]  ;;  %v386_v2 = vld [vmem:[#allocation2 + $0x110] sm:$0xff]  ;;  %v384_v8 = vld [vmem:[#allocation2 + $0x100] sm:$0xff] }
  0x9a   : > { %3527 = vmatprep.subr.bf16.mxu0 %v3526_v27  ;;  %v4680_v27 = vld [vmem:[%s4634_s29 + $0x48] sm:$0xff]  ;;  %v387_v9 = vld [vmem:[#allocation2 + $0x118] sm:$0xff]  ;;  %v3594_v15 = vpack.c.bf16 %v386_v2, %v383_v1  ;;  %v382_v17 = vld [vmem:[#allocation2 + $0xf0] sm:$0xff] }
  0x9b   : > { %v537_v10 = vsel %vm517_vm0, %v532_v40, %v536_v56  ;;  %v427_v14 = vld [vmem:[%s4634_s29 + $0x78] sm:$0x1f]  ;;  %v385_v18 = vld [vmem:[#allocation2 + $0x108] sm:$0xff]  ;;  %v3638_v24 = vpack.c.bf16 %v387_v9, %v384_v8  ;;  %v390_v26 = vld [vmem:[#allocation2 + $0x130] sm:$0xff] }
  0x9c   : > { %3567 = vmatpush1.bf16.msra.mxu1 %v3566_v33  ;;  %v531_v33 = vsel %vm517_vm0, %v526_v3, %v530_v20  ;;  %v546_v23 = vrot.slane %v427_v14, 1  ;;  %v409_v8 = vld [vmem:[#allocation2 + $0x1c8] sm:$0xff]  ;;  %vm5079_vm7 = vmpackc.low %vm1864_vm4, %vm4448_vm6 }
  0x9d   : > { %3529 = vmatpush1.bf16.msra.mxu0 %v3528_v34  ;;  %3568 = vmatprep.subr.bf16.mxu1 %v4446_v0  ;;  %v534_v34 = vrot.slane %v4680_v27, 1  ;;  %v413_v9 = vld [vmem:[#allocation2 + $0x1e8] sm:$0xff] }
  0x9e   : > { %3531 = vmatprep.subr.bf16.mxu0 %v3530_v36  ;;  %v3584_v36 = vpack.c.bf16 %v367_v29, %v364_v11 }
  0x9f   : > { %v535_v48 = vsel %vm517_vm0, %v530_v20, %v534_v34  ;;  %v539_v3 = vsel %vm517_vm0, %v534_v34, %v538_v50  ;;  %v389_v20 = vld [vmem:[#allocation2 + $0x128] sm:$0xff]  ;;  %v395_v34 = vld [vmem:[#allocation2 + $0x158] sm:$0xff] }
  0xa0   : > { %3570 = vmatpush1.bf16.msra.mxu1 %v3569_v42  ;;  %v3586_v42 = vpack.c.bf16 %v374_v32, %v371_v31  ;;  %v393_v31 = vld [vmem:[#allocation2 + $0x148] sm:$0xff]  ;;  %v388_v32 = vld [vmem:[#allocation2 + $0x120] sm:$0xff] }
  0xa1   : > { %3533 = vmatpush1.bf16.msra.mxu0 %v3532_v43  ;;  %3571 = vmatprep.subr.bf16.mxu1 %v4446_v0  ;;  %v370_v43 = vld [vmem:[#allocation2 + $0x90] sm:$0xff]  ;;  %v3641_v37 = vpack.c.bf16 %v393_v31, %v390_v26  ;;  %v1033_v31 = vld [vmem:[#allocation2 + $0x488] sm:$0xff] }
  0xa2   : > { %3535 = vmatprep.subr.bf16.mxu0 %v3534_v47  ;;  %v380_v47 = vld [vmem:[#allocation2 + $0xe0] sm:$0xff]  ;;  %v3588_v52 = vpack.c.bf16 %v373_v44, %v370_v43  ;;  %v399_v43 = vld [vmem:[#allocation2 + $0x178] sm:$0xff]  ;;  %v394_v44 = vld [vmem:[#allocation2 + $0x150] sm:$0xff] }
  0xa3   : > { %v3590_v58 = vpack.c.bf16 %v380_v47, %v377_v46  ;;  %v397_v46 = vld [vmem:[#allocation2 + $0x168] sm:$0xff] }
  0xa4   : > { %3573 = vmatpush1.bf16.msra.mxu1 %v3572_v53  ;;  %v378_v53 = vld [vmem:[#allocation2 + $0xd0] sm:$0xff]  ;;  %v401_v47 = vld [vmem:[#allocation2 + $0x188] sm:$0xff] }
  0xa5   : > { %3537 = vmatpush1.bf16.msra.mxu0 %v3536_v54  ;;  %3622 = vmatprep.subr.bf16.mxu1 %v4446_v0  ;;  %v381_v54 = vld [vmem:[#allocation2 + $0xe8] sm:$0xff] }
  0xa6   : > { %3575 = vmatprep.subr.bf16.mxu0 %v3574_v60  ;;  %v376_v60 = vld [vmem:[#allocation2 + $0xc0] sm:$0xff] }
  0xa7   : > { %751 = vmatmul.mubr.f32.vlgmr.msra.gmra.mrb[0].mxu1 %v520_v5 }
  0xa8   : > { %638 = vmatmul.mubr.f32.vlgmr.msra.gmra.mrb[0].mxu0 %v520_v5  ;;  %3624 = vmatpush1.bf16.msra.mxu1 %v3623_v6  ;;  %v542_v5 = vrot.slane %v4706_v57, 1  ;;  %v3635_v6 = vpack.c.bf16 %v381_v54, %v378_v53  ;;  %v405_v54 = vld [vmem:[#allocation2 + $0x1a8] sm:$0xff] }
  0xa9   : > { %3577 = vmatpush1.bf16.msra.mxu0 %v3576_v7  ;;  %3625 = vmatprep.subr.bf16.mxu1 %v4446_v0  ;;  %v3592_v7 = vpack.c.bf16 %v379_v61, %v376_v60  ;;  %v410_v60 = vld [vmem:[#allocation2 + $0x1d0] sm:$0xff]  ;;  %v337_v61 = vld [vmem:[%s4634_s29 + $0x8] sm:$0xff] }
  0xaa   : > { %3579 = vmatprep.subr.bf16.mxu0 %v3578_v13  ;;  %3317 = vmatprep.mubr.msk.f32.mxu1 %vm556_vm1, %v527_v19  ;;  %v540_v13 = vrot.slane %v4710_v62, 1 }
  0xab   : > { %3309 = vmatprep.mubr.msk.f32.mxu0 %vm556_vm1, %v527_v19  ;;  %756 = vmatmul.mubr.f32.gmra.mrb[2].mxu1 %v525_v25  ;;  %v426_v19 = vld [vmem:[%s4634_s29 + $0x70] sm:$0x1f] }
  0xac   : > { %644 = vmatmul.mubr.f32.gmra.mrb[2].mxu0 %v525_v25  ;;  %3627 = vmatpush1.bf16.msra.mxu1 %v3626_v21  ;;  %v392_v21 = vld [vmem:[#allocation2 + $0x140] sm:$0xff]  ;;  %v3596_v25 = vpack.c.bf16 %v385_v18, %v382_v17  ;;  %v544_v11 = vrot.slane %v426_v19, 1  ;;  %v417_v18 = vld [vmem:[#allocation2 + $0x208] sm:$0xff] }
  0xad   : > { %3581 = vmatpush1.bf16.msra.mxu0 %v3580_v22  ;;  %3628 = vmatprep.subr.bf16.mxu1 %v4446_v0  ;;  %v543_v22 = vsel %vm517_vm0, %v538_v50, %v542_v5  ;;  %v3598_v29 = vpack.c.bf16 %v392_v21, %v389_v20  ;;  %v412_v19 = vld [vmem:[#allocation2 + $0x1e0] sm:$0xff]  ;;  %v415_v20 = vld [vmem:[#allocation2 + $0x1f8] sm:$0xff] }
  0xae   : > { %3583 = vmatprep.subr.bf16.mxu0 %v3582_v28  ;;  %3318 = vmatprep.mubr.msk.f32.mxu1 %vm556_vm1, %v531_v33  ;;  %v541_v28 = vsel %vm517_vm0, %v536_v56, %v540_v13  ;;  %v545_v40 = vsel %vm517_vm0, %v540_v13, %v544_v11  ;;  %v403_v56 = vld [vmem:[#allocation2 + $0x198] sm:$0xff] }
  0xaf   : > { %3310 = vmatprep.mubr.msk.f32.mxu0 %vm556_vm1, %v531_v33  ;;  %761 = vmatmul.mubr.f32.gmra.mrb[4].mxu1 %v529_v39  ;;  %v391_v33 = vld [vmem:[#allocation2 + $0x138] sm:$0xff] }
  0xb0   : > { %650 = vmatmul.mubr.f32.gmra.mrb[4].mxu0 %v529_v39  ;;  %3630 = vmatpush1.bf16.msra.mxu1 %v3629_v35  ;;  %v398_v35 = vld [vmem:[#allocation2 + $0x170] sm:$0xff]  ;;  %v3600_v38 = vpack.c.bf16 %v391_v33, %v388_v32  ;;  %v396_v39 = vld [vmem:[#allocation2 + $0x160] sm:$0xff]  ;;  %v419_v21 = vld [vmem:[#allocation2 + $0x218] sm:$0xff] }
  0xb1   : > { %3585 = vmatpush1.bf16.msra.mxu0 %v3584_v36  ;;  %3631 = vmatprep.subr.bf16.mxu1 %v4446_v0  ;;  %v547_v36 = vsel %vm517_vm0, %v542_v5, %v546_v23  ;;  %v3644_v50 = vpack.c.bf16 %v399_v43, %v396_v39  ;;  %v1036_v32 = vld [vmem:[#allocation2 + $0x4a0] sm:$0xff]  ;;  %v1035_v39 = vld [vmem:[#allocation2 + $0x498] sm:$0xff] }
  0xb2   : > { %3587 = vmatprep.subr.bf16.mxu0 %v3586_v42  ;;  %3319 = vmatprep.mubr.msk.f32.mxu1 %vm556_vm1, %v535_v48  ;;  %v3602_v42 = vpack.c.bf16 %v398_v35, %v395_v34  ;;  %v1034_v35 = vld [vmem:[#allocation2 + $0x490] sm:$0xff]  ;;  %v336_v43 = vld [vmem:[%s4634_s29] sm:$0xff] }
  0xb3   : > { %3311 = vmatprep.mubr.msk.f32.mxu0 %vm556_vm1, %v535_v48  ;;  %766 = vmatmul.mubr.f32.gmra.mrb[6].mxu1 %v533_v55  ;;  %v404_v48 = vld [vmem:[#allocation2 + $0x1a0] sm:$0xff] }
  0xb4   : > { %656 = vmatmul.mubr.f32.gmra.mrb[6].mxu0 %v533_v55  ;;  %3633 = vmatpush1.bf16.msra.mxu1 %v3632_v51  ;;  %v3604_v51 = vpack.c.bf16 %v397_v46, %v394_v44  ;;  %v3606_v53 = vpack.c.bf16 %v404_v48, %v401_v47  ;;  %v400_v55 = vld [vmem:[#allocation2 + $0x180] sm:$0xff]  ;;  %v1043_v48 = vld [vmem:[#allocation2 + $0x4d8] sm:$0xff] }
  0xb5   : > { %3589 = vmatpush1.bf16.msra.mxu0 %v3588_v52  ;;  %3634 = vmatprep.subr.bf16.mxu1 %v4446_v0  ;;  %v402_v52 = vld [vmem:[#allocation2 + $0x190] sm:$0xff]  ;;  %v3608_v2 = vpack.c.bf16 %v403_v56, %v400_v55  ;;  %v1040_v47 = vld [vmem:[#allocation2 + $0x4c0] sm:$0xff] }
  0xb6   : > { %3591 = vmatprep.subr.bf16.mxu0 %v3590_v58  ;;  %3320 = vmatprep.mubr.msk.f32.mxu1 %vm556_vm1, %v539_v3  ;;  %v407_v58 = vld [vmem:[#allocation2 + $0x1b8] sm:$0xff]  ;;  %v3647_v1 = vpack.c.bf16 %v405_v54, %v402_v52  ;;  %v1048_v54 = vld [vmem:[#allocation2 + $0x500] sm:$0xff]  ;;  %v3710_v55 = vpack.c.bf16 %v1043_v48, %v1040_v47  ;;  %v1078_v47 = vld [vmem:[#allocation2 + $0x5f0] sm:$0xff] }
  0xb7   : > { %3312 = vmatprep.mubr.msk.f32.mxu0 %vm556_vm1, %v539_v3  ;;  %771 = vmatmul.mubr.f32.gmra.mrb[8].mxu1 %v537_v10  ;;  %v408_v3 = vld [vmem:[#allocation2 + $0x1c0] sm:$0xff]  ;;  %v3610_v5 = vpack.c.bf16 %v410_v60, %v407_v58  ;;  %v1046_v58 = vld [vmem:[#allocation2 + $0x4f0] sm:$0xff]  ;;  %v1049_v60 = vld [vmem:[#allocation2 + $0x508] sm:$0xff] }
  0xb8   : > { %662 = vmatmul.mubr.f32.gmra.mrb[8].mxu0 %v537_v10  ;;  %3636 = vmatpush1.bf16.msra.mxu1 %v3635_v6  ;;  %v411_v6 = vld [vmem:[#allocation2 + $0x1d8] sm:$0xff]  ;;  %v416_v10 = vld [vmem:[#allocation2 + $0x200] sm:$0xff] }
  0xb9   : > { %3593 = vmatpush1.bf16.msra.mxu0 %v3592_v7  ;;  %3637 = vmatprep.subr.bf16.mxu1 %v4446_v0  ;;  %v406_v7 = vld [vmem:[#allocation2 + $0x1b0] sm:$0xff]  ;;  %v3650_v13 = vpack.c.bf16 %v411_v6, %v408_v3  ;;  %v3614_v17 = vpack.c.bf16 %v416_v10, %v413_v9  ;;  %v1051_v3 = vld [vmem:[#allocation2 + $0x518] sm:$0xff]  ;;  %v3713_v6 = vpack.c.bf16 %v1049_v60, %v1046_v58  ;;  %v1081_v60 = vld [vmem:[#allocation2 + $0x608] sm:$0xff] }
  0xba   : > { %3595 = vmatprep.subr.bf16.mxu0 %v3594_v15  ;;  %3321 = vmatprep.mubr.msk.f32.mxu1 %vm556_vm1, %v543_v22  ;;  %v3612_v14 = vpack.c.bf16 %v409_v8, %v406_v7  ;;  %v414_v15 = vld [vmem:[#allocation2 + $0x1f0] sm:$0xff]  ;;  %v1052_v8 = vld [vmem:[#allocation2 + $0x520] sm:$0xff]  ;;  %v1055_v9 = vld [vmem:[#allocation2 + $0x538] sm:$0xff] }
  0xbb   : > { %3313 = vmatprep.mubr.msk.f32.mxu0 %vm556_vm1, %v543_v22  ;;  %776 = vmatmul.mubr.f32.gmra.mrb[10].mxu1 %v541_v28  ;;  %v422_v22 = vld [vmem:[#allocation2 + $0x230] sm:$0xff] }
  0xbc   : > { %668 = vmatmul.mubr.f32.gmra.mrb[10].mxu0 %v541_v28  ;;  %3639 = vmatpush1.bf16.msra.mxu1 %v3638_v24  ;;  %v3616_v24 = vpack.c.bf16 %v415_v20, %v412_v19  ;;  %v3618_v26 = vpack.c.bf16 %v422_v22, %v419_v21  ;;  %v423_v28 = vld [vmem:[#allocation2 + $0x238] sm:$0xff]  ;;  %v1050_v10 = vld [vmem:[#allocation2 + $0x510] sm:$0xff]  ;;  %v1061_v21 = vld [vmem:[#allocation2 + $0x568] sm:$0xff] }
  0xbd   : > { %3597 = vmatpush1.bf16.msra.mxu0 %v3596_v25  ;;  %3640 = vmatprep.subr.bf16.mxu1 %v4446_v0  ;;  %v420_v25 = vld [vmem:[#allocation2 + $0x220] sm:$0xff]  ;;  %v1058_v20 = vld [vmem:[#allocation2 + $0x550] sm:$0xff] }
  0xbe   : > { %3599 = vmatprep.subr.bf16.mxu0 %v3598_v29  ;;  %3322 = vmatprep.mubr.msk.f32.mxu1 %vm556_vm1, %v547_v36  ;;  %v421_v29 = vld [vmem:[#allocation2 + $0x228] sm:$0xff]  ;;  %v3656_v33 = vpack.c.bf16 %v423_v28, %v420_v25  ;;  %v1056_v22 = vld [vmem:[#allocation2 + $0x540] sm:$0xff]  ;;  %v1063_v25 = vld [vmem:[#allocation2 + $0x578] sm:$0xff]  ;;  %v3719_v28 = vpack.c.bf16 %v1061_v21, %v1058_v20 }
  0xbf   : > { %3314 = vmatprep.mubr.msk.f32.mxu0 %vm556_vm1, %v547_v36  ;;  %781 = vmatmul.mubr.f32.gmra.mrb[12].mxu1 %v545_v40  ;;  %v3658_v36 = vpack.c.bf16 %v1036_v32, %v1033_v31  ;;  %v1067_v31 = vld [vmem:[#allocation2 + $0x598] sm:$0xff]  ;;  %v1062_v32 = vld [vmem:[#allocation2 + $0x570] sm:$0xff]  ;;  %v1088_v20 = vld [vmem:[#allocation2 + $0x640] sm:$0xff] }
  0xc0   : > { %674 = vmatmul.mubr.f32.gmra.mrb[12].mxu0 %v545_v40  ;;  %3642 = vmatpush1.bf16.msra.mxu1 %v3641_v37  ;;  %v1037_v37 = vld [vmem:[#allocation2 + $0x4a8] sm:$0xff]  ;;  %v1039_v40 = vld [vmem:[#allocation2 + $0x4b8] sm:$0xff] }
  0xc1   : > { %3601 = vmatpush1.bf16.msra.mxu0 %v3600_v38  ;;  %3643 = vmatprep.subr.bf16.mxu1 %v4446_v0  ;;  %v1032_v38 = vld [vmem:[#allocation2 + $0x480] sm:$0xff]  ;;  %v3707_v44 = vpack.c.bf16 %v1037_v37, %v1034_v35  ;;  %v1069_v35 = vld [vmem:[#allocation2 + $0x5a8] sm:$0xff] }
  0xc2   : > { %3603 = vmatprep.subr.bf16.mxu0 %v3602_v42  ;;  %3323 = vmatprep.mubr.msk.f32.mxu1 %vm556_vm1, %v546_v23  ;;  %v1042_v42 = vld [vmem:[#allocation2 + $0x4d0] sm:$0xff]  ;;  %v3660_v46 = vpack.c.bf16 %v1035_v39, %v1032_v38 }
  0xc3   : > { %3315 = vmatprep.mubr.msk.f32.mxu0 %vm556_vm1, %v546_v23  ;;  %786 = vmatmul.mubr.f32.gmra.mrb[14].mxu1 %v544_v11  ;;  %v3653_v23 = vpack.c.bf16 %v417_v18, %v414_v15  ;;  %v3662_v52 = vpack.c.bf16 %v1042_v42, %v1039_v40  ;;  %v1057_v15 = vld [vmem:[#allocation2 + $0x548] sm:$0xff]  ;;  %v3716_v18 = vpack.c.bf16 %v1055_v9, %v1052_v8  ;;  %v1070_v39 = vld [vmem:[#allocation2 + $0x5b0] sm:$0xff]  ;;  %v1068_v42 = vld [vmem:[#allocation2 + $0x5a0] sm:$0xff] }
  0xc4   : > { %680 = vmatmul.mubr.f32.gmra.mrb[14].mxu0 %v544_v11  ;;  %3645 = vmatpush1.bf16.msra.mxu1 %v3644_v50  ;;  %v418_v11 = vld [vmem:[#allocation2 + $0x210] sm:$0xff]  ;;  %v1073_v40 = vld [vmem:[#allocation2 + $0x5c8] sm:$0xff] }
  0xc5   : > { %3605 = vmatpush1.bf16.msra.mxu0 %v3604_v51  ;;  %3646 = vmatprep.subr.bf16.mxu1 %v4446_v0  ;;  %v3620_v34 = vpack.c.bf16 %v421_v29, %v418_v11  ;;  %v1038_v50 = vld [vmem:[#allocation2 + $0x4b0] sm:$0xff]  ;;  %v1041_v51 = vld [vmem:[#allocation2 + $0x4c8] sm:$0xff]  ;;  %v1064_v29 = vld [vmem:[#allocation2 + $0x580] sm:$0xff]  ;;  %v3725_v48 = vpack.c.bf16 %v1073_v40, %v1070_v39 }
  0xc6   : > { %3607 = vmatprep.subr.bf16.mxu0 %v3606_v53  ;;  %3332 = vmatprep.mubr.msk.f32.mxu1 %vm556_vm1, %v337_v61  ;;  %v1045_v53 = vld [vmem:[#allocation2 + $0x4e8] sm:$0xff]  ;;  %v3664_v56 = vpack.c.bf16 %v1041_v51, %v1038_v50  ;;  %v3722_v37 = vpack.c.bf16 %v1067_v31, %v1064_v29  ;;  %v1076_v51 = vld [vmem:[#allocation2 + $0x5e0] sm:$0xff]  ;;  %v1094_v29 = vld [vmem:[#allocation2 + $0x670] sm:$0xff] }
  0xc7   : > { %3324 = vmatprep.mubr.msk.f32.mxu0 %vm556_vm1, %v337_v61  ;;  %v1044_v61 = vld [vmem:[#allocation2 + $0x4e0] sm:$0xff]  ;;  %v1085_v9 = vld [vmem:[#allocation2 + $0x628] sm:$0xff]  ;;  %v1103_v40 = vld [vmem:[#allocation2 + $0x6b8] sm:$0xff] }
  0xc8   : > { %3648 = vmatpush1.bf16.msra.mxu1 %v3647_v1  ;;  %v1047_v1 = vld [vmem:[#allocation2 + $0x4f8] sm:$0xff]  ;;  %v1100_v39 = vld [vmem:[#allocation2 + $0x6a0] sm:$0xff] }
  0xc9   : > { %3609 = vmatpush1.bf16.msra.mxu0 %v3608_v2  ;;  %3649 = vmatprep.subr.bf16.mxu1 %v4446_v0  ;;  %v3666_v2 = vpack.c.bf16 %v1048_v54, %v1045_v53  ;;  %v3668_v7 = vpack.c.bf16 %v1047_v1, %v1044_v61  ;;  %v1079_v53 = vld [vmem:[#allocation2 + $0x5f8] sm:$0xff]  ;;  %v1074_v54 = vld [vmem:[#allocation2 + $0x5d0] sm:$0xff]  ;;  %v1084_v61 = vld [vmem:[#allocation2 + $0x620] sm:$0xff] }
  0xca   : > { %3611 = vmatprep.subr.bf16.mxu0 %v3610_v5  ;;  %v1054_v5 = vld [vmem:[#allocation2 + $0x530] sm:$0xff]  ;;  %v3690_v8 = vpack.c.bf16 %v1084_v61, %v1081_v60  ;;  %v1413_v60 = vld [vmem:[#allocation2 + $0x6d8] sm:$0xff]  ;;  %v1117_v61 = vrot.slane %v4657_v59, 2 }
  0xcc   : > { %3651 = vmatpush1.bf16.msra.mxu1 %v3650_v13  ;;  %v1053_v13 = vld [vmem:[#allocation2 + $0x528] sm:$0xff] }
  0xcd   : > { %3613 = vmatpush1.bf16.msra.mxu0 %v3612_v14  ;;  %3652 = vmatprep.subr.bf16.mxu1 %v4446_v0  ;;  %v3670_v14 = vpack.c.bf16 %v1054_v5, %v1051_v3  ;;  %v3672_v19 = vpack.c.bf16 %v1053_v13, %v1050_v10  ;;  %v350_v3 = vld [vmem:[%s4634_s29 + $0x70] sm:$0xf]  ;;  %v3728_v5 = vpack.c.bf16 %v1079_v53, %v1076_v51  ;;  %v1080_v10 = vld [vmem:[#allocation2 + $0x600] sm:$0xff]  ;;  %v1083_v13 = vld [vmem:[#allocation2 + $0x618] sm:$0xff]  ;;  %v1110_v53 = vrot.slane %v4652_v49, 2 }
  0xce   : > { %3615 = vmatprep.subr.bf16.mxu0 %v3614_v17  ;;  %v1060_v17 = vld [vmem:[#allocation2 + $0x560] sm:$0xff] }
  0xd0   : > { %3654 = vmatpush1.bf16.msra.mxu1 %v3653_v23  ;;  %v1059_v23 = vld [vmem:[#allocation2 + $0x558] sm:$0xff] }
  0xd1   : > { %3617 = vmatpush1.bf16.msra.mxu0 %v3616_v24  ;;  %3655 = vmatprep.subr.bf16.mxu1 %v4446_v0  ;;  %v3674_v24 = vpack.c.bf16 %v1060_v17, %v1057_v15  ;;  %v3676_v11 = vpack.c.bf16 %v1059_v23, %v1056_v22  ;;  %v1090_v15 = vld [vmem:[#allocation2 + $0x650] sm:$0xff]  ;;  %v1091_v22 = vld [vmem:[#allocation2 + $0x658] sm:$0xff] }
  0xd2   : > { %3619 = vmatprep.subr.bf16.mxu0 %v3618_v26  ;;  %v1066_v26 = vld [vmem:[#allocation2 + $0x590] sm:$0xff] }
  0xd3   : > { %v1086_v23 = vld [vmem:[#allocation2 + $0x630] sm:$0xff] }
  0xd4   : > { %3657 = vmatpush1.bf16.msra.mxu1 %v3656_v33  ;;  %v1065_v33 = vld [vmem:[#allocation2 + $0x588] sm:$0xff] }
  0xd5   : > { %3621 = vmatpush1.bf16.msra.mxu0 %v3620_v34  ;;  %3706 = vmatprep.subr.bf16.mxu1 %v4446_v0  ;;  %v3678_v34 = vpack.c.bf16 %v1066_v26, %v1063_v25  ;;  %v3680_v38 = vpack.c.bf16 %v1065_v33, %v1062_v32  ;;  %v1093_v25 = vld [vmem:[#allocation2 + $0x668] sm:$0xff]  ;;  %v1096_v26 = vld [vmem:[#allocation2 + $0x680] sm:$0xff] }
  0xd6   : > { %3659 = vmatprep.subr.bf16.mxu0 %v3658_v36  ;;  %v1072_v36 = vld [vmem:[#allocation2 + $0x5c0] sm:$0xff]  ;;  %v3698_v31 = vpack.c.bf16 %v1096_v26, %v1093_v25  ;;  %v1097_v32 = vld [vmem:[#allocation2 + $0x688] sm:$0xff]  ;;  %v1125_v25 = vrot.slane %v4680_v27, 2  ;;  %v1429_v26 = vld [vmem:[#allocation2 + $0x758] sm:$0xff] }
  0xd7   : > { %987 = vmatmul.mubr.f32.vlgmr.msra.gmra.mrb[16].mxu1 %v336_v43  ;;  %v1092_v33 = vld [vmem:[#allocation2 + $0x660] sm:$0xff] }
  0xd8   : > { %874 = vmatmul.mubr.f32.vlgmr.msra.gmra.mrb[0].mxu0 %v336_v43  ;;  %3708 = vmatpush1.bf16.msra.mxu1 %v3707_v44  ;;  %v1071_v43 = vld [vmem:[#allocation2 + $0x5b8] sm:$0xff]  ;;  %v3682_v44 = vpack.c.bf16 %v1072_v36, %v1069_v35  ;;  %v1102_v36 = vld [vmem:[#allocation2 + $0x6b0] sm:$0xff] }
  0xd9   : > { %3661 = vmatpush1.bf16.msra.mxu0 %v3660_v46  ;;  %3333 = vmatprep.mubr.msk.f32.mxu1 %vm556_vm1, %v4637_v4  ;;  %v1075_v46 = vld [vmem:[#allocation2 + $0x5d8] sm:$0xff]  ;;  %v3684_v50 = vpack.c.bf16 %v1071_v43, %v1068_v42  ;;  %v1098_v43 = vld [vmem:[#allocation2 + $0x690] sm:$0xff] }
  0xda   : > { %3709 = vmatprep.subr.bf16.mxu1 %v4446_v0  ;;  %3663 = vmatprep.subr.bf16.mxu0 %v3662_v52  ;;  %v1028_v52 = vld [vmem:[%s4634_s29 + $0x8] sm:$0xfc]  ;;  %v3686_v58 = vpack.c.bf16 %v1078_v47, %v1075_v46  ;;  %v1099_v35 = vld [vmem:[#allocation2 + $0x698] sm:$0xff]  ;;  %v1027_v46 = vld [vmem:[%s4634_s29] sm:$0xfc] }
  0xdb   : > { %3325 = vmatprep.mubr.msk.f32.mxu0 %vm556_vm1, %v4637_v4  ;;  %992 = vmatmul.mubr.f32.gmra.mrb[18].mxu1 %v4652_v49  ;;  %v1112_v1 = vrot.slane %v1028_v52, 2  ;;  %v3702_v42 = vpack.c.bf16 %v1102_v36, %v1099_v35  ;;  %v1411_v47 = vld [vmem:[#allocation2 + $0x6c8] sm:$0xff]  ;;  %v1109_v52 = vrot.slane %v1027_v46, 2  ;;  %v1434_v46 = vld [vmem:[#allocation2 + $0x780] sm:$0xff] }
  0xdc   : > { %880 = vmatmul.mubr.f32.gmra.mrb[2].mxu0 %v4652_v49  ;;  %3711 = vmatpush1.bf16.msra.mxu1 %v3710_v55  ;;  %v1077_v55 = vld [vmem:[#allocation2 + $0x5e8] sm:$0xff]  ;;  %v1115_v49 = vrot.slane %v4661_v63, 2 }
  0xdd   : > { %3665 = vmatpush1.bf16.msra.mxu0 %v3664_v56  ;;  %3334 = vmatprep.mubr.msk.f32.mxu1 %vm556_vm1, %v4657_v59  ;;  %v351_v56 = vld [vmem:[%s4634_s29 + $0x78] sm:$0xf] }
  0xde   : > { %3712 = vmatprep.subr.bf16.mxu1 %v4446_v0  ;;  %3667 = vmatprep.subr.bf16.mxu0 %v3666_v2  ;;  %v1113_v2 = vrot.slane %v4637_v4, 2  ;;  %v1427_v4 = vld [vmem:[#allocation2 + $0x748] sm:$0xff] }
  0xdf   : > { %3326 = vmatprep.mubr.msk.f32.mxu0 %vm556_vm1, %v4657_v59  ;;  %997 = vmatmul.mubr.f32.gmra.mrb[20].mxu1 %v4661_v63 }
  0xe0   : > { %886 = vmatmul.mubr.f32.gmra.mrb[4].mxu0 %v4661_v63  ;;  %3714 = vmatpush1.bf16.msra.mxu1 %v3713_v6  ;;  %v3688_v6 = vpack.c.bf16 %v1077_v55, %v1074_v54  ;;  %v1114_v17 = vsel %vm1108_vm2, %v1112_v1, %v1113_v2  ;;  %v1412_v54 = vld [vmem:[#allocation2 + $0x6d0] sm:$0xff]  ;;  %v1417_v1 = vld [vmem:[#allocation2 + $0x6f8] sm:$0xff]  ;;  %v1118_v59 = vsel %vm1108_vm2, %v1113_v2, %v1117_v61  ;;  %v1422_v2 = vld [vmem:[#allocation2 + $0x720] sm:$0xff] }
  0xe1   : > { %3669 = vmatpush1.bf16.msra.mxu0 %v3668_v7  ;;  %3335 = vmatprep.mubr.msk.f32.mxu1 %vm556_vm1, %v4667_v12  ;;  %v1082_v7 = vld [vmem:[#allocation2 + $0x610] sm:$0xff]  ;;  %v1116_v63 = vsel %vm1108_vm2, %v1110_v53, %v1115_v49 }
  0xe2   : > { %3715 = vmatprep.subr.bf16.mxu1 %v4446_v0  ;;  %3671 = vmatprep.subr.bf16.mxu0 %v3670_v14  ;;  %v1087_v14 = vld [vmem:[#allocation2 + $0x638] sm:$0xff] }
  0xe3   : > { %3327 = vmatprep.mubr.msk.f32.mxu0 %vm556_vm1, %v4667_v12  ;;  %1002 = vmatmul.mubr.f32.gmra.mrb[22].mxu1 %v4671_v16  ;;  %v3694_v21 = vpack.c.bf16 %v1090_v15, %v1087_v14  ;;  %v1121_v15 = vrot.slane %v4667_v12, 2  ;;  %v1425_v12 = vld [vmem:[#allocation2 + $0x738] sm:$0xff] }
  0xe4   : > { %892 = vmatmul.mubr.f32.gmra.mrb[6].mxu0 %v4671_v16  ;;  %3717 = vmatpush1.bf16.msra.mxu1 %v3716_v18  ;;  %v3731_v18 = vpack.c.bf16 %v1085_v9, %v1082_v7  ;;  %v1421_v9 = vld [vmem:[#allocation2 + $0x718] sm:$0xff] }
  0xe5   : > { %3673 = vmatpush1.bf16.msra.mxu0 %v3672_v19  ;;  %3336 = vmatprep.mubr.msk.f32.mxu1 %vm556_vm1, %v4680_v27  ;;  %v3692_v19 = vpack.c.bf16 %v1083_v13, %v1080_v10  ;;  %v1416_v10 = vld [vmem:[#allocation2 + $0x6f0] sm:$0xff]  ;;  %v1419_v13 = vld [vmem:[#allocation2 + $0x708] sm:$0xff]  ;;  %v1126_v35 = vsel %vm1108_vm2, %v1121_v15, %v1125_v25 }
  0xe6   : > { %3718 = vmatprep.subr.bf16.mxu1 %v4446_v0  ;;  %3675 = vmatprep.subr.bf16.mxu0 %v3674_v24  ;;  %v1089_v24 = vld [vmem:[#allocation2 + $0x648] sm:$0xff] }
  0xe7   : > { %3328 = vmatprep.mubr.msk.f32.mxu0 %vm556_vm1, %v4680_v27  ;;  %1007 = vmatmul.mubr.f32.gmra.mrb[24].mxu1 %v4684_v30  ;;  %v1433_v27 = vld [vmem:[#allocation2 + $0x778] sm:$0xff] }
  0xe8   : > { %898 = vmatmul.mubr.f32.gmra.mrb[8].mxu0 %v4684_v30  ;;  %3720 = vmatpush1.bf16.msra.mxu1 %v3719_v28  ;;  %v3734_v28 = vpack.c.bf16 %v1091_v22, %v1088_v20  ;;  %v3748_v20 = vpack.c.bf16 %v1419_v13, %v1416_v10  ;;  %v1424_v22 = vld [vmem:[#allocation2 + $0x730] sm:$0xff] }
  0xe9   : > { %3677 = vmatpush1.bf16.msra.mxu0 %v3676_v11  ;;  %3337 = vmatprep.mubr.msk.f32.mxu1 %vm556_vm1, %v4693_v41  ;;  %v3696_v11 = vpack.c.bf16 %v1089_v24, %v1086_v23  ;;  %v1122_v23 = vsel %vm1108_vm2, %v1117_v61, %v1121_v15  ;;  %v1445_v61 = vld [vmem:[#allocation2 + $0x7d8] sm:$0xff]  ;;  %v1446_v15 = vld [vmem:[#allocation2 + $0x7e0] sm:$0xff] }
  0xea   : > { %3721 = vmatprep.subr.bf16.mxu1 %v4446_v0  ;;  %3679 = vmatprep.subr.bf16.mxu0 %v3678_v34  ;;  %v1095_v34 = vld [vmem:[#allocation2 + $0x678] sm:$0xff] }
  0xeb   : > { %3329 = vmatprep.mubr.msk.f32.mxu0 %vm556_vm1, %v4693_v41  ;;  %1012 = vmatmul.mubr.f32.gmra.mrb[26].mxu1 %v4697_v45 }
  0xec   : > { %904 = vmatmul.mubr.f32.gmra.mrb[10].mxu0 %v4697_v45  ;;  %3723 = vmatpush1.bf16.msra.mxu1 %v3722_v37  ;;  %v3737_v37 = vpack.c.bf16 %v1097_v32, %v1094_v29  ;;  %v3752_v29 = vpack.c.bf16 %v1425_v12, %v1422_v2  ;;  %v1430_v32 = vld [vmem:[#allocation2 + $0x760] sm:$0xff]  ;;  %v1406_v12 = vld [vmem:[%s4634_s29 + $0x8] sm:$0xf8] }
  0xed   : > { %3681 = vmatpush1.bf16.msra.mxu0 %v3680_v38  ;;  %3338 = vmatprep.mubr.msk.f32.mxu1 %vm556_vm1, %v4706_v57  ;;  %v3700_v38 = vpack.c.bf16 %v1095_v34, %v1092_v33  ;;  %v1428_v33 = vld [vmem:[#allocation2 + $0x750] sm:$0xff]  ;;  %v1431_v34 = vld [vmem:[#allocation2 + $0x768] sm:$0xff]  ;;  %v1454_v2 = vld [vmem:[#allocation2 + $0x820] sm:$0xff] }
  0xee   : > { %3724 = vmatprep.subr.bf16.mxu1 %v4446_v0  ;;  %3683 = vmatprep.subr.bf16.mxu0 %v3682_v44  ;;  %v1101_v44 = vld [vmem:[#allocation2 + $0x6a8] sm:$0xff] }
  0xef   : > { %3330 = vmatprep.mubr.msk.f32.mxu0 %vm556_vm1, %v4706_v57  ;;  %1017 = vmatmul.mubr.f32.gmra.mrb[28].mxu1 %v4710_v62  ;;  %v3704_v51 = vpack.c.bf16 %v1101_v44, %v1098_v43  ;;  %v1127_v43 = vrot.slane %v4697_v45, 2  ;;  %v1436_v44 = vld [vmem:[#allocation2 + $0x790] sm:$0xff] }
  0xf0   : > { %910 = vmatmul.mubr.f32.gmra.mrb[12].mxu0 %v4710_v62  ;;  %3726 = vmatpush1.bf16.msra.mxu1 %v3725_v48  ;;  %v1414_v48 = vld [vmem:[#allocation2 + $0x6e0] sm:$0xff]  ;;  %v1444_v45 = vld [vmem:[#allocation2 + $0x7d0] sm:$0xff] }
  0xf1   : > { %3685 = vmatpush1.bf16.msra.mxu0 %v3684_v50  ;;  %3339 = vmatprep.mubr.msk.f32.mxu1 %vm556_vm1, %v351_v56  ;;  %v3740_v50 = vpack.c.bf16 %v1103_v40, %v1100_v39  ;;  %v3742_v55 = vpack.c.bf16 %v1414_v48, %v1411_v47  ;;  %v1438_v39 = vld [vmem:[#allocation2 + $0x7a0] sm:$0xff]  ;;  %v3800_v40 = vpack.c.bf16 %v1433_v27, %v1430_v32  ;;  %v1437_v47 = vld [vmem:[#allocation2 + $0x798] sm:$0xff] }
  0xf2   : > { %3727 = vmatprep.subr.bf16.mxu1 %v4446_v0  ;;  %3687 = vmatprep.subr.bf16.mxu0 %v3686_v58  ;;  %v1410_v58 = vld [vmem:[#allocation2 + $0x6c0] sm:$0xff] }
  0xf3   : > { %3331 = vmatprep.mubr.msk.f32.mxu0 %vm556_vm1, %v351_v56  ;;  %1022 = vmatmul.mubr.f32.gmra.mrb[30].mxu1 %v350_v3  ;;  %v1415_v56 = vld [vmem:[#allocation2 + $0x6e8] sm:$0xff]  ;;  %v3744_v7 = vpack.c.bf16 %v1413_v60, %v1410_v58  ;;  %v1131_v58 = vrot.slane %v4710_v62, 2  ;;  %v1442_v60 = vld [vmem:[#allocation2 + $0x7c0] sm:$0xff] }
  0xf4   : > { %916 = vmatmul.mubr.f32.gmra.mrb[14].mxu0 %v350_v3  ;;  %3729 = vmatpush1.bf16.msra.mxu1 %v3728_v5  ;;  %v1420_v3 = vld [vmem:[#allocation2 + $0x710] sm:$0xff]  ;;  %v1111_v5 = vsel %vm1108_vm2, %v1109_v52, %v1110_v53  ;;  %v1441_v52 = vld [vmem:[#allocation2 + $0x7b8] sm:$0xff]  ;;  %v1450_v62 = vld [vmem:[#allocation2 + $0x800] sm:$0xff] }
  0xf5   : > { %3689 = vmatpush1.bf16.msra.mxu0 %v3688_v6  ;;  %3730 = vmatprep.subr.bf16.mxu1 %v4446_v0  ;;  %v3791_v6 = vpack.c.bf16 %v1415_v56, %v1412_v54  ;;  %v3746_v14 = vpack.c.bf16 %v1420_v3, %v1417_v1  ;;  %v1030_v53 = vld [vmem:[%s4634_s29 + $0x78] sm:$0x3f]  ;;  %v3760_v56 = vpack.c.bf16 %v1437_v47, %v1434_v46  ;;  %v1443_v1 = vld [vmem:[#allocation2 + $0x7c8] sm:$0xff]  ;;  %v1029_v3 = vld [vmem:[%s4634_s29 + $0x70] sm:$0x3f] }
  0xf6   : > { %3691 = vmatprep.subr.bf16.mxu0 %v3690_v8  ;;  %3348 = vmatprep.mubr.msk.f32.mxu1 %vm556_vm1, %v1114_v17  ;;  %v1418_v8 = vld [vmem:[#allocation2 + $0x700] sm:$0xff]  ;;  %v1135_v13 = vrot.slane %v1029_v3, 2  ;;  %v1464_v46 = vld [vmem:[#allocation2 + $0x870] sm:$0xff]  ;;  %v1467_v47 = vld [vmem:[#allocation2 + $0x888] sm:$0xff] }
  0xf7   : > { %3340 = vmatprep.mubr.msk.f32.mxu0 %vm556_vm1, %v1114_v17  ;;  %v1423_v17 = vld [vmem:[#allocation2 + $0x728] sm:$0xff]  ;;  %v1481_v3 = vld [vmem:[#allocation2 + $0x8f8] sm:$0xff] }
  0xf8   : > { %3732 = vmatpush1.bf16.msra.mxu1 %v3731_v18  ;;  %v1426_v18 = vld [vmem:[#allocation2 + $0x740] sm:$0xff] }
  0xf9   : > { %3693 = vmatpush1.bf16.msra.mxu0 %v3692_v19  ;;  %3733 = vmatprep.subr.bf16.mxu1 %v4446_v0  ;;  %v3794_v19 = vpack.c.bf16 %v1421_v9, %v1418_v8  ;;  %v3750_v24 = vpack.c.bf16 %v1426_v18, %v1423_v17  ;;  %v1132_v8 = vsel %vm1108_vm2, %v1127_v43, %v1131_v58  ;;  %v1449_v17 = vld [vmem:[#allocation2 + $0x7f8] sm:$0xff] }
  0xfa   : > { %3695 = vmatprep.subr.bf16.mxu0 %v3694_v21  ;;  %v1119_v21 = vrot.slane %v4671_v16, 2  ;;  %v3806_v9 = vpack.c.bf16 %v1445_v61, %v1442_v60  ;;  %v1480_v60 = vld [vmem:[#allocation2 + $0x8f0] sm:$0xff] }
  0xfc   : > { %3735 = vmatpush1.bf16.msra.mxu1 %v3734_v28  ;;  %v1432_v28 = vld [vmem:[#allocation2 + $0x770] sm:$0xff]  ;;  %v1120_v16 = vsel %vm1108_vm2, %v1115_v49, %v1119_v21  ;;  %v1447_v49 = vld [vmem:[#allocation2 + $0x7e8] sm:$0xff] }
  0xfd   : > { %3697 = vmatpush1.bf16.msra.mxu0 %v3696_v11  ;;  %3736 = vmatprep.subr.bf16.mxu1 %v4446_v0  ;;  %v3797_v11 = vpack.c.bf16 %v1427_v4, %v1424_v22  ;;  %v3754_v36 = vpack.c.bf16 %v1432_v28, %v1429_v26  ;;  %v3768_v4 = vpack.c.bf16 %v1449_v17, %v1446_v15  ;;  %v1459_v28 = vld [vmem:[#allocation2 + $0x848] sm:$0xff]  ;;  %v1790_v15 = vld [vmem:[#allocation2 + $0x910] sm:$0xff] }
  0xfe   : > { %3699 = vmatprep.subr.bf16.mxu0 %v3698_v31  ;;  %v1123_v31 = vrot.slane %v4684_v30, 2 }
 0x100   : > { %3738 = vmatpush1.bf16.msra.mxu1 %v3737_v37  ;;  %v1129_v37 = vrot.slane %v4693_v41, 2  ;;  %v1124_v30 = vsel %vm1108_vm2, %v1119_v21, %v1123_v31  ;;  %v1439_v41 = vld [vmem:[#allocation2 + $0x7a8] sm:$0xff]  ;;  %v1128_v54 = vsel %vm1108_vm2, %v1123_v31, %v1127_v43  ;;  %v1136_v21 = vsel %vm1108_vm2, %v1131_v58, %v1135_v13  ;;  %v1466_v43 = vld [vmem:[#allocation2 + $0x880] sm:$0xff]  ;;  %v1477_v58 = vld [vmem:[#allocation2 + $0x8d8] sm:$0xff] }
 0x101   : > { %3701 = vmatpush1.bf16.msra.mxu0 %v3700_v38  ;;  %3739 = vmatprep.subr.bf16.mxu1 %v4446_v0  ;;  %v1435_v38 = vld [vmem:[#allocation2 + $0x788] sm:$0xff] }
 0x102   : > { %3703 = vmatprep.subr.bf16.mxu0 %v3702_v42  ;;  %v3756_v42 = vpack.c.bf16 %v1431_v34, %v1428_v33  ;;  %v1130_v48 = vsel %vm1108_vm2, %v1125_v25, %v1129_v37  ;;  %v1455_v25 = vld [vmem:[#allocation2 + $0x828] sm:$0xff]  ;;  %v1460_v33 = vld [vmem:[#allocation2 + $0x850] sm:$0xff] }
 0x104   : > { %3741 = vmatpush1.bf16.msra.mxu1 %v3740_v50  ;;  %v3758_v50 = vpack.c.bf16 %v1438_v39, %v1435_v38  ;;  %v1465_v38 = vld [vmem:[#allocation2 + $0x878] sm:$0xff]  ;;  %v1468_v39 = vld [vmem:[#allocation2 + $0x890] sm:$0xff] }
 0x105   : > { %3705 = vmatpush1.bf16.msra.mxu0 %v3704_v51  ;;  %3790 = vmatprep.subr.bf16.mxu1 %v4446_v0  ;;  %v1133_v51 = vrot.slane %v4706_v57, 2  ;;  %v1440_v57 = vld [vmem:[#allocation2 + $0x7b0] sm:$0xff] }
 0x106   : > { %3743 = vmatprep.subr.bf16.mxu0 %v3742_v55  ;;  %v3803_v55 = vpack.c.bf16 %v1439_v41, %v1436_v44  ;;  %v3764_v10 = vpack.c.bf16 %v1443_v1, %v1440_v57  ;;  %v3778_v44 = vpack.c.bf16 %v1468_v39, %v1465_v38  ;;  %v1469_v41 = vld [vmem:[#allocation2 + $0x898] sm:$0xff]  ;;  %v1478_v1 = vld [vmem:[#allocation2 + $0x8e0] sm:$0xff] }
 0x107   : > { %1341 = vmatmul.mubr.f32.vlgmr.msra.gmra.mrb[32].mxu1 %v1111_v5 }
 0x108   : > { %1228 = vmatmul.mubr.f32.vlgmr.msra.gmra.mrb[0].mxu0 %v1111_v5  ;;  %3792 = vmatpush1.bf16.msra.mxu1 %v3791_v6  ;;  %v1134_v5 = vsel %vm1108_vm2, %v1129_v37, %v1133_v51  ;;  %v3762_v6 = vpack.c.bf16 %v1444_v45, %v1441_v52  ;;  %v1461_v37 = vld [vmem:[#allocation2 + $0x858] sm:$0xff]  ;;  %v3780_v52 = vpack.c.bf16 %v1467_v47, %v1464_v46  ;;  %v1472_v45 = vld [vmem:[#allocation2 + $0x8b0] sm:$0xff]  ;;  %v4904_v47 = vld [vmem:[%s4634_s29 + $0x48] sm:$0xff] }
 0x109   : > { %3745 = vmatpush1.bf16.msra.mxu0 %v3744_v7  ;;  %3349 = vmatprep.mubr.msk.f32.mxu1 %vm556_vm1, %v1118_v59  ;;  %v4841_v7 = vrot.slane %v1030_v53, 2 }
 0x10a   : > { %3793 = vmatprep.subr.bf16.mxu1 %v4446_v0  ;;  %3747 = vmatprep.subr.bf16.mxu0 %v3746_v14  ;;  %v1451_v14 = vld [vmem:[#allocation2 + $0x808] sm:$0xff] }
 0x10b   : > { %3341 = vmatprep.mubr.msk.f32.mxu0 %vm556_vm1, %v1118_v59  ;;  %1346 = vmatmul.mubr.f32.gmra.mrb[34].mxu1 %v1116_v63  ;;  %v1448_v59 = vld [vmem:[#allocation2 + $0x7f0] sm:$0xff]  ;;  %v1138_v18 = vsel %vm1108_vm2, %v1133_v51, %v4841_v7  ;;  %v3818_v51 = vpack.c.bf16 %v1469_v41, %v1466_v43  ;;  %v1800_v43 = vld [vmem:[#allocation2 + $0x960] sm:$0xff] }
 0x10c   : > { %1234 = vmatmul.mubr.f32.gmra.mrb[2].mxu0 %v1116_v63  ;;  %3795 = vmatpush1.bf16.msra.mxu1 %v3794_v19  ;;  %v3766_v63 = vpack.c.bf16 %v1450_v62, %v1447_v49  ;;  %v1453_v19 = vld [vmem:[#allocation2 + $0x818] sm:$0xff]  ;;  %v3809_v22 = vpack.c.bf16 %v1451_v14, %v1448_v59  ;;  %v1405_v49 = vld [vmem:[%s4634_s29] sm:$0xf8]  ;;  %v1789_v62 = vld [vmem:[#allocation2 + $0x908] sm:$0xff] }
 0x10d   : > { %3749 = vmatpush1.bf16.msra.mxu0 %v3748_v20  ;;  %3350 = vmatprep.mubr.msk.f32.mxu1 %vm556_vm1, %v1122_v23  ;;  %v1456_v20 = vld [vmem:[#allocation2 + $0x830] sm:$0xff] }
 0x10e   : > { %3796 = vmatprep.subr.bf16.mxu1 %v4446_v0  ;;  %3751 = vmatprep.subr.bf16.mxu0 %v3750_v24  ;;  %v1452_v24 = vld [vmem:[#allocation2 + $0x810] sm:$0xff]  ;;  %v3770_v26 = vpack.c.bf16 %v1456_v20, %v1453_v19  ;;  %v1791_v19 = vld [vmem:[#allocation2 + $0x918] sm:$0xff]  ;;  %v4879_v20 = vld [vmem:[%s4634_s29 + $0x28] sm:$0xff] }
 0x10f   : > { %3342 = vmatprep.mubr.msk.f32.mxu0 %vm556_vm1, %v1122_v23  ;;  %1351 = vmatmul.mubr.f32.gmra.mrb[36].mxu1 %v1120_v16  ;;  %v1457_v23 = vld [vmem:[#allocation2 + $0x838] sm:$0xff]  ;;  %v3772_v27 = vpack.c.bf16 %v1455_v25, %v1452_v24  ;;  %v4874_v59 = vld [vmem:[%s4634_s29 + $0x10] sm:$0xff]  ;;  %v4884_v24 = vld [vmem:[%s4634_s29 + $0x20] sm:$0xff] }
 0x110   : > { %1240 = vmatmul.mubr.f32.gmra.mrb[4].mxu0 %v1120_v16  ;;  %3798 = vmatpush1.bf16.msra.mxu1 %v3797_v11  ;;  %v1462_v16 = vld [vmem:[#allocation2 + $0x860] sm:$0xff]  ;;  %v1490_v11 = vrot.slane %v1406_v12, 3  ;;  %v3812_v32 = vpack.c.bf16 %v1457_v23, %v1454_v2  ;;  %v1488_v14 = vrot.slane %v4874_v59, 3  ;;  %v1493_v25 = vrot.slane %v4884_v24, 3 }
 0x111   : > { %3753 = vmatpush1.bf16.msra.mxu0 %v3752_v29  ;;  %3351 = vmatprep.mubr.msk.f32.mxu1 %vm556_vm1, %v1126_v35  ;;  %v4856_v29 = vld [vmem:[%s4634_s29 + $0x18] sm:$0xff]  ;;  %v3774_v34 = vpack.c.bf16 %v1462_v16, %v1459_v28  ;;  %v1794_v16 = vld [vmem:[#allocation2 + $0x930] sm:$0xff] }
 0x112   : > { %3799 = vmatprep.subr.bf16.mxu1 %v4446_v0  ;;  %3755 = vmatprep.subr.bf16.mxu0 %v3754_v36  ;;  %v1491_v31 = vrot.slane %v4856_v29, 3  ;;  %v1458_v36 = vld [vmem:[#allocation2 + $0x840] sm:$0xff]  ;;  %v1799_v28 = vld [vmem:[#allocation2 + $0x958] sm:$0xff] }
 0x113   : > { %3343 = vmatprep.mubr.msk.f32.mxu0 %vm556_vm1, %v1126_v35  ;;  %1356 = vmatmul.mubr.f32.gmra.mrb[38].mxu1 %v1124_v30  ;;  %v1463_v35 = vld [vmem:[#allocation2 + $0x868] sm:$0xff] }
 0x114   : > { %1246 = vmatmul.mubr.f32.gmra.mrb[6].mxu0 %v1124_v30  ;;  %3801 = vmatpush1.bf16.msra.mxu1 %v3800_v40  ;;  %v1492_v30 = vsel %vm1486_vm3, %v1490_v11, %v1491_v31  ;;  %v3815_v40 = vpack.c.bf16 %v1463_v35, %v1460_v33  ;;  %v1797_v11 = vld [vmem:[#allocation2 + $0x948] sm:$0xff]  ;;  %v4892_v33 = vld [vmem:[%s4634_s29 + $0x38] sm:$0xff] }
 0x115   : > { %3757 = vmatpush1.bf16.msra.mxu0 %v3756_v42  ;;  %3352 = vmatprep.mubr.msk.f32.mxu1 %vm556_vm1, %v1130_v48  ;;  %v3776_v42 = vpack.c.bf16 %v1461_v37, %v1458_v36  ;;  %v1801_v35 = vld [vmem:[#allocation2 + $0x968] sm:$0xff]  ;;  %v1804_v36 = vld [vmem:[#allocation2 + $0x980] sm:$0xff]  ;;  %v1494_v37 = vsel %vm1486_vm3, %v1488_v14, %v1493_v25  ;;  %v3832_v39 = vpack.c.bf16 %v1797_v11, %v1794_v16  ;;  %v1823_v11 = vld [vmem:[#allocation2 + $0xa18] sm:$0xff] }
 0x116   : > { %3802 = vmatprep.subr.bf16.mxu1 %v4446_v0  ;;  %3759 = vmatprep.subr.bf16.mxu0 %v3758_v50  ;;  %v1474_v50 = vld [vmem:[#allocation2 + $0x8c0] sm:$0xff]  ;;  %v3834_v46 = vpack.c.bf16 %v1804_v36, %v1801_v35 }
 0x117   : > { %3344 = vmatprep.mubr.msk.f32.mxu0 %vm556_vm1, %v1130_v48  ;;  %1361 = vmatmul.mubr.f32.gmra.mrb[40].mxu1 %v1128_v54  ;;  %v1471_v48 = vld [vmem:[#allocation2 + $0x8a8] sm:$0xff]  ;;  %v1820_v16 = vld [vmem:[#allocation2 + $0xa00] sm:$0xff] }
 0x118   : > { %1252 = vmatmul.mubr.f32.gmra.mrb[8].mxu0 %v1128_v54  ;;  %3804 = vmatpush1.bf16.msra.mxu1 %v3803_v55  ;;  %v3782_v53 = vpack.c.bf16 %v1474_v50, %v1471_v48  ;;  %v1475_v54 = vld [vmem:[#allocation2 + $0x8c8] sm:$0xff]  ;;  %v1470_v55 = vld [vmem:[#allocation2 + $0x8a0] sm:$0xff]  ;;  %v1503_v48 = vrot.slane %v4904_v47, 3  ;;  %v1807_v50 = vld [vmem:[#allocation2 + $0x998] sm:$0xff] }
 0x119   : > { %3761 = vmatpush1.bf16.msra.mxu0 %v3760_v56  ;;  %3353 = vmatprep.mubr.msk.f32.mxu1 %vm556_vm1, %v1134_v5  ;;  %v1473_v56 = vld [vmem:[#allocation2 + $0x8b8] sm:$0xff]  ;;  %v3821_v61 = vpack.c.bf16 %v1475_v54, %v1472_v45  ;;  %v4910_v54 = vld [vmem:[%s4634_s29 + $0x40] sm:$0xff] }
 0x11a   : > { %3805 = vmatprep.subr.bf16.mxu1 %v4446_v0  ;;  %3763 = vmatprep.subr.bf16.mxu0 %v3762_v6  ;;  %v3784_v57 = vpack.c.bf16 %v1473_v56, %v1470_v55  ;;  %v1476_v6 = vld [vmem:[#allocation2 + $0x8d0] sm:$0xff]  ;;  %v1501_v55 = vrot.slane %v4910_v54, 3  ;;  %v1808_v56 = vld [vmem:[#allocation2 + $0x9a0] sm:$0xff] }
 0x11b   : > { %3345 = vmatprep.mubr.msk.f32.mxu0 %vm556_vm1, %v1134_v5  ;;  %1366 = vmatmul.mubr.f32.gmra.mrb[42].mxu1 %v1132_v8  ;;  %v3786_v5 = vpack.c.bf16 %v1480_v60, %v1477_v58  ;;  %v1811_v58 = vld [vmem:[#allocation2 + $0x9b8] sm:$0xff]  ;;  %v1806_v60 = vld [vmem:[#allocation2 + $0x990] sm:$0xff] }
 0x11c   : > { %1258 = vmatmul.mubr.f32.gmra.mrb[10].mxu0 %v1132_v8  ;;  %3807 = vmatpush1.bf16.msra.mxu1 %v3806_v9  ;;  %v1792_v8 = vld [vmem:[#allocation2 + $0x920] sm:$0xff]  ;;  %v3824_v9 = vpack.c.bf16 %v1481_v3, %v1478_v1  ;;  %v4917_v3 = vld [vmem:[%s4634_s29 + $0x58] sm:$0xff] }
 0x11d   : > { %3765 = vmatpush1.bf16.msra.mxu0 %v3764_v10  ;;  %3354 = vmatprep.mubr.msk.f32.mxu1 %vm556_vm1, %v1138_v18  ;;  %v3826_v17 = vpack.c.bf16 %v1792_v8, %v1789_v62  ;;  %v3884_v62 = vpack.c.bf16 %v1811_v58, %v1808_v56  ;;  %v1832_v58 = vld [vmem:[#allocation2 + $0xa60] sm:$0xff] }
 0x11e   : > { %3808 = vmatprep.subr.bf16.mxu1 %v4446_v0  ;;  %3767 = vmatprep.subr.bf16.mxu0 %v3766_v63  ;;  %v1788_v63 = vld [vmem:[#allocation2 + $0x900] sm:$0xff] }
 0x11f   : > { %3346 = vmatprep.mubr.msk.f32.mxu0 %vm556_vm1, %v1138_v18  ;;  %1371 = vmatmul.mubr.f32.gmra.mrb[44].mxu1 %v1136_v21  ;;  %v1793_v18 = vld [vmem:[#allocation2 + $0x928] sm:$0xff]  ;;  %v3828_v23 = vpack.c.bf16 %v1791_v19, %v1788_v63 }
 0x120   : > { %1264 = vmatmul.mubr.f32.gmra.mrb[12].mxu0 %v1136_v21  ;;  %3810 = vmatpush1.bf16.msra.mxu1 %v3809_v22  ;;  %v1495_v21 = vrot.slane %v4879_v20, 3  ;;  %v1795_v22 = vld [vmem:[#allocation2 + $0x938] sm:$0xff]  ;;  %v3875_v12 = vpack.c.bf16 %v1793_v18, %v1790_v15  ;;  %v1812_v15 = vld [vmem:[#allocation2 + $0x9c0] sm:$0xff]  ;;  %v4930_v19 = vld [vmem:[%s4634_s29 + $0x68] sm:$0xff] }
 0x121   : > { %3769 = vmatpush1.bf16.msra.mxu0 %v3768_v4  ;;  %3355 = vmatprep.mubr.msk.f32.mxu1 %vm556_vm1, %v4841_v7  ;;  %v1798_v4 = vld [vmem:[#allocation2 + $0x950] sm:$0xff] }
 0x122   : > { %3811 = vmatprep.subr.bf16.mxu1 %v4446_v0  ;;  %3771 = vmatprep.subr.bf16.mxu0 %v3770_v26  ;;  %v1796_v26 = vld [vmem:[#allocation2 + $0x940] sm:$0xff] }
 0x123   : > { %3347 = vmatprep.mubr.msk.f32.mxu0 %vm556_vm1, %v4841_v7  ;;  %1376 = vmatmul.mubr.f32.gmra.mrb[46].mxu1 %v1135_v13  ;;  %v1479_v7 = vld [vmem:[#allocation2 + $0x8e8] sm:$0xff]  ;;  %v3878_v38 = vpack.c.bf16 %v1799_v28, %v1796_v26  ;;  %v4937_v26 = vld [vmem:[%s4634_s29 + $0x60] sm:$0xff] }
 0x124   : > { %1270 = vmatmul.mubr.f32.gmra.mrb[14].mxu0 %v1135_v13  ;;  %3813 = vmatpush1.bf16.msra.mxu1 %v3812_v32  ;;  %v3788_v10 = vpack.c.bf16 %v1479_v7, %v1476_v6  ;;  %v1487_v13 = vrot.slane %v1405_v49, 3  ;;  %v1496_v32 = vsel %vm1486_vm3, %v1491_v31, %v1495_v21  ;;  %v1813_v6 = vld [vmem:[#allocation2 + $0x9c8] sm:$0xff]  ;;  %v1816_v7 = vld [vmem:[#allocation2 + $0x9e0] sm:$0xff]  ;;  %v1509_v28 = vrot.slane %v4937_v26, 3 }
 0x125   : > { %3773 = vmatpush1.bf16.msra.mxu0 %v3772_v27  ;;  %3814 = vmatprep.subr.bf16.mxu1 %v4446_v0  ;;  %v3830_v27 = vpack.c.bf16 %v1798_v4, %v1795_v22  ;;  %v3842_v63 = vpack.c.bf16 %v1816_v7, %v1813_v6  ;;  %v1819_v22 = vld [vmem:[#allocation2 + $0x9f8] sm:$0xff]  ;;  %v1822_v4 = vld [vmem:[#allocation2 + $0xa10] sm:$0xff]  ;;  %v1837_v6 = vld [vmem:[#allocation2 + $0xa88] sm:$0xff] }
 0x126   : > { %3775 = vmatprep.subr.bf16.mxu0 %v3774_v34  ;;  %3364 = vmatprep.mubr.msk.f32.mxu1 %vm556_vm1, %v1492_v30  ;;  %v1489_v2 = vsel %vm1486_vm3, %v1487_v13, %v1488_v14  ;;  %v1499_v34 = vrot.slane %v4892_v33, 3  ;;  %v1814_v13 = vld [vmem:[#allocation2 + $0x9d0] sm:$0xff]  ;;  %v1817_v14 = vld [vmem:[#allocation2 + $0x9e8] sm:$0xff]  ;;  %v3846_v36 = vpack.c.bf16 %v1822_v4, %v1819_v22  ;;  %v1840_v7 = vld [vmem:[#allocation2 + $0xaa0] sm:$0xff] }
 0x127   : > { %3356 = vmatprep.mubr.msk.f32.mxu0 %vm556_vm1, %v1492_v30  ;;  %v4897_v30 = vld [vmem:[%s4634_s29 + $0x30] sm:$0xff] }
 0x128   : > { %3816 = vmatpush1.bf16.msra.mxu1 %v3815_v40  ;;  %v1497_v31 = vrot.slane %v4897_v30, 3  ;;  %v1802_v40 = vld [vmem:[#allocation2 + $0x970] sm:$0xff]  ;;  %v1500_v41 = vsel %vm1486_vm3, %v1495_v21, %v1499_v34  ;;  %v1511_v21 = vrot.slane %v4930_v19, 3 }
 0x129   : > { %3777 = vmatpush1.bf16.msra.mxu0 %v3776_v42  ;;  %3817 = vmatprep.subr.bf16.mxu1 %v4446_v0  ;;  %v1805_v42 = vld [vmem:[#allocation2 + $0x988] sm:$0xff] }
 0x12a   : > { %3779 = vmatprep.subr.bf16.mxu0 %v3778_v44  ;;  %v1803_v44 = vld [vmem:[#allocation2 + $0x978] sm:$0xff]  ;;  %v3881_v45 = vpack.c.bf16 %v1805_v42, %v1802_v40  ;;  %v1502_v49 = vsel %vm1486_vm3, %v1497_v31, %v1501_v55  ;;  %v3890_v40 = vpack.c.bf16 %v1823_v11, %v1820_v16  ;;  %v1845_v16 = vld [vmem:[#allocation2 + $0xac8] sm:$0xff] }
 0x12b   : > { %v1849_v11 = vld [vmem:[#allocation2 + $0xae8] sm:$0xff] }
 0x12c   : > { %3819 = vmatpush1.bf16.msra.mxu1 %v3818_v51  ;;  %v1810_v51 = vld [vmem:[#allocation2 + $0x9b0] sm:$0xff] }
 0x12d   : > { %3781 = vmatpush1.bf16.msra.mxu0 %v3780_v52  ;;  %3820 = vmatprep.subr.bf16.mxu1 %v4446_v0  ;;  %v1498_v52 = vsel %vm1486_vm3, %v1493_v25, %v1497_v31  ;;  %v3838_v1 = vpack.c.bf16 %v1810_v51, %v1807_v50 }
 0x12e   : > { %3783 = vmatprep.subr.bf16.mxu0 %v3782_v53  ;;  %v3836_v53 = vpack.c.bf16 %v1803_v44, %v1800_v43  ;;  %v1826_v44 = vld [vmem:[#allocation2 + $0xa30] sm:$0xff] }
 0x130   : > { %3822 = vmatpush1.bf16.msra.mxu1 %v3821_v61  ;;  %v1809_v61 = vld [vmem:[#allocation2 + $0x9a8] sm:$0xff] }
 0x131   : > { %3785 = vmatpush1.bf16.msra.mxu0 %v3784_v57  ;;  %3823 = vmatprep.subr.bf16.mxu1 %v4446_v0  ;;  %v1504_v57 = vsel %vm1486_vm3, %v1499_v34, %v1503_v48  ;;  %v3840_v8 = vpack.c.bf16 %v1809_v61, %v1806_v60  ;;  %v1407_v34 = vld [vmem:[%s4634_s29 + $0x70] sm:$0x7f]  ;;  %v1784_v60 = vld [vmem:[%s4634_s29 + $0x8] sm:$0xf0]  ;;  %v1835_v61 = vld [vmem:[#allocation2 + $0xa78] sm:$0xff] }
 0x132   : > { %3787 = vmatprep.subr.bf16.mxu0 %v3786_v5  ;;  %v1507_v5 = vrot.slane %v4917_v3, 3  ;;  %v1513_v43 = vrot.slane %v1407_v34, 3 }
 0x134   : > { %3825 = vmatpush1.bf16.msra.mxu1 %v3824_v9  ;;  %v4923_v9 = vld [vmem:[%s4634_s29 + $0x50] sm:$0xff]  ;;  %v1508_v18 = vsel %vm1486_vm3, %v1503_v48, %v1507_v5  ;;  %v1512_v35 = vsel %vm1486_vm3, %v1507_v5, %v1511_v21  ;;  %v1827_v48 = vld [vmem:[#allocation2 + $0xa38] sm:$0xff] }
 0x135   : > { %3789 = vmatpush1.bf16.msra.mxu0 %v3788_v10  ;;  %3874 = vmatprep.subr.bf16.mxu1 %v4446_v0  ;;  %v1505_v10 = vrot.slane %v4923_v9, 3 }
 0x136   : > { %3827 = vmatprep.subr.bf16.mxu0 %v3826_v17  ;;  %v1815_v17 = vld [vmem:[#allocation2 + $0x9d8] sm:$0xff] }
 0x137   : > { %1719 = vmatmul.mubr.f32.vlgmr.msra.gmra.mrb[48].mxu1 %v1489_v2  ;;  %v3844_v25 = vpack.c.bf16 %v1815_v17, %v1812_v15  ;;  %v1510_v31 = vsel %vm1486_vm3, %v1505_v10, %v1509_v28  ;;  %v1841_v15 = vld [vmem:[#allocation2 + $0xaa8] sm:$0xff]  ;;  %v1836_v17 = vld [vmem:[#allocation2 + $0xa80] sm:$0xff] }
 0x138   : > { %1606 = vmatmul.mubr.f32.vlgmr.msra.gmra.mrb[0].mxu0 %v1489_v2  ;;  %3876 = vmatpush1.bf16.msra.mxu1 %v3875_v12  ;;  %v1408_v2 = vld [vmem:[%s4634_s29 + $0x78] sm:$0x7f]  ;;  %v1506_v12 = vsel %vm1486_vm3, %v1501_v55, %v1505_v10 }
 0x139   : > { %3829 = vmatpush1.bf16.msra.mxu0 %v3828_v23  ;;  %3365 = vmatprep.mubr.msk.f32.mxu1 %vm556_vm1, %v1496_v32  ;;  %v3887_v23 = vpack.c.bf16 %v1817_v14, %v1814_v13  ;;  %v1838_v13 = vld [vmem:[#allocation2 + $0xa90] sm:$0xff]  ;;  %v3858_v14 = vpack.c.bf16 %v1840_v7, %v1837_v6  ;;  %v1889_v7 = vrot.slane %v4930_v19, 4 }
 0x13a   : > { %3877 = vmatprep.subr.bf16.mxu1 %v4446_v0  ;;  %3831 = vmatprep.subr.bf16.mxu0 %v3830_v27  ;;  %v1821_v27 = vld [vmem:[#allocation2 + $0xa08] sm:$0xff]  ;;  %v3899_v4 = vpack.c.bf16 %v1841_v15, %v1838_v13 }
 0x13b   : > { %3357 = vmatprep.mubr.msk.f32.mxu0 %vm556_vm1, %v1496_v32  ;;  %1724 = vmatmul.mubr.f32.gmra.mrb[50].mxu1 %v1494_v37  ;;  %v1818_v32 = vld [vmem:[#allocation2 + $0x9f0] sm:$0xff] }
 0x13c   : > { %1612 = vmatmul.mubr.f32.gmra.mrb[2].mxu0 %v1494_v37  ;;  %3879 = vmatpush1.bf16.msra.mxu1 %v3878_v38  ;;  %v1515_v37 = vrot.slane %v1408_v2, 3  ;;  %v1825_v38 = vld [vmem:[#allocation2 + $0xa28] sm:$0xff]  ;;  %v3848_v42 = vpack.c.bf16 %v1821_v27, %v1818_v32  ;;  %v1852_v32 = vld [vmem:[#allocation2 + $0xb00] sm:$0xff] }
 0x13d   : > { %3833 = vmatpush1.bf16.msra.mxu0 %v3832_v39  ;;  %3366 = vmatprep.mubr.msk.f32.mxu1 %vm556_vm1, %v1500_v41  ;;  %v1828_v39 = vld [vmem:[#allocation2 + $0xa40] sm:$0xff] }
 0x13e   : > { %3880 = vmatprep.subr.bf16.mxu1 %v4446_v0  ;;  %3835 = vmatprep.subr.bf16.mxu0 %v3834_v46  ;;  %v1824_v46 = vld [vmem:[#allocation2 + $0xa20] sm:$0xff]  ;;  %v1516_v50 = vsel %vm1486_vm3, %v1511_v21, %v1515_v37  ;;  %v3850_v51 = vpack.c.bf16 %v1828_v39, %v1825_v38  ;;  %v1846_v21 = vld [vmem:[#allocation2 + $0xad0] sm:$0xff]  ;;  %v1851_v39 = vld [vmem:[#allocation2 + $0xaf8] sm:$0xff] }
 0x13f   : > { %3358 = vmatprep.mubr.msk.f32.mxu0 %vm556_vm1, %v1500_v41  ;;  %1729 = vmatmul.mubr.f32.gmra.mrb[52].mxu1 %v1498_v52  ;;  %v1829_v41 = vld [vmem:[#allocation2 + $0xa48] sm:$0xff]  ;;  %v3852_v56 = vpack.c.bf16 %v1827_v48, %v1824_v46  ;;  %v1848_v38 = vld [vmem:[#allocation2 + $0xae0] sm:$0xff]  ;;  %v1854_v48 = vld [vmem:[#allocation2 + $0xb10] sm:$0xff] }
 0x140   : > { %1618 = vmatmul.mubr.f32.gmra.mrb[4].mxu0 %v1498_v52  ;;  %3882 = vmatpush1.bf16.msra.mxu1 %v3881_v45  ;;  %v1831_v52 = vld [vmem:[#allocation2 + $0xa58] sm:$0xff]  ;;  %v1834_v45 = vld [vmem:[#allocation2 + $0xa70] sm:$0xff]  ;;  %v3893_v55 = vpack.c.bf16 %v1829_v41, %v1826_v44  ;;  %v1856_v44 = vld [vmem:[#allocation2 + $0xb20] sm:$0xff] }
 0x141   : > { %3837 = vmatpush1.bf16.msra.mxu0 %v3836_v53  ;;  %3367 = vmatprep.mubr.msk.f32.mxu1 %vm556_vm1, %v1504_v57  ;;  %v1514_v53 = vsel %vm1486_vm3, %v1509_v28, %v1513_v43  ;;  %v3854_v5 = vpack.c.bf16 %v1834_v45, %v1831_v52  ;;  %v1842_v28 = vld [vmem:[#allocation2 + $0xab0] sm:$0xff]  ;;  %v1859_v41 = vld [vmem:[#allocation2 + $0xb38] sm:$0xff] }
 0x142   : > { %3883 = vmatprep.subr.bf16.mxu1 %v4446_v0  ;;  %3839 = vmatprep.subr.bf16.mxu0 %v3838_v1  ;;  %v1833_v1 = vld [vmem:[#allocation2 + $0xa68] sm:$0xff]  ;;  %v3864_v34 = vpack.c.bf16 %v1845_v16, %v1842_v28  ;;  %v3908_v52 = vpack.c.bf16 %v1859_v41, %v1856_v44 }
 0x143   : > { %3359 = vmatprep.mubr.msk.f32.mxu0 %vm556_vm1, %v1504_v57  ;;  %1734 = vmatmul.mubr.f32.gmra.mrb[54].mxu1 %v1502_v49  ;;  %v1830_v57 = vld [vmem:[#allocation2 + $0xa50] sm:$0xff] }
 0x144   : > { %1624 = vmatmul.mubr.f32.gmra.mrb[6].mxu0 %v1502_v49  ;;  %3885 = vmatpush1.bf16.msra.mxu1 %v3884_v62  ;;  %v1868_v49 = vrot.slane %v1784_v60, 4  ;;  %v1869_v62 = vrot.slane %v4856_v29, 4  ;;  %v3856_v10 = vpack.c.bf16 %v1833_v1, %v1830_v57  ;;  %v1871_v60 = vrot.slane %v4884_v24, 4 }
 0x145   : > { %3841 = vmatpush1.bf16.msra.mxu0 %v3840_v8  ;;  %3368 = vmatprep.mubr.msk.f32.mxu1 %vm556_vm1, %v1508_v18  ;;  %v3896_v8 = vpack.c.bf16 %v1835_v61, %v1832_v58  ;;  %v1877_v57 = vrot.slane %v4892_v33, 4  ;;  %v1881_v24 = vrot.slane %v4904_v47, 4  ;;  %v1879_v33 = vrot.slane %v4910_v54, 4  ;;  %v1786_v54 = vld [vmem:[%s4634_s29 + $0x78] sm:$0xff] }
 0x146   : > { %3886 = vmatprep.subr.bf16.mxu1 %v4446_v0  ;;  %3843 = vmatprep.subr.bf16.mxu0 %v3842_v63  ;;  %v1843_v63 = vld [vmem:[#allocation2 + $0xab8] sm:$0xff]  ;;  %v1870_v22 = vsel %vm1864_vm4, %v1868_v49, %v1869_v62  ;;  %v1883_v47 = vrot.slane %v4923_v9, 4  ;;  %v1887_v49 = vrot.slane %v4937_v26, 4 }
 0x147   : > { %3360 = vmatprep.mubr.msk.f32.mxu0 %vm556_vm1, %v1508_v18  ;;  %1739 = vmatmul.mubr.f32.gmra.mrb[56].mxu1 %v1506_v12  ;;  %v1839_v18 = vld [vmem:[#allocation2 + $0xa98] sm:$0xff]  ;;  %v1882_v1 = vsel %vm1864_vm4, %v1877_v57, %v1881_v24 }
 0x148   : > { %1630 = vmatmul.mubr.f32.gmra.mrb[8].mxu0 %v1506_v12  ;;  %3888 = vmatpush1.bf16.msra.mxu1 %v3887_v23  ;;  %v3860_v2 = vpack.c.bf16 %v1839_v18, %v1836_v17  ;;  %v1844_v12 = vld [vmem:[#allocation2 + $0xac0] sm:$0xff]  ;;  %v3862_v23 = vpack.c.bf16 %v1846_v21, %v1843_v63  ;;  %v1888_v9 = vsel %vm1864_vm4, %v1883_v47, %v1887_v49 }
 0x149   : > { %3845 = vmatpush1.bf16.msra.mxu0 %v3844_v25  ;;  %3369 = vmatprep.mubr.msk.f32.mxu1 %vm556_vm1, %v1512_v35  ;;  %v1847_v25 = vld [vmem:[#allocation2 + $0xad8] sm:$0xff] }
 0x14a   : > { %3889 = vmatprep.subr.bf16.mxu1 %v4446_v0  ;;  %3847 = vmatprep.subr.bf16.mxu0 %v3846_v36  ;;  %v3902_v27 = vpack.c.bf16 %v1847_v25, %v1844_v12  ;;  %v3866_v36 = vpack.c.bf16 %v1852_v32, %v1849_v11 }
 0x14b   : > { %3361 = vmatprep.mubr.msk.f32.mxu0 %vm556_vm1, %v1512_v35  ;;  %1744 = vmatmul.mubr.f32.gmra.mrb[58].mxu1 %v1510_v31  ;;  %v1850_v35 = vld [vmem:[#allocation2 + $0xaf0] sm:$0xff] }
 0x14c   : > { %1636 = vmatmul.mubr.f32.gmra.mrb[10].mxu0 %v1510_v31  ;;  %3891 = vmatpush1.bf16.msra.mxu1 %v3890_v40  ;;  %v1855_v31 = vld [vmem:[#allocation2 + $0xb18] sm:$0xff]  ;;  %v1858_v40 = vld [vmem:[#allocation2 + $0xb30] sm:$0xff] }
 0x14d   : > { %3849 = vmatpush1.bf16.msra.mxu0 %v3848_v42  ;;  %3370 = vmatprep.mubr.msk.f32.mxu1 %vm556_vm1, %v1516_v50  ;;  %v3870_v46 = vpack.c.bf16 %v1858_v40, %v1855_v31 }
 0x14e   : > { %3892 = vmatprep.subr.bf16.mxu1 %v4446_v0  ;;  %3851 = vmatprep.subr.bf16.mxu0 %v3850_v51  ;;  %v1783_v51 = vld [vmem:[%s4634_s29] sm:$0xf0] }
 0x14f   : > { %3362 = vmatprep.mubr.msk.f32.mxu0 %vm556_vm1, %v1516_v50  ;;  %1749 = vmatmul.mubr.f32.gmra.mrb[60].mxu1 %v1514_v53  ;;  %v1857_v50 = vld [vmem:[#allocation2 + $0xb28] sm:$0xff] }
 0x150   : > { %1642 = vmatmul.mubr.f32.gmra.mrb[12].mxu0 %v1514_v53  ;;  %3894 = vmatpush1.bf16.msra.mxu1 %v3893_v55  ;;  %v3872_v45 = vpack.c.bf16 %v1857_v50, %v1854_v48  ;;  %v1865_v53 = vrot.slane %v1783_v51, 4  ;;  %v1866_v55 = vrot.slane %v4874_v59, 4  ;;  %v1875_v59 = vrot.slane %v4897_v30, 4 }
 0x151   : > { %3853 = vmatpush1.bf16.msra.mxu0 %v3852_v56  ;;  %3371 = vmatprep.mubr.msk.f32.mxu1 %vm556_vm1, %v1515_v37  ;;  %v1873_v56 = vrot.slane %v4879_v20, 4 }
 0x152   : > { %3895 = vmatprep.subr.bf16.mxu1 %v4446_v0  ;;  %3855 = vmatprep.subr.bf16.mxu0 %v3854_v5  ;;  %v1867_v58 = vsel %vm1864_vm4, %v1865_v53, %v1866_v55  ;;  %v1876_v29 = vsel %vm1864_vm4, %v1871_v60, %v1875_v59  ;;  %v1885_v5 = vrot.slane %v4917_v3, 4  ;;  %v1880_v30 = vsel %vm1864_vm4, %v1875_v59, %v1879_v33 }
 0x153   : > { %3363 = vmatprep.mubr.msk.f32.mxu0 %vm556_vm1, %v1515_v37  ;;  %1754 = vmatmul.mubr.f32.gmra.mrb[62].mxu1 %v1513_v43  ;;  %v1853_v37 = vld [vmem:[#allocation2 + $0xb08] sm:$0xff]  ;;  %v1874_v61 = vsel %vm1864_vm4, %v1869_v62, %v1873_v56  ;;  %v1878_v20 = vsel %vm1864_vm4, %v1873_v56, %v1877_v57  ;;  %v1884_v3 = vsel %vm1864_vm4, %v1879_v33, %v1883_v47 }
 0x154   : > { %1648 = vmatmul.mubr.f32.gmra.mrb[14].mxu0 %v1513_v43  ;;  %3897 = vmatpush1.bf16.msra.mxu1 %v3896_v8  ;;  %v3905_v42 = vpack.c.bf16 %v1853_v37, %v1850_v35  ;;  %v3868_v43 = vpack.c.bf16 %v1851_v39, %v1848_v38  ;;  %v1886_v6 = vsel %vm1864_vm4, %v1881_v24, %v1885_v5  ;;  %v1893_v8 = vrot.slane %v1786_v54, 4 }
 0x155   : > { %3857 = vmatpush1.bf16.msra.mxu0 %v3856_v10  ;;  %3898 = vmatprep.subr.bf16.mxu1 %v4446_v0  ;;  %v1890_v62 = vsel %vm1864_vm4, %v1885_v5, %v1889_v7  ;;  %v1785_v10 = vld [vmem:[%s4634_s29 + $0x70] sm:$0xff] }
 0x156   : > { %3859 = vmatprep.subr.bf16.mxu0 %v3858_v14  ;;  %3380 = vmatprep.mubr.msk.f32.mxu1 %vm556_vm1, %v1870_v22  ;;  %v1891_v19 = vrot.slane %v1785_v10, 4  ;;  %v1894_v13 = vsel %vm1864_vm4, %v1889_v7, %v1893_v8 }
 0x157   : > { %3372 = vmatprep.mubr.msk.f32.mxu0 %vm556_vm1, %v1870_v22 }
 0x158   : > { %3900 = vmatpush1.bf16.msra.mxu1 %v3899_v4  ;;  %v1892_v26 = vsel %vm1864_vm4, %v1887_v49, %v1891_v19 }
 0x159   : > { %3861 = vmatpush1.bf16.msra.mxu0 %v3860_v2  ;;  %3901 = vmatprep.subr.bf16.mxu1 %v4446_v0 }
 0x15a   : > { %3863 = vmatprep.subr.bf16.mxu0 %v3862_v23 }
 0x15c   : > { %3903 = vmatpush1.bf16.msra.mxu1 %v3902_v27 }
 0x15d   : > { %3865 = vmatpush1.bf16.msra.mxu0 %v3864_v34  ;;  %3904 = vmatprep.subr.bf16.mxu1 %v4446_v0 }
 0x15e   : > { %3867 = vmatprep.subr.bf16.mxu0 %v3866_v36 }
 0x160   : > { %3906 = vmatpush1.bf16.msra.mxu1 %v3905_v42 }
 0x161   : > { %3869 = vmatpush1.bf16.msra.mxu0 %v3868_v43  ;;  %3907 = vmatprep.subr.bf16.mxu1 %v4446_v0  ;;  %v1872_v0 = vsel %vm1864_vm4, %v1866_v55, %v1871_v60 }
 0x162   : > { %3871 = vmatprep.subr.bf16.mxu0 %v3870_v46 }
 0x164   : > { %3909 = vmatpush1.bf16.msra.mxu1 %v3908_v52 }
 0x165   : > { %3873 = vmatpush1.bf16.msra.mxu0 %v3872_v45 }
 0x167   : > { %2097 = vmatmul.mubr.f32.vlgmr.msra.gmra.mrb[64].mxu1 %v1867_v58 }
 0x168   : > { %1984 = vmatmul.mubr.f32.vlgmr.msra.gmra.mrb[0].mxu0 %v1867_v58  ;;  %3381 = vmatprep.mubr.msk.f32.mxu1 %vm556_vm1, %v1874_v61 }
 0x169   : > { %3373 = vmatprep.mubr.msk.f32.mxu0 %vm556_vm1, %v1874_v61 }
 0x16b   : > { %2102 = vmatmul.mubr.f32.gmra.mrb[66].mxu1 %v1872_v0 }
 0x16c   : > { %1990 = vmatmul.mubr.f32.gmra.mrb[2].mxu0 %v1872_v0  ;;  %3382 = vmatprep.mubr.msk.f32.mxu1 %vm556_vm1, %v1878_v20 }
 0x16d   : > { %3374 = vmatprep.mubr.msk.f32.mxu0 %vm556_vm1, %v1878_v20 }
 0x16f   : > { %2107 = vmatmul.mubr.f32.gmra.mrb[68].mxu1 %v1876_v29 }
 0x170   : > { %1996 = vmatmul.mubr.f32.gmra.mrb[4].mxu0 %v1876_v29  ;;  %3383 = vmatprep.mubr.msk.f32.mxu1 %vm556_vm1, %v1882_v1  ;;  %v5011_v29 = vld [vmem:[#allocation6] sm:$0xff] }
 0x171   : > { %3375 = vmatprep.mubr.msk.f32.mxu0 %vm556_vm1, %v1882_v1  ;;  %v4447_v1 = vmov 0.0  }
 0x173   : > { %2112 = vmatmul.mubr.f32.gmra.mrb[70].mxu1 %v1880_v30 }
 0x174   : > { %2002 = vmatmul.mubr.f32.gmra.mrb[6].mxu0 %v1880_v30  ;;  %3384 = vmatprep.mubr.msk.f32.mxu1 %vm556_vm1, %v1886_v6 }
 0x175   : > { %3376 = vmatprep.mubr.msk.f32.mxu0 %vm556_vm1, %v1886_v6 }
 0x177   : > { %2117 = vmatmul.mubr.f32.gmra.mrb[72].mxu1 %v1884_v3 }
 0x178   : > { %2008 = vmatmul.mubr.f32.gmra.mrb[8].mxu0 %v1884_v3  ;;  %3385 = vmatprep.mubr.msk.f32.mxu1 %vm556_vm1, %v1890_v62 }
 0x179   : > { %3377 = vmatprep.mubr.msk.f32.mxu0 %vm556_vm1, %v1890_v62 }
 0x17a   : > { %v752_v14 = vpop.f32.mrb[0].mxu1 }
 0x17b   : > { %2122 = vmatmul.mubr.f32.gmra.mrb[74].mxu1 %v1888_v9  ;;  %v754_v15 = vpop.f32.mrb[1].mxu1 }
 0x17c   : > { %2014 = vmatmul.mubr.f32.gmra.mrb[10].mxu0 %v1888_v9  ;;  %3386 = vmatprep.mubr.msk.f32.mxu1 %vm556_vm1, %v1894_v13 }
 0x17d   : > { %3378 = vmatprep.mubr.msk.f32.mxu0 %vm556_vm1, %v1894_v13 }
 0x17e   : > { %v757_v17 = vpop.f32.mrb[2].mxu1 }
 0x17f   : > { %2127 = vmatmul.mubr.f32.gmra.mrb[76].mxu1 %v1892_v26  ;;  %v759_v18 = vpop.f32.mrb[3].mxu1 }
 0x180   : > { %2020 = vmatmul.mubr.f32.gmra.mrb[12].mxu0 %v1892_v26  ;;  %3387 = vmatprep.mubr.msk.f32.mxu1 %vm556_vm1, %v1893_v8 }
 0x181   : > { %3379 = vmatprep.mubr.msk.f32.mxu0 %vm556_vm1, %v1893_v8 }
 0x182   : > { %v762_v63 = vpop.f32.mrb[4].mxu1 }
 0x183   : > { %2132 = vmatmul.mubr.f32.gmra.mrb[78].mxu1 %v1891_v19  ;;  %v764_v21 = vpop.f32.mrb[5].mxu1 }
 0x184   : > { %2026 = vmatmul.mubr.f32.gmra.mrb[14].mxu0 %v1891_v19  ;;  %3462 = vmatprep.mubr.msk.f32.mxu1 %vm2230_vm5, %v5011_v29 }
 0x185   : > { %2316 = vmatprep.mubr.f32.mxu0 %v4447_v1 }
 0x186   : > { %v767_v22 = vpop.f32.mrb[6].mxu1 }
 0x187   : > { %v769_v4 = vpop.f32.mrb[7].mxu1 }
 0x18a   : > { %v772_v2 = vpop.f32.mrb[8].mxu1 }
 0x18b   : > { %v774_v12 = vpop.f32.mrb[9].mxu1 }
 0x18e   : > { %v777_v23 = vpop.f32.mrb[10].mxu1 }
 0x18f   : > { %v779_v25 = vpop.f32.mrb[11].mxu1 }
 0x192   : > { %v782_v28 = vpop.f32.mrb[12].mxu1 }
 0x193   : > { %v784_v16 = vpop.f32.mrb[13].mxu1 }
 0x196   : > { %v787_v11 = vpop.f32.mrb[14].mxu1 }
 0x197   : > { %v789_v32 = vpop.f32.mrb[15].mxu1 }
 0x1aa   : > { %v988_v27 = vpop.f32.mrb[16].mxu1 }
 0x1ab   : > { %v989_v34 = vadd.f32 %v988_v27, %v752_v14  ;;  %v990_v35 = vpop.f32.mrb[17].mxu1 }
 0x1ae   : > { %v993_v36 = vpop.f32.mrb[18].mxu1 }
 0x1af   : > { %v994_v37 = vadd.f32 %v993_v36, %v757_v17  ;;  %v995_v38 = vpop.f32.mrb[19].mxu1 }
 0x1b2   : > { %v998_v39 = vpop.f32.mrb[20].mxu1 }
 0x1b3   : > { %v999_v31 = vadd.f32 %v998_v39, %v762_v63  ;;  %v1000_v40 = vpop.f32.mrb[21].mxu1 }
 0x1b6   : > { %v1003_v42 = vpop.f32.mrb[22].mxu1 }
 0x1b7   : > { %v1004_v43 = vadd.f32 %v1003_v42, %v767_v22  ;;  %v1005_v44 = vpop.f32.mrb[23].mxu1 }
 0x1ba   : > { %v1008_v41 = vpop.f32.mrb[24].mxu1 }
 0x1bb   : > { %v1009_v46 = vadd.f32 %v1008_v41, %v772_v2  ;;  %v1010_v48 = vpop.f32.mrb[25].mxu1 }
 0x1be   : > { %v1013_v50 = vpop.f32.mrb[26].mxu1 }
 0x1bf   : > { %v1014_v51 = vadd.f32 %v1013_v50, %v777_v23  ;;  %v1015_v52 = vpop.f32.mrb[27].mxu1 }
 0x1c2   : > { %v1018_v45 = vpop.f32.mrb[28].mxu1 }
 0x1c3   : > { %v1019_v53 = vadd.f32 %v1018_v45, %v782_v28  ;;  %v1020_v55 = vpop.f32.mrb[29].mxu1 }
 0x1c6   : > { %v1023_v56 = vpop.f32.mrb[30].mxu1 }
 0x1c7   : > { %v1024_v58 = vadd.f32 %v1023_v56, %v787_v11  ;;  %v1025_v60 = vpop.f32.mrb[31].mxu1 }
 0x1da   : > { %v1342_v61 = vpop.f32.mrb[32].mxu1 }
 0x1db   : > { %v1383_v57 = vadd.f32 %v1342_v61, %v989_v34  ;;  %v1344_v0 = vpop.f32.mrb[33].mxu1 }
 0x1de   : > { %v1347_v59 = vpop.f32.mrb[34].mxu1 }
 0x1df   : > { %v1386_v20 = vadd.f32 %v1347_v59, %v994_v37  ;;  %v1349_v24 = vpop.f32.mrb[35].mxu1 }
 0x1e2   : > { %v1352_v33 = vpop.f32.mrb[36].mxu1 }
 0x1e3   : > { %v1389_v5 = vadd.f32 %v1352_v33, %v999_v31  ;;  %v1354_v30 = vpop.f32.mrb[37].mxu1 }
 0x1e6   : > { %v1357_v47 = vpop.f32.mrb[38].mxu1 }
 0x1e7   : > { %v1392_v6 = vadd.f32 %v1357_v47, %v1004_v43  ;;  %v1359_v7 = vpop.f32.mrb[39].mxu1  ;;  %v2163_v43 = vlaneseq }
 0x1e9   : > { %v2164_v44 = vshrl.u32 %v2163_v43, 7 }
 0x1ea   : > { %v1362_v54 = vpop.f32.mrb[40].mxu1 }
 0x1eb   : > { %v1395_v3 = vadd.f32 %v1362_v54, %v1009_v46  ;;  %v1364_v49 = vpop.f32.mrb[41].mxu1  ;;  %v2165_v41 = vsub.s32 0, %v2164_v44  ;;  %v2161_v46 = vld [vmem:[#allocation4] sm:$0x7]  ;;  %v2169_v48 = vsub.s32 1, %v2164_v44  ;;  %v2173_v50 = vsub.s32 2, %v2164_v44 }
 0x1ed   : > { %v5028_v56 = vrot.slane %v2161_v46, %v2173_v50 }
 0x1ee   : > { %v1367_v62 = vpop.f32.mrb[42].mxu1 }
 0x1ef   : > { %v1398_v8 = vadd.f32 %v1367_v62, %v1014_v51  ;;  %v1369_v10 = vpop.f32.mrb[43].mxu1  ;;  %v5024_v51 = vrot.slane %v2161_v46, %v2165_v41 }
 0x1f2   : > { %v1372_v9 = vpop.f32.mrb[44].mxu1 }
 0x1f3   : > { %v1401_v19 = vadd.f32 %v1372_v9, %v1019_v53  ;;  %v1374_v13 = vpop.f32.mrb[45].mxu1  ;;  %v5026_v53 = vrot.slane %v2161_v46, %v2169_v48 }
 0x1f6   : > { %v1377_v14 = vpop.f32.mrb[46].mxu1 }
 0x1f7   : > { %v1404_v15 = vadd.f32 %v1377_v14, %v1024_v58  ;;  %v1379_v26 = vpop.f32.mrb[47].mxu1 }
 0x20a   : > { %v1720_v17 = vpop.f32.mrb[48].mxu1 }
 0x20b   : > { %v1761_v18 = vadd.f32 %v1720_v17, %v1383_v57  ;;  %v1722_v63 = vpop.f32.mrb[49].mxu1 }
 0x20e   : > { %v1725_v21 = vpop.f32.mrb[50].mxu1 }
 0x20f   : > { %v1764_v22 = vadd.f32 %v1725_v21, %v1386_v20  ;;  %v1727_v4 = vpop.f32.mrb[51].mxu1 }
 0x212   : > { %v1730_v2 = vpop.f32.mrb[52].mxu1 }
 0x213   : > { %v1767_v12 = vadd.f32 %v1730_v2, %v1389_v5  ;;  %v1732_v23 = vpop.f32.mrb[53].mxu1 }
 0x216   : > { %v1735_v25 = vpop.f32.mrb[54].mxu1 }
 0x217   : > { %v1770_v28 = vadd.f32 %v1735_v25, %v1392_v6  ;;  %v1737_v16 = vpop.f32.mrb[55].mxu1 }
 0x21a   : > { %v1740_v11 = vpop.f32.mrb[56].mxu1 }
 0x21b   : > { %v5016_v32 = vadd.f32 %v1740_v11, %v1395_v3  ;;  %v1742_v27 = vpop.f32.mrb[57].mxu1 }
 0x21e   : > { %v1745_v34 = vpop.f32.mrb[58].mxu1 }
 0x21f   : > { %v5018_v35 = vadd.f32 %v1745_v34, %v1398_v8  ;;  %v1747_v36 = vpop.f32.mrb[59].mxu1 }
 0x222   : > { %v1750_v37 = vpop.f32.mrb[60].mxu1 }
 0x223   : > { %v5020_v38 = vadd.f32 %v1750_v37, %v1401_v19  ;;  %v1752_v39 = vpop.f32.mrb[61].mxu1 }
 0x226   : > { %v1755_v31 = vpop.f32.mrb[62].mxu1 }
 0x227   : > { %v5022_v40 = vadd.f32 %v1755_v31, %v1404_v15  ;;  %v1757_v42 = vpop.f32.mrb[63].mxu1 }
 0x23a   : > { %v2098_v52 = vpop.f32.mrb[64].mxu1 }
 0x23b   : > { %v1985_v45 = vpop.f32.mrb[0].mxu0  ;;  %v2139_v55 = vadd.f32 %v2098_v52, %v1761_v18  ;;  %v2100_v60 = vpop.f32.mrb[65].mxu1 }
 0x23c   : > { %v1987_v58 = vpop.f32.mrb[1].mxu0  ;;  %v2178_v61 = vadd.f32 %v5024_v51, %v1985_v45 }
 0x23d   : > { %v2179_v57 = vadd.f32 %v5026_v53, %v1987_v58  ;;  %v2180_v20 = vadd.f32 %v5028_v56, %v2139_v55 }
 0x23e   : > { %v2103_v0 = vpop.f32.mrb[66].mxu1  ;;  %v2202_v6 = vmax.f32 %v2178_v61, 0.0 }
 0x23f   : > { %v1991_v59 = vpop.f32.mrb[2].mxu0  ;;  %v2142_v24 = vadd.f32 %v2103_v0, %v1764_v22  ;;  %v2105_v30 = vpop.f32.mrb[67].mxu1  ;;  %v2203_v3 = vmax.f32 %v2179_v57, 0.0  ;;  %v2204_v10 = vmax.f32 %v2180_v20, 0.0 }
 0x240   : > { %v2181_v33 = vadd.f32 %v5024_v51, %v1991_v59  ;;  %v1993_v5 = vpop.f32.mrb[3].mxu0 }
 0x241   : > { %v2182_v47 = vadd.f32 %v5026_v53, %v1993_v5  ;;  %v2183_v7 = vadd.f32 %v5028_v56, %v2142_v24 }
 0x242   : > { %v2205_v54 = vmax.f32 %v2181_v33, 0.0  ;;  %v2108_v62 = vpop.f32.mrb[68].mxu1 }
 0x243   : > { %v2206_v49 = vmax.f32 %v2182_v47, 0.0  ;;  %v1997_v8 = vpop.f32.mrb[4].mxu0  ;;  %v2207_v9 = vmax.f32 %v2183_v7, 0.0  ;;  %v2145_v13 = vadd.f32 %v2108_v62, %v1767_v12  ;;  %v2110_v15 = vpop.f32.mrb[69].mxu1 }
 0x244   : > { %v5036_v19 = vpack.c.bf16 %v2205_v54, %v2202_v6  ;;  %v1999_v14 = vpop.f32.mrb[5].mxu0  ;;  %v2184_v18 = vadd.f32 %v5024_v51, %v1997_v8 }
 0x245   : > { %v5038_v26 = vpack.c.bf16 %v2206_v49, %v2203_v3  ;;  %v5040_v17 = vpack.c.bf16 %v2207_v9, %v2204_v10  ;;  %v2185_v63 = vadd.f32 %v5026_v53, %v1999_v14  ;;  %v2186_v4 = vadd.f32 %v5028_v56, %v2145_v13 }
 0x246   : > { %v2113_v21 = vpop.f32.mrb[70].mxu1  ;;  %v2208_v11 = vmax.f32 %v2184_v18, 0.0 }
 0x247   : > { %v2003_v22 = vpop.f32.mrb[6].mxu0  ;;  %3911 = vmatprep.subr.bf16.mxu0 %v5038_v26  ;;  %v2148_v2 = vadd.f32 %v2113_v21, %v1770_v28  ;;  %3929 = vmatprep.subr.bf16.mxu1 %v5040_v17  ;;  %v2115_v25 = vpop.f32.mrb[71].mxu1  ;;  %v2209_v36 = vmax.f32 %v2185_v63, 0.0  ;;  %v2210_v31 = vmax.f32 %v2186_v4, 0.0 }
 0x248   : > { %v2187_v23 = vadd.f32 %v5024_v51, %v2003_v22  ;;  %v2005_v12 = vpop.f32.mrb[7].mxu0  ;;  %3913 = vmatpush1.bf16.msra.mxu0 %v5036_v19  ;;  %3931 = vmatpush3.bf16.msra.mxu1 %v5040_v17 }
 0x249   : > { %v2188_v16 = vadd.f32 %v5026_v53, %v2005_v12  ;;  %v2189_v27 = vadd.f32 %v5028_v56, %v2148_v2 }
 0x24a   : > { %v2211_v34 = vmax.f32 %v2187_v23, 0.0  ;;  %v2118_v39 = vpop.f32.mrb[72].mxu1 }
 0x24b   : > { %v2212_v37 = vmax.f32 %v2188_v16, 0.0  ;;  %v2009_v28 = vpop.f32.mrb[8].mxu0  ;;  %v2213_v42 = vmax.f32 %v2189_v27, 0.0  ;;  %v2151_v44 = vadd.f32 %v2118_v39, %v5016_v32  ;;  %v2120_v46 = vpop.f32.mrb[73].mxu1  ;;  %v2912_v39 = vld [vmem:[%s5740_s6 + $0x18] sm:$0xff] }
 0x24c   : > { %v5052_v43 = vpack.c.bf16 %v2211_v34, %v2208_v11  ;;  %v2011_v41 = vpop.f32.mrb[9].mxu0  ;;  %v2190_v52 = vadd.f32 %v5024_v51, %v2009_v28  ;;  %v2633_v46 = vld [vmem:[%s5739_s5 + $0x28] sm:$0xff] }
 0x24d   : > { %v5055_v48 = vpack.c.bf16 %v2212_v37, %v2209_v36  ;;  %v5057_v50 = vpack.c.bf16 %v2213_v42, %v2210_v31  ;;  %v2191_v45 = vadd.f32 %v5026_v53, %v2011_v41  ;;  %v2192_v60 = vadd.f32 %v5028_v56, %v2151_v44  ;;  %v2910_v37 = vld [vmem:[%s5740_s6 + $0x8] sm:$0xff]  ;;  %v2628_v42 = vld [vmem:[%s5739_s5] sm:$0xff]  ;;  %v2911_v41 = vld [vmem:[%s5740_s6 + $0x10] sm:$0xff] }
 0x24e   : > { %v2123_v55 = vpop.f32.mrb[74].mxu1  ;;  %v2214_v20 = vmax.f32 %v2190_v52, 0.0  ;;  %v4070_v31 = vpack.c.bf16 %v2912_v39, %v2910_v37  ;;  %v2909_v44 = vld [vmem:[%s5740_s6] sm:$0xff]  ;;  %v2916_v52 = vld [vmem:[%s5740_s6 + $0x38] sm:$0xff] }
 0x24f   : > { %v2015_v58 = vpop.f32.mrb[10].mxu0  ;;  %3915 = vmatprep.subr.bf16.mxu0 %v5055_v48  ;;  %v2154_v61 = vadd.f32 %v2123_v55, %v5018_v35  ;;  %3933 = vmatprep.subr.bf16.mxu1 %v5057_v50  ;;  %v2125_v0 = vpop.f32.mrb[75].mxu1  ;;  %v2215_v5 = vmax.f32 %v2191_v45, 0.0  ;;  %v2216_v6 = vmax.f32 %v2192_v60, 0.0  ;;  %v2427_v45 = vld [vmem:[#allocation7 + $0x8] sm:$0xff] }
 0x250   : > { %v2193_v32 = vadd.f32 %v5024_v51, %v2015_v58  ;;  %v2017_v57 = vpop.f32.mrb[11].mxu0  ;;  %3917 = vmatpush1.bf16.msra.mxu0 %v5052_v43  ;;  %3935 = vmatpush3.bf16.msra.mxu1 %v5057_v50  ;;  %v4072_v58 = vpack.c.bf16 %v2911_v41, %v2909_v44  ;;  %v2931_v41 = vld [vmem:[%s5740_s6 + $0xb0] sm:$0xff] }
 0x251   : > { %v2194_v59 = vadd.f32 %v5026_v53, %v2017_v57  ;;  %v2195_v24 = vadd.f32 %v5028_v56, %v2154_v61  ;;  %v2632_v61 = vld [vmem:[%s5739_s5 + $0x20] sm:$0xff] }
 0x252   : > { %v2217_v33 = vmax.f32 %v2193_v32, 0.0  ;;  %v2128_v47 = vpop.f32.mrb[76].mxu1  ;;  %v2634_v32 = vld [vmem:[%s5739_s5 + $0x30] sm:$0xff]  ;;  %v2913_v57 = vld [vmem:[%s5740_s6 + $0x20] sm:$0xff] }
 0x253   : > { %v2218_v30 = vmax.f32 %v2194_v59, 0.0  ;;  %v2021_v35 = vpop.f32.mrb[12].mxu0  ;;  %v2219_v7 = vmax.f32 %v2195_v24, 0.0  ;;  %v2157_v3 = vadd.f32 %v2128_v47, %v5020_v38  ;;  %v2130_v62 = vpop.f32.mrb[77].mxu1  ;;  %v2915_v59 = vld [vmem:[%s5740_s6 + $0x30] sm:$0xff]  ;;  %v2639_v24 = vld [vmem:[%s5739_s5 + $0x58] sm:$0xff] }
 0x254   : > { %v3920_v54 = vpack.c.bf16 %v2217_v33, %v2214_v20  ;;  %v2023_v49 = vpop.f32.mrb[13].mxu0  ;;  %v2196_v9 = vadd.f32 %v5024_v51, %v2021_v35  ;;  %v2637_v20 = vld [vmem:[%s5739_s5 + $0x48] sm:$0xff]  ;;  %v2428_v33 = vld [vmem:[#allocation7 + $0x10] sm:$0xff]  ;;  %v2429_v47 = vld [vmem:[#allocation7 + $0x18] sm:$0x3f]  ;;  %v3988_v35 = vpack.c.bf16 %v2634_v32, %v2632_v61 }
 0x255   : > { %v3918_v8 = vpack.c.bf16 %v2218_v30, %v2215_v5  ;;  %v3936_v10 = vpack.c.bf16 %v2219_v7, %v2216_v6  ;;  %v2197_v13 = vadd.f32 %v5026_v53, %v2023_v49  ;;  %v2198_v18 = vadd.f32 %v5028_v56, %v2157_v3  ;;  %v2918_v5 = vld [vmem:[%s5740_s6 + $0x48] sm:$0xff]  ;;  %v2920_v30 = vld [vmem:[%s5740_s6 + $0x58] sm:$0xff]  ;;  %v2638_v3 = vld [vmem:[%s5739_s5 + $0x50] sm:$0xff] }
 0x256   : > { %v2133_v14 = vpop.f32.mrb[78].mxu1  ;;  %v2220_v2 = vmax.f32 %v2196_v9, 0.0  ;;  %v4076_v6 = vpack.c.bf16 %v2915_v59, %v2913_v57  ;;  %v3990_v7 = vpack.c.bf16 %v2639_v24, %v2637_v20  ;;  %v2917_v49 = vld [vmem:[%s5740_s6 + $0x40] sm:$0xff]  ;;  %v4078_v62 = vpack.c.bf16 %v2920_v30, %v2918_v5  ;;  %v2643_v9 = vld [vmem:[%s5739_s5 + $0x78] sm:$0xff]  ;;  %v2654_v61 = vld [vmem:[%s5739_s5 + $0xd0] sm:$0xff] }
 0x257   : > { %v2027_v15 = vpop.f32.mrb[14].mxu0  ;;  %3919 = vmatprep.subr.bf16.mxu0 %v3918_v8  ;;  %v2160_v63 = vadd.f32 %v2133_v14, %v5022_v40  ;;  %3937 = vmatprep.subr.bf16.mxu1 %v3936_v10  ;;  %v2135_v38 = vpop.f32.mrb[79].mxu1  ;;  %v2221_v25 = vmax.f32 %v2197_v13, 0.0  ;;  %v2222_v11 = vmax.f32 %v2198_v18, 0.0  ;;  %v2922_v13 = vld [vmem:[%s5740_s6 + $0x68] sm:$0xff]  ;;  %v2924_v14 = vld [vmem:[%s5740_s6 + $0x78] sm:$0xff] }
 0x258   : > { %v2199_v21 = vadd.f32 %v5024_v51, %v2027_v15  ;;  %v2029_v22 = vpop.f32.mrb[15].mxu0  ;;  %3921 = vmatpush1.bf16.msra.mxu0 %v3920_v54  ;;  %3939 = vmatpush3.bf16.msra.mxu1 %v3936_v10  ;;  %v2921_v38 = vld [vmem:[%s5740_s6 + $0x60] sm:$0xff]  ;;  %v2657_v59 = vld [vmem:[%s5739_s5 + $0xe8] sm:$0xff]  ;;  %v2659_v20 = vld [vmem:[%s5739_s5 + $0xf8] sm:$0xff] }
 0x259   : > { %v2200_v4 = vadd.f32 %v5026_v53, %v2029_v22  ;;  %v2201_v23 = vadd.f32 %v5028_v56, %v2160_v63  ;;  %v2227_v53 = vld [vmem:[#allocation6 + $0x8] sm:$0xff]  ;;  %v2228_v56 = vld [vmem:[#allocation6 + $0x10] sm:$0xff]  ;;  %v2644_v40 = vld [vmem:[%s5739_s5 + $0x80] sm:$0xff] }
 0x25a   : > { %v2223_v12 = vmax.f32 %v2199_v21, 0.0  ;;  %v2640_v21 = vld [vmem:[%s5739_s5 + $0x60] sm:$0xff]  ;;  %v2642_v22 = vld [vmem:[%s5739_s5 + $0x70] sm:$0xff]  ;;  %v2938_v24 = vld [vmem:[%s5740_s6 + $0xe8] sm:$0xff] }
 0x25b   : > { %v2224_v16 = vmax.f32 %v2200_v4, 0.0  ;;  %v2225_v27 = vmax.f32 %v2201_v23, 0.0  ;;  %v4082_v4 = vpack.c.bf16 %v2924_v14, %v2922_v13  ;;  %v2645_v23 = vld [vmem:[%s5739_s5 + $0x88] sm:$0xff]  ;;  %v2933_v32 = vld [vmem:[%s5740_s6 + $0xc0] sm:$0xff] }
 0x25c   : > { %v3925_v34 = vpack.c.bf16 %v2223_v12, %v2220_v2  ;;  %v2923_v2 = vld [vmem:[%s5740_s6 + $0x70] sm:$0xff]  ;;  %v2647_v12 = vld [vmem:[%s5739_s5 + $0x98] sm:$0xff] }
 0x25d   : > { %v3922_v51 = vpack.c.bf16 %v2224_v16, %v2221_v25  ;;  %v3940_v36 = vpack.c.bf16 %v2225_v27, %v2222_v11  ;;  %v2926_v25 = vld [vmem:[%s5740_s6 + $0x88] sm:$0xff]  ;;  %v2928_v16 = vld [vmem:[%s5740_s6 + $0x98] sm:$0xff]  ;;  %v3996_v11 = vpack.c.bf16 %v2642_v22, %v2640_v21  ;;  %v4084_v27 = vpack.c.bf16 %v2923_v2, %v2921_v38  ;;  %v2943_v22 = vld [vmem:[%s5740_s6 + $0x110] sm:$0xff] }
 0x25e   : > { %v2665_v38 = vld [vmem:[%s5739_s5 + $0x128] sm:$0xff] }
 0x25f   : > { %3924 = vmatprep.subr.msk.bf16.mxu0 %vm5079_vm7, %v3922_v51  ;;  %3942 = vmatprep.subr.msk.bf16.mxu1 %vm5079_vm7, %v3940_v36  ;;  %v2946_v2 = vld [vmem:[%s5740_s6 + $0x128] sm:$0xff] }
 0x260   : > { %3927 = vmatpush1.bf16.msk.msra.mxu0 %vm5079_vm7, %v3925_v34  ;;  %3945 = vmatpush3.bf16.msk.msra.mxu1 %vm5079_vm7, %v3940_v36 }
 0x261   : > { %3947 = vmatprep.subr.bf16.mxu0 %v5038_v26  ;;  %3965 = vmatprep.subr.bf16.mxu1 %v5040_v17  ;;  %v2629_v26 = vld [vmem:[%s5739_s5 + $0x8] sm:$0xff] }
 0x263   : > { %3390 = vmatmul.mubr.msk.f32.vlgmr.msra.gmra.mrb[16].mxu0 %vm2230_vm5, %v5011_v29  ;;  %3463 = vmatmul.mubr.msk.f32.vlgmr.msra.gmra.mrb[80].mxu1 %vm2230_vm5, %v2227_v53  ;;  %v2229_v29 = vld [vmem:[#allocation6 + $0x18] sm:$0x3f] }
 0x264   : > { %3949 = vmatpush1.bf16.msra.mxu0 %v5036_v19  ;;  %3967 = vmatpush3.bf16.msra.mxu1 %v5040_v17  ;;  %v2426_v19 = vld [vmem:[#allocation7] sm:$0xff]  ;;  %v2631_v17 = vld [vmem:[%s5739_s5 + $0x18] sm:$0xff] }
 0x265   : > { %3951 = vmatprep.subr.bf16.mxu0 %v5055_v48  ;;  %3969 = vmatprep.subr.bf16.mxu1 %v5057_v50  ;;  %v3982_v28 = vpack.c.bf16 %v2631_v17, %v2629_v26  ;;  %v2635_v48 = vld [vmem:[%s5739_s5 + $0x38] sm:$0xff]  ;;  %v2930_v26 = vld [vmem:[%s5740_s6 + $0xa8] sm:$0xff] }
 0x266   : > { %2322 = vmatprep.mubr.f32.mxu0 %v4447_v1  ;;  %3465 = vmatprep.mubr.msk.f32.mxu1 %vm2230_vm5, %v2228_v56  ;;  %v3986_v60 = vpack.c.bf16 %v2635_v48, %v2633_v46  ;;  %v2932_v17 = vld [vmem:[%s5740_s6 + $0xb8] sm:$0xff]  ;;  %v2653_v46 = vld [vmem:[%s5739_s5 + $0xc8] sm:$0xff] }
 0x267   : > { %3391 = vmatmul.mubr.msk.f32.gmra.mrb[18].mxu0 %vm2230_vm5, %v2227_v53  ;;  %3466 = vmatmul.mubr.msk.f32.gmra.mrb[82].mxu1 %vm2230_vm5, %v2229_v29  ;;  %v4086_v53 = vpack.c.bf16 %v2928_v16, %v2926_v25  ;;  %v4090_v44 = vpack.c.bf16 %v2932_v17, %v2930_v26  ;;  %v2655_v48 = vld [vmem:[%s5739_s5 + $0xd8] sm:$0xff] }
 0x268   : > { %3953 = vmatpush1.bf16.msra.mxu0 %v5052_v43  ;;  %2328 = vmatprep.mubr.f32.mxu0 %v4447_v1  ;;  %v2630_v43 = vld [vmem:[%s5739_s5 + $0x10] sm:$0xff] }
 0x269   : > { %3971 = vmatpush3.bf16.msra.mxu1 %v5057_v50  ;;  %3955 = vmatprep.subr.bf16.mxu0 %v3918_v8  ;;  %v2914_v50 = vld [vmem:[%s5740_s6 + $0x28] sm:$0xff]  ;;  %v3984_v55 = vpack.c.bf16 %v2630_v43, %v2628_v42  ;;  %v2919_v8 = vld [vmem:[%s5740_s6 + $0x50] sm:$0xff]  ;;  %v2929_v43 = vld [vmem:[%s5740_s6 + $0xa0] sm:$0xff] }
 0x26a   : > { %3973 = vmatprep.subr.bf16.mxu1 %v3936_v10  ;;  %3484 = vmatprep.mubr.msk.f32.mxu1 %vm2230_vm5, %v2426_v19  ;;  %v4074_v0 = vpack.c.bf16 %v2916_v52, %v2914_v50  ;;  %v4080_v18 = vpack.c.bf16 %v2919_v8, %v2917_v49  ;;  %v2650_v42 = vld [vmem:[%s5739_s5 + $0xb0] sm:$0xff]  ;;  %v2934_v50 = vld [vmem:[%s5740_s6 + $0xc8] sm:$0xff]  ;;  %v2936_v52 = vld [vmem:[%s5740_s6 + $0xd8] sm:$0xff] }
 0x26b   : > { %3392 = vmatmul.mubr.msk.f32.gmra.mrb[20].mxu0 %vm2230_vm5, %v2228_v56  ;;  %v2927_v56 = vld [vmem:[%s5740_s6 + $0x90] sm:$0xff]  ;;  %v4094_v57 = vpack.c.bf16 %v2936_v52, %v2934_v50  ;;  %v2661_v49 = vld [vmem:[%s5739_s5 + $0x108] sm:$0xff] }
 0x26c   : > { %3957 = vmatpush1.bf16.msra.mxu0 %v3920_v54  ;;  %2334 = vmatprep.mubr.f32.mxu0 %v4447_v1  ;;  %v2636_v54 = vld [vmem:[%s5739_s5 + $0x40] sm:$0xff]  ;;  %v2942_v8 = vld [vmem:[%s5740_s6 + $0x108] sm:$0xff] }
 0x26d   : > { %3975 = vmatpush3.bf16.msra.mxu1 %v3936_v10  ;;  %3960 = vmatprep.subr.msk.bf16.mxu0 %vm5079_vm7, %v3922_v51  ;;  %v2641_v10 = vld [vmem:[%s5739_s5 + $0x68] sm:$0xff]  ;;  %v3992_v15 = vpack.c.bf16 %v2638_v3, %v2636_v54  ;;  %v2646_v51 = vld [vmem:[%s5739_s5 + $0x90] sm:$0xff] }
 0x26e   : > { %3978 = vmatprep.subr.msk.bf16.mxu1 %vm5079_vm7, %v3940_v36  ;;  %v3994_v63 = vpack.c.bf16 %v2643_v9, %v2641_v10  ;;  %v4000_v37 = vpack.c.bf16 %v2646_v51, %v2644_v40  ;;  %v2939_v3 = vld [vmem:[%s5740_s6 + $0xf0] sm:$0xff]  ;;  %v2944_v10 = vld [vmem:[%s5740_s6 + $0x118] sm:$0xff] }
 0x26f   : > { %3393 = vmatmul.mubr.msk.f32.gmra.mrb[22].mxu0 %vm2230_vm5, %v2229_v29  ;;  %v2649_v29 = vld [vmem:[%s5739_s5 + $0xa8] sm:$0xff]  ;;  %v4102_v21 = vpack.c.bf16 %v2944_v10, %v2942_v8  ;;  %v2947_v51 = vld [vmem:[%s5740_s6 + $0x130] sm:$0xff]  ;;  %v2964_v10 = vld [vmem:[%s5740_s6 + $0x1b8] sm:$0xff] }
 0x270   : > { %3963 = vmatpush1.bf16.msk.msra.mxu0 %vm5079_vm7, %v3925_v34  ;;  %2506 = vmatprep.mubr.f32.mxu0 %v4447_v1  ;;  %v3998_v34 = vpack.c.bf16 %v2647_v12, %v2645_v23  ;;  %v2948_v23 = vld [vmem:[%s5740_s6 + $0x138] sm:$0xff] }
 0x271   : > { %3981 = vmatpush3.bf16.msk.msra.mxu1 %vm5079_vm7, %v3940_v36  ;;  %3983 = vmatprep.subr.bf16.mxu0 %v3982_v28  ;;  %v2925_v36 = vld [vmem:[%s5740_s6 + $0x80] sm:$0xff]  ;;  %v4106_v40 = vpack.c.bf16 %v2948_v23, %v2946_v2  ;;  %v2968_v23 = vld [vmem:[%s5740_s6 + $0x1d8] sm:$0xff] }
 0x272   : > { %4071 = vmatprep.subr.bf16.mxu1 %v4070_v31  ;;  %v4088_v39 = vpack.c.bf16 %v2927_v56, %v2925_v36  ;;  %v2648_v31 = vld [vmem:[%s5739_s5 + $0xa0] sm:$0xff]  ;;  %v2669_v36 = vld [vmem:[%s5739_s5 + $0x148] sm:$0xff] }
 0x273   : > { %3401 = vmatmul.mubr.msk.f32.vlgmr.msra.gmra.mrb[24].mxu0 %vm2230_vm5, %v2426_v19  ;;  %v2651_v19 = vld [vmem:[%s5739_s5 + $0xb8] sm:$0xff]  ;;  %v2950_v56 = vld [vmem:[%s5740_s6 + $0x148] sm:$0xff] }
 0x274   : > { %2512 = vmatprep.mubr.f32.mxu0 %v4447_v1  ;;  %3485 = vmatmul.mubr.msk.f32.vlgmr.msra.gmra.mrb[84].mxu1 %vm2230_vm5, %v2427_v45  ;;  %v4002_v28 = vpack.c.bf16 %v2651_v19, %v2649_v29  ;;  %v2952_v29 = vld [vmem:[%s5740_s6 + $0x158] sm:$0xff] }
 0x275   : > { %3487 = vmatprep.mubr.msk.f32.mxu1 %vm2230_vm5, %v2428_v33  ;;  %3985 = vmatpush1.bf16.msra.mxu0 %v3984_v55  ;;  %v4092_v55 = vpack.c.bf16 %v2931_v41, %v2929_v43  ;;  %v2673_v43 = vld [vmem:[%s5739_s5 + $0x168] sm:$0xff] }
 0x276   : > { %4073 = vmatpush1.bf16.msra.mxu1 %v4072_v58  ;;  %3987 = vmatprep.subr.bf16.mxu0 %v3986_v60  ;;  %v4006_v58 = vpack.c.bf16 %v2655_v48, %v2653_v46  ;;  %v2652_v60 = vld [vmem:[%s5739_s5 + $0xc0] sm:$0xff]  ;;  %v2954_v41 = vld [vmem:[%s5740_s6 + $0x168] sm:$0xff]  ;;  %v2956_v46 = vld [vmem:[%s5740_s6 + $0x178] sm:$0xff] }
 0x277   : > { %3402 = vmatmul.mubr.msk.f32.gmra.mrb[26].mxu0 %vm2230_vm5, %v2427_v45  ;;  %4075 = vmatprep.subr.bf16.mxu1 %v4074_v0  ;;  %v4004_v45 = vpack.c.bf16 %v2650_v42, %v2648_v31  ;;  %v2935_v0 = vld [vmem:[%s5740_s6 + $0xd0] sm:$0xff]  ;;  %v4008_v5 = vpack.c.bf16 %v2654_v61, %v2652_v60  ;;  %v4110_v31 = vpack.c.bf16 %v2952_v29, %v2950_v56  ;;  %v2953_v60 = vld [vmem:[%s5740_s6 + $0x160] sm:$0xff]  ;;  %v2972_v29 = vld [vmem:[%s5740_s6 + $0x1f8] sm:$0xff] }
 0x278   : > { %2518 = vmatprep.mubr.f32.mxu0 %v4447_v1  ;;  %3488 = vmatmul.mubr.msk.f32.gmra.mrb[86].mxu1 %vm2230_vm5, %v2429_v47  ;;  %v4096_v30 = vpack.c.bf16 %v2935_v0, %v2933_v32  ;;  %v2951_v42 = vld [vmem:[%s5740_s6 + $0x150] sm:$0xff]  ;;  %v2677_v0 = vld [vmem:[%s5739_s5 + $0x188] sm:$0xff] }
 0x279   : > { %3989 = vmatpush1.bf16.msra.mxu0 %v3988_v35  ;;  %v2656_v35 = vld [vmem:[%s5739_s5 + $0xe0] sm:$0xff]  ;;  %v2955_v61 = vld [vmem:[%s5740_s6 + $0x170] sm:$0xff] }
 0x27a   : > { %4077 = vmatpush1.bf16.msra.mxu1 %v4076_v6  ;;  %3991 = vmatprep.subr.bf16.mxu0 %v3990_v7  ;;  %v2658_v6 = vld [vmem:[%s5739_s5 + $0xf0] sm:$0xff]  ;;  %v2937_v7 = vld [vmem:[%s5740_s6 + $0xe0] sm:$0xff] }
 0x27b   : > { %3403 = vmatmul.mubr.msk.f32.gmra.mrb[28].mxu0 %vm2230_vm5, %v2428_v33  ;;  %4079 = vmatprep.subr.bf16.mxu1 %v4078_v62  ;;  %v2940_v33 = vld [vmem:[%s5740_s6 + $0xf8] sm:$0xff]  ;;  %v4012_v9 = vpack.c.bf16 %v2658_v6, %v2656_v35  ;;  %v4100_v13 = vpack.c.bf16 %v2939_v3, %v2937_v7  ;;  %v2957_v6 = vld [vmem:[%s5740_s6 + $0x180] sm:$0xff]  ;;  %v2959_v7 = vld [vmem:[%s5740_s6 + $0x190] sm:$0xff] }
 0x27c   : > { %2524 = vmatprep.mubr.f32.mxu0 %v4447_v1  ;;  %v4098_v54 = vpack.c.bf16 %v2940_v33, %v2938_v24  ;;  %v2663_v62 = vld [vmem:[%s5739_s5 + $0x118] sm:$0xff]  ;;  %v2681_v3 = vld [vmem:[%s5739_s5 + $0x1a8] sm:$0xff] }
 0x27d   : > { %3993 = vmatpush1.bf16.msra.mxu0 %v3992_v15  ;;  %v4014_v14 = vpack.c.bf16 %v2663_v62, %v2661_v49  ;;  %v2660_v15 = vld [vmem:[%s5739_s5 + $0x100] sm:$0xff]  ;;  %v2960_v33 = vld [vmem:[%s5740_s6 + $0x198] sm:$0xff]  ;;  %v2962_v62 = vld [vmem:[%s5740_s6 + $0x1a8] sm:$0xff] }
 0x27e   : > { %4081 = vmatpush1.bf16.msra.mxu1 %v4080_v18  ;;  %3995 = vmatprep.subr.bf16.mxu0 %v3994_v63  ;;  %v2662_v18 = vld [vmem:[%s5739_s5 + $0x110] sm:$0xff]  ;;  %v2941_v63 = vld [vmem:[%s5740_s6 + $0x100] sm:$0xff]  ;;  %v2683_v49 = vld [vmem:[%s5739_s5 + $0x1b8] sm:$0xff] }
 0x27f   : > { %3404 = vmatmul.mubr.msk.f32.gmra.mrb[30].mxu0 %vm2230_vm5, %v2429_v47  ;;  %4083 = vmatprep.subr.bf16.mxu1 %v4082_v4  ;;  %v4010_v47 = vpack.c.bf16 %v2659_v20, %v2657_v59  ;;  %v2667_v4 = vld [vmem:[%s5739_s5 + $0x138] sm:$0xff]  ;;  %v4016_v12 = vpack.c.bf16 %v2662_v18, %v2660_v15  ;;  %v4104_v25 = vpack.c.bf16 %v2943_v22, %v2941_v63  ;;  %v2958_v20 = vld [vmem:[%s5740_s6 + $0x188] sm:$0xff]  ;;  %v2961_v18 = vld [vmem:[%s5740_s6 + $0x1a0] sm:$0xff] }
 0x280   : > { %v4018_v16 = vpack.c.bf16 %v2667_v4, %v2665_v38  ;;  %v2679_v59 = vld [vmem:[%s5739_s5 + $0x198] sm:$0xff]  ;;  %v4034_v8 = vpack.c.bf16 %v2683_v49, %v2681_v3  ;;  %v2963_v63 = vld [vmem:[%s5740_s6 + $0x1b0] sm:$0xff]  ;;  %v2685_v22 = vld [vmem:[%s5739_s5 + $0x1c8] sm:$0xff] }
 0x281   : > { %3997 = vmatpush1.bf16.msra.mxu0 %v3996_v11  ;;  %v2664_v11 = vld [vmem:[%s5739_s5 + $0x120] sm:$0xff]  ;;  %v4030_v24 = vpack.c.bf16 %v2679_v59, %v2677_v0  ;;  %v2687_v38 = vld [vmem:[%s5739_s5 + $0x1d8] sm:$0xff]  ;;  %v2966_v4 = vld [vmem:[%s5740_s6 + $0x1c8] sm:$0xff] }
 0x282   : > { %4085 = vmatpush1.bf16.msra.mxu1 %v4084_v27  ;;  %3999 = vmatprep.subr.bf16.mxu0 %v3998_v34  ;;  %v2666_v27 = vld [vmem:[%s5739_s5 + $0x130] sm:$0xff]  ;;  %v2945_v34 = vld [vmem:[%s5740_s6 + $0x120] sm:$0xff]  ;;  %v4038_v2 = vpack.c.bf16 %v2687_v38, %v2685_v22 }
 0x283   : > { %4087 = vmatprep.subr.bf16.mxu1 %v4086_v53  ;;  %v2671_v53 = vld [vmem:[%s5739_s5 + $0x158] sm:$0xff]  ;;  %v4020_v19 = vpack.c.bf16 %v2666_v27, %v2664_v11  ;;  %v4108_v26 = vpack.c.bf16 %v2947_v51, %v2945_v34  ;;  %v2965_v27 = vld [vmem:[%s5740_s6 + $0x1c0] sm:$0xff]  ;;  %v2967_v34 = vld [vmem:[%s5740_s6 + $0x1d0] sm:$0xff] }
 0x284   : > { %v4022_v17 = vpack.c.bf16 %v2671_v53, %v2669_v36  ;;  %v2689_v51 = vld [vmem:[%s5739_s5 + $0x1e8] sm:$0xff]  ;;  %v2691_v36 = vld [vmem:[%s5739_s5 + $0x1f8] sm:$0xff]  ;;  %v2977_v22 = vld [vmem:[%s5740_s6 + $0x220] sm:$0xff] }
 0x285   : > { %4001 = vmatpush1.bf16.msra.mxu0 %v4000_v37  ;;  %v2668_v37 = vld [vmem:[%s5739_s5 + $0x140] sm:$0xff]  ;;  %v2970_v53 = vld [vmem:[%s5740_s6 + $0x1e8] sm:$0xff]  ;;  %v4042_v56 = vpack.c.bf16 %v2691_v36, %v2689_v51  ;;  %v2979_v38 = vld [vmem:[%s5740_s6 + $0x230] sm:$0xff] }
 0x286   : > { %4089 = vmatpush1.bf16.msra.mxu1 %v4088_v39  ;;  %4003 = vmatprep.subr.bf16.mxu0 %v4002_v28  ;;  %v2670_v39 = vld [vmem:[%s5739_s5 + $0x150] sm:$0xff]  ;;  %v2949_v28 = vld [vmem:[%s5740_s6 + $0x140] sm:$0xff]  ;;  %v4140_v36 = vpack.c.bf16 %v2979_v38, %v2977_v22 }
 0x287   : > { %4091 = vmatprep.subr.bf16.mxu1 %v4090_v44  ;;  %v2675_v44 = vld [vmem:[%s5739_s5 + $0x178] sm:$0xff]  ;;  %v4024_v48 = vpack.c.bf16 %v2670_v39, %v2668_v37  ;;  %v4112_v50 = vpack.c.bf16 %v2951_v42, %v2949_v28  ;;  %v2969_v39 = vld [vmem:[%s5740_s6 + $0x1e0] sm:$0xff]  ;;  %v2971_v28 = vld [vmem:[%s5740_s6 + $0x1f0] sm:$0xff] }
 0x288   : > { %v4026_v52 = vpack.c.bf16 %v2675_v44, %v2673_v43  ;;  %v2693_v42 = vld [vmem:[%s5739_s5 + $0x208] sm:$0xff]  ;;  %v2695_v43 = vld [vmem:[%s5739_s5 + $0x218] sm:$0xff] }
 0x289   : > { %4005 = vmatpush1.bf16.msra.mxu0 %v4004_v45  ;;  %v2672_v45 = vld [vmem:[%s5739_s5 + $0x160] sm:$0xff]  ;;  %v2974_v44 = vld [vmem:[%s5740_s6 + $0x208] sm:$0xff] }
 0x28a   : > { %4093 = vmatpush1.bf16.msra.mxu1 %v4092_v55  ;;  %4007 = vmatprep.subr.bf16.mxu0 %v4006_v58  ;;  %v2674_v55 = vld [vmem:[%s5739_s5 + $0x170] sm:$0xff]  ;;  %v4114_v58 = vpack.c.bf16 %v2956_v46, %v2954_v41  ;;  %v4046_v41 = vpack.c.bf16 %v2695_v43, %v2693_v42  ;;  %v2976_v46 = vld [vmem:[%s5740_s6 + $0x218] sm:$0xff] }
 0x28b   : > { %4095 = vmatprep.subr.bf16.mxu1 %v4094_v57  ;;  %v4028_v32 = vpack.c.bf16 %v2674_v55, %v2672_v45  ;;  %v4116_v57 = vpack.c.bf16 %v2955_v61, %v2953_v60  ;;  %v2707_v43 = vld [vmem:[%s5739_s5 + $0x278] sm:$0xff] }
 0x28d   : > { %4009 = vmatpush1.bf16.msra.mxu0 %v4008_v5  ;;  %v2676_v5 = vld [vmem:[%s5739_s5 + $0x180] sm:$0xff] }
 0x28e   : > { %4097 = vmatpush1.bf16.msra.mxu1 %v4096_v30  ;;  %4011 = vmatprep.subr.bf16.mxu0 %v4010_v47  ;;  %v2678_v30 = vld [vmem:[%s5739_s5 + $0x190] sm:$0xff]  ;;  %v4118_v47 = vpack.c.bf16 %v2960_v33, %v2958_v20 }
 0x28f   : > { %4099 = vmatprep.subr.bf16.mxu1 %v4098_v54  ;;  %v4032_v35 = vpack.c.bf16 %v2678_v30, %v2676_v5  ;;  %v4120_v54 = vpack.c.bf16 %v2959_v7, %v2957_v6  ;;  %v2694_v33 = vld [vmem:[%s5739_s5 + $0x210] sm:$0xff]  ;;  %v2973_v5 = vld [vmem:[%s5740_s6 + $0x200] sm:$0xff]  ;;  %v2699_v6 = vld [vmem:[%s5739_s5 + $0x238] sm:$0xff] }
 0x290   : > { %v2975_v30 = vld [vmem:[%s5740_s6 + $0x210] sm:$0xff]  ;;  %v2978_v7 = vld [vmem:[%s5740_s6 + $0x228] sm:$0xff] }
 0x291   : > { %4013 = vmatpush1.bf16.msra.mxu0 %v4012_v9  ;;  %v2680_v9 = vld [vmem:[%s5739_s5 + $0x1a0] sm:$0xff] }
 0x292   : > { %4101 = vmatpush1.bf16.msra.mxu1 %v4100_v13  ;;  %4015 = vmatprep.subr.bf16.mxu0 %v4014_v14  ;;  %v2682_v13 = vld [vmem:[%s5739_s5 + $0x1b0] sm:$0xff]  ;;  %v4122_v14 = vpack.c.bf16 %v2964_v10, %v2962_v62 }
 0x293   : > { %4103 = vmatprep.subr.bf16.mxu1 %v4102_v21  ;;  %v4036_v15 = vpack.c.bf16 %v2682_v13, %v2680_v9  ;;  %v4124_v21 = vpack.c.bf16 %v2963_v63, %v2961_v18  ;;  %v4136_v9 = vpack.c.bf16 %v2975_v30, %v2973_v5  ;;  %v2696_v13 = vld [vmem:[%s5739_s5 + $0x220] sm:$0xff]  ;;  %v2990_v5 = vld [vmem:[%s5740_s6 + $0x288] sm:$0xff]  ;;  %v2992_v30 = vld [vmem:[%s5740_s6 + $0x298] sm:$0xff] }
 0x295   : > { %4017 = vmatpush1.bf16.msra.mxu0 %v4016_v12  ;;  %v2684_v12 = vld [vmem:[%s5739_s5 + $0x1c0] sm:$0xff] }
 0x296   : > { %4105 = vmatpush1.bf16.msra.mxu1 %v4104_v25  ;;  %4019 = vmatprep.subr.bf16.mxu0 %v4018_v16  ;;  %v2686_v25 = vld [vmem:[%s5739_s5 + $0x1d0] sm:$0xff]  ;;  %v4126_v16 = vpack.c.bf16 %v2968_v23, %v2966_v4  ;;  %v2701_v4 = vld [vmem:[%s5739_s5 + $0x248] sm:$0xff] }
 0x297   : > { %4107 = vmatprep.subr.bf16.mxu1 %v4106_v40  ;;  %v4040_v11 = vpack.c.bf16 %v2686_v25, %v2684_v12  ;;  %v4128_v40 = vpack.c.bf16 %v2967_v34, %v2965_v27  ;;  %v2703_v12 = vld [vmem:[%s5739_s5 + $0x258] sm:$0xff]  ;;  %v2982_v25 = vld [vmem:[%s5740_s6 + $0x248] sm:$0xff] }
 0x299   : > { %4021 = vmatpush1.bf16.msra.mxu0 %v4020_v19  ;;  %v2688_v19 = vld [vmem:[%s5739_s5 + $0x1e0] sm:$0xff] }
 0x29a   : > { %4109 = vmatpush1.bf16.msra.mxu1 %v4108_v26  ;;  %4023 = vmatprep.subr.bf16.mxu0 %v4022_v17  ;;  %v2690_v26 = vld [vmem:[%s5739_s5 + $0x1f0] sm:$0xff]  ;;  %v4130_v17 = vpack.c.bf16 %v2972_v29, %v2970_v53  ;;  %v2700_v53 = vld [vmem:[%s5739_s5 + $0x240] sm:$0xff] }
 0x29b   : > { %4111 = vmatprep.subr.bf16.mxu1 %v4110_v31  ;;  %v4044_v37 = vpack.c.bf16 %v2690_v26, %v2688_v19  ;;  %v4132_v31 = vpack.c.bf16 %v2971_v28, %v2969_v39  ;;  %v4054_v26 = vpack.c.bf16 %v2703_v12, %v2701_v4  ;;  %v2983_v39 = vld [vmem:[%s5740_s6 + $0x250] sm:$0xff]  ;;  %v2705_v28 = vld [vmem:[%s5739_s5 + $0x268] sm:$0xff] }
 0x29c   : > { %v2714_v4 = vld [vmem:[%s5739_s5 + $0x2b0] sm:$0xff] }
 0x29d   : > { %4025 = vmatpush1.bf16.msra.mxu0 %v4024_v48  ;;  %v4134_v48 = vpack.c.bf16 %v2976_v46, %v2974_v44  ;;  %v2986_v44 = vld [vmem:[%s5740_s6 + $0x268] sm:$0xff]  ;;  %v2995_v12 = vld [vmem:[%s5740_s6 + $0x2b0] sm:$0xff] }
 0x29e   : > { %4113 = vmatpush1.bf16.msra.mxu1 %v4112_v50  ;;  %4027 = vmatprep.subr.bf16.mxu0 %v4026_v52 }
 0x29f   : > { %4115 = vmatprep.subr.bf16.mxu1 %v4114_v58 }
 0x2a1   : > { %4029 = vmatpush1.bf16.msra.mxu0 %v4028_v32 }
 0x2a2   : > { %4117 = vmatpush1.bf16.msra.mxu1 %v4116_v57  ;;  %4031 = vmatprep.subr.bf16.mxu0 %v4030_v24  ;;  %v2692_v24 = vld [vmem:[%s5739_s5 + $0x200] sm:$0xff] }
 0x2a3   : > { %4119 = vmatprep.subr.bf16.mxu1 %v4118_v47  ;;  %v2697_v47 = vld [vmem:[%s5739_s5 + $0x228] sm:$0xff]  ;;  %v4048_v10 = vpack.c.bf16 %v2694_v33, %v2692_v24  ;;  %v2711_v33 = vld [vmem:[%s5739_s5 + $0x298] sm:$0xff] }
 0x2a4   : > { %v4050_v63 = vpack.c.bf16 %v2699_v6, %v2697_v47 }
 0x2a5   : > { %4033 = vmatpush1.bf16.msra.mxu0 %v4032_v35 }
 0x2a6   : > { %4121 = vmatpush1.bf16.msra.mxu1 %v4120_v54  ;;  %4035 = vmatprep.subr.bf16.mxu0 %v4034_v8  ;;  %v2980_v54 = vld [vmem:[%s5740_s6 + $0x238] sm:$0xff] }
 0x2a7   : > { %4123 = vmatprep.subr.bf16.mxu1 %v4122_v14  ;;  %v2698_v14 = vld [vmem:[%s5739_s5 + $0x230] sm:$0xff] }
 0x2a8   : > { %v4052_v34 = vpack.c.bf16 %v2698_v14, %v2696_v13  ;;  %v2994_v13 = vld [vmem:[%s5740_s6 + $0x2a8] sm:$0xff]  ;;  %v2996_v14 = vld [vmem:[%s5740_s6 + $0x2b8] sm:$0xff] }
 0x2a9   : > { %4037 = vmatpush1.bf16.msra.mxu0 %v4036_v15  ;;  %v4154_v38 = vpack.c.bf16 %v2996_v14, %v2994_v13 }
 0x2aa   : > { %4125 = vmatpush1.bf16.msra.mxu1 %v4124_v21  ;;  %4039 = vmatprep.subr.bf16.mxu0 %v4038_v2  ;;  %v4138_v21 = vpack.c.bf16 %v2980_v54, %v2978_v7 }
 0x2ab   : > { %4127 = vmatprep.subr.bf16.mxu1 %v4126_v16  ;;  %v2984_v16 = vld [vmem:[%s5740_s6 + $0x258] sm:$0xff] }
 0x2ad   : > { %4041 = vmatpush1.bf16.msra.mxu0 %v4040_v11 }
 0x2ae   : > { %4129 = vmatpush1.bf16.msra.mxu1 %v4128_v40  ;;  %4043 = vmatprep.subr.bf16.mxu0 %v4042_v56  ;;  %v2702_v56 = vld [vmem:[%s5739_s5 + $0x250] sm:$0xff] }
 0x2af   : > { %4131 = vmatprep.subr.bf16.mxu1 %v4130_v17  ;;  %v4142_v17 = vpack.c.bf16 %v2984_v16, %v2982_v25 }
 0x2b1   : > { %4045 = vmatpush1.bf16.msra.mxu0 %v4044_v37  ;;  %v2981_v37 = vld [vmem:[%s5740_s6 + $0x240] sm:$0xff] }
 0x2b2   : > { %4133 = vmatpush1.bf16.msra.mxu1 %v4132_v31  ;;  %4047 = vmatprep.subr.bf16.mxu0 %v4046_v41  ;;  %v2988_v41 = vld [vmem:[%s5740_s6 + $0x278] sm:$0xff] }
 0x2b3   : > { %4135 = vmatprep.subr.bf16.mxu1 %v4134_v48 }
 0x336   : > { %v2318_v50 = vpop.f32.mrb[16].mxu0  ;;  %v3464_v45 = vpop.f32.mrb[80].mxu1 }
 0x337   : > { %v2320_v52 = vpop.f32.mrb[17].mxu0  ;;  %v2407_v55 = vpop.f32.mrb[81].mxu1 }
 0x33a   : > { %v2324_v58 = vpop.f32.mrb[18].mxu0  ;;  %v3467_v61 = vpop.f32.mrb[82].mxu1 }
 0x33b   : > { %v2326_v60 = vpop.f32.mrb[19].mxu0  ;;  %v2417_v57 = vpop.f32.mrb[83].mxu1 }
 0x33e   : > { %v5526_v32 = vpop.f32.mrb[20].mxu0 }
 0x33f   : > { %v5528_v0 = vpop.f32.mrb[21].mxu0 }
 0x342   : > { %v5530_v59 = vpop.f32.mrb[22].mxu0 }
 0x343   : > { %v5532_v20 = vpop.f32.mrb[23].mxu0 }
 0x346   : > { %v2508_v35 = vpop.f32.mrb[24].mxu0 }
 0x347   : > { %v2616_v3 = vmax.f32 %v2318_v50, %v2508_v35  ;;  %v2510_v49 = vpop.f32.mrb[25].mxu0  ;;  %v3486_v62 = vpop.f32.mrb[84].mxu1 }
 0x348   : > { %v2617_v8 = vmax.f32 %v2320_v52, %v2510_v49  ;;  %v5564_v15 = vmax.f32 %v3464_v45, %v3486_v62  ;;  %v2597_v18 = vpop.f32.mrb[85].mxu1  ;;  %v4056_v52 = vpack.c.bf16 %v2702_v56, %v2700_v53  ;;  %v4144_v45 = vpack.c.bf16 %v2983_v39, %v2981_v37  ;;  %v2710_v49 = vld [vmem:[%s5739_s5 + $0x290] sm:$0xff] }
 0x349   : > { %v5575_v2 = vmax.f32 %v2407_v55, %v2597_v18  ;;  %v2704_v55 = vld [vmem:[%s5739_s5 + $0x260] sm:$0xff]  ;;  %v4150_v62 = vpack.c.bf16 %v2992_v30, %v2990_v5 }
 0x34a   : > { %v2514_v23 = vpop.f32.mrb[26].mxu0  ;;  %2795 = vmatprep.mubr.f32.mxu0 %v2617_v8  ;;  %3063 = vmatprep.mubr.f32.mxu1 %v2617_v8  ;;  %v2991_v8 = vld [vmem:[%s5740_s6 + $0x290] sm:$0xff] }
 0x34b   : > { %v2619_v11 = vmax.f32 %v2324_v58, %v2514_v23  ;;  %v2516_v27 = vpop.f32.mrb[27].mxu0  ;;  %2796 = vmatmul.mubr.f32.vlgmr.msra.gmra.mrb[32].mxu0 %v2616_v3  ;;  %3064 = vmatmul.mubr.f32.vlgmr.msra.gmra.mrb[88].mxu1 %v2616_v3  ;;  %v3489_v40 = vpop.f32.mrb[86].mxu1  ;;  %v2706_v58 = vld [vmem:[%s5739_s5 + $0x270] sm:$0xff]  ;;  %v2708_v3 = vld [vmem:[%s5739_s5 + $0x280] sm:$0xff] }
 0x34c   : > { %v2620_v51 = vmax.f32 %v2326_v60, %v2516_v27  ;;  %4049 = vmatpush1.bf16.msra.mxu0 %v4048_v10  ;;  %4137 = vmatpush1.bf16.msra.mxu1 %v4136_v9  ;;  %v5592_v29 = vmax.f32 %v3467_v61, %v3489_v40  ;;  %v2607_v19 = vpop.f32.mrb[87].mxu1  ;;  %v4058_v60 = vpack.c.bf16 %v2707_v43, %v2705_v28  ;;  %v2713_v10 = vld [vmem:[%s5739_s5 + $0x2a8] sm:$0xff]  ;;  %v2715_v9 = vld [vmem:[%s5739_s5 + $0x2b8] sm:$0xff]  ;;  %v2993_v23 = vld [vmem:[%s5740_s6 + $0x2a0] sm:$0xff] }
 0x34d   : > { %4051 = vmatprep.subr.bf16.mxu0 %v4050_v63  ;;  %4139 = vmatprep.subr.bf16.mxu1 %v4138_v21  ;;  %v5603_v31 = vmax.f32 %v2417_v57, %v2607_v19  ;;  %v4146_v61 = vpack.c.bf16 %v2988_v41, %v2986_v44  ;;  %v2987_v57 = vld [vmem:[%s5740_s6 + $0x270] sm:$0xff]  ;;  %v4060_v7 = vpack.c.bf16 %v2706_v58, %v2704_v55  ;;  %v2712_v21 = vld [vmem:[%s5739_s5 + $0x2a0] sm:$0xff]  ;;  %v2998_v27 = vld [vmem:[%s5740_s6 + $0x2c8] sm:$0xff] }
 0x34e   : > { %v2520_v42 = vpop.f32.mrb[28].mxu0  ;;  %2801 = vmatprep.mubr.f32.mxu0 %v2620_v51  ;;  %3069 = vmatprep.mubr.f32.mxu1 %v2620_v51  ;;  %v4064_v18 = vpack.c.bf16 %v2710_v49, %v2708_v3  ;;  %v4066_v22 = vpack.c.bf16 %v2715_v9, %v2713_v10  ;;  %v4068_v25 = vpack.c.bf16 %v2714_v4, %v2712_v21  ;;  %v2997_v40 = vld [vmem:[%s5740_s6 + $0x2c0] sm:$0xff] }
 0x34f   : > { %v2622_v46 = vmax.f32 %v5526_v32, %v2520_v42  ;;  %v2522_v48 = vpop.f32.mrb[29].mxu0  ;;  %2802 = vmatmul.mubr.f32.gmra.mrb[34].mxu0 %v2619_v11  ;;  %3070 = vmatmul.mubr.f32.gmra.mrb[90].mxu1 %v2619_v11  ;;  %v2985_v32 = vld [vmem:[%s5740_s6 + $0x260] sm:$0xff]  ;;  %v4156_v16 = vpack.c.bf16 %v2995_v12, %v2993_v23  ;;  %v2717_v11 = vld [vmem:[%s5739_s5 + $0x2c8] sm:$0xff] }
 0x350   : > { %v2623_v50 = vmax.f32 %v5528_v0, %v2522_v48  ;;  %4053 = vmatpush1.bf16.msra.mxu0 %v4052_v34  ;;  %4141 = vmatpush1.bf16.msra.mxu1 %v4140_v36  ;;  %v2709_v0 = vld [vmem:[%s5739_s5 + $0x288] sm:$0xff]  ;;  %v4148_v54 = vpack.c.bf16 %v2987_v57, %v2985_v32  ;;  %v2716_v34 = vld [vmem:[%s5739_s5 + $0x2c0] sm:$0xff] }
 0x351   : > { %4055 = vmatprep.subr.bf16.mxu0 %v4054_v26  ;;  %4143 = vmatprep.subr.bf16.mxu1 %v4142_v17 }
 0x352   : > { %v2526_v24 = vpop.f32.mrb[30].mxu0  ;;  %2807 = vmatprep.mubr.f32.mxu0 %v2623_v50  ;;  %3075 = vmatprep.mubr.f32.mxu1 %v2623_v50 }
 0x353   : > { %v2625_v47 = vmax.f32 %v5530_v59, %v2526_v24  ;;  %v2528_v35 = vpop.f32.mrb[31].mxu0  ;;  %2808 = vmatmul.mubr.f32.gmra.mrb[36].mxu0 %v2622_v46  ;;  %3076 = vmatmul.mubr.f32.gmra.mrb[92].mxu1 %v2622_v46  ;;  %v4062_v59 = vpack.c.bf16 %v2711_v33, %v2709_v0 }
 0x354   : > { %v2626_v6 = vmax.f32 %v5532_v20, %v2528_v35  ;;  %4057 = vmatpush1.bf16.msra.mxu0 %v4056_v52  ;;  %4145 = vmatpush1.bf16.msra.mxu1 %v4144_v45  ;;  %v2989_v20 = vld [vmem:[%s5740_s6 + $0x280] sm:$0xff] }
 0x355   : > { %4059 = vmatprep.subr.bf16.mxu0 %v4058_v60  ;;  %4147 = vmatprep.subr.bf16.mxu1 %v4146_v61  ;;  %v4152_v63 = vpack.c.bf16 %v2991_v8, %v2989_v20 }
 0x356   : > { %2813 = vmatprep.mubr.f32.mxu0 %v2626_v6  ;;  %3081 = vmatprep.mubr.f32.mxu1 %v2626_v6 }
 0x357   : > { %2814 = vmatmul.mubr.f32.gmra.mrb[38].mxu0 %v2625_v47  ;;  %3082 = vmatmul.mubr.f32.gmra.mrb[94].mxu1 %v2625_v47 }
 0x358   : > { %4061 = vmatpush1.bf16.msra.mxu0 %v4060_v7  ;;  %4149 = vmatpush1.bf16.msra.mxu1 %v4148_v54 }
 0x359   : > { %4063 = vmatprep.subr.bf16.mxu0 %v4062_v59  ;;  %4151 = vmatprep.subr.bf16.mxu1 %v4150_v62 }
 0x35a   : > { %2884 = vmatprep.mubr.f32.mxu0 %v4447_v1  ;;  %3152 = vmatprep.mubr.f32.mxu1 %v4447_v1 }
 0x35c   : > { %4065 = vmatpush1.bf16.msra.mxu0 %v4064_v18  ;;  %4153 = vmatpush1.bf16.msra.mxu1 %v4152_v63 }
 0x35d   : > { %4067 = vmatprep.subr.bf16.mxu0 %v4066_v22  ;;  %4155 = vmatprep.subr.bf16.mxu1 %v4154_v38 }
 0x360   : > { %4069 = vmatpush1.bf16.msra.mxu0 %v4068_v25  ;;  %4157 = vmatpush1.bf16.msra.mxu1 %v4156_v16 }
 0x361   : > { %2844 = vmatprep.subr.mxu0 %v2717_v11  ;;  %3112 = vmatprep.subr.mxu1 %v2998_v27 }
 0x364   : > { %2845 = vmatpush1.msra.mxu0 %v2716_v34  ;;  %3113 = vmatpush1.msra.mxu1 %v2997_v40 }
 0x365   : > { %3410 = vmatmul.mubr.msk.f32.vlgmr.msra.gmra.mrb[32].mxu0 %vm2718_vm8, %v5575_v2  ;;  %3414 = vmatmul.mubr.msk.f32.vlgmr.msra.gmra.mrb[88].mxu1 %vm2718_vm8, %v5575_v2 }
 0x366   : > { %2890 = vmatprep.mubr.f32.mxu0 %v4447_v1  ;;  %3158 = vmatprep.mubr.f32.mxu1 %v4447_v1 }
 0x369   : > { %3411 = vmatmul.mubr.msk.f32.gmra.mrb[34].mxu0 %vm2718_vm8, %v5564_v15  ;;  %3415 = vmatmul.mubr.msk.f32.gmra.mrb[90].mxu1 %vm2718_vm8, %v5564_v15 }
 0x36a   : > { %2896 = vmatprep.mubr.f32.mxu0 %v4447_v1  ;;  %3164 = vmatprep.mubr.f32.mxu1 %v4447_v1 }
 0x36d   : > { %3412 = vmatmul.mubr.msk.f32.gmra.mrb[36].mxu0 %vm2718_vm8, %v5603_v31  ;;  %3416 = vmatmul.mubr.msk.f32.gmra.mrb[92].mxu1 %vm2718_vm8, %v5603_v31 }
 0x36e   : > { %2902 = vmatprep.mubr.f32.mxu0 %v4447_v1  ;;  %3170 = vmatprep.mubr.f32.mxu1 %v4447_v1 }
 0x371   : > { %3413 = vmatmul.mubr.msk.f32.gmra.mrb[38].mxu0 %vm2718_vm8, %v5592_v29  ;;  %3417 = vmatmul.mubr.msk.f32.gmra.mrb[94].mxu1 %vm2718_vm8, %v5592_v29 }
 0x438   : > { %v2886_v15 = vpop.f32.mrb[32].mxu0  ;;  %v3154_v2 = vpop.f32.mrb[88].mxu1 }
 0x439   : > { %v3177_v51 = vmax.f32 %v2886_v15, %v3154_v2  ;;  %v2888_v1 = vpop.f32.mrb[33].mxu0  ;;  %v3156_v36 = vpop.f32.mrb[89].mxu1 }
 0x43a   : > { %v3178_v53 = vmax.f32 %v2888_v1, %v3156_v36 }
 0x43b   : > { %3185 = vst [vmem:[%s5718_s14] sm:$0xff] %v3177_v51 }
 0x43c   : > { %3187 = vst.msk [vmem:[%s5718_s14 + $0x8] sm:$0xff] %vm3186_vm9, %v3178_v53  ;;  %v2892_v56 = vpop.f32.mrb[34].mxu0  ;;  %v3160_v29 = vpop.f32.mrb[90].mxu1 }
 0x43d   : > { %v3179_v19 = vmax.f32 %v2892_v56, %v3160_v29  ;;  %v2894_v26 = vpop.f32.mrb[35].mxu0  ;;  %v3162_v17 = vpop.f32.mrb[91].mxu1 }
 0x43e   : > { %v3180_v37 = vmax.f32 %v2894_v26, %v3162_v17 }
 0x43f   : > { %3188 = vst [vmem:[%s5718_s14 + $0x10] sm:$0xff] %v3179_v19 }
 0x440   : > { %3189 = vst.msk [vmem:[%s5718_s14 + $0x18] sm:$0xff] %vm3186_vm9, %v3180_v37  ;;  %v2898_v39 = vpop.f32.mrb[36].mxu0  ;;  %v3166_v28 = vpop.f32.mrb[92].mxu1 }
 0x441   : > { %v3181_v31 = vmax.f32 %v2898_v39, %v3166_v28  ;;  %v2900_v42 = vpop.f32.mrb[37].mxu0  ;;  %v3168_v43 = vpop.f32.mrb[93].mxu1 }
 0x442   : > { %v3182_v44 = vmax.f32 %v2900_v42, %v3168_v43 }
 0x443   : > { %3190 = vst [vmem:[%s5718_s14 + $0x20] sm:$0xff] %v3181_v31 }
 0x444   : > { %3191 = vst.msk [vmem:[%s5718_s14 + $0x28] sm:$0xff] %vm3186_vm9, %v3182_v44  ;;  %v2904_v41 = vpop.f32.mrb[38].mxu0  ;;  %v3172_v46 = vpop.f32.mrb[94].mxu1 }
 0x445   : > { %v3183_v48 = vmax.f32 %v2904_v41, %v3172_v46  ;;  %v2906_v50 = vpop.f32.mrb[39].mxu0  ;;  %v3174_v52 = vpop.f32.mrb[95].mxu1 }
 0x446   : > { %v3184_v45 = vmax.f32 %v2906_v50, %v3174_v52 }
 0x447   : > { %3192 = vst [vmem:[%s5718_s14 + $0x30] sm:$0x3f] %v3183_v48 }
 0x448   : > { %3194 = vst.msk [vmem:[%s5718_s14 + $0x38] sm:$0x3f] %vm3193_vm10, %v3184_v45 }
 0x449 PF: > { %s20_s24 = sadd.s32 1, %s4436_s24  }
 0x44a   : > { %p17_p11 = scmp.ge.s32.totalorder %s20_s24, 4  }
 0x44c   :  { %19 = sbr.rel (!%p17_p11) target bundleno = 3 (0x3), region = 99 }
 0x453   :  { %3216 = vsyncpa [#allocation3], 1 }
 0x454   :  { %3218 = vsyncpa [#allocation3 + $0x1], 1 }
 0x455   :  { %3219 = vsyncpa [#allocation5], 1 }
 0x456   :  { %3220 = vsyncpa [#allocation8], 1 }

// kernel: lenet_forward.4
= control target key start
LH: loop header
LB: loop body
LE: loop exit
PB: predicated region body
PF: predicated region fallthrough
CT: control target
= control target key end

     0   :  { %s4177_s24 = smov 0   ;;  %s6473_s0 = inlined_call_operand.vmem [shape: f32[2,30,180], index: 0, kind: input, shape index: {}]   ;;  %s6474_s1 = inlined_call_operand.vmem [shape: f32[5,180,416], index: 1, kind: input, shape index: {}]   ;;  %s6475_s2 = inlined_call_operand.vmem [shape: f32[1,416], index: 2, kind: input, shape index: {}]   ;;  %s6476_s3 = inlined_call_operand.vmem [shape: f32[13,26], index: 3, kind: input, shape index: {}]   ;;  %s6477_s4 = inlined_call_operand.vmem [shape: f32[13,26], index: 4, kind: input, shape index: {}]   ;;  %s6478_s5 = inlined_call_operand.vmem [shape: f32[416,208], index: 5, kind: input, shape index: {}]   ;;  %s6479_s6 = inlined_call_operand.vmem [shape: f32[416,208], index: 6, kind: input, shape index: {}]   ;;  %s6480_s7 = inlined_call_operand.vmem [shape: f32[2,13,208], index: 7, kind: output, shape index: {}]  }
   0x1 LB: > { %s2892_s25 = sadd.s32 4294967295, %s4133_s24   ;;  %p2896_p0 = scmp.ge.s32.totalorder %s4133_s24, 1  ;;  %s4133_s24 = sphi %s4177_s24, %s17_s24  }
   0x2   : > { %p237_p1 = scmp.lt.s32.totalorder %s4133_s24, 3 }
   0x4   : > { %p238_p2 = pnand %p2896_p0, %p237_p1 }
   0x5   : > { %v2902_v0 = vld [vmem:[%s6474_s1 + $0x2e8] sm:$0xff] (!%p238_p2)  ;;  %v2904_v2 = vld [vmem:[%s6474_s1 + $0x2f8] sm:$0xff] (!%p238_p2)  ;;  %v2901_v5 = vld [vmem:[%s6474_s1 + $0x2e0] sm:$0xff] (!%p238_p2)  ;;  %p4319_p3 = scmp.lt.s32.totalorder (!%p238_p2), %s2892_s25, 1  ;;  %vm484_vm0 = vcmask (!%p238_p2), 1046528   ;;  %vm503_vm1 = vcmask (!%p238_p2), 424960  }
   0x6   : > { %241 = sbr.rel (%p238_p2) target bundleno = 962 (0x3c2), region = 48  ;;  %v2906_v1 = vld [vmem:[%s6474_s1 + $0x308] sm:$0xff] (!%p238_p2)  ;;  %v2908_v4 = vld [vmem:[%s6474_s1 + $0x318] sm:$0xff] (!%p238_p2)  ;;  %v2905_v6 = vld [vmem:[%s6474_s1 + $0x300] sm:$0xff] (!%p238_p2)  ;;  %vm512_vm2 = vcmask (!%p238_p2), 1043456   ;;  %vm1004_vm3 = vcmask (!%p238_p2), 1045504  }
   0x7   : > { %v3353_v3 = vpack.c.bf16 (!%p238_p2), %v2906_v1, %v2902_v0  ;;  %v3397_v7 = vpack.c.bf16 (!%p238_p2), %v2908_v4, %v2904_v2  ;;  %v3355_v8 = vpack.c.bf16 (!%p238_p2), %v2905_v6, %v2901_v5  ;;  %v2903_v9 = vld [vmem:[%s6474_s1 + $0x2f0] sm:$0xff] (!%p238_p2)  ;;  %v2910_v11 = vld [vmem:[%s6474_s1 + $0x328] sm:$0xff] (!%p238_p2)  ;;  %v2912_v14 = vld [vmem:[%s6474_s1 + $0x338] sm:$0xff] (!%p238_p2)  ;;  %vm1338_vm4 = vcmask (!%p238_p2), 1044480  }
   0x8   : > { %v2907_v10 = vld [vmem:[%s6474_s1 + $0x310] sm:$0xff] (!%p238_p2)  ;;  %v2914_v13 = vld [vmem:[%s6474_s1 + $0x348] sm:$0xff] (!%p238_p2)  ;;  %v2916_v15 = vld [vmem:[%s6474_s1 + $0x358] sm:$0xff] (!%p238_p2)  ;;  %vm1967_vm5 = vcmask (!%p238_p2), 1041408   ;;  %vm4136_vm6 = vmmov (!%p238_p2), 1   ;;  %vm1960_vm8 = vcmask (!%p238_p2), 211968  }
   0x9   : > { %3354 = vmatprep.subr.bf16.mxu0 (!%p238_p2), %v3353_v3  ;;  %v3399_v12 = vpack.c.bf16 (!%p238_p2), %v2907_v10, %v2903_v9  ;;  %3398 = vmatprep.subr.bf16.mxu1 (!%p238_p2), %v3397_v7  ;;  %v3357_v16 = vpack.c.bf16 (!%p238_p2), %v2914_v13, %v2910_v11  ;;  %v3401_v17 = vpack.c.bf16 (!%p238_p2), %v2916_v15, %v2912_v14  ;;  %v2909_v18 = vld [vmem:[%s6474_s1 + $0x320] sm:$0xff] (!%p238_p2)  ;;  %v2911_v20 = vld [vmem:[%s6474_s1 + $0x330] sm:$0xff] (!%p238_p2)  ;;  %v2918_v23 = vld [vmem:[%s6474_s1 + $0x368] sm:$0xff] (!%p238_p2)  ;;  %vm2408_vm9 = vcmask (!%p238_p2), 261120  }
   0xa   : > { %3356 = vmatpush1.bf16.msra.mxu0 (!%p238_p2), %v3355_v8  ;;  %v2913_v19 = vld [vmem:[%s6474_s1 + $0x340] sm:$0xff] (!%p238_p2)  ;;  %v2915_v22 = vld [vmem:[%s6474_s1 + $0x350] sm:$0xff] (!%p238_p2)  ;;  %v2922_v24 = vld [vmem:[%s6474_s1 + $0x388] sm:$0xff] (!%p238_p2)  ;;  %vm2832_vm10 = vcmask (!%p238_p2), 654336   ;;  %vm2835_vm11 = vcmask (!%p238_p2), 651264  }
   0xb   : > { %3400 = vmatpush1.bf16.msra.mxu1 (!%p238_p2), %v3399_v12  ;;  %v3359_v21 = vpack.c.bf16 (!%p238_p2), %v2913_v19, %v2909_v18  ;;  %3358 = vmatprep.subr.bf16.mxu0 (!%p238_p2), %v3357_v16  ;;  %v3403_v25 = vpack.c.bf16 (!%p238_p2), %v2915_v22, %v2911_v20  ;;  %v3361_v26 = vpack.c.bf16 (!%p238_p2), %v2922_v24, %v2918_v23  ;;  %v2920_v27 = vld [vmem:[%s6474_s1 + $0x378] sm:$0xff] (!%p238_p2)  ;;  %v2917_v29 = vld [vmem:[%s6474_s1 + $0x360] sm:$0xff] (!%p238_p2)  ;;  %v2919_v32 = vld [vmem:[%s6474_s1 + $0x370] sm:$0xff] (!%p238_p2) }
   0xc   : > { %3402 = vmatprep.subr.bf16.mxu1 (!%p238_p2), %v3401_v17  ;;  %v2924_v28 = vld [vmem:[%s6474_s1 + $0x398] sm:$0xff] (!%p238_p2)  ;;  %v2921_v31 = vld [vmem:[%s6474_s1 + $0x380] sm:$0xff] (!%p238_p2)  ;;  %v2923_v33 = vld [vmem:[%s6474_s1 + $0x390] sm:$0xff] (!%p238_p2) }
   0xd   : > { %v3405_v30 = vpack.c.bf16 %v2924_v28, %v2920_v27  ;;  %v3363_v34 = vpack.c.bf16 %v2921_v31, %v2917_v29  ;;  %v2926_v35 = vld [vmem:[%s6474_s1 + $0x3a8] sm:$0xff]  ;;  %v2928_v37 = vld [vmem:[%s6474_s1 + $0x3b8] sm:$0xff]  ;;  %v3407_v38 = vpack.c.bf16 %v2923_v33, %v2919_v32  ;;  %v2925_v41 = vld [vmem:[%s6474_s1 + $0x3a0] sm:$0xff]  ;;  %s6485_s25 = smov (!%p4319_p3, %s2892_s25), 1 }
   0xe   : > { %3360 = vmatpush1.bf16.msra.mxu0 %v3359_v21  ;;  %v2930_v36 = vld [vmem:[%s6474_s1 + $0x3c8] sm:$0xff]  ;;  %v2932_v40 = vld [vmem:[%s6474_s1 + $0x3d8] sm:$0xff]  ;;  %v2929_v42 = vld [vmem:[%s6474_s1 + $0x3c0] sm:$0xff]  ;;  %s3351_s19 = sshll.u32 %s6485_s25, 6  ;;  %s3352_s29 = sshll.u32 %s6485_s25, 5 }
   0xf   : > { %3404 = vmatpush1.bf16.msra.mxu1 %v3403_v25  ;;  %3362 = vmatprep.subr.bf16.mxu0 %v3361_v26  ;;  %v3365_v39 = vpack.c.bf16 %v2930_v36, %v2926_v35  ;;  %v3409_v43 = vpack.c.bf16 %v2932_v40, %v2928_v37  ;;  %v2927_v44 = vld [vmem:[%s6474_s1 + $0x3b0] sm:$0xff]  ;;  %v2934_v46 = vld [vmem:[%s6474_s1 + $0x3e8] sm:$0xff]  ;;  %v2936_v48 = vld [vmem:[%s6474_s1 + $0x3f8] sm:$0xff]  ;;  %v3367_v50 = vpack.c.bf16 %v2929_v42, %v2925_v41  ;;  %s4405_s17 = scalar_lea.vmem %s6473_s0, %s3351_s19  ;;  %s278_s30 = scalar_lea.vmem %s6480_s7, %s3352_s29 }
  0x10   : > { %3406 = vmatprep.subr.bf16.mxu1 %v3405_v30  ;;  %v2931_v45 = vld [vmem:[%s6474_s1 + $0x3d0] sm:$0xff]  ;;  %v2938_v47 = vld [vmem:[%s6474_s1 + $0x408] sm:$0xff]  ;;  %v2940_v49 = vld [vmem:[%s6474_s1 + $0x418] sm:$0xff] }
  0x11   : > { %v3411_v51 = vpack.c.bf16 %v2931_v45, %v2927_v44  ;;  %v3369_v52 = vpack.c.bf16 %v2938_v47, %v2934_v46  ;;  %v2933_v53 = vld [vmem:[%s6474_s1 + $0x3e0] sm:$0xff]  ;;  %v2935_v55 = vld [vmem:[%s6474_s1 + $0x3f0] sm:$0xff]  ;;  %v3413_v56 = vpack.c.bf16 %v2940_v49, %v2936_v48  ;;  %v2942_v58 = vld [vmem:[%s6474_s1 + $0x428] sm:$0xff] }
  0x12   : > { %3364 = vmatpush1.bf16.msra.mxu0 %v3363_v34  ;;  %v2937_v54 = vld [vmem:[%s6474_s1 + $0x400] sm:$0xff]  ;;  %v2939_v57 = vld [vmem:[%s6474_s1 + $0x410] sm:$0xff]  ;;  %v2946_v59 = vld [vmem:[%s6474_s1 + $0x448] sm:$0xff] }
  0x13   : > { %3408 = vmatpush1.bf16.msra.mxu1 %v3407_v38  ;;  %3366 = vmatprep.subr.bf16.mxu0 %v3365_v39  ;;  %v2944_v60 = vld [vmem:[%s6474_s1 + $0x438] sm:$0xff]  ;;  %v3371_v62 = vpack.c.bf16 %v2937_v54, %v2933_v53  ;;  %v3415_v63 = vpack.c.bf16 %v2939_v57, %v2935_v55  ;;  %v3373_v0 = vpack.c.bf16 %v2946_v59, %v2942_v58  ;;  %v2941_v1 = vld [vmem:[%s6474_s1 + $0x420] sm:$0xff]  ;;  %v2943_v3 = vld [vmem:[%s6474_s1 + $0x430] sm:$0xff] }
  0x14   : > { %3410 = vmatprep.subr.bf16.mxu1 %v3409_v43  ;;  %v2948_v61 = vld [vmem:[%s6474_s1 + $0x458] sm:$0xff]  ;;  %v2945_v2 = vld [vmem:[%s6474_s1 + $0x440] sm:$0xff]  ;;  %v2947_v5 = vld [vmem:[%s6474_s1 + $0x450] sm:$0xff] }
  0x15   : > { %v3417_v4 = vpack.c.bf16 %v2948_v61, %v2944_v60  ;;  %v2950_v6 = vld [vmem:[%s6474_s1 + $0x468] sm:$0xff]  ;;  %v2952_v8 = vld [vmem:[%s6474_s1 + $0x478] sm:$0xff]  ;;  %v3375_v10 = vpack.c.bf16 %v2945_v2, %v2941_v1  ;;  %v3419_v11 = vpack.c.bf16 %v2947_v5, %v2943_v3  ;;  %v2949_v13 = vld [vmem:[%s6474_s1 + $0x460] sm:$0xff] }
  0x16   : > { %3368 = vmatpush1.bf16.msra.mxu0 %v3367_v50  ;;  %v2954_v7 = vld [vmem:[%s6474_s1 + $0x488] sm:$0xff]  ;;  %v2956_v9 = vld [vmem:[%s6474_s1 + $0x498] sm:$0xff]  ;;  %v2953_v14 = vld [vmem:[%s6474_s1 + $0x480] sm:$0xff] }
  0x17   : > { %3412 = vmatpush1.bf16.msra.mxu1 %v3411_v51  ;;  %3370 = vmatprep.subr.bf16.mxu0 %v3369_v52  ;;  %v3377_v12 = vpack.c.bf16 %v2954_v7, %v2950_v6  ;;  %v2951_v15 = vld [vmem:[%s6474_s1 + $0x470] sm:$0xff]  ;;  %v3421_v16 = vpack.c.bf16 %v2956_v9, %v2952_v8  ;;  %v2958_v18 = vld [vmem:[%s6474_s1 + $0x4a8] sm:$0xff]  ;;  %v2960_v20 = vld [vmem:[%s6474_s1 + $0x4b8] sm:$0xff]  ;;  %v3379_v22 = vpack.c.bf16 %v2953_v14, %v2949_v13 }
  0x18   : > { %3414 = vmatprep.subr.bf16.mxu1 %v3413_v56  ;;  %v2955_v17 = vld [vmem:[%s6474_s1 + $0x490] sm:$0xff]  ;;  %v2962_v19 = vld [vmem:[%s6474_s1 + $0x4c8] sm:$0xff]  ;;  %v2964_v21 = vld [vmem:[%s6474_s1 + $0x4d8] sm:$0xff] }
  0x19   : > { %v3423_v23 = vpack.c.bf16 %v2955_v17, %v2951_v15  ;;  %v3381_v24 = vpack.c.bf16 %v2962_v19, %v2958_v18  ;;  %v2957_v25 = vld [vmem:[%s6474_s1 + $0x4a0] sm:$0xff]  ;;  %v2959_v27 = vld [vmem:[%s6474_s1 + $0x4b0] sm:$0xff]  ;;  %v3425_v28 = vpack.c.bf16 %v2964_v21, %v2960_v20  ;;  %v2966_v30 = vld [vmem:[%s6474_s1 + $0x4e8] sm:$0xff] }
  0x1a   : > { %3372 = vmatpush1.bf16.msra.mxu0 %v3371_v62  ;;  %v2961_v26 = vld [vmem:[%s6474_s1 + $0x4c0] sm:$0xff]  ;;  %v2963_v29 = vld [vmem:[%s6474_s1 + $0x4d0] sm:$0xff]  ;;  %v2970_v31 = vld [vmem:[%s6474_s1 + $0x508] sm:$0xff] }
  0x1b   : > { %3416 = vmatpush1.bf16.msra.mxu1 %v3415_v63  ;;  %3374 = vmatprep.subr.bf16.mxu0 %v3373_v0  ;;  %v2968_v32 = vld [vmem:[%s6474_s1 + $0x4f8] sm:$0xff]  ;;  %v3383_v34 = vpack.c.bf16 %v2961_v26, %v2957_v25  ;;  %v2965_v35 = vld [vmem:[%s6474_s1 + $0x4e0] sm:$0xff]  ;;  %v3427_v36 = vpack.c.bf16 %v2963_v29, %v2959_v27  ;;  %v3385_v37 = vpack.c.bf16 %v2970_v31, %v2966_v30  ;;  %v2967_v39 = vld [vmem:[%s6474_s1 + $0x4f0] sm:$0xff] }
  0x1c   : > { %3418 = vmatprep.subr.bf16.mxu1 %v3417_v4  ;;  %v2972_v33 = vld [vmem:[%s6474_s1 + $0x518] sm:$0xff]  ;;  %v2969_v38 = vld [vmem:[%s6474_s1 + $0x500] sm:$0xff]  ;;  %v2971_v40 = vld [vmem:[%s6474_s1 + $0x510] sm:$0xff] }
  0x1d   : > { %v3429_v41 = vpack.c.bf16 %v2972_v33, %v2968_v32  ;;  %v2974_v42 = vld [vmem:[%s6474_s1 + $0x528] sm:$0xff]  ;;  %v4426_v44 = vld [vmem:[%s4405_s17 + $0x18] sm:$0xff]  ;;  %v3387_v49 = vpack.c.bf16 %v2969_v38, %v2965_v35  ;;  %v3431_v51 = vpack.c.bf16 %v2971_v40, %v2967_v39  ;;  %v2973_v53 = vld [vmem:[%s6474_s1 + $0x520] sm:$0xff] }
  0x1e   : > { %3376 = vmatpush1.bf16.msra.mxu0 %v3375_v10  ;;  %v2978_v43 = vld [vmem:[%s6474_s1 + $0x548] sm:$0xff]  ;;  %v2976_v45 = vld [vmem:[%s6474_s1 + $0x538] sm:$0xff]  ;;  %v489_v48 = vrot.slane %v4426_v44, 1  ;;  %v2977_v54 = vld [vmem:[%s6474_s1 + $0x540] sm:$0xff] }
  0x1f   : > { %3420 = vmatpush1.bf16.msra.mxu1 %v3419_v11  ;;  %3378 = vmatprep.subr.bf16.mxu0 %v3377_v12  ;;  %v2980_v46 = vld [vmem:[%s6474_s1 + $0x558] sm:$0xff]  ;;  %v380_v47 = vld [vmem:[%s4405_s17 + $0x8] sm:$0xfe]  ;;  %v3389_v52 = vpack.c.bf16 %v2978_v43, %v2974_v42  ;;  %v2975_v55 = vld [vmem:[%s6474_s1 + $0x530] sm:$0xff]  ;;  %v3391_v63 = vpack.c.bf16 %v2977_v54, %v2973_v53 }
  0x20   : > { %3422 = vmatprep.subr.bf16.mxu1 %v3421_v16  ;;  %v488_v50 = vrot.slane %v380_v47, 1  ;;  %v3433_v56 = vpack.c.bf16 %v2980_v46, %v2976_v45  ;;  %v2979_v57 = vld [vmem:[%s6474_s1 + $0x550] sm:$0xff]  ;;  %v2982_v58 = vld [vmem:[%s6474_s1 + $0x568] sm:$0xff]  ;;  %v2984_v61 = vld [vmem:[%s6474_s1 + $0x578] sm:$0xff] }
  0x21   : > { %v2986_v59 = vld [vmem:[%s6474_s1 + $0x588] sm:$0xff]  ;;  %v2988_v62 = vld [vmem:[%s6474_s1 + $0x598] sm:$0xff]  ;;  %v3435_v0 = vpack.c.bf16 %v2979_v57, %v2975_v55  ;;  %v2981_v2 = vld [vmem:[%s6474_s1 + $0x560] sm:$0xff] }
  0x22   : > { %3380 = vmatpush1.bf16.msra.mxu0 %v3379_v22  ;;  %v490_v60 = vsel %vm484_vm0, %v488_v50, %v489_v48  ;;  %v3393_v1 = vpack.c.bf16 %v2986_v59, %v2982_v58  ;;  %v2985_v3 = vld [vmem:[%s6474_s1 + $0x580] sm:$0xff]  ;;  %v3437_v4 = vpack.c.bf16 %v2988_v62, %v2984_v61  ;;  %v2983_v5 = vld [vmem:[%s6474_s1 + $0x570] sm:$0xff]  ;;  %v2990_v11 = vld [vmem:[%s6474_s1 + $0x5a8] sm:$0xf] }
  0x23   : > { %3424 = vmatpush1.bf16.msra.mxu1 %v3423_v23  ;;  %3382 = vmatprep.subr.bf16.mxu0 %v3381_v24  ;;  %v2987_v6 = vld [vmem:[%s6474_s1 + $0x590] sm:$0xff]  ;;  %v3395_v7 = vpack.c.bf16 %v2985_v3, %v2981_v2  ;;  %v379_v9 = vld [vmem:[%s4405_s17] sm:$0xfe]  ;;  %v2992_v12 = vld [vmem:[%s6474_s1 + $0x5b8] sm:$0xf] }
  0x24   : > { %3426 = vmatprep.subr.bf16.mxu1 %v3425_v28  ;;  %2995 = vmatprep.mubr.msk.f32.mxu0 %vm503_vm1, %v490_v60  ;;  %v4478_v8 = vld [vmem:[%s4405_s17 + $0x10] sm:$0xff]  ;;  %v3439_v10 = vpack.c.bf16 %v2987_v6, %v2983_v5  ;;  %v288_v13 = vld [vmem:[%s6474_s1 + $0x8] sm:$0xff]  ;;  %v2989_v15 = vld [vmem:[%s6474_s1 + $0x5a0] sm:$0xf]  ;;  %v485_v18 = vrot.slane %v379_v9, 1 }
  0x25   : > { %3001 = vmatprep.mubr.msk.f32.mxu1 %vm503_vm1, %v490_v60  ;;  %v292_v14 = vld [vmem:[%s6474_s1 + $0x28] sm:$0xff]  ;;  %v290_v16 = vld [vmem:[%s6474_s1 + $0x18] sm:$0xff]  ;;  %v486_v19 = vrot.slane %v4478_v8, 1  ;;  %v287_v20 = vld [vmem:[%s6474_s1] sm:$0xff] }
  0x26   : > { %3384 = vmatpush1.bf16.msra.mxu0 %v3383_v34  ;;  %v294_v17 = vld [vmem:[%s6474_s1 + $0x38] sm:$0xff]  ;;  %v291_v21 = vld [vmem:[%s6474_s1 + $0x20] sm:$0xff]  ;;  %v289_v22 = vld [vmem:[%s6474_s1 + $0x10] sm:$0xff]  ;;  %v3441_v23 = vpack.c.bf16 %v292_v14, %v288_v13 }
  0x27   : > { %3428 = vmatpush1.bf16.msra.mxu1 %v3427_v36  ;;  %3386 = vmatprep.subr.bf16.mxu0 %v3385_v37  ;;  %v293_v24 = vld [vmem:[%s6474_s1 + $0x30] sm:$0xff]  ;;  %v296_v25 = vld [vmem:[%s6474_s1 + $0x48] sm:$0xff]  ;;  %v3485_v28 = vpack.c.bf16 %v294_v17, %v290_v16  ;;  %v298_v29 = vld [vmem:[%s6474_s1 + $0x58] sm:$0xff]  ;;  %v487_v31 = vsel %vm484_vm0, %v485_v18, %v486_v19  ;;  %v3443_v32 = vpack.c.bf16 %v291_v21, %v287_v20 }
  0x28   : > { %3430 = vmatprep.subr.bf16.mxu1 %v3429_v41  ;;  %v300_v26 = vld [vmem:[%s6474_s1 + $0x68] sm:$0xff]  ;;  %v2991_v27 = vld [vmem:[%s6474_s1 + $0x5b0] sm:$0xf]  ;;  %v302_v30 = vld [vmem:[%s6474_s1 + $0x78] sm:$0xff]  ;;  %v3487_v33 = vpack.c.bf16 %v293_v24, %v289_v22 }
  0x29   : > { %v3445_v34 = vpack.c.bf16 %v300_v26, %v296_v25  ;;  %v295_v35 = vld [vmem:[%s6474_s1 + $0x40] sm:$0xff]  ;;  %v297_v37 = vld [vmem:[%s6474_s1 + $0x50] sm:$0xff]  ;;  %v3489_v38 = vpack.c.bf16 %v302_v30, %v298_v29  ;;  %v304_v40 = vld [vmem:[%s6474_s1 + $0x88] sm:$0xff] }
  0x2a   : > { %3388 = vmatpush1.bf16.msra.mxu0 %v3387_v49  ;;  %v299_v36 = vld [vmem:[%s6474_s1 + $0x60] sm:$0xff]  ;;  %v301_v39 = vld [vmem:[%s6474_s1 + $0x70] sm:$0xff]  ;;  %v308_v41 = vld [vmem:[%s6474_s1 + $0xa8] sm:$0xff] }
  0x2b   : > { %3432 = vmatpush1.bf16.msra.mxu1 %v3431_v51  ;;  %3390 = vmatprep.subr.bf16.mxu0 %v3389_v52  ;;  %v306_v42 = vld [vmem:[%s6474_s1 + $0x98] sm:$0xff]  ;;  %v3447_v45 = vpack.c.bf16 %v299_v36, %v295_v35  ;;  %v3491_v46 = vpack.c.bf16 %v301_v39, %v297_v37  ;;  %v3449_v47 = vpack.c.bf16 %v308_v41, %v304_v40  ;;  %v303_v49 = vld [vmem:[%s6474_s1 + $0x80] sm:$0xff]  ;;  %v305_v51 = vld [vmem:[%s6474_s1 + $0x90] sm:$0xff] }
  0x2c   : > { %3434 = vmatprep.subr.bf16.mxu1 %v3433_v56  ;;  %v310_v43 = vld [vmem:[%s6474_s1 + $0xb8] sm:$0xff]  ;;  %v307_v50 = vld [vmem:[%s6474_s1 + $0xa0] sm:$0xff]  ;;  %v309_v53 = vld [vmem:[%s6474_s1 + $0xb0] sm:$0xff] }
  0x2d   : > { %v3493_v52 = vpack.c.bf16 %v310_v43, %v306_v42  ;;  %v312_v54 = vld [vmem:[%s6474_s1 + $0xc8] sm:$0xff]  ;;  %v314_v56 = vld [vmem:[%s6474_s1 + $0xd8] sm:$0xff]  ;;  %v3451_v58 = vpack.c.bf16 %v307_v50, %v303_v49  ;;  %v311_v59 = vld [vmem:[%s6474_s1 + $0xc0] sm:$0xff]  ;;  %v3495_v61 = vpack.c.bf16 %v309_v53, %v305_v51 }
  0x2e   : > { %3392 = vmatpush1.bf16.msra.mxu0 %v3391_v63  ;;  %v316_v55 = vld [vmem:[%s6474_s1 + $0xe8] sm:$0xff]  ;;  %v318_v57 = vld [vmem:[%s6474_s1 + $0xf8] sm:$0xff]  ;;  %v315_v60 = vld [vmem:[%s6474_s1 + $0xe0] sm:$0xff] }
  0x2f   : > { %3436 = vmatpush1.bf16.msra.mxu1 %v3435_v0  ;;  %3394 = vmatprep.subr.bf16.mxu0 %v3393_v1  ;;  %v3453_v62 = vpack.c.bf16 %v316_v55, %v312_v54  ;;  %v313_v63 = vld [vmem:[%s6474_s1 + $0xd0] sm:$0xff]  ;;  %v4595_v0 = vld [vmem:[%s4405_s17 + $0x28] sm:$0xff]  ;;  %v4598_v1 = vld [vmem:[%s4405_s17 + $0x20] sm:$0xff]  ;;  %v3497_v2 = vpack.c.bf16 %v318_v57, %v314_v56 }
  0x30   : > { %3438 = vmatprep.subr.bf16.mxu1 %v3437_v4  ;;  %v317_v3 = vld [vmem:[%s6474_s1 + $0xf0] sm:$0xff]  ;;  %v320_v4 = vld [vmem:[%s6474_s1 + $0x108] sm:$0xff]  ;;  %v493_v6 = vrot.slane %v4595_v0, 1  ;;  %v322_v9 = vld [vmem:[%s6474_s1 + $0x118] sm:$0xff] }
  0x31   : > { %v324_v5 = vld [vmem:[%s6474_s1 + $0x128] sm:$0xff]  ;;  %v382_v14 = vld [vmem:[%s4405_s17 + $0x38] sm:$0x7]  ;;  %v3499_v16 = vpack.c.bf16 %v317_v3, %v313_v63  ;;  %v319_v18 = vld [vmem:[%s6474_s1 + $0x100] sm:$0xff] }
  0x32   : > { %3396 = vmatpush1.bf16.msra.mxu0 %v3395_v7  ;;  %v491_v7 = vrot.slane %v4598_v1, 1  ;;  %v3457_v17 = vpack.c.bf16 %v324_v5, %v320_v4  ;;  %v323_v20 = vld [vmem:[%s6474_s1 + $0x120] sm:$0xff]  ;;  %v497_v21 = vrot.slane %v382_v14, 1  ;;  %v328_v24 = vld [vmem:[%s6474_s1 + $0x148] sm:$0xff]  ;;  %v330_v26 = vld [vmem:[%s6474_s1 + $0x158] sm:$0xff] }
  0x33   : > { %3440 = vmatpush1.bf16.msra.mxu1 %v3439_v10  ;;  %2993 = vmatprep.subr.msk.mxu0 %vm512_vm2, %v2990_v11  ;;  %v326_v10 = vld [vmem:[%s6474_s1 + $0x138] sm:$0xff]  ;;  %v3455_v11 = vpack.c.bf16 %v315_v60, %v311_v59  ;;  %v332_v25 = vld [vmem:[%s6474_s1 + $0x168] sm:$0xff]  ;;  %v3459_v29 = vpack.c.bf16 %v323_v20, %v319_v18  ;;  %v329_v35 = vld [vmem:[%s6474_s1 + $0x150] sm:$0xff] }
  0x34   : > { %2999 = vmatprep.subr.msk.mxu1 %vm512_vm2, %v2992_v12  ;;  %v494_v12 = vsel %vm484_vm0, %v489_v48, %v493_v6  ;;  %v492_v13 = vsel %vm484_vm0, %v486_v19, %v491_v7  ;;  %v321_v48 = vld [vmem:[%s6474_s1 + $0x110] sm:$0xff]  ;;  %v3501_v22 = vpack.c.bf16 %v326_v10, %v322_v9  ;;  %v340_v39 = vld [vmem:[%s6474_s1 + $0x1a8] sm:$0xff]  ;;  %v338_v40 = vld [vmem:[%s6474_s1 + $0x198] sm:$0xff] }
  0x35   : > { %v333_v37 = vld [vmem:[%s6474_s1 + $0x170] sm:$0xff]  ;;  %v342_v41 = vld [vmem:[%s6474_s1 + $0x1b8] sm:$0xff]  ;;  %v348_v53 = vld [vmem:[%s6474_s1 + $0x1e8] sm:$0xff] }
  0x36   : > { %2994 = vmatpush1.msk.msra.mxu0 %vm512_vm2, %v2989_v15  ;;  %v381_v15 = vld [vmem:[%s4405_s17 + $0x30] sm:$0x7]  ;;  %v3507_v43 = vpack.c.bf16 %v333_v37, %v329_v35  ;;  %v3509_v50 = vpack.c.bf16 %v342_v41, %v338_v40  ;;  %v346_v54 = vld [vmem:[%s6474_s1 + $0x1d8] sm:$0xff]  ;;  %v280_v56 = vld [vmem:[%s4405_s17 + $0x8] sm:$0xff] }
  0x37   : > { %3000 = vmatpush1.msk.msra.mxu1 %vm512_vm2, %v2991_v27  ;;  %3442 = vmatprep.subr.bf16.mxu0 %v3441_v23  ;;  %v495_v19 = vrot.slane %v381_v15, 1  ;;  %v325_v23 = vld [vmem:[%s6474_s1 + $0x130] sm:$0xff]  ;;  %v334_v27 = vld [vmem:[%s6474_s1 + $0x178] sm:$0xff]  ;;  %v343_v60 = vld [vmem:[%s6474_s1 + $0x1c0] sm:$0xff] }
  0x38   : > { %3486 = vmatprep.subr.bf16.mxu1 %v3485_v28  ;;  %590 = vmatmul.mubr.f32.vlgmr.msra.gmra.mrb[0].mxu0 %v487_v31  ;;  %v498_v28 = vsel %vm484_vm0, %v493_v6, %v497_v21  ;;  %v3505_v36 = vpack.c.bf16 %v334_v27, %v330_v26  ;;  %v337_v49 = vld [vmem:[%s6474_s1 + $0x190] sm:$0xff]  ;;  %v350_v55 = vld [vmem:[%s6474_s1 + $0x1f8] sm:$0xff]  ;;  %v352_v3 = vld [vmem:[%s6474_s1 + $0x208] sm:$0xff] }
  0x39   : > { %679 = vmatmul.mubr.f32.vlgmr.msra.gmra.mrb[0].mxu1 %v487_v31  ;;  %3444 = vmatpush1.bf16.msra.mxu0 %v3443_v32  ;;  %v496_v30 = vsel %vm484_vm0, %v491_v7, %v495_v19  ;;  %v3503_v31 = vpack.c.bf16 %v325_v23, %v321_v48  ;;  %v3461_v32 = vpack.c.bf16 %v332_v25, %v328_v24  ;;  %v341_v51 = vld [vmem:[%s6474_s1 + $0x1b0] sm:$0xff]  ;;  %v356_v4 = vld [vmem:[%s6474_s1 + $0x228] sm:$0xff]  ;;  %v354_v5 = vld [vmem:[%s6474_s1 + $0x218] sm:$0xff] }
  0x3a   : > { %3488 = vmatpush1.bf16.msra.mxu1 %v3487_v33  ;;  %3446 = vmatprep.subr.bf16.mxu0 %v3445_v34  ;;  %v327_v33 = vld [vmem:[%s6474_s1 + $0x140] sm:$0xff]  ;;  %v3513_v63 = vpack.c.bf16 %v350_v55, %v346_v54  ;;  %v358_v6 = vld [vmem:[%s6474_s1 + $0x238] sm:$0xff]  ;;  %v3473_v10 = vpack.c.bf16 %v356_v4, %v352_v3  ;;  %v357_v15 = vld [vmem:[%s6474_s1 + $0x230] sm:$0xff] }
  0x3b   : > { %3490 = vmatprep.subr.bf16.mxu1 %v3489_v38  ;;  %2996 = vmatprep.mubr.msk.f32.mxu0 %vm503_vm1, %v494_v12  ;;  %v331_v34 = vld [vmem:[%s6474_s1 + $0x160] sm:$0xff]  ;;  %v336_v38 = vld [vmem:[%s6474_s1 + $0x188] sm:$0xff]  ;;  %v3517_v14 = vpack.c.bf16 %v358_v6, %v354_v5  ;;  %v362_v18 = vld [vmem:[%s6474_s1 + $0x258] sm:$0xff] }
  0x3c   : > { %3002 = vmatprep.mubr.msk.f32.mxu1 %vm503_vm1, %v494_v12  ;;  %596 = vmatmul.mubr.f32.gmra.mrb[2].mxu0 %v492_v13  ;;  %v3463_v42 = vpack.c.bf16 %v331_v34, %v327_v33  ;;  %v355_v12 = vld [vmem:[%s6474_s1 + $0x220] sm:$0xff]  ;;  %v366_v20 = vld [vmem:[%s6474_s1 + $0x278] sm:$0xff]  ;;  %v361_v24 = vld [vmem:[%s6474_s1 + $0x250] sm:$0xff] }
  0x3d   : > { %3448 = vmatpush1.bf16.msra.mxu0 %v3447_v45  ;;  %685 = vmatmul.mubr.f32.gmra.mrb[2].mxu1 %v492_v13  ;;  %v3465_v45 = vpack.c.bf16 %v340_v39, %v336_v38  ;;  %v353_v13 = vld [vmem:[%s6474_s1 + $0x210] sm:$0xff]  ;;  %v363_v23 = vld [vmem:[%s6474_s1 + $0x260] sm:$0xff]  ;;  %v3521_v25 = vpack.c.bf16 %v366_v20, %v362_v18  ;;  %v368_v27 = vld [vmem:[%s6474_s1 + $0x288] sm:$0xff] }
  0x3e   : > { %3492 = vmatpush1.bf16.msra.mxu1 %v3491_v46  ;;  %3450 = vmatprep.subr.bf16.mxu0 %v3449_v47  ;;  %v335_v46 = vld [vmem:[%s6474_s1 + $0x180] sm:$0xff]  ;;  %v365_v26 = vld [vmem:[%s6474_s1 + $0x270] sm:$0xff]  ;;  %v376_v41 = vld [vmem:[%s6474_s1 + $0x2c8] sm:$0xf] }
  0x3f   : > { %3494 = vmatprep.subr.bf16.mxu1 %v3493_v52  ;;  %2997 = vmatprep.mubr.msk.f32.mxu0 %vm503_vm1, %v498_v28  ;;  %v339_v47 = vld [vmem:[%s6474_s1 + $0x1a0] sm:$0xff]  ;;  %v344_v52 = vld [vmem:[%s6474_s1 + $0x1c8] sm:$0xff]  ;;  %v369_v37 = vld [vmem:[%s6474_s1 + $0x290] sm:$0xff] }
  0x40   : > { %3003 = vmatprep.mubr.msk.f32.mxu1 %vm503_vm1, %v498_v28  ;;  %602 = vmatmul.mubr.f32.gmra.mrb[4].mxu0 %v496_v30  ;;  %v3467_v57 = vpack.c.bf16 %v339_v47, %v335_v46  ;;  %v3469_v59 = vpack.c.bf16 %v348_v53, %v344_v52  ;;  %v372_v28 = vld [vmem:[%s6474_s1 + $0x2a8] sm:$0xff]  ;;  %v367_v34 = vld [vmem:[%s6474_s1 + $0x280] sm:$0xff]  ;;  %v373_v38 = vld [vmem:[%s6474_s1 + $0x2b0] sm:$0xff] }
  0x41   : > { %3452 = vmatpush1.bf16.msra.mxu0 %v3451_v58  ;;  %691 = vmatmul.mubr.f32.gmra.mrb[4].mxu1 %v496_v30  ;;  %v3511_v58 = vpack.c.bf16 %v341_v51, %v337_v49  ;;  %v374_v30 = vld [vmem:[%s6474_s1 + $0x2b8] sm:$0xff]  ;;  %v3481_v33 = vpack.c.bf16 %v372_v28, %v368_v27  ;;  %v371_v35 = vld [vmem:[%s6474_s1 + $0x2a0] sm:$0xff]  ;;  %v3527_v40 = vpack.c.bf16 %v373_v38, %v369_v37  ;;  %v3019_v52 = vld [vmem:[%s6474_s1 + $0x5d0] sm:$0xff] }
  0x42   : > { %3496 = vmatpush1.bf16.msra.mxu1 %v3495_v61  ;;  %3454 = vmatprep.subr.bf16.mxu0 %v3453_v62  ;;  %v347_v61 = vld [vmem:[%s6474_s1 + $0x1e0] sm:$0xff]  ;;  %v345_v62 = vld [vmem:[%s6474_s1 + $0x1d0] sm:$0xff]  ;;  %v3483_v39 = vpack.c.bf16 %v371_v35, %v367_v34  ;;  %v3020_v47 = vld [vmem:[%s6474_s1 + $0x5d8] sm:$0xff] }
  0x43   : > { %3498 = vmatprep.subr.bf16.mxu1 %v3497_v2  ;;  %2998 = vmatprep.mubr.msk.f32.mxu0 %vm503_vm1, %v497_v21  ;;  %v349_v2 = vld [vmem:[%s6474_s1 + $0x1f0] sm:$0xff]  ;;  %v3471_v7 = vpack.c.bf16 %v347_v61, %v343_v60  ;;  %v375_v46 = vld [vmem:[%s6474_s1 + $0x2c0] sm:$0xf]  ;;  %v3024_v49 = vld [vmem:[%s6474_s1 + $0x5f8] sm:$0xff] }
  0x44   : > { %3004 = vmatprep.mubr.msk.f32.mxu1 %vm503_vm1, %v497_v21  ;;  %608 = vmatmul.mubr.f32.gmra.mrb[6].mxu0 %v495_v19  ;;  %v3515_v9 = vpack.c.bf16 %v349_v2, %v345_v62  ;;  %v3519_v21 = vpack.c.bf16 %v357_v15, %v353_v13  ;;  %v3021_v51 = vld [vmem:[%s6474_s1 + $0x5e0] sm:$0xff]  ;;  %v3023_v54 = vld [vmem:[%s6474_s1 + $0x5f0] sm:$0xff]  ;;  %v3026_v55 = vld [vmem:[%s6474_s1 + $0x608] sm:$0xff] }
  0x45   : > { %3456 = vmatpush1.bf16.msra.mxu0 %v3455_v11  ;;  %697 = vmatmul.mubr.f32.gmra.mrb[6].mxu1 %v495_v19  ;;  %v351_v11 = vld [vmem:[%s6474_s1 + $0x200] sm:$0xff]  ;;  %v3032_v60 = vld [vmem:[%s6474_s1 + $0x638] sm:$0xff]  ;;  %v3027_v5 = vld [vmem:[%s6474_s1 + $0x610] sm:$0xff] }
  0x46   : > { %3500 = vmatpush1.bf16.msra.mxu1 %v3499_v16  ;;  %3458 = vmatprep.subr.bf16.mxu0 %v3457_v17  ;;  %v360_v16 = vld [vmem:[%s6474_s1 + $0x248] sm:$0xff]  ;;  %v3475_v48 = vpack.c.bf16 %v355_v12, %v351_v11  ;;  %v279_v61 = vld [vmem:[%s4405_s17] sm:$0xff]  ;;  %v3036_v11 = vld [vmem:[%s6474_s1 + $0x658] sm:$0xff] }
  0x47   : > { %3502 = vmatprep.subr.bf16.mxu1 %v3501_v22  ;;  %3007 = vmatprep.mubr.msk.f32.mxu0 %vm503_vm1, %v280_v56  ;;  %v364_v17 = vld [vmem:[%s6474_s1 + $0x268] sm:$0xff]  ;;  %v359_v22 = vld [vmem:[%s6474_s1 + $0x240] sm:$0xff]  ;;  %v3040_v12 = vld [vmem:[%s6474_s1 + $0x678] sm:$0xff] }
  0x48   : > { %3013 = vmatprep.mubr.msk.f32.mxu1 %vm503_vm1, %v280_v56  ;;  %v3477_v19 = vpack.c.bf16 %v364_v17, %v360_v16  ;;  %v3030_v56 = vld [vmem:[%s6474_s1 + $0x628] sm:$0xff]  ;;  %v3025_v3 = vld [vmem:[%s6474_s1 + $0x600] sm:$0xff]  ;;  %v3035_v18 = vld [vmem:[%s6474_s1 + $0x650] sm:$0xff]  ;;  %v3581_v20 = vpack.c.bf16 %v3040_v12, %v3036_v11 }
  0x49   : > { %3460 = vmatpush1.bf16.msra.mxu0 %v3459_v29  ;;  %v370_v29 = vld [vmem:[%s6474_s1 + $0x298] sm:$0xff]  ;;  %v3533_v2 = vpack.c.bf16 %v3030_v56, %v3026_v55  ;;  %v3029_v4 = vld [vmem:[%s6474_s1 + $0x620] sm:$0xff]  ;;  %v3054_v34 = vld [vmem:[%s6474_s1 + $0x6e8] sm:$0xff] }
  0x4a   : > { %3504 = vmatpush1.bf16.msra.mxu1 %v3503_v31  ;;  %3462 = vmatprep.subr.bf16.mxu0 %v3461_v32  ;;  %v3479_v31 = vpack.c.bf16 %v363_v23, %v359_v22  ;;  %v3523_v32 = vpack.c.bf16 %v365_v26, %v361_v24  ;;  %v3535_v13 = vpack.c.bf16 %v3029_v4, %v3025_v3  ;;  %v3033_v16 = vld [vmem:[%s6474_s1 + $0x640] sm:$0xff]  ;;  %v3044_v22 = vld [vmem:[%s6474_s1 + $0x698] sm:$0xff]  ;;  %v3070_v3 = vld [vmem:[%s6474_s1 + $0x768] sm:$0xff] }
  0x4b   : > { %3506 = vmatprep.subr.bf16.mxu1 %v3505_v36  ;;  %v3525_v36 = vpack.c.bf16 %v374_v30, %v370_v29  ;;  %v3037_v17 = vld [vmem:[%s6474_s1 + $0x660] sm:$0xff]  ;;  %v3048_v23 = vld [vmem:[%s6474_s1 + $0x6b8] sm:$0xff]  ;;  %v3043_v30 = vld [vmem:[%s6474_s1 + $0x690] sm:$0xff] }
  0x4c   : > { %v3539_v24 = vpack.c.bf16 %v3037_v17, %v3033_v16  ;;  %v3041_v28 = vld [vmem:[%s6474_s1 + $0x680] sm:$0xff]  ;;  %v3052_v35 = vld [vmem:[%s6474_s1 + $0x6d8] sm:$0xff]  ;;  %v3067_v12 = vld [vmem:[%s6474_s1 + $0x750] sm:$0xff] }
  0x4d   : > { %3464 = vmatpush1.bf16.msra.mxu0 %v3463_v42  ;;  %v378_v42 = vld [vmem:[%s6474_s1 + $0x2d8] sm:$0xf]  ;;  %v3045_v29 = vld [vmem:[%s6474_s1 + $0x6a0] sm:$0xff]  ;;  %v3078_v16 = vld [vmem:[%s6474_s1 + $0x7a8] sm:$0xff] }
  0x4e   : > { %3508 = vmatpush1.bf16.msra.mxu1 %v3507_v43  ;;  %3466 = vmatprep.subr.bf16.mxu0 %v3465_v45  ;;  %v3018_v43 = vld [vmem:[%s6474_s1 + $0x5c8] sm:$0xff]  ;;  %v286_v37 = vld [vmem:[%s4405_s17 + $0x38] sm:$0x3]  ;;  %v3069_v11 = vld [vmem:[%s6474_s1 + $0x760] sm:$0xff] }
  0x4f   : > { %3510 = vmatprep.subr.bf16.mxu1 %v3509_v50  ;;  %v3022_v45 = vld [vmem:[%s6474_s1 + $0x5e8] sm:$0xff]  ;;  %v3017_v50 = vld [vmem:[%s6474_s1 + $0x5c0] sm:$0xff]  ;;  %v3068_v4 = vld [vmem:[%s6474_s1 + $0x758] sm:$0xff] }
  0x50   : > { %v3529_v53 = vpack.c.bf16 %v3022_v45, %v3018_v43  ;;  %v3531_v62 = vpack.c.bf16 %v3021_v51, %v3017_v50  ;;  %v3049_v45 = vld [vmem:[%s6474_s1 + $0x6c0] sm:$0xff]  ;;  %v3055_v50 = vld [vmem:[%s6474_s1 + $0x6f0] sm:$0xff]  ;;  %v3058_v51 = vld [vmem:[%s6474_s1 + $0x708] sm:$0xff] }
  0x51   : > { %3468 = vmatpush1.bf16.msra.mxu0 %v3467_v57  ;;  %v377_v57 = vld [vmem:[%s6474_s1 + $0x2d0] sm:$0xf]  ;;  %v3076_v17 = vld [vmem:[%s6474_s1 + $0x798] sm:$0xff]  ;;  %vm5780_vm7 = vmpackc.low %vm1967_vm5, %vm4136_vm6 }
  0x52   : > { %3512 = vmatpush1.bf16.msra.mxu1 %v3511_v58  ;;  %3470 = vmatprep.subr.bf16.mxu0 %v3469_v59  ;;  %v3573_v58 = vpack.c.bf16 %v3024_v49, %v3020_v47  ;;  %v3028_v59 = vld [vmem:[%s6474_s1 + $0x618] sm:$0xff]  ;;  %v3051_v47 = vld [vmem:[%s6474_s1 + $0x6d0] sm:$0xff] }
  0x53   : > { %3514 = vmatprep.subr.bf16.mxu1 %v3513_v63  ;;  %v3575_v63 = vpack.c.bf16 %v3023_v54, %v3019_v52  ;;  %v3577_v6 = vpack.c.bf16 %v3032_v60, %v3028_v59  ;;  %v3062_v52 = vld [vmem:[%s6474_s1 + $0x728] sm:$0xff]  ;;  %v3064_v54 = vld [vmem:[%s6474_s1 + $0x738] sm:$0xff]  ;;  %v3057_v59 = vld [vmem:[%s6474_s1 + $0x700] sm:$0xff] }
  0x54   : > { %v3061_v60 = vld [vmem:[%s6474_s1 + $0x720] sm:$0xff] }
  0x55   : > { %3472 = vmatpush1.bf16.msra.mxu0 %v3471_v7  ;;  %v3031_v7 = vld [vmem:[%s6474_s1 + $0x630] sm:$0xff] }
  0x56   : > { %3516 = vmatpush1.bf16.msra.mxu1 %v3515_v9  ;;  %3474 = vmatprep.subr.bf16.mxu0 %v3473_v10  ;;  %v3034_v9 = vld [vmem:[%s6474_s1 + $0x648] sm:$0xff] }
  0x57   : > { %3518 = vmatprep.subr.bf16.mxu1 %v3517_v14  ;;  %v3038_v10 = vld [vmem:[%s6474_s1 + $0x668] sm:$0xff]  ;;  %v3579_v14 = vpack.c.bf16 %v3031_v7, %v3027_v5  ;;  %v3072_v5 = vld [vmem:[%s6474_s1 + $0x778] sm:$0xff] }
  0x58   : > { %v3537_v15 = vpack.c.bf16 %v3038_v10, %v3034_v9  ;;  %v3065_v10 = vld [vmem:[%s6474_s1 + $0x740] sm:$0xff] }
  0x59   : > { %3476 = vmatpush1.bf16.msra.mxu0 %v3475_v48  ;;  %v3039_v48 = vld [vmem:[%s6474_s1 + $0x670] sm:$0xff] }
  0x5a   : > { %3520 = vmatpush1.bf16.msra.mxu1 %v3519_v21  ;;  %3478 = vmatprep.subr.bf16.mxu0 %v3477_v19  ;;  %v3042_v21 = vld [vmem:[%s6474_s1 + $0x688] sm:$0xff]  ;;  %v3583_v26 = vpack.c.bf16 %v3039_v48, %v3035_v18  ;;  %v3080_v18 = vld [vmem:[%s6474_s1 + $0x7b8] sm:$0xff] }
  0x5b   : > { %3522 = vmatprep.subr.bf16.mxu1 %v3521_v25  ;;  %v3046_v19 = vld [vmem:[%s6474_s1 + $0x6a8] sm:$0xff] }
  0x5c   : > { %v904_v25 = vld [vmem:[%s4405_s17 + $0x8] sm:$0xfc]  ;;  %v3541_v27 = vpack.c.bf16 %v3046_v19, %v3042_v21  ;;  %v3073_v19 = vld [vmem:[%s6474_s1 + $0x780] sm:$0xff] }
  0x5d   : > { %3480 = vmatpush1.bf16.msra.mxu0 %v3479_v31  ;;  %v3585_v31 = vpack.c.bf16 %v3048_v23, %v3044_v22  ;;  %v1008_v38 = vrot.slane %v904_v25, 2  ;;  %v3077_v22 = vld [vmem:[%s6474_s1 + $0x7a0] sm:$0xff]  ;;  %v3075_v23 = vld [vmem:[%s6474_s1 + $0x790] sm:$0xff] }
  0x5e   : > { %3524 = vmatpush1.bf16.msra.mxu1 %v3523_v32  ;;  %3482 = vmatprep.subr.bf16.mxu0 %v3481_v33  ;;  %v3047_v32 = vld [vmem:[%s6474_s1 + $0x6b0] sm:$0xff]  ;;  %v3050_v33 = vld [vmem:[%s6474_s1 + $0x6c8] sm:$0xff] }
  0x5f   : > { %3526 = vmatprep.subr.bf16.mxu1 %v3525_v36  ;;  %v3056_v36 = vld [vmem:[%s6474_s1 + $0x6f8] sm:$0xff]  ;;  %v3545_v43 = vpack.c.bf16 %v3054_v34, %v3050_v33  ;;  %v3079_v25 = vld [vmem:[%s6474_s1 + $0x7b0] sm:$0xff]  ;;  %v3081_v33 = vld [vmem:[%s6474_s1 + $0x7c0] sm:$0xff] }
  0x60   : > { %v3589_v49 = vpack.c.bf16 %v3056_v36, %v3052_v35  ;;  %v3085_v34 = vld [vmem:[%s6474_s1 + $0x7e0] sm:$0xff]  ;;  %v3083_v35 = vld [vmem:[%s6474_s1 + $0x7d0] sm:$0xff] }
  0x61   : > { %3484 = vmatpush1.bf16.msra.mxu0 %v3483_v39  ;;  %v1009_v39 = vrot.slane %v4426_v44, 2 }
  0x62   : > { %3528 = vmatpush1.bf16.msra.mxu1 %v3527_v40  ;;  %3005 = vmatprep.subr.msk.mxu0 %vm512_vm2, %v376_v41  ;;  %v3543_v40 = vpack.c.bf16 %v3045_v29, %v3041_v28  ;;  %v285_v41 = vld [vmem:[%s4405_s17 + $0x30] sm:$0x3]  ;;  %v3084_v28 = vld [vmem:[%s6474_s1 + $0x7d8] sm:$0xff] }
  0x63   : > { %3011 = vmatprep.subr.msk.mxu1 %vm512_vm2, %v378_v42  ;;  %v3587_v42 = vpack.c.bf16 %v3047_v32, %v3043_v30  ;;  %v1010_v55 = vsel %vm1004_vm3, %v1008_v38, %v1009_v39  ;;  %v3088_v29 = vld [vmem:[%s6474_s1 + $0x7f8] sm:$0xff]  ;;  %v3559_v30 = vpack.c.bf16 %v3077_v22, %v3073_v19  ;;  %v3090_v38 = vld [vmem:[%s6474_s1 + $0x808] sm:$0xff]  ;;  %v3107_v19 = vld [vmem:[%s6474_s1 + $0x890] sm:$0xf] }
  0x64   : > { %v3605_v36 = vpack.c.bf16 %v3088_v29, %v3084_v28  ;;  %v3129_v28 = vld [vmem:[%s6474_s1 + $0x8e0] sm:$0xff]  ;;  %v1011_v29 = vrot.slane %v4598_v1, 2 }
  0x65   : > { %3006 = vmatpush1.msk.msra.mxu0 %vm512_vm2, %v375_v46  ;;  %v3053_v46 = vld [vmem:[%s6474_s1 + $0x6e0] sm:$0xff] }
  0x66   : > { %3012 = vmatpush1.msk.msra.mxu1 %vm512_vm2, %v377_v57  ;;  %3530 = vmatprep.subr.bf16.mxu0 %v3529_v53  ;;  %v3060_v53 = vld [vmem:[%s6474_s1 + $0x718] sm:$0xff]  ;;  %v3547_v56 = vpack.c.bf16 %v3053_v46, %v3049_v45  ;;  %v3591_v57 = vpack.c.bf16 %v3055_v50, %v3051_v47  ;;  %v3089_v47 = vld [vmem:[%s6474_s1 + $0x800] sm:$0xff]  ;;  %v3091_v50 = vld [vmem:[%s6474_s1 + $0x810] sm:$0xff] }
  0x67   : > { %3574 = vmatprep.subr.bf16.mxu1 %v3573_v58  ;;  %790 = vmatmul.mubr.f32.vlgmr.msra.gmra.mrb[0].mxu0 %v279_v61  ;;  %v3549_v58 = vpack.c.bf16 %v3062_v52, %v3058_v51  ;;  %v3095_v52 = vld [vmem:[%s6474_s1 + $0x830] sm:$0xff] }
  0x68   : > { %879 = vmatmul.mubr.f32.vlgmr.msra.gmra.mrb[0].mxu1 %v279_v61  ;;  %3532 = vmatpush1.bf16.msra.mxu0 %v3531_v62  ;;  %v3059_v61 = vld [vmem:[%s6474_s1 + $0x710] sm:$0xff]  ;;  %v3593_v62 = vpack.c.bf16 %v3064_v54, %v3060_v53  ;;  %v3098_v53 = vld [vmem:[%s6474_s1 + $0x848] sm:$0xff] }
  0x69   : > { %3576 = vmatpush1.bf16.msra.mxu1 %v3575_v63  ;;  %3534 = vmatprep.subr.bf16.mxu0 %v3533_v2  ;;  %v3063_v63 = vld [vmem:[%s6474_s1 + $0x730] sm:$0xff]  ;;  %v3066_v2 = vld [vmem:[%s6474_s1 + $0x748] sm:$0xff] }
  0x6a   : > { %3578 = vmatprep.subr.bf16.mxu1 %v3577_v6  ;;  %3008 = vmatprep.mubr.msk.f32.mxu0 %vm503_vm1, %v4426_v44  ;;  %v3551_v6 = vpack.c.bf16 %v3061_v60, %v3057_v59  ;;  %v3595_v7 = vpack.c.bf16 %v3063_v63, %v3059_v61  ;;  %v3553_v9 = vpack.c.bf16 %v3070_v3, %v3066_v2  ;;  %v3102_v54 = vld [vmem:[%s6474_s1 + $0x868] sm:$0xff]  ;;  %v3097_v60 = vld [vmem:[%s6474_s1 + $0x840] sm:$0xff]  ;;  %v3099_v63 = vld [vmem:[%s6474_s1 + $0x850] sm:$0xff] }
  0x6b   : > { %3014 = vmatprep.mubr.msk.f32.mxu1 %vm503_vm1, %v4426_v44  ;;  %796 = vmatmul.mubr.f32.gmra.mrb[2].mxu0 %v4478_v8  ;;  %v3569_v59 = vpack.c.bf16 %v3102_v54, %v3098_v53  ;;  %v3101_v61 = vld [vmem:[%s6474_s1 + $0x860] sm:$0xff]  ;;  %v3103_v2 = vld [vmem:[%s6474_s1 + $0x870] sm:$0xff]  ;;  %v3146_v53 = vld [vmem:[%s6474_s1 + $0x968] sm:$0xff] }
  0x6c   : > { %3536 = vmatpush1.bf16.msra.mxu0 %v3535_v13  ;;  %885 = vmatmul.mubr.f32.gmra.mrb[2].mxu1 %v4478_v8  ;;  %v3597_v13 = vpack.c.bf16 %v3072_v5, %v3068_v4  ;;  %v3571_v3 = vpack.c.bf16 %v3101_v61, %v3097_v60  ;;  %v903_v4 = vld [vmem:[%s4405_s17] sm:$0xfc]  ;;  %v3615_v5 = vpack.c.bf16 %v3103_v2, %v3099_v63  ;;  %v3150_v54 = vld [vmem:[%s6474_s1 + $0x988] sm:$0xff] }
  0x6d   : > { %3580 = vmatpush1.bf16.msra.mxu1 %v3579_v14  ;;  %3538 = vmatprep.subr.bf16.mxu0 %v3537_v15  ;;  %v3071_v14 = vld [vmem:[%s6474_s1 + $0x770] sm:$0xff]  ;;  %v3074_v15 = vld [vmem:[%s6474_s1 + $0x788] sm:$0xff]  ;;  %v3141_v44 = vld [vmem:[%s6474_s1 + $0x940] sm:$0xff] }
  0x6e   : > { %3582 = vmatprep.subr.bf16.mxu1 %v3581_v20  ;;  %3009 = vmatprep.mubr.msk.f32.mxu0 %vm503_vm1, %v4595_v0  ;;  %v3555_v20 = vpack.c.bf16 %v3069_v11, %v3065_v10  ;;  %v3599_v48 = vpack.c.bf16 %v3071_v14, %v3067_v12  ;;  %v3557_v21 = vpack.c.bf16 %v3078_v16, %v3074_v15  ;;  %v3126_v10 = vld [vmem:[%s6474_s1 + $0x8c8] sm:$0xff]  ;;  %v3105_v11 = vld [vmem:[%s6474_s1 + $0x880] sm:$0xf]  ;;  %v3124_v12 = vld [vmem:[%s6474_s1 + $0x8b8] sm:$0xff]  ;;  %v1005_v14 = vrot.slane %v903_v4, 2 }
  0x6f   : > { %3015 = vmatprep.mubr.msk.f32.mxu1 %vm503_vm1, %v4595_v0  ;;  %802 = vmatmul.mubr.f32.gmra.mrb[4].mxu0 %v4598_v1  ;;  %v1006_v15 = vrot.slane %v4478_v8, 2  ;;  %v3121_v16 = vld [vmem:[%s6474_s1 + $0x8a0] sm:$0xff]  ;;  %v3127_v8 = vld [vmem:[%s6474_s1 + $0x8d0] sm:$0xff]  ;;  %v1238_v60 = vld [vmem:[%s4405_s17 + $0x8] sm:$0xf8] }
  0x70   : > { %3540 = vmatpush1.bf16.msra.mxu0 %v3539_v24  ;;  %891 = vmatmul.mubr.f32.gmra.mrb[4].mxu1 %v4598_v1  ;;  %v3601_v24 = vpack.c.bf16 %v3080_v18, %v3076_v17  ;;  %v3125_v17 = vld [vmem:[%s6474_s1 + $0x8c0] sm:$0xff]  ;;  %v3123_v18 = vld [vmem:[%s6474_s1 + $0x8b0] sm:$0xff] }
  0x71   : > { %3584 = vmatpush1.bf16.msra.mxu1 %v3583_v26  ;;  %3542 = vmatprep.subr.bf16.mxu0 %v3541_v27  ;;  %v3082_v26 = vld [vmem:[%s6474_s1 + $0x7c8] sm:$0xff]  ;;  %v3135_v1 = vld [vmem:[%s6474_s1 + $0x910] sm:$0xff]  ;;  %v3145_v63 = vld [vmem:[%s6474_s1 + $0x960] sm:$0xff] }
  0x72   : > { %3586 = vmatprep.subr.bf16.mxu1 %v3585_v31  ;;  %3010 = vmatprep.mubr.msk.f32.mxu0 %vm503_vm1, %v286_v37  ;;  %v3086_v27 = vld [vmem:[%s6474_s1 + $0x7e8] sm:$0xff]  ;;  %v3603_v31 = vpack.c.bf16 %v3079_v25, %v3075_v23  ;;  %v3132_v23 = vld [vmem:[%s6474_s1 + $0x8f8] sm:$0xff]  ;;  %v1013_v25 = vrot.slane %v4595_v0, 2  ;;  %v3131_v0 = vld [vmem:[%s6474_s1 + $0x8f0] sm:$0xff] }
  0x73   : > { %3016 = vmatprep.mubr.msk.f32.mxu1 %vm503_vm1, %v286_v37  ;;  %808 = vmatmul.mubr.f32.gmra.mrb[6].mxu0 %v285_v41  ;;  %v3561_v32 = vpack.c.bf16 %v3086_v27, %v3082_v26  ;;  %v3087_v37 = vld [vmem:[%s6474_s1 + $0x7f0] sm:$0xff]  ;;  %v1007_v26 = vsel %vm1004_vm3, %v1005_v14, %v1006_v15  ;;  %v3619_v27 = vpack.c.bf16 %v3125_v17, %v3121_v16  ;;  %v3149_v2 = vld [vmem:[%s6474_s1 + $0x980] sm:$0xff] }
  0x74   : > { %3544 = vmatpush1.bf16.msra.mxu0 %v3543_v40  ;;  %897 = vmatmul.mubr.f32.gmra.mrb[6].mxu1 %v285_v41  ;;  %v3094_v40 = vld [vmem:[%s6474_s1 + $0x828] sm:$0xff]  ;;  %v3092_v41 = vld [vmem:[%s6474_s1 + $0x818] sm:$0xff]  ;;  %v3607_v45 = vpack.c.bf16 %v3087_v37, %v3083_v35  ;;  %v3631_v14 = vpack.c.bf16 %v3149_v2, %v3145_v63  ;;  %v3153_v17 = vld [vmem:[%s6474_s1 + $0x9a0] sm:$0xff] }
  0x75   : > { %3588 = vmatpush1.bf16.msra.mxu1 %v3587_v42  ;;  %3546 = vmatprep.subr.bf16.mxu0 %v3545_v43  ;;  %v3096_v42 = vld [vmem:[%s6474_s1 + $0x838] sm:$0xff]  ;;  %v3563_v43 = vpack.c.bf16 %v3085_v34, %v3081_v33  ;;  %v3565_v46 = vpack.c.bf16 %v3094_v40, %v3090_v38  ;;  %v3133_v33 = vld [vmem:[%s6474_s1 + $0x900] sm:$0xff]  ;;  %v905_v34 = vld [vmem:[%s4405_s17 + $0x30] sm:$0xf] }
  0x76   : > { %3590 = vmatprep.subr.bf16.mxu1 %v3589_v49  ;;  %3111 = vmatprep.mubr.msk.f32.mxu0 %vm503_vm1, %v1010_v55  ;;  %v3093_v49 = vld [vmem:[%s6474_s1 + $0x820] sm:$0xff]  ;;  %v3609_v51 = vpack.c.bf16 %v3096_v42, %v3092_v41  ;;  %v3142_v37 = vld [vmem:[%s6474_s1 + $0x948] sm:$0xff]  ;;  %v3140_v38 = vld [vmem:[%s6474_s1 + $0x938] sm:$0xff]  ;;  %v1014_v41 = vsel %vm1004_vm3, %v1009_v39, %v1013_v25 }
  0x77   : > { %3117 = vmatprep.mubr.msk.f32.mxu1 %vm503_vm1, %v1010_v55  ;;  %v3100_v55 = vld [vmem:[%s6474_s1 + $0x858] sm:$0xff]  ;;  %v3139_v39 = vld [vmem:[%s6474_s1 + $0x930] sm:$0xff]  ;;  %v3185_v63 = vld [vmem:[%s6474_s1 + $0xaa0] sm:$0xff] }
  0x78   : > { %3548 = vmatpush1.bf16.msra.mxu0 %v3547_v56  ;;  %v3104_v56 = vld [vmem:[%s6474_s1 + $0x878] sm:$0xff]  ;;  %v3189_v2 = vld [vmem:[%s6474_s1 + $0xac0] sm:$0xff] }
  0x79   : > { %3592 = vmatpush1.bf16.msra.mxu1 %v3591_v57  ;;  %3550 = vmatprep.subr.bf16.mxu0 %v3549_v58  ;;  %v3567_v57 = vpack.c.bf16 %v3093_v49, %v3089_v47  ;;  %v3611_v58 = vpack.c.bf16 %v3095_v52, %v3091_v50  ;;  %v3144_v40 = vld [vmem:[%s6474_s1 + $0x958] sm:$0xff]  ;;  %v3667_v47 = vpack.c.bf16 %v3135_v1, %v3131_v0  ;;  %v3137_v50 = vld [vmem:[%s6474_s1 + $0x920] sm:$0xff]  ;;  %v3143_v52 = vld [vmem:[%s6474_s1 + $0x950] sm:$0xff] }
  0x7a   : > { %3594 = vmatprep.subr.bf16.mxu1 %v3593_v62  ;;  %v3613_v62 = vpack.c.bf16 %v3104_v56, %v3100_v55  ;;  %v3148_v55 = vld [vmem:[%s6474_s1 + $0x978] sm:$0xff]  ;;  %v3671_v61 = vpack.c.bf16 %v3143_v52, %v3139_v39  ;;  %v3174_v0 = vld [vmem:[%s6474_s1 + $0xa48] sm:$0xff]  ;;  %v3181_v52 = vld [vmem:[%s6474_s1 + $0xa80] sm:$0xff] }
  0x7b   : > { %v3152_v56 = vld [vmem:[%s6474_s1 + $0x998] sm:$0xff] }
  0x7c   : > { %3552 = vmatpush1.bf16.msra.mxu0 %v3551_v6  ;;  %v3106_v6 = vld [vmem:[%s6474_s1 + $0x888] sm:$0xf]  ;;  %v3673_v4 = vpack.c.bf16 %v3152_v56, %v3148_v55  ;;  %v3183_v55 = vld [vmem:[%s6474_s1 + $0xa90] sm:$0xff] }
  0x7d   : > { %3596 = vmatpush1.bf16.msra.mxu1 %v3595_v7  ;;  %3554 = vmatprep.subr.bf16.mxu0 %v3553_v9  ;;  %v3108_v7 = vld [vmem:[%s6474_s1 + $0x898] sm:$0xf]  ;;  %v3122_v9 = vld [vmem:[%s6474_s1 + $0x8a8] sm:$0xff] }
  0x7e   : > { %3598 = vmatprep.subr.bf16.mxu1 %v3597_v13  ;;  %v3128_v13 = vld [vmem:[%s6474_s1 + $0x8d8] sm:$0xff]  ;;  %v3186_v56 = vld [vmem:[%s6474_s1 + $0xaa8] sm:$0xff] }
  0x7f   : > { %v3661_v22 = vpack.c.bf16 %v3128_v13, %v3124_v12  ;;  %v5245_v12 = vld [vmem:[%s4405_s17 + $0x18] sm:$0xff] }
  0x80   : > { %3556 = vmatpush1.bf16.msra.mxu0 %v3555_v20  ;;  %v3617_v20 = vpack.c.bf16 %v3126_v10, %v3122_v9  ;;  %v3156_v9 = vld [vmem:[%s6474_s1 + $0x9b8] sm:$0xff]  ;;  %v1343_v13 = vrot.slane %v5245_v12, 3 }
  0x81   : > { %3600 = vmatpush1.bf16.msra.mxu1 %v3599_v48  ;;  %3558 = vmatprep.subr.bf16.mxu0 %v3557_v21  ;;  %v3130_v48 = vld [vmem:[%s6474_s1 + $0x8e8] sm:$0xff]  ;;  %v3160_v10 = vld [vmem:[%s6474_s1 + $0x9d8] sm:$0xff] }
  0x82   : > { %3602 = vmatprep.subr.bf16.mxu1 %v3601_v24  ;;  %v3134_v21 = vld [vmem:[%s6474_s1 + $0x908] sm:$0xff]  ;;  %v3136_v24 = vld [vmem:[%s6474_s1 + $0x918] sm:$0xff] }
  0x83   : > { %v3665_v35 = vpack.c.bf16 %v3136_v24, %v3132_v23  ;;  %v3168_v23 = vld [vmem:[%s6474_s1 + $0xa18] sm:$0xff] }
  0x84   : > { %3560 = vmatpush1.bf16.msra.mxu0 %v3559_v30  ;;  %v906_v30 = vld [vmem:[%s4405_s17 + $0x38] sm:$0xf] }
  0x85   : > { %3604 = vmatpush1.bf16.msra.mxu1 %v3603_v31  ;;  %3562 = vmatprep.subr.bf16.mxu0 %v3561_v32  ;;  %v3663_v31 = vpack.c.bf16 %v3127_v8, %v3123_v18  ;;  %v3621_v32 = vpack.c.bf16 %v3134_v21, %v3130_v48  ;;  %v5182_v42 = vrot.slane %v906_v30, 2  ;;  %v3157_v18 = vld [vmem:[%s6474_s1 + $0x9c0] sm:$0xff]  ;;  %v3677_v8 = vpack.c.bf16 %v3160_v10, %v3156_v9  ;;  %v3159_v48 = vld [vmem:[%s6474_s1 + $0x9d0] sm:$0xff]  ;;  %v3162_v21 = vld [vmem:[%s6474_s1 + $0x9e8] sm:$0xff] }
  0x86   : > { %3606 = vmatprep.subr.bf16.mxu1 %v3605_v36  ;;  %v3138_v36 = vld [vmem:[%s6474_s1 + $0x928] sm:$0xff]  ;;  %v3163_v30 = vld [vmem:[%s6474_s1 + $0x9f0] sm:$0xff]  ;;  %v3196_v9 = vld [vmem:[%s6474_s1 + $0xaf8] sm:$0xff] }
  0x87   : > { %v3625_v49 = vpack.c.bf16 %v3142_v37, %v3138_v36  ;;  %v3200_v10 = vld [vmem:[%s6474_s1 + $0xb18] sm:$0xff] }
  0x88   : > { %3564 = vmatpush1.bf16.msra.mxu0 %v3563_v43  ;;  %v3623_v43 = vpack.c.bf16 %v3133_v33, %v3129_v28  ;;  %v3161_v28 = vld [vmem:[%s6474_s1 + $0x9e0] sm:$0xff]  ;;  %v3170_v33 = vld [vmem:[%s6474_s1 + $0xa28] sm:$0xff] }
  0x89   : > { %3608 = vmatpush1.bf16.msra.mxu1 %v3607_v45  ;;  %3566 = vmatprep.subr.bf16.mxu0 %v3565_v46  ;;  %v1012_v45 = vsel %vm1004_vm3, %v1006_v15, %v1011_v29  ;;  %v5185_v46 = vrot.slane %v905_v34, 2  ;;  %v3172_v34 = vld [vmem:[%s6474_s1 + $0xa38] sm:$0xff]  ;;  %v3641_v37 = vpack.c.bf16 %v3174_v0, %v3170_v33  ;;  %v3210_v0 = vld [vmem:[%s6474_s1 + $0xb68] sm:$0xf] }
  0x8a   : > { %3610 = vmatprep.subr.bf16.mxu1 %v3609_v51  ;;  %v3669_v51 = vpack.c.bf16 %v3144_v40, %v3140_v38  ;;  %v3169_v38 = vld [vmem:[%s6474_s1 + $0xa20] sm:$0xff] }
  0x8b   : > { %v3173_v40 = vld [vmem:[%s6474_s1 + $0xa40] sm:$0xff] }
  0x8c   : > { %3568 = vmatpush1.bf16.msra.mxu0 %v3567_v57  ;;  %v1018_v57 = vsel %vm1004_vm3, %v1013_v25, %v5182_v42  ;;  %v3635_v25 = vpack.c.bf16 %v3157_v18, %v3153_v17  ;;  %v3197_v17 = vld [vmem:[%s6474_s1 + $0xb00] sm:$0xff]  ;;  %v3195_v18 = vld [vmem:[%s6474_s1 + $0xaf0] sm:$0xff] }
  0x8d   : > { %3612 = vmatpush1.bf16.msra.mxu1 %v3611_v58  ;;  %3570 = vmatprep.subr.bf16.mxu0 %v3569_v59  ;;  %v3627_v58 = vpack.c.bf16 %v3141_v44, %v3137_v50  ;;  %v1016_v59 = vsel %vm1004_vm3, %v1011_v29, %v5185_v46  ;;  %v3165_v29 = vld [vmem:[%s6474_s1 + $0xa00] sm:$0xff]  ;;  %v3643_v50 = vpack.c.bf16 %v3173_v40, %v3169_v38  ;;  %v3232_v38 = vld [vmem:[%s6474_s1 + $0xbb8] sm:$0xff] }
  0x8e   : > { %3614 = vmatprep.subr.bf16.mxu1 %v3613_v62  ;;  %v3629_v62 = vpack.c.bf16 %v3150_v54, %v3146_v53  ;;  %v3639_v1 = vpack.c.bf16 %v3165_v29, %v3161_v28  ;;  %v3179_v53 = vld [vmem:[%s6474_s1 + $0xa70] sm:$0xff] }
  0x8f   : > { %v3203_v29 = vld [vmem:[%s6474_s1 + $0xb30] sm:$0xff] }
  0x90   : > { %3572 = vmatpush1.bf16.msra.mxu0 %v3571_v3  ;;  %v3147_v3 = vld [vmem:[%s6474_s1 + $0x970] sm:$0xff] }
  0x91   : > { %3616 = vmatpush1.bf16.msra.mxu1 %v3615_v5  ;;  %3109 = vmatprep.subr.msk.mxu0 %vm512_vm2, %v3106_v6  ;;  %v3151_v5 = vld [vmem:[%s6474_s1 + $0x990] sm:$0xff]  ;;  %v3154_v6 = vld [vmem:[%s6474_s1 + $0x9a8] sm:$0xff] }
  0x92   : > { %3115 = vmatprep.subr.msk.mxu1 %vm512_vm2, %v3108_v7  ;;  %v3158_v7 = vld [vmem:[%s6474_s1 + $0x9c8] sm:$0xff]  ;;  %v3675_v15 = vpack.c.bf16 %v3151_v5, %v3147_v3  ;;  %v3187_v3 = vld [vmem:[%s6474_s1 + $0xab0] sm:$0xff] }
  0x93   : > { %v3633_v16 = vpack.c.bf16 %v3158_v7, %v3154_v6  ;;  %v3191_v5 = vld [vmem:[%s6474_s1 + $0xad0] sm:$0xff]  ;;  %v3194_v6 = vld [vmem:[%s6474_s1 + $0xae8] sm:$0xff] }
  0x94   : > { %3110 = vmatpush1.msk.msra.mxu0 %vm512_vm2, %v3105_v11  ;;  %v1342_v11 = vrot.slane %v1238_v60, 3  ;;  %v3198_v7 = vld [vmem:[%s6474_s1 + $0xb08] sm:$0xff] }
  0x95   : > { %3116 = vmatpush1.msk.msra.mxu1 %vm512_vm2, %v3107_v19  ;;  %3618 = vmatprep.subr.bf16.mxu0 %v3617_v20  ;;  %v3155_v20 = vld [vmem:[%s6474_s1 + $0x9b0] sm:$0xff]  ;;  %v3166_v19 = vld [vmem:[%s6474_s1 + $0xa08] sm:$0xff] }
  0x96   : > { %3662 = vmatprep.subr.bf16.mxu1 %v3661_v22  ;;  %1108 = vmatmul.mubr.f32.vlgmr.msra.gmra.mrb[0].mxu0 %v1007_v26  ;;  %v3164_v22 = vld [vmem:[%s6474_s1 + $0x9f8] sm:$0xff]  ;;  %v1344_v24 = vsel %vm1338_vm4, %v1342_v11, %v1343_v13  ;;  %v3651_v11 = vpack.c.bf16 %v3189_v2, %v3185_v63  ;;  %v3237_v2 = vld [vmem:[%s6474_s1 + $0xbe0] sm:$0xff] }
  0x97   : > { %1197 = vmatmul.mubr.f32.vlgmr.msra.gmra.mrb[0].mxu1 %v1007_v26  ;;  %3620 = vmatpush1.bf16.msra.mxu0 %v3619_v27  ;;  %v3679_v26 = vpack.c.bf16 %v3159_v48, %v3155_v20  ;;  %v3637_v27 = vpack.c.bf16 %v3166_v19, %v3162_v21  ;;  %v3697_v20 = vpack.c.bf16 %v3200_v10, %v3196_v9  ;;  %v3202_v48 = vld [vmem:[%s6474_s1 + $0xb28] sm:$0xff]  ;;  %v3204_v19 = vld [vmem:[%s6474_s1 + $0xb38] sm:$0xff] }
  0x98   : > { %3664 = vmatpush1.bf16.msra.mxu1 %v3663_v31  ;;  %3622 = vmatprep.subr.bf16.mxu0 %v3621_v32  ;;  %v3681_v31 = vpack.c.bf16 %v3168_v23, %v3164_v22  ;;  %v3167_v32 = vld [vmem:[%s6474_s1 + $0xa10] sm:$0xff]  ;;  %v3206_v21 = vld [vmem:[%s6474_s1 + $0xb48] sm:$0xff]  ;;  %v3208_v22 = vld [vmem:[%s6474_s1 + $0xb58] sm:$0xff] }
  0x99   : > { %3666 = vmatprep.subr.bf16.mxu1 %v3665_v35  ;;  %3112 = vmatprep.mubr.msk.f32.mxu0 %vm503_vm1, %v1014_v41  ;;  %v3176_v35 = vld [vmem:[%s6474_s1 + $0xa58] sm:$0xff]  ;;  %v3683_v36 = vpack.c.bf16 %v3167_v32, %v3163_v30  ;;  %v3701_v28 = vpack.c.bf16 %v3208_v22, %v3204_v19  ;;  %v3207_v30 = vld [vmem:[%s6474_s1 + $0xb50] sm:$0xff]  ;;  %v1237_v32 = vld [vmem:[%s4405_s17] sm:$0xf8] }
  0x9a   : > { %3118 = vmatprep.mubr.msk.f32.mxu1 %vm503_vm1, %v1014_v41  ;;  %1114 = vmatmul.mubr.f32.gmra.mrb[2].mxu0 %v1012_v45  ;;  %v3171_v41 = vld [vmem:[%s6474_s1 + $0xa30] sm:$0xff]  ;;  %v3703_v33 = vpack.c.bf16 %v3207_v30, %v3203_v29  ;;  %v1339_v40 = vrot.slane %v1237_v32, 3  ;;  %v3246_v9 = vld [vmem:[%s6474_s1 + $0xc28] sm:$0xff]  ;;  %v3244_v10 = vld [vmem:[%s6474_s1 + $0xc18] sm:$0xff] }
  0x9b   : > { %3624 = vmatpush1.bf16.msra.mxu0 %v3623_v43  ;;  %1203 = vmatmul.mubr.f32.gmra.mrb[2].mxu1 %v1012_v45  ;;  %v3175_v43 = vld [vmem:[%s6474_s1 + $0xa50] sm:$0xff]  ;;  %v3178_v45 = vld [vmem:[%s6474_s1 + $0xa68] sm:$0xff] }
  0x9c   : > { %3668 = vmatpush1.bf16.msra.mxu1 %v3667_v47  ;;  %3626 = vmatprep.subr.bf16.mxu0 %v3625_v49  ;;  %v3180_v47 = vld [vmem:[%s6474_s1 + $0xa78] sm:$0xff]  ;;  %v3687_v44 = vpack.c.bf16 %v3175_v43, %v3171_v41  ;;  %v5438_v41 = vld [vmem:[%s4405_s17 + $0x10] sm:$0xff]  ;;  %v3225_v43 = vld [vmem:[%s6474_s1 + $0xb80] sm:$0xff] }
  0x9d   : > { %3670 = vmatprep.subr.bf16.mxu1 %v3669_v51  ;;  %3113 = vmatprep.mubr.msk.f32.mxu0 %vm503_vm1, %v1018_v57  ;;  %v3184_v49 = vld [vmem:[%s6474_s1 + $0xa98] sm:$0xff]  ;;  %v3177_v51 = vld [vmem:[%s6474_s1 + $0xa60] sm:$0xff]  ;;  %v3247_v22 = vld [vmem:[%s6474_s1 + $0xc30] sm:$0xff] }
  0x9e   : > { %3119 = vmatprep.mubr.msk.f32.mxu1 %vm503_vm1, %v1018_v57  ;;  %1120 = vmatmul.mubr.f32.gmra.mrb[4].mxu0 %v1016_v59  ;;  %v3689_v54 = vpack.c.bf16 %v3184_v49, %v3180_v47  ;;  %v3190_v57 = vld [vmem:[%s6474_s1 + $0xac8] sm:$0xff]  ;;  %v3647_v60 = vpack.c.bf16 %v3181_v52, %v3177_v51  ;;  %v3231_v49 = vld [vmem:[%s6474_s1 + $0xbb0] sm:$0xff]  ;;  %v3236_v52 = vld [vmem:[%s6474_s1 + $0xbd8] sm:$0xff] }
  0x9f   : > { %3628 = vmatpush1.bf16.msra.mxu0 %v3627_v58  ;;  %1209 = vmatmul.mubr.f32.gmra.mrb[4].mxu1 %v1016_v59  ;;  %v3188_v58 = vld [vmem:[%s6474_s1 + $0xab8] sm:$0xff]  ;;  %v1572_v30 = vld [vmem:[%s4405_s17 + $0x8] sm:$0xf0] }
  0xa0   : > { %3672 = vmatpush1.bf16.msra.mxu1 %v3671_v61  ;;  %3630 = vmatprep.subr.bf16.mxu0 %v3629_v62  ;;  %v3192_v59 = vld [vmem:[%s6474_s1 + $0xad8] sm:$0xff]  ;;  %v3691_v61 = vpack.c.bf16 %v3183_v55, %v3179_v53  ;;  %v3649_v62 = vpack.c.bf16 %v3190_v57, %v3186_v56 }
  0xa1   : > { %3674 = vmatprep.subr.bf16.mxu1 %v3673_v4  ;;  %3114 = vmatprep.mubr.msk.f32.mxu0 %vm503_vm1, %v5182_v42  ;;  %v3693_v4 = vpack.c.bf16 %v3192_v59, %v3188_v58  ;;  %v3240_v53 = vld [vmem:[%s6474_s1 + $0xbf8] sm:$0xff]  ;;  %v3233_v58 = vld [vmem:[%s6474_s1 + $0xbc0] sm:$0xff] }
  0xa2   : > { %3120 = vmatprep.mubr.msk.f32.mxu1 %vm503_vm1, %v5182_v42  ;;  %1126 = vmatmul.mubr.f32.gmra.mrb[6].mxu0 %v5185_v46  ;;  %v3685_v42 = vpack.c.bf16 %v3176_v35, %v3172_v34  ;;  %v3212_v34 = vld [vmem:[%s6474_s1 + $0xb78] sm:$0xf]  ;;  %v3226_v35 = vld [vmem:[%s6474_s1 + $0xb88] sm:$0xff]  ;;  %v5479_v59 = vld [vmem:[%s4405_s17 + $0x20] sm:$0xff] }
  0xa3   : > { %3632 = vmatpush1.bf16.msra.mxu0 %v3631_v14  ;;  %1215 = vmatmul.mubr.f32.gmra.mrb[6].mxu1 %v5185_v46  ;;  %v3182_v46 = vld [vmem:[%s6474_s1 + $0xa88] sm:$0xff]  ;;  %v3695_v14 = vpack.c.bf16 %v3191_v5, %v3187_v3  ;;  %v3235_v3 = vld [vmem:[%s6474_s1 + $0xbd0] sm:$0xff]  ;;  %v3753_v5 = vpack.c.bf16 %v3240_v53, %v3236_v52 }
  0xa4   : > { %3676 = vmatpush1.bf16.msra.mxu1 %v3675_v15  ;;  %3634 = vmatprep.subr.bf16.mxu0 %v3633_v16  ;;  %v3645_v39 = vpack.c.bf16 %v3182_v46, %v3178_v45  ;;  %v3653_v15 = vpack.c.bf16 %v3198_v7, %v3194_v6  ;;  %v3193_v16 = vld [vmem:[%s6474_s1 + $0xae0] sm:$0xff]  ;;  %v3227_v46 = vld [vmem:[%s6474_s1 + $0xb90] sm:$0xff]  ;;  %v3242_v7 = vld [vmem:[%s6474_s1 + $0xc08] sm:$0xff] }
  0xa5   : > { %3678 = vmatprep.subr.bf16.mxu1 %v3677_v8  ;;  %3215 = vmatprep.mubr.msk.f32.mxu0 %vm503_vm1, %v1344_v24  ;;  %v3199_v8 = vld [vmem:[%s6474_s1 + $0xb10] sm:$0xff]  ;;  %v3655_v23 = vpack.c.bf16 %v3197_v17, %v3193_v16  ;;  %v3229_v45 = vld [vmem:[%s6474_s1 + $0xba0] sm:$0xff]  ;;  %v3711_v16 = vpack.c.bf16 %v3237_v2, %v3233_v58  ;;  %v3266_v52 = vld [vmem:[%s6474_s1 + $0xcc8] sm:$0xff] }
  0xa6   : > { %3221 = vmatprep.mubr.msk.f32.mxu1 %vm503_vm1, %v1344_v24  ;;  %v3699_v24 = vpack.c.bf16 %v3199_v8, %v3195_v18  ;;  %v3707_v57 = vpack.c.bf16 %v3229_v45, %v3225_v43  ;;  %v3239_v6 = vld [vmem:[%s6474_s1 + $0xbf0] sm:$0xff]  ;;  %v3713_v8 = vpack.c.bf16 %v3246_v9, %v3242_v7  ;;  %v1676_v43 = vrot.slane %v5245_v12, 4  ;;  %v3270_v53 = vld [vmem:[%s6474_s1 + $0xce8] sm:$0xff]  ;;  %v3276_v7 = vld [vmem:[%s6474_s1 + $0xd18] sm:$0xff] }
  0xa7   : > { %3636 = vmatpush1.bf16.msra.mxu0 %v3635_v25  ;;  %v3657_v25 = vpack.c.bf16 %v3206_v21, %v3202_v48  ;;  %v3241_v48 = vld [vmem:[%s6474_s1 + $0xc00] sm:$0xff]  ;;  %v3243_v21 = vld [vmem:[%s6474_s1 + $0xc10] sm:$0xff]  ;;  %v3280_v9 = vld [vmem:[%s6474_s1 + $0xd38] sm:$0xff] }
  0xa8   : > { %3680 = vmatpush1.bf16.msra.mxu1 %v3679_v26  ;;  %3638 = vmatprep.subr.bf16.mxu0 %v3637_v27  ;;  %v3201_v26 = vld [vmem:[%s6474_s1 + $0xb20] sm:$0xff]  ;;  %v3267_v2 = vld [vmem:[%s6474_s1 + $0xcd0] sm:$0xff] }
  0xa9   : > { %3682 = vmatprep.subr.bf16.mxu1 %v3681_v31  ;;  %v3205_v27 = vld [vmem:[%s6474_s1 + $0xb40] sm:$0xff] }
  0xaa   : > { %v3659_v31 = vpack.c.bf16 %v3205_v27, %v3201_v26  ;;  %v3256_v26 = vld [vmem:[%s6474_s1 + $0xc78] sm:$0xff] }
  0xab   : > { %3640 = vmatpush1.bf16.msra.mxu0 %v3639_v1  ;;  %v3230_v1 = vld [vmem:[%s6474_s1 + $0xba8] sm:$0xff] }
  0xac   : > { %3684 = vmatpush1.bf16.msra.mxu1 %v3683_v36  ;;  %3642 = vmatprep.subr.bf16.mxu0 %v3641_v37  ;;  %v3209_v36 = vld [vmem:[%s6474_s1 + $0xb60] sm:$0xf]  ;;  %v3228_v37 = vld [vmem:[%s6474_s1 + $0xb98] sm:$0xff]  ;;  %v3705_v47 = vpack.c.bf16 %v3230_v1, %v3226_v35  ;;  %v3255_v1 = vld [vmem:[%s6474_s1 + $0xc70] sm:$0xff] }
  0xad   : > { %3686 = vmatprep.subr.bf16.mxu1 %v3685_v42  ;;  %v1340_v42 = vrot.slane %v5438_v41, 3  ;;  %v3749_v51 = vpack.c.bf16 %v3232_v38, %v3228_v37  ;;  %v3262_v37 = vld [vmem:[%s6474_s1 + $0xca8] sm:$0xff]  ;;  %v3260_v38 = vld [vmem:[%s6474_s1 + $0xc98] sm:$0xff] }
  0xaf   : > { %3644 = vmatpush1.bf16.msra.mxu0 %v3643_v50  ;;  %v3234_v50 = vld [vmem:[%s6474_s1 + $0xbc8] sm:$0xff]  ;;  %v1341_v56 = vsel %vm1338_vm4, %v1339_v40, %v1340_v42  ;;  %v3264_v40 = vld [vmem:[%s6474_s1 + $0xcb8] sm:$0xff] }
  0xb0   : > { %3688 = vmatpush1.bf16.msra.mxu1 %v3687_v44  ;;  %3646 = vmatprep.subr.bf16.mxu0 %v3645_v39  ;;  %v3238_v44 = vld [vmem:[%s6474_s1 + $0xbe8] sm:$0xff]  ;;  %v3211_v39 = vld [vmem:[%s6474_s1 + $0xb70] sm:$0xf] }
  0xb1   : > { %3690 = vmatprep.subr.bf16.mxu1 %v3689_v54  ;;  %v5471_v54 = vld [vmem:[%s4405_s17 + $0x28] sm:$0xff]  ;;  %v3709_v63 = vpack.c.bf16 %v3238_v44, %v3234_v50  ;;  %v3261_v50 = vld [vmem:[%s6474_s1 + $0xca0] sm:$0xff]  ;;  %v3259_v44 = vld [vmem:[%s6474_s1 + $0xc90] sm:$0xff] }
  0xb2   : > { %v1347_v55 = vrot.slane %v5471_v54, 3 }
  0xb3   : > { %3648 = vmatpush1.bf16.msra.mxu0 %v3647_v60  ;;  %v1345_v60 = vrot.slane %v5479_v59, 3 }
  0xb4   : > { %3692 = vmatpush1.bf16.msra.mxu1 %v3691_v61  ;;  %3650 = vmatprep.subr.bf16.mxu0 %v3649_v62  ;;  %v1240_v61 = vld [vmem:[%s4405_s17 + $0x38] sm:$0x1f]  ;;  %v3751_v62 = vpack.c.bf16 %v3231_v49, %v3227_v46  ;;  %v3257_v49 = vld [vmem:[%s6474_s1 + $0xc80] sm:$0xff] }
  0xb5   : > { %3694 = vmatprep.subr.bf16.mxu1 %v3693_v4  ;;  %v1239_v4 = vld [vmem:[%s4405_s17 + $0x30] sm:$0x1f]  ;;  %v1346_v17 = vsel %vm1338_vm4, %v1340_v42, %v1345_v60  ;;  %v1675_v42 = vrot.slane %v1572_v30, 4  ;;  %v3723_v58 = vpack.c.bf16 %v3261_v50, %v3257_v49  ;;  %v3294_v30 = vld [vmem:[%s6474_s1 + $0xda8] sm:$0xff] }
  0xb6   : > { %v5513_v18 = vrot.slane %v1239_v4, 3  ;;  %v3271_v4 = vld [vmem:[%s6474_s1 + $0xcf0] sm:$0xff] }
  0xb7   : > { %3652 = vmatpush1.bf16.msra.mxu0 %v3651_v11  ;;  %v3248_v11 = vld [vmem:[%s6474_s1 + $0xc38] sm:$0xff] }
  0xb8   : > { %3696 = vmatpush1.bf16.msra.mxu1 %v3695_v14  ;;  %3654 = vmatprep.subr.bf16.mxu0 %v3653_v15  ;;  %v1348_v14 = vsel %vm1338_vm4, %v1343_v13, %v1347_v55  ;;  %v5510_v15 = vrot.slane %v1240_v61, 3  ;;  %v3245_v13 = vld [vmem:[%s6474_s1 + $0xc20] sm:$0xff]  ;;  %v3757_v19 = vpack.c.bf16 %v3248_v11, %v3244_v10  ;;  %v1350_v29 = vsel %vm1338_vm4, %v1345_v60, %v5513_v18 }
  0xb9   : > { %3698 = vmatprep.subr.bf16.mxu1 %v3697_v20  ;;  %v3755_v20 = vpack.c.bf16 %v3239_v6, %v3235_v3  ;;  %v3725_v61 = vpack.c.bf16 %v3270_v53, %v3266_v52  ;;  %v3278_v6 = vld [vmem:[%s6474_s1 + $0xd28] sm:$0xff]  ;;  %v3771_v11 = vpack.c.bf16 %v3271_v4, %v3267_v2  ;;  %v3303_v53 = vld [vmem:[%s6474_s1 + $0xdf0] sm:$0xff]  ;;  %v3309_v2 = vld [vmem:[%s6474_s1 + $0xe20] sm:$0xff] }
  0xba   : > { %v1352_v27 = vsel %vm1338_vm4, %v1347_v55, %v5510_v15  ;;  %v3268_v55 = vld [vmem:[%s6474_s1 + $0xcd8] sm:$0xff]  ;;  %v3307_v4 = vld [vmem:[%s6474_s1 + $0xe10] sm:$0xff] }
  0xbb   : > { %3656 = vmatpush1.bf16.msra.mxu0 %v3655_v23  ;;  %v3250_v23 = vld [vmem:[%s6474_s1 + $0xc48] sm:$0xff] }
  0xbc   : > { %3700 = vmatpush1.bf16.msra.mxu1 %v3699_v24  ;;  %3658 = vmatprep.subr.bf16.mxu0 %v3657_v25  ;;  %v3254_v24 = vld [vmem:[%s6474_s1 + $0xc68] sm:$0xff]  ;;  %v3252_v25 = vld [vmem:[%s6474_s1 + $0xc58] sm:$0xff] }
  0xbd   : > { %3702 = vmatprep.subr.bf16.mxu1 %v3701_v28  ;;  %v3715_v28 = vpack.c.bf16 %v3245_v13, %v3241_v48  ;;  %v3717_v32 = vpack.c.bf16 %v3254_v24, %v3250_v23  ;;  %v3761_v35 = vpack.c.bf16 %v3256_v26, %v3252_v25  ;;  %v3286_v48 = vld [vmem:[%s6474_s1 + $0xd68] sm:$0xff]  ;;  %v3284_v13 = vld [vmem:[%s6474_s1 + $0xd58] sm:$0xff]  ;;  %v3281_v24 = vld [vmem:[%s6474_s1 + $0xd40] sm:$0xff] }
  0xbe   : > { %v3285_v25 = vld [vmem:[%s6474_s1 + $0xd60] sm:$0xff]  ;;  %v3283_v26 = vld [vmem:[%s6474_s1 + $0xd50] sm:$0xff] }
  0xbf   : > { %3660 = vmatpush1.bf16.msra.mxu0 %v3659_v31  ;;  %v3759_v31 = vpack.c.bf16 %v3247_v22, %v3243_v21  ;;  %v3288_v21 = vld [vmem:[%s6474_s1 + $0xd78] sm:$0xff] }
  0xc0   : > { %3704 = vmatpush1.bf16.msra.mxu1 %v3703_v33  ;;  %3213 = vmatprep.subr.msk.mxu0 %vm512_vm2, %v3210_v0  ;;  %v3249_v33 = vld [vmem:[%s6474_s1 + $0xc40] sm:$0xff] }
  0xc1   : > { %3219 = vmatprep.subr.msk.mxu1 %vm512_vm2, %v3212_v34  ;;  %v3253_v0 = vld [vmem:[%s6474_s1 + $0xc60] sm:$0xff]  ;;  %v3251_v34 = vld [vmem:[%s6474_s1 + $0xc50] sm:$0xff] }
  0xc2   : > { %v3719_v45 = vpack.c.bf16 %v3253_v0, %v3249_v33  ;;  %v3763_v46 = vpack.c.bf16 %v3255_v1, %v3251_v34  ;;  %v3735_v33 = vpack.c.bf16 %v3285_v25, %v3281_v24  ;;  %v3293_v1 = vld [vmem:[%s6474_s1 + $0xda0] sm:$0xff] }
  0xc3   : > { %3214 = vmatpush1.msk.msra.mxu0 %vm512_vm2, %v3209_v36  ;;  %v3258_v36 = vld [vmem:[%s6474_s1 + $0xc88] sm:$0xff]  ;;  %v1904_v25 = vld [vmem:[%s6475_s2] sm:$0xf] }
  0xc4   : > { %3220 = vmatpush1.msk.msra.mxu1 %vm512_vm2, %v3211_v39  ;;  %3706 = vmatprep.subr.bf16.mxu0 %v3705_v47  ;;  %v3721_v47 = vpack.c.bf16 %v3262_v37, %v3258_v36  ;;  %v3765_v39 = vpack.c.bf16 %v3264_v40, %v3260_v38  ;;  %v3291_v36 = vld [vmem:[%s6474_s1 + $0xd90] sm:$0xff]  ;;  %v3298_v40 = vld [vmem:[%s6474_s1 + $0xdc8] sm:$0xff] }
  0xc5   : > { %3750 = vmatprep.subr.bf16.mxu1 %v3749_v51  ;;  %1442 = vmatmul.mubr.f32.vlgmr.msra.gmra.mrb[0].mxu0 %v1341_v56  ;;  %v3263_v51 = vld [vmem:[%s6474_s1 + $0xcb0] sm:$0xff] }
  0xc6   : > { %1531 = vmatmul.mubr.f32.vlgmr.msra.gmra.mrb[0].mxu1 %v1341_v56  ;;  %3708 = vmatpush1.bf16.msra.mxu0 %v3707_v57  ;;  %v3272_v56 = vld [vmem:[%s6474_s1 + $0xcf8] sm:$0xff]  ;;  %v1677_v57 = vsel %vm512_vm2, %v1675_v42, %v1676_v43  ;;  %v3767_v60 = vpack.c.bf16 %v3263_v51, %v3259_v44  ;;  %v3295_v38 = vld [vmem:[%s6474_s1 + $0xdb0] sm:$0xff]  ;;  %v3302_v42 = vld [vmem:[%s6474_s1 + $0xde8] sm:$0xff] }
  0xc7   : > { %3752 = vmatpush1.bf16.msra.mxu1 %v3751_v62  ;;  %3710 = vmatprep.subr.bf16.mxu0 %v3709_v63  ;;  %v3265_v62 = vld [vmem:[%s6474_s1 + $0xcc0] sm:$0xff]  ;;  %v3769_v3 = vpack.c.bf16 %v3272_v56, %v3268_v55  ;;  %v3783_v49 = vpack.c.bf16 %v3295_v38, %v3291_v36  ;;  %v3741_v50 = vpack.c.bf16 %v3302_v42, %v3298_v40  ;;  %v3299_v51 = vld [vmem:[%s6474_s1 + $0xdd0] sm:$0xff]  ;;  %v3306_v55 = vld [vmem:[%s6474_s1 + $0xe08] sm:$0xff] }
  0xc8   : > { %3754 = vmatprep.subr.bf16.mxu1 %v3753_v5  ;;  %3216 = vmatprep.mubr.msk.f32.mxu0 %vm503_vm1, %v1348_v14  ;;  %v3269_v63 = vld [vmem:[%s6474_s1 + $0xce0] sm:$0xff]  ;;  %v3274_v5 = vld [vmem:[%s6474_s1 + $0xd08] sm:$0xff] }
  0xc9   : > { %3222 = vmatprep.mubr.msk.f32.mxu1 %vm503_vm1, %v1348_v14  ;;  %1448 = vmatmul.mubr.f32.gmra.mrb[2].mxu0 %v1346_v17  ;;  %v3727_v10 = vpack.c.bf16 %v3269_v63, %v3265_v62  ;;  %v3729_v14 = vpack.c.bf16 %v3278_v6, %v3274_v5  ;;  %v3297_v44 = vld [vmem:[%s6474_s1 + $0xdc0] sm:$0xff]  ;;  %v3310_v56 = vld [vmem:[%s6474_s1 + $0xe28] sm:$0xff]  ;;  %v3311_v5 = vld [vmem:[%s6474_s1 + $0xe30] sm:$0xff] }
  0xca   : > { %3712 = vmatpush1.bf16.msra.mxu0 %v3711_v16  ;;  %1537 = vmatmul.mubr.f32.gmra.mrb[2].mxu1 %v1346_v17  ;;  %v3277_v16 = vld [vmem:[%s6474_s1 + $0xd20] sm:$0xff]  ;;  %v3275_v17 = vld [vmem:[%s6474_s1 + $0xd10] sm:$0xff]  ;;  %v3745_v62 = vpack.c.bf16 %v3310_v56, %v3306_v55 }
  0xcb   : > { %3756 = vmatpush1.bf16.msra.mxu1 %v3755_v20  ;;  %3714 = vmatprep.subr.bf16.mxu0 %v3713_v8  ;;  %v3279_v20 = vld [vmem:[%s6474_s1 + $0xd30] sm:$0xff]  ;;  %v3282_v8 = vld [vmem:[%s6474_s1 + $0xd48] sm:$0xff]  ;;  %v3305_v63 = vld [vmem:[%s6474_s1 + $0xe00] sm:$0xff] }
  0xcc   : > { %3758 = vmatprep.subr.bf16.mxu1 %v3757_v19  ;;  %3217 = vmatprep.mubr.msk.f32.mxu0 %vm503_vm1, %v1352_v27  ;;  %v3775_v22 = vpack.c.bf16 %v3279_v20, %v3275_v17  ;;  %v3733_v23 = vpack.c.bf16 %v3286_v48, %v3282_v8  ;;  %v1571_v6 = vld [vmem:[%s4405_s17] sm:$0xf0]  ;;  %v1574_v17 = vld [vmem:[%s4405_s17 + $0x38] sm:$0x3f]  ;;  %v1678_v8 = vrot.slane %v5479_v59, 4 }
  0xcd   : > { %3223 = vmatprep.mubr.msk.f32.mxu1 %vm503_vm1, %v1352_v27  ;;  %1454 = vmatmul.mubr.f32.gmra.mrb[4].mxu0 %v1350_v29  ;;  %v3777_v27 = vpack.c.bf16 %v3288_v21, %v3284_v13  ;;  %v1684_v48 = vrot.slane %v1574_v17, 4  ;;  %v1573_v13 = vld [vmem:[%s4405_s17 + $0x30] sm:$0x3f] }
  0xce   : > { %3716 = vmatpush1.bf16.msra.mxu0 %v3715_v28  ;;  %1543 = vmatmul.mubr.f32.gmra.mrb[4].mxu1 %v1350_v29  ;;  %v3287_v28 = vld [vmem:[%s6474_s1 + $0xd70] sm:$0xff]  ;;  %v3290_v29 = vld [vmem:[%s6474_s1 + $0xd88] sm:$0xff] }
  0xcf   : > { %3760 = vmatpush1.bf16.msra.mxu1 %v3759_v31  ;;  %3718 = vmatprep.subr.bf16.mxu0 %v3717_v32  ;;  %v3292_v31 = vld [vmem:[%s6474_s1 + $0xd98] sm:$0xff]  ;;  %v3779_v0 = vpack.c.bf16 %v3287_v28, %v3283_v26  ;;  %v3737_v34 = vpack.c.bf16 %v3294_v30, %v3290_v29 }
  0xd0   : > { %3762 = vmatprep.subr.bf16.mxu1 %v3761_v35  ;;  %3218 = vmatprep.mubr.msk.f32.mxu0 %vm503_vm1, %v5510_v15  ;;  %v3296_v32 = vld [vmem:[%s6474_s1 + $0xdb8] sm:$0xff]  ;;  %v3289_v35 = vld [vmem:[%s6474_s1 + $0xd80] sm:$0xff] }
  0xd1   : > { %3224 = vmatprep.mubr.msk.f32.mxu1 %vm503_vm1, %v5510_v15  ;;  %1460 = vmatmul.mubr.f32.gmra.mrb[6].mxu0 %v5513_v18  ;;  %v3273_v15 = vld [vmem:[%s6474_s1 + $0xd00] sm:$0xff]  ;;  %v3781_v37 = vpack.c.bf16 %v3296_v32, %v3292_v31 }
  0xd2   : > { %3720 = vmatpush1.bf16.msra.mxu0 %v3719_v45  ;;  %1549 = vmatmul.mubr.f32.gmra.mrb[6].mxu1 %v5513_v18  ;;  %v3773_v18 = vpack.c.bf16 %v3280_v9, %v3276_v7  ;;  %v3731_v19 = vpack.c.bf16 %v3277_v16, %v3273_v15  ;;  %v3300_v45 = vld [vmem:[%s6474_s1 + $0xdd8] sm:$0xff]  ;;  %v3747_v7 = vpack.c.bf16 %v3309_v2, %v3305_v63  ;;  %v1680_v16 = vrot.slane %v5471_v54, 4 }
  0xd3   : > { %3764 = vmatpush1.bf16.msra.mxu1 %v3763_v46  ;;  %3722 = vmatprep.subr.bf16.mxu0 %v3721_v47  ;;  %v3304_v46 = vld [vmem:[%s6474_s1 + $0xdf8] sm:$0xff]  ;;  %v3739_v47 = vpack.c.bf16 %v3293_v1, %v3289_v35  ;;  %v3791_v9 = vpack.c.bf16 %v3311_v5, %v3307_v4 }
  0xd4   : > { %3766 = vmatprep.subr.bf16.mxu1 %v3765_v39  ;;  %3319 = vmatprep.mubr.msk.f32.mxu0 %vm503_vm1, %v1677_v57  ;;  %v3301_v39 = vld [vmem:[%s6474_s1 + $0xde0] sm:$0xff]  ;;  %v3785_v52 = vpack.c.bf16 %v3304_v46, %v3300_v45  ;;  %v3316_v15 = vld [vmem:[%s6474_s1 + $0xe58] sm:$0xf]  ;;  %v1681_v54 = vsel %vm512_vm2, %v1676_v43, %v1680_v16  ;;  %v1685_v59 = vsel %vm512_vm2, %v1680_v16, %v1684_v48  ;;  %v4135_v43 = vmov 0.0  }
  0xd5   : > { %3325 = vmatprep.mubr.msk.f32.mxu1 %vm503_vm1, %v1677_v57  ;;  %v3308_v57 = vld [vmem:[%s6474_s1 + $0xe18] sm:$0xff] }
  0xd6   : > { %3724 = vmatpush1.bf16.msra.mxu0 %v3723_v58  ;;  %v3312_v58 = vld [vmem:[%s6474_s1 + $0xe38] sm:$0xff] }
  0xd7   : > { %3768 = vmatpush1.bf16.msra.mxu1 %v3767_v60  ;;  %3726 = vmatprep.subr.bf16.mxu0 %v3725_v61  ;;  %v3743_v60 = vpack.c.bf16 %v3301_v39, %v3297_v44  ;;  %v3787_v61 = vpack.c.bf16 %v3303_v53, %v3299_v51 }
  0xd8   : > { %3770 = vmatprep.subr.bf16.mxu1 %v3769_v3  ;;  %v3789_v3 = vpack.c.bf16 %v3312_v58, %v3308_v57 }
  0xda   : > { %3728 = vmatpush1.bf16.msra.mxu0 %v3727_v10  ;;  %v3314_v10 = vld [vmem:[%s6474_s1 + $0xe48] sm:$0xf] }
  0xdb   : > { %3772 = vmatpush1.bf16.msra.mxu1 %v3771_v11  ;;  %3730 = vmatprep.subr.bf16.mxu0 %v3729_v14  ;;  %v1672_v11 = vrot.slane %v1571_v6, 4  ;;  %v1673_v14 = vrot.slane %v5438_v41, 4  ;;  %v3315_v41 = vld [vmem:[%s6474_s1 + $0xe50] sm:$0xf] }
  0xdc   : > { %3774 = vmatprep.subr.bf16.mxu1 %v3773_v18  ;;  %v3313_v18 = vld [vmem:[%s6474_s1 + $0xe40] sm:$0xf] }
  0xdd   : > { %v1674_v20 = vsel %vm512_vm2, %v1672_v11, %v1673_v14  ;;  %v1679_v21 = vsel %vm512_vm2, %v1673_v14, %v1678_v8 }
  0xde   : > { %3732 = vmatpush1.bf16.msra.mxu0 %v3731_v19  ;;  %v1682_v19 = vrot.slane %v1573_v13, 4 }
  0xdf   : > { %3776 = vmatpush1.bf16.msra.mxu1 %v3775_v22  ;;  %3734 = vmatprep.subr.bf16.mxu0 %v3733_v23  ;;  %v1906_v22 = vlaneseq }
  0xe0   : > { %3778 = vmatprep.subr.bf16.mxu1 %v3777_v27  ;;  %v1683_v12 = vsel %vm512_vm2, %v1678_v8, %v1682_v19 }
  0xe1   : > { %v1907_v23 = vshrl.u32 %v1906_v22, 7 }
  0xe2   : > { %3736 = vmatpush1.bf16.msra.mxu0 %v3735_v33 }
  0xe3   : > { %3780 = vmatpush1.bf16.msra.mxu1 %v3779_v0  ;;  %3738 = vmatprep.subr.bf16.mxu0 %v3737_v34  ;;  %v1908_v24 = vsub.s32 0, %v1907_v23  ;;  %v1916_v26 = vsub.s32 2, %v1907_v23  ;;  %v1912_v27 = vsub.s32 1, %v1907_v23  ;;  %v1920_v28 = vsub.s32 3, %v1907_v23 }
  0xe4   : > { %3782 = vmatprep.subr.bf16.mxu1 %v3781_v37 }
  0xe5   : > { %v1909_v29 = vrot.slane %v1904_v25, %v1908_v24  ;;  %v1917_v31 = vrot.slane %v1904_v25, %v1916_v26  ;;  %v1913_v32 = vrot.slane %v1904_v25, %v1912_v27  ;;  %v1921_v34 = vrot.slane %v1904_v25, %v1920_v28  ;;  %v1958_v27 = vld [vmem:[%s6476_s3] sm:$0xff]  ;;  %v2305_v28 = vld [vmem:[%s6478_s5 + $0x8] sm:$0xff] }
  0xe6   : > { %3740 = vmatpush1.bf16.msra.mxu0 %v3739_v47 }
  0xe7   : > { %3784 = vmatpush1.bf16.msra.mxu1 %v3783_v49  ;;  %3742 = vmatprep.subr.bf16.mxu0 %v3741_v50 }
  0xe8   : > { %3786 = vmatprep.subr.bf16.mxu1 %v3785_v52 }
  0xea   : > { %3744 = vmatpush1.bf16.msra.mxu0 %v3743_v60 }
  0xeb   : > { %3788 = vmatpush1.bf16.msra.mxu1 %v3787_v61  ;;  %3746 = vmatprep.subr.bf16.mxu0 %v3745_v62 }
  0xec   : > { %3790 = vmatprep.subr.bf16.mxu1 %v3789_v3 }
  0xee   : > { %3748 = vmatpush1.bf16.msra.mxu0 %v3747_v7 }
  0xef   : > { %3792 = vmatpush1.bf16.msra.mxu1 %v3791_v9  ;;  %3317 = vmatprep.subr.msk.mxu0 %vm512_vm2, %v3314_v10 }
  0xf0   : > { %3323 = vmatprep.subr.msk.mxu1 %vm512_vm2, %v3316_v15 }
  0xf2   : > { %3318 = vmatpush1.msk.msra.mxu0 %vm512_vm2, %v3313_v18 }
  0xf3   : > { %3324 = vmatpush1.msk.msra.mxu1 %vm512_vm2, %v3315_v41  ;;  %1775 = vmatmul.mubr.f32.vlgmr.msra.gmra.mrb[0].mxu0 %v1674_v20 }
  0xf4   : > { %1864 = vmatmul.mubr.f32.vlgmr.msra.gmra.mrb[0].mxu1 %v1674_v20  ;;  %3320 = vmatprep.mubr.msk.f32.mxu0 %vm503_vm1, %v1681_v54 }
  0xf5   : > { %3326 = vmatprep.mubr.msk.f32.mxu1 %vm503_vm1, %v1681_v54 }
  0xf7   : > { %1781 = vmatmul.mubr.f32.gmra.mrb[2].mxu0 %v1679_v21 }
  0xf8   : > { %1870 = vmatmul.mubr.f32.gmra.mrb[2].mxu1 %v1679_v21  ;;  %3321 = vmatprep.mubr.msk.f32.mxu0 %vm503_vm1, %v1685_v59 }
  0xf9   : > { %3327 = vmatprep.mubr.msk.f32.mxu1 %vm503_vm1, %v1685_v59 }
  0xfb   : > { %1787 = vmatmul.mubr.f32.gmra.mrb[4].mxu0 %v1683_v12 }
  0xfc   : > { %1876 = vmatmul.mubr.f32.gmra.mrb[4].mxu1 %v1683_v12  ;;  %3322 = vmatprep.mubr.msk.f32.mxu0 %vm503_vm1, %v1684_v48 }
  0xfd   : > { %3328 = vmatprep.mubr.msk.f32.mxu1 %vm503_vm1, %v1684_v48 }
  0xff   : > { %1793 = vmatmul.mubr.f32.gmra.mrb[6].mxu0 %v1682_v19 }
 0x100   : > { %1882 = vmatmul.mubr.f32.gmra.mrb[6].mxu1 %v1682_v19  ;;  %2044 = vmatprep.mubr.f32.mxu0 %v4135_v43 }
 0x101   : > { %2121 = vmatprep.mubr.f32.mxu1 %v4135_v43 }
 0x1c6   : > { %v1776_v30 = vpop.f32.mrb[0].mxu0 }
 0x1c7   : > { %v1865_v33 = vpop.f32.mrb[0].mxu1  ;;  %v1778_v0 = vpop.f32.mrb[1].mxu0  ;;  %v1926_v1 = vadd.f32 %v1909_v29, %v1776_v30  ;;  %v2570_v30 = vld [vmem:[%s6479_s6 + $0x8] sm:$0xff] }
 0x1c8   : > { %v1867_v35 = vpop.f32.mrb[1].mxu1  ;;  %v1928_v36 = vadd.f32 %v1917_v31, %v1865_v33  ;;  %v1927_v37 = vadd.f32 %v1913_v32, %v1778_v0  ;;  %v2304_v0 = vld [vmem:[%s6478_s5] sm:$0xff] }
 0x1c9   : > { %v1929_v40 = vadd.f32 %v1921_v34, %v1867_v35  ;;  %v1942_v44 = vmax.f32 %v1926_v1, 0.0  ;;  %v2309_v1 = vld [vmem:[%s6478_s5 + $0x28] sm:$0xff] }
 0x1ca   : > { %v1782_v38 = vpop.f32.mrb[2].mxu0  ;;  %v1944_v52 = vmax.f32 %v1928_v36, 0.0  ;;  %v1943_v53 = vmax.f32 %v1927_v37, 0.0  ;;  %v2311_v36 = vld [vmem:[%s6478_s5 + $0x38] sm:$0xff]  ;;  %v2134_v37 = vld [vmem:[%s6477_s4] sm:$0xff] }
 0x1cb   : > { %v1930_v42 = vadd.f32 %v1909_v29, %v1782_v38  ;;  %v1871_v45 = vpop.f32.mrb[2].mxu1  ;;  %v1784_v46 = vpop.f32.mrb[3].mxu0  ;;  %v1945_v58 = vmax.f32 %v1929_v40, 0.0  ;;  %v2569_v40 = vld [vmem:[%s6479_s6] sm:$0xff] }
 0x1cc   : > { %v1932_v47 = vadd.f32 %v1917_v31, %v1871_v45  ;;  %v1931_v49 = vadd.f32 %v1913_v32, %v1784_v46  ;;  %v1873_v50 = vpop.f32.mrb[3].mxu1  ;;  %v3837_v45 = vpack.c.bf16 %v2311_v36, %v2309_v1  ;;  %v2574_v46 = vld [vmem:[%s6479_s6 + $0x28] sm:$0xff]  ;;  %v2589_v1 = vld [vmem:[%s6479_s6 + $0xa0] sm:$0xff]  ;;  %v2591_v36 = vld [vmem:[%s6479_s6 + $0xb0] sm:$0xff] }
 0x1cd   : > { %v1946_v39 = vmax.f32 %v1930_v42, 0.0  ;;  %v1933_v51 = vadd.f32 %v1921_v34, %v1873_v50  ;;  %v2571_v42 = vld [vmem:[%s6479_s6 + $0x10] sm:$0xff]  ;;  %v2576_v50 = vld [vmem:[%s6479_s6 + $0x38] sm:$0xff] }
 0x1ce   : > { %v1948_v55 = vmax.f32 %v1932_v47, 0.0  ;;  %v1947_v56 = vmax.f32 %v1931_v49, 0.0  ;;  %v1788_v57 = vpop.f32.mrb[4].mxu0  ;;  %v2308_v47 = vld [vmem:[%s6478_s5 + $0x20] sm:$0xff]  ;;  %v2310_v49 = vld [vmem:[%s6478_s5 + $0x30] sm:$0xff] }
 0x1cf   : > { %v3795_v60 = vpack.c.bf16 %v1946_v39, %v1942_v44  ;;  %v1949_v61 = vmax.f32 %v1933_v51, 0.0  ;;  %v1877_v62 = vpop.f32.mrb[4].mxu1  ;;  %v1790_v63 = vpop.f32.mrb[5].mxu0  ;;  %v1934_v6 = vadd.f32 %v1909_v29, %v1788_v57  ;;  %v2313_v44 = vld [vmem:[%s6478_s5 + $0x48] sm:$0xff]  ;;  %v2315_v39 = vld [vmem:[%s6478_s5 + $0x58] sm:$0xff]  ;;  %v3941_v57 = vpack.c.bf16 %v2576_v50, %v2574_v46 }
 0x1d0   : > { %v3805_v2 = vpack.c.bf16 %v1948_v55, %v1944_v52  ;;  %v3793_v3 = vpack.c.bf16 %v1947_v56, %v1943_v53  ;;  %v1879_v4 = vpop.f32.mrb[5].mxu1  ;;  %v1936_v7 = vadd.f32 %v1917_v31, %v1877_v62  ;;  %v1935_v9 = vadd.f32 %v1913_v32, %v1790_v63  ;;  %v2135_v51 = vld [vmem:[%s6477_s4 + $0x8] sm:$0x1f]  ;;  %v2573_v55 = vld [vmem:[%s6479_s6 + $0x20] sm:$0xff]  ;;  %v2575_v56 = vld [vmem:[%s6479_s6 + $0x30] sm:$0xff] }
 0x1d1   : > { %v3803_v5 = vpack.c.bf16 %v1949_v61, %v1945_v58  ;;  %v1937_v11 = vadd.f32 %v1921_v34, %v1879_v4  ;;  %v1950_v20 = vmax.f32 %v1934_v6, 0.0  ;;  %v3939_v52 = vpack.c.bf16 %v2571_v42, %v2569_v40  ;;  %v2312_v61 = vld [vmem:[%s6478_s5 + $0x40] sm:$0xff]  ;;  %v2314_v62 = vld [vmem:[%s6478_s5 + $0x50] sm:$0xff]  ;;  %v2580_v63 = vld [vmem:[%s6479_s6 + $0x58] sm:$0xff] }
 0x1d2   : > { %v1794_v10 = vpop.f32.mrb[6].mxu0  ;;  %3794 = vmatprep.subr.bf16.mxu0 %v3793_v3  ;;  %v1952_v48 = vmax.f32 %v1936_v7, 0.0  ;;  %v1951_v13 = vmax.f32 %v1935_v9, 0.0  ;;  %v3839_v53 = vpack.c.bf16 %v2310_v49, %v2308_v47  ;;  %v3841_v58 = vpack.c.bf16 %v2315_v39, %v2313_v44  ;;  %v2577_v6 = vld [vmem:[%s6479_s6 + $0x40] sm:$0xff]  ;;  %v2579_v7 = vld [vmem:[%s6479_s6 + $0x50] sm:$0xff]  ;;  %v2594_v40 = vld [vmem:[%s6479_s6 + $0xc8] sm:$0xff] }
 0x1d3   : > { %v1938_v14 = vadd.f32 %v1909_v29, %v1794_v10  ;;  %v1883_v15 = vpop.f32.mrb[6].mxu1  ;;  %3804 = vmatprep.subr.bf16.mxu1 %v3803_v5  ;;  %v1796_v16 = vpop.f32.mrb[7].mxu0  ;;  %3796 = vmatpush1.bf16.msra.mxu0 %v3795_v60  ;;  %v1953_v59 = vmax.f32 %v1937_v11, 0.0  ;;  %v2307_v29 = vld [vmem:[%s6478_s5 + $0x18] sm:$0xff]  ;;  %v3943_v4 = vpack.c.bf16 %v2575_v56, %v2573_v55  ;;  %v2316_v11 = vld [vmem:[%s6478_s5 + $0x60] sm:$0xff]  ;;  %v2333_v47 = vld [vmem:[%s6478_s5 + $0xe8] sm:$0xff]  ;;  %v3959_v50 = vpack.c.bf16 %v2591_v36, %v2589_v1 }
 0x1d4   : > { %v1940_v17 = vadd.f32 %v1917_v31, %v1883_v15  ;;  %v1939_v18 = vadd.f32 %v1913_v32, %v1796_v16  ;;  %v1885_v41 = vpop.f32.mrb[7].mxu1  ;;  %3806 = vmatpush1.bf16.msra.mxu1 %v3805_v2  ;;  %v2572_v31 = vld [vmem:[%s6479_s6 + $0x18] sm:$0xff]  ;;  %v1959_v32 = vld [vmem:[%s6476_s3 + $0x8] sm:$0x1f]  ;;  %v3833_v33 = vpack.c.bf16 %v2307_v29, %v2305_v28  ;;  %v2328_v42 = vld [vmem:[%s6478_s5 + $0xc0] sm:$0xff] }
 0x1d5   : > { %v1954_v8 = vmax.f32 %v1938_v14, 0.0  ;;  %v1941_v54 = vadd.f32 %v1921_v34, %v1885_v41  ;;  %v2306_v34 = vld [vmem:[%s6478_s5 + $0x10] sm:$0xff]  ;;  %v3937_v35 = vpack.c.bf16 %v2572_v31, %v2570_v30  ;;  %v2584_v15 = vld [vmem:[%s6479_s6 + $0x78] sm:$0xff]  ;;  %v2321_v16 = vld [vmem:[%s6478_s5 + $0x88] sm:$0xff] }
 0x1d6   : > { %v1956_v21 = vmax.f32 %v1940_v17, 0.0  ;;  %v1955_v19 = vmax.f32 %v1939_v18, 0.0  ;;  %v3835_v38 = vpack.c.bf16 %v2306_v34, %v2304_v0  ;;  %v2318_v14 = vld [vmem:[%s6478_s5 + $0x70] sm:$0xff]  ;;  %v2323_v17 = vld [vmem:[%s6478_s5 + $0x98] sm:$0xff]  ;;  %v3947_v18 = vpack.c.bf16 %v2579_v7, %v2577_v6  ;;  %v2590_v29 = vld [vmem:[%s6479_s6 + $0xa8] sm:$0xff] }
 0x1d7   : > { %v3800_v12 = vpack.c.bf16 %v1954_v8, %v1950_v20  ;;  %v1957_v22 = vmax.f32 %v1941_v54, 0.0  ;;  %v3847_v41 = vpack.c.bf16 %v2318_v14, %v2316_v11  ;;  %v2581_v20 = vld [vmem:[%s6479_s6 + $0x60] sm:$0xff]  ;;  %v2583_v8 = vld [vmem:[%s6479_s6 + $0x70] sm:$0xff]  ;;  %v2331_v0 = vld [vmem:[%s6478_s5 + $0xd8] sm:$0xff] }
 0x1d8   : > { %v3810_v24 = vpack.c.bf16 %v1956_v21, %v1952_v48  ;;  %v3797_v25 = vpack.c.bf16 %v1955_v19, %v1951_v13  ;;  %v3849_v48 = vpack.c.bf16 %v2323_v17, %v2321_v16  ;;  %v2586_v13 = vld [vmem:[%s6479_s6 + $0x88] sm:$0xff]  ;;  %v2320_v21 = vld [vmem:[%s6478_s5 + $0x80] sm:$0xff]  ;;  %v2322_v19 = vld [vmem:[%s6478_s5 + $0x90] sm:$0xff]  ;;  %v3951_v23 = vpack.c.bf16 %v2583_v8, %v2581_v20 }
 0x1d9   : > { %v3807_v26 = vpack.c.bf16 %v1957_v22, %v1953_v59  ;;  %v2588_v59 = vld [vmem:[%s6479_s6 + $0x98] sm:$0xff]  ;;  %v2324_v30 = vld [vmem:[%s6478_s5 + $0xa0] sm:$0xff]  ;;  %v2326_v31 = vld [vmem:[%s6478_s5 + $0xb0] sm:$0xff] }
 0x1da   : > { %3799 = vmatprep.subr.msk.bf16.mxu0 %vm5780_vm7, %v3797_v25  ;;  %v2327_v22 = vld [vmem:[%s6478_s5 + $0xb8] sm:$0xff]  ;;  %v2593_v39 = vld [vmem:[%s6479_s6 + $0xc0] sm:$0xff]  ;;  %v2598_v55 = vld [vmem:[%s6479_s6 + $0xe8] sm:$0xff] }
 0x1db   : > { %3809 = vmatprep.subr.msk.bf16.mxu1 %vm5780_vm7, %v3807_v26  ;;  %3802 = vmatpush1.bf16.msk.msra.mxu0 %vm5780_vm7, %v3800_v12  ;;  %v2596_v46 = vld [vmem:[%s6479_s6 + $0xd8] sm:$0xff]  ;;  %v2332_v56 = vld [vmem:[%s6478_s5 + $0xe0] sm:$0xff]  ;;  %v2602_v6 = vld [vmem:[%s6479_s6 + $0x108] sm:$0xff] }
 0x1dc   : > { %3812 = vmatpush1.bf16.msk.msra.mxu1 %vm5780_vm7, %v3810_v24  ;;  %3814 = vmatprep.subr.bf16.mxu0 %v3793_v3  ;;  %v2319_v3 = vld [vmem:[%s6478_s5 + $0x78] sm:$0xff]  ;;  %v2336_v7 = vld [vmem:[%s6478_s5 + $0x100] sm:$0xff]  ;;  %v2603_v17 = vld [vmem:[%s6479_s6 + $0x110] sm:$0xff] }
 0x1dd   : > { %3824 = vmatprep.subr.bf16.mxu1 %v3803_v5  ;;  %v3843_v5 = vpack.c.bf16 %v2314_v62, %v2312_v61  ;;  %v2335_v49 = vld [vmem:[%s6478_s5 + $0xf8] sm:$0xff]  ;;  %v2601_v16 = vld [vmem:[%s6479_s6 + $0x100] sm:$0xff]  ;;  %v2606_v20 = vld [vmem:[%s6479_s6 + $0x128] sm:$0xff] }
 0x1de   : > { %3331 = vmatmul.mubr.msk.f32.vlgmr.msra.gmra.mrb[8].mxu0 %vm1960_vm8, %v1958_v27  ;;  %v2339_v61 = vld [vmem:[%s6478_s5 + $0x118] sm:$0xff]  ;;  %v2340_v8 = vld [vmem:[%s6478_s5 + $0x120] sm:$0xff]  ;;  %v2614_v1 = vld [vmem:[%s6479_s6 + $0x168] sm:$0xff] }
 0x1df   : > { %3335 = vmatmul.mubr.msk.f32.vlgmr.msra.gmra.mrb[8].mxu1 %vm1960_vm8, %v1958_v27  ;;  %3816 = vmatpush1.bf16.msra.mxu0 %v3795_v60  ;;  %v2578_v60 = vld [vmem:[%s6479_s6 + $0x48] sm:$0xff]  ;;  %v3953_v27 = vpack.c.bf16 %v2588_v59, %v2586_v13  ;;  %v2343_v11 = vld [vmem:[%s6478_s5 + $0x138] sm:$0xff]  ;;  %v2348_v36 = vld [vmem:[%s6478_s5 + $0x160] sm:$0xff] }
 0x1e0   : > { %3826 = vmatpush1.bf16.msra.mxu1 %v3805_v2  ;;  %3819 = vmatprep.subr.msk.bf16.mxu0 %vm5780_vm7, %v3797_v25  ;;  %v2317_v2 = vld [vmem:[%s6478_s5 + $0x68] sm:$0xff]  ;;  %v3945_v9 = vpack.c.bf16 %v2580_v63, %v2578_v60  ;;  %v2585_v25 = vld [vmem:[%s6479_s6 + $0x80] sm:$0xff] }
 0x1e1   : > { %3829 = vmatprep.subr.msk.bf16.mxu1 %vm5780_vm7, %v3807_v26  ;;  %2050 = vmatprep.mubr.f32.mxu0 %v4135_v43  ;;  %v3845_v10 = vpack.c.bf16 %v2319_v3, %v2317_v2  ;;  %v2587_v26 = vld [vmem:[%s6479_s6 + $0x90] sm:$0xff]  ;;  %v2337_v60 = vld [vmem:[%s6478_s5 + $0x108] sm:$0xff]  ;;  %v2597_v2 = vld [vmem:[%s6479_s6 + $0xe0] sm:$0xff] }
 0x1e2   : > { %3332 = vmatmul.mubr.msk.f32.gmra.mrb[10].mxu0 %vm1960_vm8, %v1959_v32  ;;  %2127 = vmatprep.mubr.f32.mxu1 %v4135_v43  ;;  %v3955_v34 = vpack.c.bf16 %v2587_v26, %v2585_v25  ;;  %v2599_v3 = vld [vmem:[%s6479_s6 + $0xf0] sm:$0xff]  ;;  %v2345_v13 = vld [vmem:[%s6478_s5 + $0x148] sm:$0xff]  ;;  %v2344_v26 = vld [vmem:[%s6478_s5 + $0x140] sm:$0xff] }
 0x1e3   : > { %3822 = vmatpush1.bf16.msk.msra.mxu0 %vm5780_vm7, %v3800_v12  ;;  %2206 = vmatprep.mubr.f32.mxu0 %v4135_v43  ;;  %v2325_v12 = vld [vmem:[%s6478_s5 + $0xa8] sm:$0xff]  ;;  %v3967_v14 = vpack.c.bf16 %v2599_v3, %v2597_v2  ;;  %v2356_v2 = vld [vmem:[%s6478_s5 + $0x1a0] sm:$0xff]  ;;  %v2358_v3 = vld [vmem:[%s6478_s5 + $0x1b0] sm:$0xff] }
 0x1e4   : > { %3832 = vmatpush1.bf16.msk.msra.mxu1 %vm5780_vm7, %v3810_v24  ;;  %3834 = vmatprep.subr.bf16.mxu0 %v3833_v33  ;;  %v3851_v24 = vpack.c.bf16 %v2322_v19, %v2320_v21  ;;  %v3853_v28 = vpack.c.bf16 %v2327_v22, %v2325_v12  ;;  %v2329_v33 = vld [vmem:[%s6478_s5 + $0xc8] sm:$0xff]  ;;  %v2347_v21 = vld [vmem:[%s6478_s5 + $0x158] sm:$0xff]  ;;  %v3971_v19 = vpack.c.bf16 %v2603_v17, %v2601_v16  ;;  %v2605_v12 = vld [vmem:[%s6479_s6 + $0x120] sm:$0xff] }
 0x1e5   : > { %3336 = vmatmul.mubr.msk.f32.gmra.mrb[10].mxu1 %vm1960_vm8, %v1959_v32  ;;  %3938 = vmatprep.subr.bf16.mxu1 %v3937_v35  ;;  %v2592_v32 = vld [vmem:[%s6479_s6 + $0xb8] sm:$0xff]  ;;  %v3855_v35 = vpack.c.bf16 %v2326_v31, %v2324_v30  ;;  %v2607_v22 = vld [vmem:[%s6479_s6 + $0x130] sm:$0xff]  ;;  %v2610_v25 = vld [vmem:[%s6479_s6 + $0x148] sm:$0xff] }
 0x1e6   : > { %3339 = vmatmul.mubr.msk.f32.vlgmr.msra.gmra.mrb[12].mxu0 %vm1960_vm8, %v2134_v37  ;;  %2283 = vmatprep.mubr.f32.mxu1 %v4135_v43  ;;  %v2351_v30 = vld [vmem:[%s6478_s5 + $0x178] sm:$0xff]  ;;  %v3975_v31 = vpack.c.bf16 %v2607_v22, %v2605_v12  ;;  %v2626_v16 = vld [vmem:[%s6479_s6 + $0x1c8] sm:$0xff] }
 0x1e7   : > { %2212 = vmatprep.mubr.f32.mxu0 %v4135_v43  ;;  %3836 = vmatpush1.bf16.msra.mxu0 %v3835_v38  ;;  %v3857_v38 = vpack.c.bf16 %v2331_v0, %v2329_v33  ;;  %v2609_v33 = vld [vmem:[%s6479_s6 + $0x140] sm:$0xff]  ;;  %v2611_v0 = vld [vmem:[%s6479_s6 + $0x150] sm:$0xff]  ;;  %v2630_v12 = vld [vmem:[%s6479_s6 + $0x1e8] sm:$0xff] }
 0x1e8   : > { %3838 = vmatprep.subr.bf16.mxu0 %v3837_v45  ;;  %v2330_v45 = vld [vmem:[%s6478_s5 + $0xd0] sm:$0xff] }
 0x1e9   : > { %3343 = vmatmul.mubr.msk.f32.vlgmr.msra.gmra.mrb[12].mxu1 %vm1960_vm8, %v2134_v37  ;;  %v3957_v37 = vpack.c.bf16 %v2592_v32, %v2590_v29  ;;  %v3859_v44 = vpack.c.bf16 %v2330_v45, %v2328_v42  ;;  %v2349_v29 = vld [vmem:[%s6478_s5 + $0x168] sm:$0xff]  ;;  %v2355_v42 = vld [vmem:[%s6478_s5 + $0x198] sm:$0xff]  ;;  %v3979_v45 = vpack.c.bf16 %v2611_v0, %v2609_v33 }
 0x1ea   : > { %3340 = vmatmul.mubr.msk.f32.gmra.mrb[14].mxu0 %vm1960_vm8, %v2135_v51  ;;  %2289 = vmatprep.mubr.f32.mxu1 %v4135_v43  ;;  %v2582_v43 = vld [vmem:[%s6479_s6 + $0x68] sm:$0xff] }
 0x1eb   : > { %3940 = vmatpush1.bf16.msra.mxu1 %v3939_v52  ;;  %3840 = vmatpush1.bf16.msra.mxu0 %v3839_v53  ;;  %v3949_v54 = vpack.c.bf16 %v2584_v15, %v2582_v43  ;;  %v3961_v52 = vpack.c.bf16 %v2596_v46, %v2594_v40  ;;  %v3861_v53 = vpack.c.bf16 %v2335_v49, %v2333_v47  ;;  %v2341_v43 = vld [vmem:[%s6478_s5 + $0x128] sm:$0xff]  ;;  %v2613_v47 = vld [vmem:[%s6479_s6 + $0x160] sm:$0xff]  ;;  %v2615_v49 = vld [vmem:[%s6479_s6 + $0x170] sm:$0xff] }
 0x1ec   : > { %3942 = vmatprep.subr.bf16.mxu1 %v3941_v57  ;;  %3842 = vmatprep.subr.bf16.mxu0 %v3841_v58  ;;  %v2334_v57 = vld [vmem:[%s6478_s5 + $0xf0] sm:$0xff]  ;;  %v2600_v58 = vld [vmem:[%s6479_s6 + $0xf8] sm:$0xff]  ;;  %v2353_v40 = vld [vmem:[%s6478_s5 + $0x188] sm:$0xff] }
 0x1ed   : > { %3344 = vmatmul.mubr.msk.f32.gmra.mrb[14].mxu1 %vm1960_vm8, %v2135_v51  ;;  %v2595_v51 = vld [vmem:[%s6479_s6 + $0xd0] sm:$0xff]  ;;  %v3863_v63 = vpack.c.bf16 %v2334_v57, %v2332_v56  ;;  %v2359_v56 = vld [vmem:[%s6478_s5 + $0x1b8] sm:$0xff]  ;;  %v3983_v57 = vpack.c.bf16 %v2615_v49, %v2613_v47  ;;  %v2634_v33 = vld [vmem:[%s6479_s6 + $0x208] sm:$0xff] }
 0x1ee   : > { %v3963_v62 = vpack.c.bf16 %v2595_v51, %v2593_v39  ;;  %v2618_v39 = vld [vmem:[%s6479_s6 + $0x188] sm:$0xff]  ;;  %v2352_v51 = vld [vmem:[%s6478_s5 + $0x180] sm:$0xff]  ;;  %v2635_v49 = vld [vmem:[%s6479_s6 + $0x210] sm:$0xff] }
 0x1ef   : > { %3944 = vmatpush1.bf16.msra.mxu1 %v3943_v4  ;;  %3844 = vmatpush1.bf16.msra.mxu0 %v3843_v5  ;;  %v3965_v4 = vpack.c.bf16 %v2600_v58, %v2598_v55  ;;  %v3865_v5 = vpack.c.bf16 %v2339_v61, %v2337_v60  ;;  %v2357_v55 = vld [vmem:[%s6478_s5 + $0x1a8] sm:$0xff]  ;;  %v2617_v60 = vld [vmem:[%s6479_s6 + $0x180] sm:$0xff] }
 0x1f0   : > { %3946 = vmatprep.subr.bf16.mxu1 %v3945_v9  ;;  %3846 = vmatprep.subr.bf16.mxu0 %v3845_v10  ;;  %v2338_v9 = vld [vmem:[%s6478_s5 + $0x110] sm:$0xff]  ;;  %v2604_v10 = vld [vmem:[%s6479_s6 + $0x118] sm:$0xff]  ;;  %v2633_v47 = vld [vmem:[%s6479_s6 + $0x200] sm:$0xff] }
 0x1f1   : > { %v3867_v15 = vpack.c.bf16 %v2338_v9, %v2336_v7  ;;  %v3887_v7 = vpack.c.bf16 %v2358_v3, %v2356_v2 }
 0x1f3   : > { %3948 = vmatpush1.bf16.msra.mxu1 %v3947_v18  ;;  %3848 = vmatpush1.bf16.msra.mxu0 %v3847_v41  ;;  %v3969_v18 = vpack.c.bf16 %v2604_v10, %v2602_v6  ;;  %v3869_v41 = vpack.c.bf16 %v2343_v11, %v2341_v43  ;;  %v2621_v10 = vld [vmem:[%s6479_s6 + $0x1a0] sm:$0xff]  ;;  %v2623_v43 = vld [vmem:[%s6479_s6 + $0x1b0] sm:$0xff] }
 0x1f4   : > { %3950 = vmatprep.subr.bf16.mxu1 %v3949_v54  ;;  %3850 = vmatprep.subr.bf16.mxu0 %v3849_v48  ;;  %v2342_v54 = vld [vmem:[%s6478_s5 + $0x130] sm:$0xff]  ;;  %v2608_v48 = vld [vmem:[%s6479_s6 + $0x138] sm:$0xff]  ;;  %v3991_v11 = vpack.c.bf16 %v2623_v43, %v2621_v10  ;;  %v2642_v43 = vld [vmem:[%s6479_s6 + $0x248] sm:$0xff] }
 0x1f5   : > { %v3871_v59 = vpack.c.bf16 %v2342_v54, %v2340_v8  ;;  %v2379_v10 = vld [vmem:[%s6478_s5 + $0x258] sm:$0xff] }
 0x1f7   : > { %3952 = vmatpush1.bf16.msra.mxu1 %v3951_v23  ;;  %3852 = vmatpush1.bf16.msra.mxu0 %v3851_v24  ;;  %v3973_v23 = vpack.c.bf16 %v2608_v48, %v2606_v20  ;;  %v3873_v24 = vpack.c.bf16 %v2347_v21, %v2345_v13  ;;  %v2362_v20 = vld [vmem:[%s6478_s5 + $0x1d0] sm:$0xff]  ;;  %v2625_v48 = vld [vmem:[%s6479_s6 + $0x1c0] sm:$0xff] }
 0x1f8   : > { %3954 = vmatprep.subr.bf16.mxu1 %v3953_v27  ;;  %3854 = vmatprep.subr.bf16.mxu0 %v3853_v28  ;;  %v2346_v27 = vld [vmem:[%s6478_s5 + $0x150] sm:$0xff]  ;;  %v2612_v28 = vld [vmem:[%s6479_s6 + $0x158] sm:$0xff] }
 0x1f9   : > { %v3875_v32 = vpack.c.bf16 %v2346_v27, %v2344_v26  ;;  %v2627_v13 = vld [vmem:[%s6479_s6 + $0x1d0] sm:$0xff] }
 0x1fa   : > { %v3995_v21 = vpack.c.bf16 %v2627_v13, %v2625_v48  ;;  %v2378_v48 = vld [vmem:[%s6478_s5 + $0x250] sm:$0xff] }
 0x1fb   : > { %3956 = vmatpush1.bf16.msra.mxu1 %v3955_v34  ;;  %3856 = vmatpush1.bf16.msra.mxu0 %v3855_v35  ;;  %v3977_v34 = vpack.c.bf16 %v2612_v28, %v2610_v25  ;;  %v3877_v35 = vpack.c.bf16 %v2351_v30, %v2349_v29  ;;  %v2366_v25 = vld [vmem:[%s6478_s5 + $0x1f0] sm:$0xff]  ;;  %v2629_v28 = vld [vmem:[%s6479_s6 + $0x1e0] sm:$0xff] }
 0x1fc   : > { %3958 = vmatprep.subr.bf16.mxu1 %v3957_v37  ;;  %3858 = vmatprep.subr.bf16.mxu0 %v3857_v38  ;;  %v2350_v37 = vld [vmem:[%s6478_s5 + $0x170] sm:$0xff]  ;;  %v2616_v38 = vld [vmem:[%s6479_s6 + $0x178] sm:$0xff] }
 0x1fd   : > { %v3879_v46 = vpack.c.bf16 %v2350_v37, %v2348_v36  ;;  %v2631_v29 = vld [vmem:[%s6479_s6 + $0x1f0] sm:$0xff] }
 0x1fe   : > { %v3999_v30 = vpack.c.bf16 %v2631_v29, %v2629_v28 }
 0x1ff   : > { %3960 = vmatpush1.bf16.msra.mxu1 %v3959_v50  ;;  %3860 = vmatpush1.bf16.msra.mxu0 %v3859_v44  ;;  %v3981_v50 = vpack.c.bf16 %v2616_v38, %v2614_v1  ;;  %v3881_v44 = vpack.c.bf16 %v2355_v42, %v2353_v40 }
 0x200   : > { %3962 = vmatprep.subr.bf16.mxu1 %v3961_v52  ;;  %3862 = vmatprep.subr.bf16.mxu0 %v3861_v53  ;;  %v2354_v52 = vld [vmem:[%s6478_s5 + $0x190] sm:$0xff]  ;;  %v2620_v53 = vld [vmem:[%s6479_s6 + $0x198] sm:$0xff] }
 0x201   : > { %v3883_v58 = vpack.c.bf16 %v2354_v52, %v2352_v51  ;;  %v3985_v61 = vpack.c.bf16 %v2620_v53, %v2618_v39  ;;  %v2375_v51 = vld [vmem:[%s6478_s5 + $0x238] sm:$0xff]  ;;  %v2638_v52 = vld [vmem:[%s6479_s6 + $0x228] sm:$0xff] }
 0x202   : > { %v2640_v53 = vld [vmem:[%s6479_s6 + $0x238] sm:$0xff] }
 0x203   : > { %3964 = vmatpush1.bf16.msra.mxu1 %v3963_v62  ;;  %3864 = vmatpush1.bf16.msra.mxu0 %v3863_v63  ;;  %v2619_v62 = vld [vmem:[%s6479_s6 + $0x190] sm:$0xff]  ;;  %v3885_v63 = vpack.c.bf16 %v2359_v56, %v2357_v55  ;;  %v4005_v3 = vpack.c.bf16 %v2640_v53, %v2638_v52  ;;  %v2654_v52 = vld [vmem:[%s6479_s6 + $0x2a8] sm:$0xff]  ;;  %v2656_v53 = vld [vmem:[%s6479_s6 + $0x2b8] sm:$0xff] }
 0x204   : > { %3966 = vmatprep.subr.bf16.mxu1 %v3965_v4  ;;  %3866 = vmatprep.subr.bf16.mxu0 %v3865_v5  ;;  %v2622_v4 = vld [vmem:[%s6479_s6 + $0x1a8] sm:$0xff]  ;;  %v2624_v5 = vld [vmem:[%s6479_s6 + $0x1b8] sm:$0xff]  ;;  %v3987_v6 = vpack.c.bf16 %v2619_v62, %v2617_v60  ;;  %v2372_v62 = vld [vmem:[%s6478_s5 + $0x220] sm:$0xff] }
 0x205   : > { %v3989_v9 = vpack.c.bf16 %v2624_v5, %v2622_v4  ;;  %v2637_v4 = vld [vmem:[%s6479_s6 + $0x220] sm:$0xff]  ;;  %v2639_v5 = vld [vmem:[%s6479_s6 + $0x230] sm:$0xff] }
 0x207   : > { %3968 = vmatpush1.bf16.msra.mxu1 %v3967_v14  ;;  %3868 = vmatpush1.bf16.msra.mxu0 %v3867_v15  ;;  %v2361_v14 = vld [vmem:[%s6478_s5 + $0x1c8] sm:$0xff]  ;;  %v2363_v15 = vld [vmem:[%s6478_s5 + $0x1d8] sm:$0xff] }
 0x208   : > { %3970 = vmatprep.subr.bf16.mxu1 %v3969_v18  ;;  %3870 = vmatprep.subr.bf16.mxu0 %v3869_v41  ;;  %v3889_v17 = vpack.c.bf16 %v2363_v15, %v2361_v14  ;;  %v2628_v18 = vld [vmem:[%s6479_s6 + $0x1d8] sm:$0xff]  ;;  %v2360_v41 = vld [vmem:[%s6478_s5 + $0x1c0] sm:$0xff] }
 0x209   : > { %v3993_v8 = vpack.c.bf16 %v2628_v18, %v2626_v16  ;;  %v3891_v54 = vpack.c.bf16 %v2362_v20, %v2360_v41 }
 0x20b   : > { %3972 = vmatpush1.bf16.msra.mxu1 %v3971_v19  ;;  %3872 = vmatpush1.bf16.msra.mxu0 %v3871_v59  ;;  %v2365_v19 = vld [vmem:[%s6478_s5 + $0x1e8] sm:$0xff]  ;;  %v2367_v59 = vld [vmem:[%s6478_s5 + $0x1f8] sm:$0xff] }
 0x20c   : > { %3974 = vmatprep.subr.bf16.mxu1 %v3973_v23  ;;  %3874 = vmatprep.subr.bf16.mxu0 %v3873_v24  ;;  %v3893_v22 = vpack.c.bf16 %v2367_v59, %v2365_v19  ;;  %v2632_v23 = vld [vmem:[%s6479_s6 + $0x1f8] sm:$0xff]  ;;  %v2364_v24 = vld [vmem:[%s6478_s5 + $0x1e0] sm:$0xff]  ;;  %v2643_v59 = vld [vmem:[%s6479_s6 + $0x250] sm:$0xff] }
 0x20d   : > { %v3997_v26 = vpack.c.bf16 %v2632_v23, %v2630_v12  ;;  %v3895_v27 = vpack.c.bf16 %v2366_v25, %v2364_v24  ;;  %v2641_v19 = vld [vmem:[%s6479_s6 + $0x240] sm:$0xff]  ;;  %v2381_v12 = vld [vmem:[%s6478_s5 + $0x268] sm:$0xff]  ;;  %v2383_v23 = vld [vmem:[%s6478_s5 + $0x278] sm:$0xff] }
 0x20e   : > { %v2646_v24 = vld [vmem:[%s6479_s6 + $0x268] sm:$0xff]  ;;  %v2648_v25 = vld [vmem:[%s6479_s6 + $0x278] sm:$0xff] }
 0x20f   : > { %3976 = vmatpush1.bf16.msra.mxu1 %v3975_v31  ;;  %3876 = vmatpush1.bf16.msra.mxu0 %v3875_v32  ;;  %v2369_v31 = vld [vmem:[%s6478_s5 + $0x208] sm:$0xff]  ;;  %v2371_v32 = vld [vmem:[%s6478_s5 + $0x218] sm:$0xff] }
 0x210   : > { %3978 = vmatprep.subr.bf16.mxu1 %v3977_v34  ;;  %3878 = vmatprep.subr.bf16.mxu0 %v3877_v35  ;;  %v3897_v0 = vpack.c.bf16 %v2371_v32, %v2369_v31  ;;  %v2636_v34 = vld [vmem:[%s6479_s6 + $0x218] sm:$0xff]  ;;  %v2380_v31 = vld [vmem:[%s6478_s5 + $0x260] sm:$0xff]  ;;  %v2382_v32 = vld [vmem:[%s6478_s5 + $0x270] sm:$0xff] }
 0x211   : > { %v4001_v35 = vpack.c.bf16 %v2636_v34, %v2634_v33  ;;  %v3909_v33 = vpack.c.bf16 %v2383_v23, %v2381_v12  ;;  %v2645_v34 = vld [vmem:[%s6479_s6 + $0x260] sm:$0xff]  ;;  %v2663_v12 = vld [vmem:[%s6479_s6 + $0x2f0] sm:$0xff]  ;;  %v2403_v23 = vld [vmem:[%s6478_s5 + $0x318] sm:$0xff] }
 0x213   : > { %3980 = vmatpush1.bf16.msra.mxu1 %v3979_v45  ;;  %3880 = vmatpush1.bf16.msra.mxu0 %v3879_v46  ;;  %v2368_v45 = vld [vmem:[%s6478_s5 + $0x200] sm:$0xff]  ;;  %v2370_v46 = vld [vmem:[%s6478_s5 + $0x210] sm:$0xff] }
 0x214   : > { %3982 = vmatprep.subr.bf16.mxu1 %v3981_v50  ;;  %3882 = vmatprep.subr.bf16.mxu0 %v3881_v44  ;;  %v2373_v50 = vld [vmem:[%s6478_s5 + $0x228] sm:$0xff]  ;;  %v3899_v60 = vpack.c.bf16 %v2370_v46, %v2368_v45  ;;  %v2384_v45 = vld [vmem:[%s6478_s5 + $0x280] sm:$0xff]  ;;  %v2386_v46 = vld [vmem:[%s6478_s5 + $0x290] sm:$0xff] }
 0x215   : > { %v3901_v2 = vpack.c.bf16 %v2375_v51, %v2373_v50  ;;  %v2649_v50 = vld [vmem:[%s6479_s6 + $0x280] sm:$0xff]  ;;  %v2391_v51 = vld [vmem:[%s6478_s5 + $0x2b8] sm:$0xff] }
 0x217   : > { %3984 = vmatpush1.bf16.msra.mxu1 %v3983_v57  ;;  %3884 = vmatpush1.bf16.msra.mxu0 %v3883_v58 }
 0x218   : > { %3986 = vmatprep.subr.bf16.mxu1 %v3985_v61  ;;  %3886 = vmatprep.subr.bf16.mxu0 %v3885_v63  ;;  %v4003_v61 = vpack.c.bf16 %v2635_v49, %v2633_v47  ;;  %v2374_v63 = vld [vmem:[%s6478_s5 + $0x230] sm:$0xff] }
 0x219   : > { %v3903_v20 = vpack.c.bf16 %v2374_v63, %v2372_v62  ;;  %v2653_v62 = vld [vmem:[%s6479_s6 + $0x2a0] sm:$0xff]  ;;  %v2655_v63 = vld [vmem:[%s6479_s6 + $0x2b0] sm:$0xff] }
 0x21b   : > { %3988 = vmatpush1.bf16.msra.mxu1 %v3987_v6  ;;  %3888 = vmatpush1.bf16.msra.mxu0 %v3887_v7  ;;  %v2377_v6 = vld [vmem:[%s6478_s5 + $0x248] sm:$0xff] }
 0x21c   : > { %3990 = vmatprep.subr.bf16.mxu1 %v3989_v9  ;;  %3890 = vmatprep.subr.bf16.mxu0 %v3889_v17  ;;  %v3905_v13 = vpack.c.bf16 %v2379_v10, %v2377_v6  ;;  %v2394_v10 = vld [vmem:[%s6478_s5 + $0x2d0] sm:$0xff] }
 0x21f   : > { %3992 = vmatpush1.bf16.msra.mxu1 %v3991_v11  ;;  %3892 = vmatpush1.bf16.msra.mxu0 %v3891_v54  ;;  %v2644_v11 = vld [vmem:[%s6479_s6 + $0x258] sm:$0xff]  ;;  %v2376_v54 = vld [vmem:[%s6478_s5 + $0x240] sm:$0xff] }
 0x220   : > { %3994 = vmatprep.subr.bf16.mxu1 %v3993_v8  ;;  %3894 = vmatprep.subr.bf16.mxu0 %v3893_v22  ;;  %v4007_v8 = vpack.c.bf16 %v2639_v5, %v2637_v4  ;;  %v3907_v29 = vpack.c.bf16 %v2378_v48, %v2376_v54  ;;  %v2658_v4 = vld [vmem:[%s6479_s6 + $0x2c8] sm:$0xff]  ;;  %v2660_v5 = vld [vmem:[%s6479_s6 + $0x2d8] sm:$0xff]  ;;  %v2396_v48 = vld [vmem:[%s6478_s5 + $0x2e0] sm:$0xff] }
 0x223   : > { %3996 = vmatpush1.bf16.msra.mxu1 %v3995_v21  ;;  %3896 = vmatpush1.bf16.msra.mxu0 %v3895_v27  ;;  %v4009_v21 = vpack.c.bf16 %v2644_v11, %v2642_v43  ;;  %v4025_v11 = vpack.c.bf16 %v2660_v5, %v2658_v4 }
 0x224   : > { %3998 = vmatprep.subr.bf16.mxu1 %v3997_v26  ;;  %3898 = vmatprep.subr.bf16.mxu0 %v3897_v0  ;;  %v4013_v0 = vpack.c.bf16 %v2648_v25, %v2646_v24  ;;  %v2666_v24 = vld [vmem:[%s6479_s6 + $0x308] sm:$0xff]  ;;  %v2668_v25 = vld [vmem:[%s6479_s6 + $0x318] sm:$0xff] }
 0x227   : > { %4000 = vmatpush1.bf16.msra.mxu1 %v3999_v30  ;;  %v4011_v30 = vpack.c.bf16 %v2643_v59, %v2641_v19  ;;  %v2661_v59 = vld [vmem:[%s6479_s6 + $0x2e0] sm:$0xff] }
 0x228   : > { %4002 = vmatprep.subr.bf16.mxu1 %v4001_v35  ;;  %v2647_v35 = vld [vmem:[%s6479_s6 + $0x270] sm:$0xff] }
 0x2b1   : > { %v2046_v1 = vpop.f32.mrb[8].mxu0 }
 0x2b2   : > { %v2048_v36 = vpop.f32.mrb[9].mxu0  ;;  %v2123_v37 = vpop.f32.mrb[8].mxu1 }
 0x2b3   : > { %v2125_v38 = vpop.f32.mrb[9].mxu1 }
 0x2b5   : > { %v2052_v40 = vpop.f32.mrb[10].mxu0 }
 0x2b6   : > { %v2054_v42 = vpop.f32.mrb[11].mxu0 }
 0x2b8   : > { %v2129_v44 = vpop.f32.mrb[10].mxu1 }
 0x2b9   : > { %v2208_v39 = vpop.f32.mrb[12].mxu0  ;;  %v2131_v55 = vpop.f32.mrb[11].mxu1 }
 0x2ba   : > { %v2296_v56 = vmax.f32 %v2046_v1, %v2208_v39  ;;  %v2210_v57 = vpop.f32.mrb[13].mxu0  ;;  %v2385_v1 = vld [vmem:[%s6478_s5 + $0x288] sm:$0xff] }
 0x2bb   : > { %v2297_v58 = vmax.f32 %v2048_v36, %v2210_v57  ;;  %v2387_v36 = vld [vmem:[%s6478_s5 + $0x298] sm:$0xff]  ;;  %v2389_v39 = vld [vmem:[%s6478_s5 + $0x2a8] sm:$0xff]  ;;  %v2388_v57 = vld [vmem:[%s6478_s5 + $0x2a0] sm:$0xff] }
 0x2bc   : > { %v2285_v7 = vpop.f32.mrb[12].mxu1  ;;  %v3913_v47 = vpack.c.bf16 %v2387_v36, %v2385_v1  ;;  %v2407_v1 = vld [vmem:[%s6478_s5 + $0x338] sm:$0xff]  ;;  %v2670_v36 = vld [vmem:[%s6479_s6 + $0x328] sm:$0xff] }
 0x2bd   : > { %v2214_v9 = vpop.f32.mrb[14].mxu0  ;;  %2479 = vmatprep.mubr.f32.mxu0 %v2297_v58  ;;  %2737 = vmatprep.mubr.f32.mxu1 %v2297_v58  ;;  %v6270_v14 = vmax.f32 %v2123_v37, %v2285_v7  ;;  %v2287_v15 = vpop.f32.mrb[13].mxu1  ;;  %v2650_v37 = vld [vmem:[%s6479_s6 + $0x288] sm:$0xff]  ;;  %v2390_v58 = vld [vmem:[%s6478_s5 + $0x2b0] sm:$0xff]  ;;  %v4023_v7 = vpack.c.bf16 %v2655_v63, %v2653_v62 }
 0x2be   : > { %v2300_v16 = vmax.f32 %v2052_v40, %v2214_v9  ;;  %v2216_v17 = vpop.f32.mrb[15].mxu0  ;;  %2480 = vmatmul.mubr.f32.vlgmr.msra.gmra.mrb[16].mxu0 %v2296_v56  ;;  %2738 = vmatmul.mubr.f32.vlgmr.msra.gmra.mrb[16].mxu1 %v2296_v56  ;;  %v2299_v18 = vmax.f32 %v2125_v38, %v2287_v15  ;;  %v2652_v38 = vld [vmem:[%s6479_s6 + $0x298] sm:$0xff]  ;;  %v3911_v40 = vpack.c.bf16 %v2382_v32, %v2380_v31  ;;  %v2392_v9 = vld [vmem:[%s6478_s5 + $0x2c0] sm:$0xff]  ;;  %v2402_v31 = vld [vmem:[%s6478_s5 + $0x310] sm:$0xff] }
 0x2bf   : > { %v2301_v41 = vmax.f32 %v2054_v42, %v2216_v17  ;;  %3900 = vmatpush1.bf16.msra.mxu0 %v3899_v60  ;;  %4004 = vmatpush1.bf16.msra.mxu1 %v4003_v61  ;;  %v4015_v42 = vpack.c.bf16 %v2647_v35, %v2645_v34  ;;  %v4017_v49 = vpack.c.bf16 %v2652_v38, %v2650_v37  ;;  %v2657_v15 = vld [vmem:[%s6479_s6 + $0x2c0] sm:$0xff]  ;;  %v2397_v17 = vld [vmem:[%s6478_s5 + $0x2e8] sm:$0xff]  ;;  %v2667_v34 = vld [vmem:[%s6479_s6 + $0x310] sm:$0xff] }
 0x2c0   : > { %3902 = vmatprep.subr.bf16.mxu0 %v3901_v2  ;;  %4006 = vmatprep.subr.bf16.mxu1 %v4005_v3  ;;  %v2291_v22 = vpop.f32.mrb[14].mxu1  ;;  %v3917_v60 = vpack.c.bf16 %v2391_v51, %v2389_v39  ;;  %v4021_v61 = vpack.c.bf16 %v2656_v53, %v2654_v52  ;;  %v2393_v2 = vld [vmem:[%s6478_s5 + $0x2c8] sm:$0xff]  ;;  %v2395_v3 = vld [vmem:[%s6478_s5 + $0x2d8] sm:$0xff]  ;;  %v3919_v6 = vpack.c.bf16 %v2390_v58, %v2388_v57 }
 0x2c1   : > { %2485 = vmatprep.mubr.f32.mxu0 %v2301_v41  ;;  %2743 = vmatprep.mubr.f32.mxu1 %v2301_v41  ;;  %v6296_v26 = vmax.f32 %v2129_v44, %v2291_v22  ;;  %v2293_v27 = vpop.f32.mrb[15].mxu1  ;;  %v2651_v44 = vld [vmem:[%s6479_s6 + $0x290] sm:$0xff]  ;;  %v3921_v43 = vpack.c.bf16 %v2395_v3, %v2393_v2  ;;  %v2662_v41 = vld [vmem:[%s6479_s6 + $0x2e8] sm:$0xff]  ;;  %v2672_v37 = vld [vmem:[%s6479_s6 + $0x338] sm:$0xff] }
 0x2c2   : > { %2486 = vmatmul.mubr.f32.gmra.mrb[18].mxu0 %v2300_v16  ;;  %2744 = vmatmul.mubr.f32.gmra.mrb[18].mxu1 %v2300_v16  ;;  %v6298_v28 = vmax.f32 %v2131_v55, %v2293_v27  ;;  %v3915_v55 = vpack.c.bf16 %v2386_v46, %v2384_v45  ;;  %v4019_v56 = vpack.c.bf16 %v2651_v44, %v2649_v50  ;;  %v2659_v16 = vld [vmem:[%s6479_s6 + $0x2d0] sm:$0xff]  ;;  %v2401_v22 = vld [vmem:[%s6478_s5 + $0x308] sm:$0xff] }
 0x2c3   : > { %3904 = vmatpush1.bf16.msra.mxu0 %v3903_v20  ;;  %4008 = vmatpush1.bf16.msra.mxu1 %v4007_v8  ;;  %v2664_v20 = vld [vmem:[%s6479_s6 + $0x2f8] sm:$0xff]  ;;  %v3923_v8 = vpack.c.bf16 %v2394_v10, %v2392_v9  ;;  %v4027_v54 = vpack.c.bf16 %v2659_v16, %v2657_v15  ;;  %v3929_v32 = vpack.c.bf16 %v2403_v23, %v2401_v22  ;;  %v2405_v35 = vld [vmem:[%s6478_s5 + $0x328] sm:$0xff]  ;;  %v2671_v50 = vld [vmem:[%s6479_s6 + $0x330] sm:$0xff] }
 0x2c4   : > { %3906 = vmatprep.subr.bf16.mxu0 %v3905_v13  ;;  %4010 = vmatprep.subr.bf16.mxu1 %v4009_v21  ;;  %v2398_v13 = vld [vmem:[%s6478_s5 + $0x2f0] sm:$0xff]  ;;  %v4029_v19 = vpack.c.bf16 %v2664_v20, %v2662_v41  ;;  %v3933_v45 = vpack.c.bf16 %v2407_v1, %v2405_v35  ;;  %v4037_v46 = vpack.c.bf16 %v2672_v37, %v2670_v36 }
 0x2c5   : > { %3345 = vmatprep.mubr.msk.f32.mxu0 %vm2408_vm9, %v2299_v18  ;;  %3347 = vmatprep.mubr.msk.f32.mxu1 %vm2408_vm9, %v2299_v18  ;;  %v2399_v18 = vld [vmem:[%s6478_s5 + $0x2f8] sm:$0xff]  ;;  %v3927_v27 = vpack.c.bf16 %v2398_v13, %v2396_v48 }
 0x2c6   : > { %v3925_v21 = vpack.c.bf16 %v2399_v18, %v2397_v17 }
 0x2c7   : > { %3908 = vmatpush1.bf16.msra.mxu0 %v3907_v29  ;;  %4012 = vmatpush1.bf16.msra.mxu1 %v4011_v30  ;;  %v4031_v29 = vpack.c.bf16 %v2663_v12, %v2661_v59  ;;  %v2400_v30 = vld [vmem:[%s6478_s5 + $0x300] sm:$0xff] }
 0x2c8   : > { %3910 = vmatprep.subr.bf16.mxu0 %v3909_v33  ;;  %4014 = vmatprep.subr.bf16.mxu1 %v4013_v0  ;;  %v4033_v33 = vpack.c.bf16 %v2668_v25, %v2666_v24  ;;  %v2665_v0 = vld [vmem:[%s6479_s6 + $0x300] sm:$0xff]  ;;  %v3931_v38 = vpack.c.bf16 %v2402_v31, %v2400_v30 }
 0x2cb   : > { %3912 = vmatpush1.bf16.msra.mxu0 %v3911_v40  ;;  %4016 = vmatpush1.bf16.msra.mxu1 %v4015_v42  ;;  %v4035_v40 = vpack.c.bf16 %v2667_v34, %v2665_v0  ;;  %v2404_v42 = vld [vmem:[%s6478_s5 + $0x320] sm:$0xff] }
 0x2cc   : > { %3914 = vmatprep.subr.bf16.mxu0 %v3913_v47  ;;  %4018 = vmatprep.subr.bf16.mxu1 %v4017_v49  ;;  %v2406_v47 = vld [vmem:[%s6478_s5 + $0x330] sm:$0xff]  ;;  %v2669_v49 = vld [vmem:[%s6479_s6 + $0x320] sm:$0xff] }
 0x2cd   : > { %v3935_v44 = vpack.c.bf16 %v2406_v47, %v2404_v42  ;;  %v4039_v39 = vpack.c.bf16 %v2671_v50, %v2669_v49 }
 0x2cf   : > { %3916 = vmatpush1.bf16.msra.mxu0 %v3915_v55  ;;  %4020 = vmatpush1.bf16.msra.mxu1 %v4019_v56 }
 0x2d0   : > { %3918 = vmatprep.subr.bf16.mxu0 %v3917_v60  ;;  %4022 = vmatprep.subr.bf16.mxu1 %v4021_v61 }
 0x2d3   : > { %3920 = vmatpush1.bf16.msra.mxu0 %v3919_v6  ;;  %4024 = vmatpush1.bf16.msra.mxu1 %v4023_v7 }
 0x2d4   : > { %3922 = vmatprep.subr.bf16.mxu0 %v3921_v43  ;;  %4026 = vmatprep.subr.bf16.mxu1 %v4025_v11 }
 0x2d7   : > { %3924 = vmatpush1.bf16.msra.mxu0 %v3923_v8  ;;  %4028 = vmatpush1.bf16.msra.mxu1 %v4027_v54 }
 0x2d8   : > { %3926 = vmatprep.subr.bf16.mxu0 %v3925_v21  ;;  %4030 = vmatprep.subr.bf16.mxu1 %v4029_v19 }
 0x2db   : > { %3928 = vmatpush1.bf16.msra.mxu0 %v3927_v27  ;;  %4032 = vmatpush1.bf16.msra.mxu1 %v4031_v29 }
 0x2dc   : > { %3930 = vmatprep.subr.bf16.mxu0 %v3929_v32  ;;  %4034 = vmatprep.subr.bf16.mxu1 %v4033_v33 }
 0x2df   : > { %3932 = vmatpush1.bf16.msra.mxu0 %v3931_v38  ;;  %4036 = vmatpush1.bf16.msra.mxu1 %v4035_v40 }
 0x2e0   : > { %3934 = vmatprep.subr.bf16.mxu0 %v3933_v45  ;;  %4038 = vmatprep.subr.bf16.mxu1 %v4037_v46 }
 0x2e3   : > { %3936 = vmatpush1.bf16.msra.mxu0 %v3935_v44  ;;  %4040 = vmatpush1.bf16.msra.mxu1 %v4039_v39 }
 0x2e6   : > { %2557 = vmatmul.mubr.f32.vlgmr.msra.gmra.mrb[16].mxu0 %v6270_v14  ;;  %2815 = vmatmul.mubr.f32.vlgmr.msra.gmra.mrb[16].mxu1 %v6270_v14 }
 0x2e7   : > { %3346 = vmatprep.mubr.msk.f32.mxu0 %vm2408_vm9, %v6298_v28  ;;  %3348 = vmatprep.mubr.msk.f32.mxu1 %vm2408_vm9, %v6298_v28 }
 0x2ea   : > { %2563 = vmatmul.mubr.f32.gmra.mrb[18].mxu0 %v6296_v26  ;;  %2821 = vmatmul.mubr.f32.gmra.mrb[18].mxu1 %v6296_v26 }
 0x3b9   : > { %v2558_v51 = vpop.f32.mrb[16].mxu0  ;;  %v2816_v52 = vpop.f32.mrb[16].mxu1 }
 0x3ba   : > { %v2827_v53 = vmax.f32 %v2558_v51, %v2816_v52  ;;  %v2560_v55 = vpop.f32.mrb[17].mxu0  ;;  %v2818_v14 = vpop.f32.mrb[17].mxu1 }
 0x3bb   : > { %v2828_v56 = vmax.f32 %v2560_v55, %v2818_v14 }
 0x3bc   : > { %2831 = vst [vmem:[%s278_s30] sm:$0xff] %v2827_v53 }
 0x3bd   : > { %2833 = vst.msk [vmem:[%s278_s30 + $0x8] sm:$0xff] %vm2832_vm10, %v2828_v56  ;;  %v2564_v57 = vpop.f32.mrb[18].mxu0  ;;  %v2822_v28 = vpop.f32.mrb[18].mxu1 }
 0x3be   : > { %v2829_v58 = vmax.f32 %v2564_v57, %v2822_v28  ;;  %v2566_v60 = vpop.f32.mrb[19].mxu0  ;;  %v2824_v61 = vpop.f32.mrb[19].mxu1 }
 0x3bf   : > { %v2830_v26 = vmax.f32 %v2566_v60, %v2824_v61 }
 0x3c0   : > { %2834 = vst [vmem:[%s278_s30 + $0x10] sm:$0x1f] %v2829_v58 }
 0x3c1   : > { %2836 = vst.msk [vmem:[%s278_s30 + $0x18] sm:$0x1f] %vm2835_vm11, %v2830_v26 }
 0x3c2 PF: > { %s17_s24 = sadd.s32 1, %s4133_s24  }
 0x3c3   : > { %p14_p4 = scmp.ge.s32.totalorder %s17_s24, 4  }
 0x3c5   :  { %16 = sbr.rel (!%p14_p4) target bundleno = 1 (0x1), region = 82 }

// kernel: lenet_forward.5
= control target key start
LH: loop header
LB: loop body
LE: loop exit
PB: predicated region body
PF: predicated region fallthrough
CT: control target
= control target key end

     0   :  { %s5040_s0 = inlined_call_operand.vmem [shape: f32[2,2704], index: 0, kind: input, shape index: {}]   ;;  %s5041_s1 = inlined_call_operand.vmem [shape: f32[2704,240], index: 1, kind: input, shape index: {}]   ;;  %s5042_s2 = inlined_call_operand.vmem [shape: f32[1,240], index: 2, kind: input, shape index: {}]   ;;  %s5043_s3 = inlined_call_operand.vmem [shape: f32[240,84], index: 3, kind: input, shape index: {}]   ;;  %s5044_s4 = inlined_call_operand.vmem [shape: f32[1,84], index: 4, kind: input, shape index: {}]   ;;  %s5045_s5 = inlined_call_operand.vmem [shape: f32[84,10], index: 5, kind: input, shape index: {}]   ;;  %s5046_s6 = inlined_call_operand.vmem [shape: f32[1,10], index: 6, kind: input, shape index: {}]   ;;  %s5047_s7 = inlined_call_operand.hbm [shape: f32[2,10], index: 7, kind: output, shape index: {}]  }
   0x1   :  { %v34_v0 = vld [vmem:[%s5041_s1 + $0x8] sm:$0xff]  ;;  %v36_v1 = vld [vmem:[%s5041_s1 + $0x18] sm:$0xff]  ;;  %v33_v5 = vld [vmem:[%s5041_s1] sm:$0xff] }
   0x2   :  { %v290_v2 = vld [vmem:[%s5041_s1 + $0x808] sm:$0xff]  ;;  %v1895_v3 = vpack.c.bf16 %v36_v1, %v34_v0  ;;  %v292_v4 = vld [vmem:[%s5041_s1 + $0x818] sm:$0xff]  ;;  %v35_v6 = vld [vmem:[%s5041_s1 + $0x10] sm:$0xff] }
   0x3   :  { %v2151_v7 = vpack.c.bf16 %v292_v4, %v290_v2  ;;  %v1897_v8 = vpack.c.bf16 %v35_v6, %v33_v5  ;;  %v289_v9 = vld [vmem:[%s5041_s1 + $0x800] sm:$0xff]  ;;  %v291_v10 = vld [vmem:[%s5041_s1 + $0x810] sm:$0xff]  ;;  %v38_v11 = vld [vmem:[%s5041_s1 + $0x28] sm:$0xff] }
   0x4   :  { %1896 = vmatprep.subr.bf16.mxu1 %v1895_v3  ;;  %v2153_v12 = vpack.c.bf16 %v291_v10, %v289_v9  ;;  %v40_v13 = vld [vmem:[%s5041_s1 + $0x38] sm:$0xff]  ;;  %v294_v14 = vld [vmem:[%s5041_s1 + $0x828] sm:$0xff]  ;;  %v37_v18 = vld [vmem:[%s5041_s1 + $0x20] sm:$0xff] }
   0x5   :  { %v296_v15 = vld [vmem:[%s5041_s1 + $0x838] sm:$0xff]  ;;  %2152 = vmatprep.subr.bf16.mxu0 %v2151_v7  ;;  %1898 = vmatpush1.bf16.msra.mxu1 %v1897_v8  ;;  %v1899_v16 = vpack.c.bf16 %v40_v13, %v38_v11  ;;  %v39_v19 = vld [vmem:[%s5041_s1 + $0x30] sm:$0xff]  ;;  %v293_v20 = vld [vmem:[%s5041_s1 + $0x820] sm:$0xff] }
   0x6   :  { %v2155_v17 = vpack.c.bf16 %v296_v15, %v294_v14  ;;  %2154 = vmatpush1.bf16.msra.mxu0 %v2153_v12  ;;  %v1901_v21 = vpack.c.bf16 %v39_v19, %v37_v18  ;;  %v295_v22 = vld [vmem:[%s5041_s1 + $0x830] sm:$0xff]  ;;  %v42_v23 = vld [vmem:[%s5041_s1 + $0x48] sm:$0xff]  ;;  %v44_v24 = vld [vmem:[%s5041_s1 + $0x58] sm:$0xff] }
   0x7   :  { %1900 = vmatprep.subr.bf16.mxu1 %v1899_v16  ;;  %v2157_v25 = vpack.c.bf16 %v295_v22, %v293_v20  ;;  %v1903_v26 = vpack.c.bf16 %v44_v24, %v42_v23  ;;  %v298_v27 = vld [vmem:[%s5041_s1 + $0x848] sm:$0xff]  ;;  %v300_v28 = vld [vmem:[%s5041_s1 + $0x858] sm:$0xff]  ;;  %v41_v29 = vld [vmem:[%s5041_s1 + $0x40] sm:$0xff] }
   0x8   :  { %2156 = vmatprep.subr.bf16.mxu0 %v2155_v17  ;;  %v2159_v30 = vpack.c.bf16 %v300_v28, %v298_v27  ;;  %v43_v31 = vld [vmem:[%s5041_s1 + $0x50] sm:$0xff]  ;;  %v297_v32 = vld [vmem:[%s5041_s1 + $0x840] sm:$0xff]  ;;  %v46_v35 = vld [vmem:[%s5041_s1 + $0x68] sm:$0xff] }
   0x9   :  { %v299_v33 = vld [vmem:[%s5041_s1 + $0x850] sm:$0xff]  ;;  %1902 = vmatpush1.bf16.msra.mxu1 %v1901_v21  ;;  %v1905_v34 = vpack.c.bf16 %v43_v31, %v41_v29  ;;  %v48_v36 = vld [vmem:[%s5041_s1 + $0x78] sm:$0xff]  ;;  %v302_v37 = vld [vmem:[%s5041_s1 + $0x868] sm:$0xff] }
   0xa   :  { %2158 = vmatpush1.bf16.msra.mxu0 %v2157_v25  ;;  %1904 = vmatprep.subr.bf16.mxu1 %v1903_v26  ;;  %v2161_v38 = vpack.c.bf16 %v299_v33, %v297_v32  ;;  %v1907_v39 = vpack.c.bf16 %v48_v36, %v46_v35  ;;  %v304_v40 = vld [vmem:[%s5041_s1 + $0x878] sm:$0xff]  ;;  %v45_v41 = vld [vmem:[%s5041_s1 + $0x60] sm:$0xff]  ;;  %v47_v42 = vld [vmem:[%s5041_s1 + $0x70] sm:$0xff] }
   0xb   :  { %2160 = vmatprep.subr.bf16.mxu0 %v2159_v30  ;;  %v2163_v43 = vpack.c.bf16 %v304_v40, %v302_v37  ;;  %v301_v44 = vld [vmem:[%s5041_s1 + $0x860] sm:$0xff]  ;;  %v303_v45 = vld [vmem:[%s5041_s1 + $0x870] sm:$0xff]  ;;  %v50_v46 = vld [vmem:[%s5041_s1 + $0x88] sm:$0xff]  ;;  %v1909_v50 = vpack.c.bf16 %v47_v42, %v45_v41 }
   0xc   :  { %v52_v47 = vld [vmem:[%s5041_s1 + $0x98] sm:$0xff]  ;;  %v306_v48 = vld [vmem:[%s5041_s1 + $0x888] sm:$0xff]  ;;  %v2165_v51 = vpack.c.bf16 %v303_v45, %v301_v44  ;;  %v49_v53 = vld [vmem:[%s5041_s1 + $0x80] sm:$0xff] }
   0xd   :  { %v308_v49 = vld [vmem:[%s5041_s1 + $0x898] sm:$0xff]  ;;  %1906 = vmatpush1.bf16.msra.mxu1 %v1905_v34  ;;  %v1911_v52 = vpack.c.bf16 %v52_v47, %v50_v46  ;;  %v51_v54 = vld [vmem:[%s5041_s1 + $0x90] sm:$0xff]  ;;  %v305_v55 = vld [vmem:[%s5041_s1 + $0x880] sm:$0xff]  ;;  %v711_v46 = vlaneseq  ;;  %v2687_v47 = vmov 1983009808  }
   0xe   :  { %2162 = vmatpush1.bf16.msra.mxu0 %v2161_v38  ;;  %1908 = vmatprep.subr.bf16.mxu1 %v1907_v39  ;;  %v2167_v56 = vpack.c.bf16 %v308_v49, %v306_v48  ;;  %v307_v57 = vld [vmem:[%s5041_s1 + $0x890] sm:$0xff]  ;;  %v54_v58 = vld [vmem:[%s5041_s1 + $0xa8] sm:$0xff]  ;;  %v56_v59 = vld [vmem:[%s5041_s1 + $0xb8] sm:$0xff]  ;;  %v1913_v62 = vpack.c.bf16 %v51_v54, %v49_v53  ;;  %v729_v48 = vunpack.c.l.s4 %v2687_v47 }
   0xf   :  { %2164 = vmatprep.subr.bf16.mxu0 %v2163_v43  ;;  %v310_v60 = vld [vmem:[%s5041_s1 + $0x8a8] sm:$0xff]  ;;  %v312_v61 = vld [vmem:[%s5041_s1 + $0x8b8] sm:$0xff]  ;;  %v2169_v63 = vpack.c.bf16 %v307_v57, %v305_v55  ;;  %v1915_v0 = vpack.c.bf16 %v56_v59, %v54_v58  ;;  %v53_v1 = vld [vmem:[%s5041_s1 + $0xa0] sm:$0xff] }
  0x10   :  { %v55_v2 = vld [vmem:[%s5041_s1 + $0xb0] sm:$0xff]  ;;  %v309_v3 = vld [vmem:[%s5041_s1 + $0x8a0] sm:$0xff]  ;;  %v2171_v4 = vpack.c.bf16 %v312_v61, %v310_v60  ;;  %v58_v6 = vld [vmem:[%s5041_s1 + $0xc8] sm:$0xff]  ;;  %v2984_v61 = vshrl.u32 %v711_v46, 7 }
  0x11   :  { %1910 = vmatpush1.bf16.msra.mxu1 %v1909_v50  ;;  %v311_v5 = vld [vmem:[%s5041_s1 + $0x8b0] sm:$0xff]  ;;  %v60_v7 = vld [vmem:[%s5041_s1 + $0xd8] sm:$0xff]  ;;  %v314_v8 = vld [vmem:[%s5041_s1 + $0x8c8] sm:$0xff]  ;;  %v1917_v10 = vpack.c.bf16 %v55_v2, %v53_v1 }
  0x12   :  { %2166 = vmatpush1.bf16.msra.mxu0 %v2165_v51  ;;  %1912 = vmatprep.subr.bf16.mxu1 %v1911_v52  ;;  %v316_v9 = vld [vmem:[%s5041_s1 + $0x8d8] sm:$0xff]  ;;  %v2173_v11 = vpack.c.bf16 %v311_v5, %v309_v3  ;;  %v1919_v12 = vpack.c.bf16 %v60_v7, %v58_v6  ;;  %v57_v13 = vld [vmem:[%s5041_s1 + $0xc0] sm:$0xff]  ;;  %v59_v14 = vld [vmem:[%s5041_s1 + $0xd0] sm:$0xff] }
  0x13   :  { %2168 = vmatprep.subr.bf16.mxu0 %v2167_v56  ;;  %v313_v15 = vld [vmem:[%s5041_s1 + $0x8c0] sm:$0xff]  ;;  %v2175_v16 = vpack.c.bf16 %v316_v9, %v314_v8  ;;  %v315_v17 = vld [vmem:[%s5041_s1 + $0x8d0] sm:$0xff]  ;;  %v62_v18 = vld [vmem:[%s5041_s1 + $0xe8] sm:$0xff]  ;;  %v1921_v22 = vpack.c.bf16 %v59_v14, %v57_v13 }
  0x14   :  { %v64_v19 = vld [vmem:[%s5041_s1 + $0xf8] sm:$0xff]  ;;  %v318_v20 = vld [vmem:[%s5041_s1 + $0x8e8] sm:$0xff]  ;;  %v2177_v23 = vpack.c.bf16 %v315_v17, %v313_v15  ;;  %v61_v25 = vld [vmem:[%s5041_s1 + $0xe0] sm:$0xff] }
  0x15   :  { %1914 = vmatpush1.bf16.msra.mxu1 %v1913_v62  ;;  %v320_v21 = vld [vmem:[%s5041_s1 + $0x8f8] sm:$0xff]  ;;  %v1923_v24 = vpack.c.bf16 %v64_v19, %v62_v18  ;;  %v63_v26 = vld [vmem:[%s5041_s1 + $0xf0] sm:$0xff]  ;;  %v317_v27 = vld [vmem:[%s5041_s1 + $0x8e0] sm:$0xff]  ;;  %v730_v62 = vunpack.c.0.s8 %v729_v48 }
  0x16   :  { %2170 = vmatpush1.bf16.msra.mxu0 %v2169_v63  ;;  %1916 = vmatprep.subr.bf16.mxu1 %v1915_v0  ;;  %v2179_v28 = vpack.c.bf16 %v320_v21, %v318_v20  ;;  %v319_v29 = vld [vmem:[%s5041_s1 + $0x8f0] sm:$0xff]  ;;  %v66_v30 = vld [vmem:[%s5041_s1 + $0x108] sm:$0xff]  ;;  %v68_v31 = vld [vmem:[%s5041_s1 + $0x118] sm:$0xff]  ;;  %v1925_v34 = vpack.c.bf16 %v63_v26, %v61_v25 }
  0x17   :  { %2172 = vmatprep.subr.bf16.mxu0 %v2171_v4  ;;  %v322_v32 = vld [vmem:[%s5041_s1 + $0x908] sm:$0xff]  ;;  %v324_v33 = vld [vmem:[%s5041_s1 + $0x918] sm:$0xff]  ;;  %v2181_v35 = vpack.c.bf16 %v319_v29, %v317_v27  ;;  %v1927_v36 = vpack.c.bf16 %v68_v31, %v66_v30  ;;  %v65_v37 = vld [vmem:[%s5041_s1 + $0x100] sm:$0xff] }
  0x18   :  { %v67_v38 = vld [vmem:[%s5041_s1 + $0x110] sm:$0xff]  ;;  %v321_v39 = vld [vmem:[%s5041_s1 + $0x900] sm:$0xff]  ;;  %v2183_v40 = vpack.c.bf16 %v324_v33, %v322_v32  ;;  %v70_v42 = vld [vmem:[%s5041_s1 + $0x128] sm:$0xff] }
  0x19   :  { %1918 = vmatpush1.bf16.msra.mxu1 %v1917_v10  ;;  %v323_v41 = vld [vmem:[%s5041_s1 + $0x910] sm:$0xff]  ;;  %v72_v43 = vld [vmem:[%s5041_s1 + $0x138] sm:$0xff]  ;;  %v326_v44 = vld [vmem:[%s5041_s1 + $0x928] sm:$0xff]  ;;  %v1929_v49 = vpack.c.bf16 %v67_v38, %v65_v37 }
  0x1a   :  { %2174 = vmatpush1.bf16.msra.mxu0 %v2173_v11  ;;  %1920 = vmatprep.subr.bf16.mxu1 %v1919_v12  ;;  %v328_v45 = vld [vmem:[%s5041_s1 + $0x938] sm:$0xff]  ;;  %v2185_v50 = vpack.c.bf16 %v323_v41, %v321_v39  ;;  %v1931_v51 = vpack.c.bf16 %v72_v43, %v70_v42  ;;  %v69_v52 = vld [vmem:[%s5041_s1 + $0x120] sm:$0xff]  ;;  %v71_v53 = vld [vmem:[%s5041_s1 + $0x130] sm:$0xff]  ;;  %v3011_v11 = vsub.s32 %v730_v62, %v2984_v61 }
  0x1b   :  { %2176 = vmatprep.subr.bf16.mxu0 %v2175_v16  ;;  %v325_v54 = vld [vmem:[%s5041_s1 + $0x920] sm:$0xff]  ;;  %v2187_v55 = vpack.c.bf16 %v328_v45, %v326_v44  ;;  %v327_v56 = vld [vmem:[%s5041_s1 + $0x930] sm:$0xff]  ;;  %v74_v57 = vld [vmem:[%s5041_s1 + $0x148] sm:$0xff]  ;;  %v1933_v63 = vpack.c.bf16 %v71_v53, %v69_v52 }
  0x1c   :  { %v76_v58 = vld [vmem:[%s5041_s1 + $0x158] sm:$0xff]  ;;  %v330_v59 = vld [vmem:[%s5041_s1 + $0x948] sm:$0xff]  ;;  %v2189_v0 = vpack.c.bf16 %v327_v56, %v325_v54  ;;  %v73_v2 = vld [vmem:[%s5041_s1 + $0x140] sm:$0xff] }
  0x1d   :  { %1922 = vmatpush1.bf16.msra.mxu1 %v1921_v22  ;;  %v332_v60 = vld [vmem:[%s5041_s1 + $0x958] sm:$0xff]  ;;  %v1935_v1 = vpack.c.bf16 %v76_v58, %v74_v57  ;;  %v75_v3 = vld [vmem:[%s5041_s1 + $0x150] sm:$0xff]  ;;  %v329_v4 = vld [vmem:[%s5041_s1 + $0x940] sm:$0xff] }
  0x1e   :  { %2178 = vmatpush1.bf16.msra.mxu0 %v2177_v23  ;;  %1924 = vmatprep.subr.bf16.mxu1 %v1923_v24  ;;  %v2191_v5 = vpack.c.bf16 %v332_v60, %v330_v59  ;;  %v331_v6 = vld [vmem:[%s5041_s1 + $0x950] sm:$0xff]  ;;  %v78_v7 = vld [vmem:[%s5041_s1 + $0x168] sm:$0xff]  ;;  %v80_v8 = vld [vmem:[%s5041_s1 + $0x178] sm:$0xff]  ;;  %v1937_v12 = vpack.c.bf16 %v75_v3, %v73_v2 }
  0x1f   :  { %2180 = vmatprep.subr.bf16.mxu0 %v2179_v28  ;;  %v334_v9 = vld [vmem:[%s5041_s1 + $0x968] sm:$0xff]  ;;  %v336_v10 = vld [vmem:[%s5041_s1 + $0x978] sm:$0xff]  ;;  %v77_v13 = vld [vmem:[%s5041_s1 + $0x160] sm:$0xff]  ;;  %v2193_v14 = vpack.c.bf16 %v331_v6, %v329_v4  ;;  %v1939_v15 = vpack.c.bf16 %v80_v8, %v78_v7 }
  0x20   :  { %v79_v16 = vld [vmem:[%s5041_s1 + $0x170] sm:$0xff]  ;;  %v333_v17 = vld [vmem:[%s5041_s1 + $0x960] sm:$0xff]  ;;  %v2195_v19 = vpack.c.bf16 %v336_v10, %v334_v9  ;;  %v82_v20 = vld [vmem:[%s5041_s1 + $0x188] sm:$0xff] }
  0x21   :  { %1926 = vmatpush1.bf16.msra.mxu1 %v1925_v34  ;;  %v335_v18 = vld [vmem:[%s5041_s1 + $0x970] sm:$0xff]  ;;  %v84_v21 = vld [vmem:[%s5041_s1 + $0x198] sm:$0xff]  ;;  %v3034_v22 = vld [vmem:[%s5040_s0] sm:$0xff]  ;;  %v1941_v27 = vpack.c.bf16 %v79_v16, %v77_v13 }
  0x22   :  { %2182 = vmatpush1.bf16.msra.mxu0 %v2181_v35  ;;  %1928 = vmatprep.subr.bf16.mxu1 %v1927_v36  ;;  %v338_v23 = vld [vmem:[%s5041_s1 + $0x988] sm:$0xff]  ;;  %v340_v24 = vld [vmem:[%s5041_s1 + $0x998] sm:$0xff]  ;;  %v3044_v25 = vrot.slane %v3034_v22, %v3011_v11  ;;  %v3049_v26 = vld [vmem:[%s5040_s0 + $0x10] sm:$0xff]  ;;  %v2197_v29 = vpack.c.bf16 %v335_v18, %v333_v17  ;;  %v1943_v30 = vpack.c.bf16 %v84_v21, %v82_v20 }
  0x23   :  { %2184 = vmatprep.subr.bf16.mxu0 %v2183_v40  ;;  %v3053_v28 = vrot.slane %v3049_v26, %v3011_v11  ;;  %v81_v31 = vld [vmem:[%s5041_s1 + $0x180] sm:$0xff]  ;;  %v83_v32 = vld [vmem:[%s5041_s1 + $0x190] sm:$0xff]  ;;  %v2199_v35 = vpack.c.bf16 %v340_v24, %v338_v23  ;;  %v86_v37 = vld [vmem:[%s5041_s1 + $0x1a8] sm:$0xff] }
  0x24   :  { %v337_v33 = vld [vmem:[%s5041_s1 + $0x980] sm:$0xff]  ;;  %v742_v34 = vcombine.high %v3044_v25, %v3044_v25  ;;  %v339_v36 = vld [vmem:[%s5041_s1 + $0x990] sm:$0xff]  ;;  %v88_v38 = vld [vmem:[%s5041_s1 + $0x1b8] sm:$0xff]  ;;  %v1945_v42 = vpack.c.bf16 %v83_v32, %v81_v31 }
  0x25   :  { %1930 = vmatpush1.bf16.msra.mxu1 %v1929_v49  ;;  %v776_v39 = vcombine.high %v3053_v28, %v3053_v28  ;;  %v342_v40 = vld [vmem:[%s5041_s1 + $0x9a8] sm:$0xff]  ;;  %v344_v41 = vld [vmem:[%s5041_s1 + $0x9b8] sm:$0xff]  ;;  %v2201_v43 = vpack.c.bf16 %v339_v36, %v337_v33  ;;  %v1947_v44 = vpack.c.bf16 %v88_v38, %v86_v37  ;;  %v85_v45 = vld [vmem:[%s5041_s1 + $0x1a0] sm:$0xff] }
  0x26   :  { %2186 = vmatpush1.bf16.msra.mxu0 %v2185_v50  ;;  %1932 = vmatprep.subr.bf16.mxu1 %v1931_v51  ;;  %v87_v46 = vld [vmem:[%s5041_s1 + $0x1b0] sm:$0xff]  ;;  %v341_v47 = vld [vmem:[%s5041_s1 + $0x9a0] sm:$0xff]  ;;  %v2203_v48 = vpack.c.bf16 %v344_v41, %v342_v40  ;;  %v90_v50 = vld [vmem:[%s5041_s1 + $0x1c8] sm:$0xff] }
  0x27   :  { %2188 = vmatprep.subr.bf16.mxu0 %v2187_v55  ;;  %908 = vmatprep.mubr.f32.mxu1 %v742_v34  ;;  %v343_v49 = vld [vmem:[%s5041_s1 + $0x9b0] sm:$0xff]  ;;  %v92_v51 = vld [vmem:[%s5041_s1 + $0x1d8] sm:$0xff]  ;;  %v346_v52 = vld [vmem:[%s5041_s1 + $0x9c8] sm:$0xff]  ;;  %v1949_v54 = vpack.c.bf16 %v87_v46, %v85_v45 }
  0x28   :  { %1192 = vmatprep.mubr.f32.mxu0 %v776_v39  ;;  %v348_v53 = vld [vmem:[%s5041_s1 + $0x9d8] sm:$0xff]  ;;  %v2205_v55 = vpack.c.bf16 %v343_v49, %v341_v47  ;;  %v1951_v56 = vpack.c.bf16 %v92_v51, %v90_v50  ;;  %v89_v57 = vld [vmem:[%s5041_s1 + $0x1c0] sm:$0xff]  ;;  %v91_v58 = vld [vmem:[%s5041_s1 + $0x1d0] sm:$0xff] }
  0x29   :  { %1934 = vmatpush1.bf16.msra.mxu1 %v1933_v63  ;;  %v345_v59 = vld [vmem:[%s5041_s1 + $0x9c0] sm:$0xff]  ;;  %v2207_v60 = vpack.c.bf16 %v348_v53, %v346_v52  ;;  %v347_v62 = vld [vmem:[%s5041_s1 + $0x9d0] sm:$0xff]  ;;  %v94_v63 = vld [vmem:[%s5041_s1 + $0x1e8] sm:$0xff]  ;;  %v1953_v3 = vpack.c.bf16 %v91_v58, %v89_v57 }
  0x2a   :  { %2190 = vmatpush1.bf16.msra.mxu0 %v2189_v0  ;;  %1936 = vmatprep.subr.bf16.mxu1 %v1935_v1  ;;  %v96_v0 = vld [vmem:[%s5041_s1 + $0x1f8] sm:$0xff]  ;;  %v350_v1 = vld [vmem:[%s5041_s1 + $0x9e8] sm:$0xff]  ;;  %v2209_v4 = vpack.c.bf16 %v347_v62, %v345_v59  ;;  %v93_v6 = vld [vmem:[%s5041_s1 + $0x1e0] sm:$0xff] }
  0x2b   :  { %2192 = vmatprep.subr.bf16.mxu0 %v2191_v5  ;;  %v352_v2 = vld [vmem:[%s5041_s1 + $0x9f8] sm:$0xff]  ;;  %v1955_v5 = vpack.c.bf16 %v96_v0, %v94_v63  ;;  %v95_v7 = vld [vmem:[%s5041_s1 + $0x1f0] sm:$0xff]  ;;  %v349_v8 = vld [vmem:[%s5041_s1 + $0x9e0] sm:$0xff] }
  0x2c   :  { %v2211_v9 = vpack.c.bf16 %v352_v2, %v350_v1  ;;  %v351_v10 = vld [vmem:[%s5041_s1 + $0x9f0] sm:$0xff]  ;;  %v98_v13 = vld [vmem:[%s5041_s1 + $0x208] sm:$0xff]  ;;  %v356_v17 = vld [vmem:[%s5041_s1 + $0xa18] sm:$0xff]  ;;  %v1957_v18 = vpack.c.bf16 %v95_v7, %v93_v6 }
  0x2d   :  { %1938 = vmatpush1.bf16.msra.mxu1 %v1937_v12  ;;  %v727_v12 = vcombine.high %v3034_v22, %v3034_v22  ;;  %v354_v16 = vld [vmem:[%s5041_s1 + $0xa08] sm:$0xff]  ;;  %v97_v21 = vld [vmem:[%s5041_s1 + $0x200] sm:$0xff]  ;;  %v99_v22 = vld [vmem:[%s5041_s1 + $0x210] sm:$0xff] }
  0x2e   :  { %2194 = vmatpush1.bf16.msra.mxu0 %v2193_v14  ;;  %1940 = vmatprep.subr.bf16.mxu1 %v1939_v15  ;;  %v100_v14 = vld [vmem:[%s5041_s1 + $0x218] sm:$0xff]  ;;  %v761_v15 = vcombine.high %v3049_v26, %v3049_v26  ;;  %v353_v23 = vld [vmem:[%s5041_s1 + $0xa00] sm:$0xff]  ;;  %v2215_v24 = vpack.c.bf16 %v356_v17, %v354_v16  ;;  %v355_v26 = vld [vmem:[%s5041_s1 + $0xa10] sm:$0xff]  ;;  %v1961_v34 = vpack.c.bf16 %v99_v22, %v97_v21 }
  0x2f   :  { %2196 = vmatprep.subr.bf16.mxu0 %v2195_v19  ;;  %v2213_v19 = vpack.c.bf16 %v351_v10, %v349_v8  ;;  %v1959_v20 = vpack.c.bf16 %v100_v14, %v98_v13  ;;  %v358_v31 = vld [vmem:[%s5041_s1 + $0xa28] sm:$0xff]  ;;  %v360_v32 = vld [vmem:[%s5041_s1 + $0xa38] sm:$0xff]  ;;  %v101_v37 = vld [vmem:[%s5041_s1 + $0x220] sm:$0xff] }
  0x30   :  { %v3187_v33 = vrot.slane %v761_v15, %v3011_v11  ;;  %v103_v38 = vld [vmem:[%s5041_s1 + $0x230] sm:$0xff]  ;;  %v357_v39 = vld [vmem:[%s5041_s1 + $0xa20] sm:$0xff]  ;;  %v2219_v40 = vpack.c.bf16 %v360_v32, %v358_v31  ;;  %v362_v45 = vld [vmem:[%s5041_s1 + $0xa48] sm:$0xff] }
  0x31   :  { %1942 = vmatpush1.bf16.msra.mxu1 %v1941_v27  ;;  %v102_v27 = vld [vmem:[%s5041_s1 + $0x228] sm:$0xff]  ;;  %v359_v41 = vld [vmem:[%s5041_s1 + $0xa30] sm:$0xff]  ;;  %v364_v46 = vld [vmem:[%s5041_s1 + $0xa58] sm:$0xff] }
  0x32   :  { %2198 = vmatpush1.bf16.msra.mxu0 %v2197_v29  ;;  %1944 = vmatprep.subr.bf16.mxu1 %v1943_v30  ;;  %v104_v29 = vld [vmem:[%s5041_s1 + $0x238] sm:$0xff]  ;;  %v3178_v30 = vrot.slane %v727_v12, %v3011_v11  ;;  %v777_v47 = vcombine.high %v3187_v33, %v3187_v33  ;;  %v2221_v49 = vpack.c.bf16 %v359_v41, %v357_v39  ;;  %v107_v51 = vld [vmem:[%s5041_s1 + $0x250] sm:$0xff]  ;;  %v361_v52 = vld [vmem:[%s5041_s1 + $0xa40] sm:$0xff] }
  0x33   :  { %2200 = vmatprep.subr.bf16.mxu0 %v2199_v35  ;;  %v2217_v35 = vpack.c.bf16 %v355_v26, %v353_v23  ;;  %v1963_v36 = vpack.c.bf16 %v104_v29, %v102_v27  ;;  %v2223_v53 = vpack.c.bf16 %v364_v46, %v362_v45  ;;  %v368_v57 = vld [vmem:[%s5041_s1 + $0xa78] sm:$0xff]  ;;  %v109_v62 = vld [vmem:[%s5041_s1 + $0x260] sm:$0xff]  ;;  %v111_v63 = vld [vmem:[%s5041_s1 + $0x270] sm:$0xff] }
  0x34   :  { %v365_v0 = vld [vmem:[%s5041_s1 + $0xa60] sm:$0xff]  ;;  %v367_v2 = vld [vmem:[%s5041_s1 + $0xa70] sm:$0xff]  ;;  %v372_v6 = vld [vmem:[%s5041_s1 + $0xa98] sm:$0xff]  ;;  %v1973_v7 = vpack.c.bf16 %v111_v63, %v109_v62 }
  0x35   :  { %1946 = vmatpush1.bf16.msra.mxu1 %v1945_v42  ;;  %v106_v42 = vld [vmem:[%s5041_s1 + $0x248] sm:$0xff]  ;;  %v2229_v8 = vpack.c.bf16 %v367_v2, %v365_v0  ;;  %v113_v10 = vld [vmem:[%s5041_s1 + $0x280] sm:$0xff]  ;;  %v115_v12 = vld [vmem:[%s5041_s1 + $0x290] sm:$0xff] }
  0x36   :  { %2202 = vmatpush1.bf16.msra.mxu0 %v2201_v43  ;;  %1948 = vmatprep.subr.bf16.mxu1 %v1947_v44  ;;  %v108_v43 = vld [vmem:[%s5041_s1 + $0x258] sm:$0xff]  ;;  %v743_v44 = vcombine.high %v3178_v30, %v3178_v30  ;;  %v369_v13 = vld [vmem:[%s5041_s1 + $0xa80] sm:$0xff]  ;;  %v371_v15 = vld [vmem:[%s5041_s1 + $0xa90] sm:$0xff] }
  0x37   :  { %2204 = vmatprep.subr.bf16.mxu0 %v2203_v48  ;;  %v1965_v48 = vpack.c.bf16 %v103_v38, %v101_v37  ;;  %v1967_v50 = vpack.c.bf16 %v108_v43, %v106_v42  ;;  %v118_v16 = vld [vmem:[%s5041_s1 + $0x2a8] sm:$0xff]  ;;  %v120_v17 = vld [vmem:[%s5041_s1 + $0x2b8] sm:$0xff]  ;;  %v2233_v21 = vpack.c.bf16 %v371_v15, %v369_v13  ;;  %v117_v23 = vld [vmem:[%s5041_s1 + $0x2a0] sm:$0xff] }
  0x38   :  { %v1979_v22 = vpack.c.bf16 %v120_v17, %v118_v16  ;;  %v373_v26 = vld [vmem:[%s5041_s1 + $0xaa0] sm:$0xff]  ;;  %v375_v29 = vld [vmem:[%s5041_s1 + $0xab0] sm:$0xff]  ;;  %v122_v31 = vld [vmem:[%s5041_s1 + $0x2c8] sm:$0xff] }
  0x39   :  { %1950 = vmatpush1.bf16.msra.mxu1 %v1949_v54  ;;  %v110_v54 = vld [vmem:[%s5041_s1 + $0x268] sm:$0xff]  ;;  %v124_v32 = vld [vmem:[%s5041_s1 + $0x2d8] sm:$0xff]  ;;  %v2237_v37 = vpack.c.bf16 %v375_v29, %v373_v26  ;;  %v121_v39 = vld [vmem:[%s5041_s1 + $0x2c0] sm:$0xff] }
  0x3a   :  { %2206 = vmatpush1.bf16.msra.mxu0 %v2205_v55  ;;  %1952 = vmatprep.subr.bf16.mxu1 %v1951_v56  ;;  %v112_v55 = vld [vmem:[%s5041_s1 + $0x278] sm:$0xff]  ;;  %v366_v56 = vld [vmem:[%s5041_s1 + $0xa68] sm:$0xff]  ;;  %v1983_v38 = vpack.c.bf16 %v124_v32, %v122_v31  ;;  %v377_v41 = vld [vmem:[%s5041_s1 + $0xac0] sm:$0xff] }
  0x3b   :  { %2208 = vmatprep.subr.bf16.mxu0 %v2207_v60  ;;  %v1971_v60 = vpack.c.bf16 %v112_v55, %v110_v54  ;;  %v2227_v1 = vpack.c.bf16 %v368_v57, %v366_v56  ;;  %v379_v43 = vld [vmem:[%s5041_s1 + $0xad0] sm:$0xff]  ;;  %v128_v45 = vld [vmem:[%s5041_s1 + $0x2f8] sm:$0xff]  ;;  %v382_v46 = vld [vmem:[%s5041_s1 + $0xae8] sm:$0xff] }
  0x3c   :  { %v130_v54 = vld [vmem:[%s5041_s1 + $0x308] sm:$0xff]  ;;  %v132_v55 = vld [vmem:[%s5041_s1 + $0x318] sm:$0xff]  ;;  %v129_v62 = vld [vmem:[%s5041_s1 + $0x300] sm:$0xff] }
  0x3d   :  { %1954 = vmatpush1.bf16.msra.mxu1 %v1953_v3  ;;  %v114_v3 = vld [vmem:[%s5041_s1 + $0x288] sm:$0xff]  ;;  %v388_v57 = vld [vmem:[%s5041_s1 + $0xb18] sm:$0xff]  ;;  %v131_v63 = vld [vmem:[%s5041_s1 + $0x310] sm:$0xff] }
  0x3e   :  { %2210 = vmatpush1.bf16.msra.mxu0 %v2209_v4  ;;  %1956 = vmatprep.subr.bf16.mxu1 %v1955_v5  ;;  %v116_v4 = vld [vmem:[%s5041_s1 + $0x298] sm:$0xff]  ;;  %v370_v5 = vld [vmem:[%s5041_s1 + $0xa88] sm:$0xff]  ;;  %v385_v0 = vld [vmem:[%s5041_s1 + $0xb00] sm:$0xff] }
  0x3f   :  { %2212 = vmatprep.subr.bf16.mxu0 %v2211_v9  ;;  %v1975_v9 = vpack.c.bf16 %v116_v4, %v114_v3  ;;  %v2231_v14 = vpack.c.bf16 %v372_v6, %v370_v5  ;;  %v386_v56 = vld [vmem:[%s5041_s1 + $0xb08] sm:$0xff]  ;;  %v387_v2 = vld [vmem:[%s5041_s1 + $0xb10] sm:$0xff]  ;;  %v136_v4 = vld [vmem:[%s5041_s1 + $0x338] sm:$0xff] }
  0x40   :  { %v134_v3 = vld [vmem:[%s5041_s1 + $0x328] sm:$0xff]  ;;  %v392_v6 = vld [vmem:[%s5041_s1 + $0xb38] sm:$0xff]  ;;  %v389_v13 = vld [vmem:[%s5041_s1 + $0xb20] sm:$0xff] }
  0x41   :  { %1958 = vmatpush1.bf16.msra.mxu1 %v1957_v18  ;;  %v374_v18 = vld [vmem:[%s5041_s1 + $0xaa8] sm:$0xff]  ;;  %v391_v15 = vld [vmem:[%s5041_s1 + $0xb30] sm:$0xff]  ;;  %v140_v17 = vld [vmem:[%s5041_s1 + $0x358] sm:$0xff] }
  0x42   :  { %2214 = vmatpush1.bf16.msra.mxu0 %v2213_v19  ;;  %1960 = vmatprep.subr.bf16.mxu1 %v1959_v20  ;;  %v376_v19 = vld [vmem:[%s5041_s1 + $0xab8] sm:$0xff]  ;;  %v1977_v20 = vpack.c.bf16 %v115_v12, %v113_v10  ;;  %v390_v5 = vld [vmem:[%s5041_s1 + $0xb28] sm:$0xff]  ;;  %v133_v10 = vld [vmem:[%s5041_s1 + $0x320] sm:$0xff] }
  0x43   :  { %2216 = vmatprep.subr.bf16.mxu0 %v2215_v24  ;;  %v119_v24 = vld [vmem:[%s5041_s1 + $0x2b0] sm:$0xff]  ;;  %v2235_v27 = vpack.c.bf16 %v376_v19, %v374_v18  ;;  %v138_v16 = vld [vmem:[%s5041_s1 + $0x348] sm:$0xff]  ;;  %v396_v19 = vld [vmem:[%s5041_s1 + $0xb58] sm:$0xff] }
  0x44   :  { %909 = vmatmul.mubr.f32.vlgmr.msra.gmra.mrb[0].mxu1 %v3044_v25  ;;  %v105_v25 = vld [vmem:[%s5041_s1 + $0x240] sm:$0xff]  ;;  %v135_v12 = vld [vmem:[%s5041_s1 + $0x330] sm:$0xff]  ;;  %v394_v18 = vld [vmem:[%s5041_s1 + $0xb48] sm:$0xff] }
  0x45   :  { %1962 = vmatpush1.bf16.msra.mxu1 %v1961_v34  ;;  %1193 = vmatmul.mubr.f32.vlgmr.msra.gmra.mrb[0].mxu0 %v3053_v28  ;;  %v363_v28 = vld [vmem:[%s5041_s1 + $0xa50] sm:$0xff]  ;;  %v1969_v58 = vpack.c.bf16 %v107_v51, %v105_v25  ;;  %v378_v34 = vld [vmem:[%s5041_s1 + $0xac8] sm:$0xff]  ;;  %v125_v25 = vld [vmem:[%s5041_s1 + $0x2e0] sm:$0xff] }
  0x46   :  { %2218 = vmatpush1.bf16.msra.mxu0 %v2217_v35  ;;  %1964 = vmatprep.subr.bf16.mxu1 %v1963_v36  ;;  %v2225_v59 = vpack.c.bf16 %v363_v28, %v361_v52  ;;  %v380_v35 = vld [vmem:[%s5041_s1 + $0xad8] sm:$0xff]  ;;  %v1981_v36 = vpack.c.bf16 %v119_v24, %v117_v23  ;;  %v127_v51 = vld [vmem:[%s5041_s1 + $0x2f0] sm:$0xff]  ;;  %v381_v52 = vld [vmem:[%s5041_s1 + $0xae0] sm:$0xff] }
  0x47   :  { %2220 = vmatprep.subr.bf16.mxu0 %v2219_v40  ;;  %979 = vmatprep.mubr.f32.mxu1 %v743_v44  ;;  %v123_v40 = vld [vmem:[%s5041_s1 + $0x2d0] sm:$0xff]  ;;  %v2239_v42 = vpack.c.bf16 %v380_v35, %v378_v34  ;;  %v126_v44 = vld [vmem:[%s5041_s1 + $0x2e8] sm:$0xff]  ;;  %v137_v23 = vld [vmem:[%s5041_s1 + $0x340] sm:$0xff] }
  0x48   :  { %1263 = vmatprep.mubr.f32.mxu0 %v777_v47  ;;  %v384_v47 = vld [vmem:[%s5041_s1 + $0xaf8] sm:$0xff]  ;;  %v383_v28 = vld [vmem:[%s5041_s1 + $0xaf0] sm:$0xff]  ;;  %v393_v26 = vld [vmem:[%s5041_s1 + $0xb40] sm:$0xff] }
  0x49   :  { %1966 = vmatpush1.bf16.msra.mxu1 %v1965_v48  ;;  %v1985_v48 = vpack.c.bf16 %v123_v40, %v121_v39  ;;  %v139_v24 = vld [vmem:[%s5041_s1 + $0x350] sm:$0xff]  ;;  %v142_v31 = vld [vmem:[%s5041_s1 + $0x368] sm:$0xff]  ;;  %v144_v32 = vld [vmem:[%s5041_s1 + $0x378] sm:$0xff] }
  0x4a   :  { %2222 = vmatpush1.bf16.msra.mxu0 %v2221_v49  ;;  %1968 = vmatprep.subr.bf16.mxu1 %v1967_v50  ;;  %v2241_v49 = vpack.c.bf16 %v379_v43, %v377_v41  ;;  %v1987_v50 = vpack.c.bf16 %v128_v45, %v126_v44  ;;  %v395_v29 = vld [vmem:[%s5041_s1 + $0xb50] sm:$0xff]  ;;  %v398_v34 = vld [vmem:[%s5041_s1 + $0xb68] sm:$0xff]  ;;  %v400_v35 = vld [vmem:[%s5041_s1 + $0xb78] sm:$0xff] }
  0x4b   :  { %2224 = vmatprep.subr.bf16.mxu0 %v2223_v53  ;;  %v2243_v53 = vpack.c.bf16 %v384_v47, %v382_v46  ;;  %v141_v39 = vld [vmem:[%s5041_s1 + $0x360] sm:$0xff]  ;;  %v143_v40 = vld [vmem:[%s5041_s1 + $0x370] sm:$0xff]  ;;  %v146_v44 = vld [vmem:[%s5041_s1 + $0x388] sm:$0xff] }
  0x4c   :  { %v397_v41 = vld [vmem:[%s5041_s1 + $0xb60] sm:$0xff]  ;;  %v399_v43 = vld [vmem:[%s5041_s1 + $0xb70] sm:$0xff]  ;;  %v148_v45 = vld [vmem:[%s5041_s1 + $0x398] sm:$0xff] }
  0x4d   :  { %1970 = vmatpush1.bf16.msra.mxu1 %v1969_v58  ;;  %v1989_v58 = vpack.c.bf16 %v127_v51, %v125_v25  ;;  %v402_v46 = vld [vmem:[%s5041_s1 + $0xb88] sm:$0xff]  ;;  %v404_v47 = vld [vmem:[%s5041_s1 + $0xb98] sm:$0xff]  ;;  %v145_v25 = vld [vmem:[%s5041_s1 + $0x380] sm:$0xff] }
  0x4e   :  { %2226 = vmatpush1.bf16.msra.mxu0 %v2225_v59  ;;  %1972 = vmatprep.subr.bf16.mxu1 %v1971_v60  ;;  %v2245_v59 = vpack.c.bf16 %v383_v28, %v381_v52  ;;  %v1991_v60 = vpack.c.bf16 %v132_v55, %v130_v54  ;;  %v147_v51 = vld [vmem:[%s5041_s1 + $0x390] sm:$0xff]  ;;  %v401_v52 = vld [vmem:[%s5041_s1 + $0xb80] sm:$0xff]  ;;  %v150_v54 = vld [vmem:[%s5041_s1 + $0x3a8] sm:$0xff] }
  0x4f   :  { %2228 = vmatprep.subr.bf16.mxu0 %v2227_v1  ;;  %v2247_v1 = vpack.c.bf16 %v388_v57, %v386_v56  ;;  %v403_v28 = vld [vmem:[%s5041_s1 + $0xb90] sm:$0xff]  ;;  %v152_v55 = vld [vmem:[%s5041_s1 + $0x3b8] sm:$0xff]  ;;  %v406_v56 = vld [vmem:[%s5041_s1 + $0xba8] sm:$0xff] }
  0x50   :  { %v408_v57 = vld [vmem:[%s5041_s1 + $0xbb8] sm:$0xff] }
  0x51   :  { %1974 = vmatpush1.bf16.msra.mxu1 %v1973_v7  ;;  %v1993_v7 = vpack.c.bf16 %v131_v63, %v129_v62  ;;  %v149_v62 = vld [vmem:[%s5041_s1 + $0x3a0] sm:$0xff]  ;;  %v151_v63 = vld [vmem:[%s5041_s1 + $0x3b0] sm:$0xff] }
  0x52   :  { %2230 = vmatpush1.bf16.msra.mxu0 %v2229_v8  ;;  %1976 = vmatprep.subr.bf16.mxu1 %v1975_v9  ;;  %v2249_v8 = vpack.c.bf16 %v387_v2, %v385_v0  ;;  %v1995_v9 = vpack.c.bf16 %v136_v4, %v134_v3  ;;  %v405_v0 = vld [vmem:[%s5041_s1 + $0xba0] sm:$0xff]  ;;  %v407_v2 = vld [vmem:[%s5041_s1 + $0xbb0] sm:$0xff]  ;;  %v154_v3 = vld [vmem:[%s5041_s1 + $0x3c8] sm:$0xff] }
  0x53   :  { %2232 = vmatprep.subr.bf16.mxu0 %v2231_v14  ;;  %v2251_v14 = vpack.c.bf16 %v392_v6, %v390_v5  ;;  %v156_v4 = vld [vmem:[%s5041_s1 + $0x3d8] sm:$0xff]  ;;  %v410_v5 = vld [vmem:[%s5041_s1 + $0xbc8] sm:$0xff] }
  0x54   :  { %v412_v6 = vld [vmem:[%s5041_s1 + $0xbd8] sm:$0xff] }
  0x55   :  { %1978 = vmatpush1.bf16.msra.mxu1 %v1977_v20  ;;  %v1997_v20 = vpack.c.bf16 %v135_v12, %v133_v10  ;;  %v153_v10 = vld [vmem:[%s5041_s1 + $0x3c0] sm:$0xff]  ;;  %v155_v12 = vld [vmem:[%s5041_s1 + $0x3d0] sm:$0xff] }
  0x56   :  { %2234 = vmatpush1.bf16.msra.mxu0 %v2233_v21  ;;  %1980 = vmatprep.subr.bf16.mxu1 %v1979_v22  ;;  %v2253_v21 = vpack.c.bf16 %v391_v15, %v389_v13  ;;  %v1999_v22 = vpack.c.bf16 %v140_v17, %v138_v16  ;;  %v409_v13 = vld [vmem:[%s5041_s1 + $0xbc0] sm:$0xff]  ;;  %v411_v15 = vld [vmem:[%s5041_s1 + $0xbd0] sm:$0xff]  ;;  %v158_v16 = vld [vmem:[%s5041_s1 + $0x3e8] sm:$0xff] }
  0x57   :  { %2236 = vmatprep.subr.bf16.mxu0 %v2235_v27  ;;  %v2255_v27 = vpack.c.bf16 %v396_v19, %v394_v18  ;;  %v160_v17 = vld [vmem:[%s5041_s1 + $0x3f8] sm:$0xff]  ;;  %v414_v18 = vld [vmem:[%s5041_s1 + $0xbe8] sm:$0xff] }
  0x58   :  { %v416_v19 = vld [vmem:[%s5041_s1 + $0xbf8] sm:$0xff] }
  0x59   :  { %1982 = vmatpush1.bf16.msra.mxu1 %v1981_v36  ;;  %v2001_v36 = vpack.c.bf16 %v139_v24, %v137_v23  ;;  %v157_v23 = vld [vmem:[%s5041_s1 + $0x3e0] sm:$0xff]  ;;  %v159_v24 = vld [vmem:[%s5041_s1 + $0x3f0] sm:$0xff] }
  0x5a   :  { %2238 = vmatpush1.bf16.msra.mxu0 %v2237_v37  ;;  %1984 = vmatprep.subr.bf16.mxu1 %v1983_v38  ;;  %v2257_v37 = vpack.c.bf16 %v395_v29, %v393_v26  ;;  %v2003_v38 = vpack.c.bf16 %v144_v32, %v142_v31  ;;  %v413_v26 = vld [vmem:[%s5041_s1 + $0xbe0] sm:$0xff]  ;;  %v415_v29 = vld [vmem:[%s5041_s1 + $0xbf0] sm:$0xff]  ;;  %v162_v31 = vld [vmem:[%s5041_s1 + $0x408] sm:$0xff] }
  0x5b   :  { %2240 = vmatprep.subr.bf16.mxu0 %v2239_v42  ;;  %v2259_v42 = vpack.c.bf16 %v400_v35, %v398_v34  ;;  %v164_v32 = vld [vmem:[%s5041_s1 + $0x418] sm:$0xff]  ;;  %v418_v34 = vld [vmem:[%s5041_s1 + $0xc08] sm:$0xff] }
  0x5c   :  { %v420_v35 = vld [vmem:[%s5041_s1 + $0xc18] sm:$0xff] }
  0x5d   :  { %1986 = vmatpush1.bf16.msra.mxu1 %v1985_v48  ;;  %v2005_v48 = vpack.c.bf16 %v143_v40, %v141_v39  ;;  %v161_v39 = vld [vmem:[%s5041_s1 + $0x400] sm:$0xff]  ;;  %v163_v40 = vld [vmem:[%s5041_s1 + $0x410] sm:$0xff] }
  0x5e   :  { %2242 = vmatpush1.bf16.msra.mxu0 %v2241_v49  ;;  %1988 = vmatprep.subr.bf16.mxu1 %v1987_v50  ;;  %v2261_v49 = vpack.c.bf16 %v399_v43, %v397_v41  ;;  %v2007_v50 = vpack.c.bf16 %v148_v45, %v146_v44  ;;  %v417_v41 = vld [vmem:[%s5041_s1 + $0xc00] sm:$0xff]  ;;  %v419_v43 = vld [vmem:[%s5041_s1 + $0xc10] sm:$0xff]  ;;  %v166_v44 = vld [vmem:[%s5041_s1 + $0x428] sm:$0xff] }
  0x5f   :  { %2244 = vmatprep.subr.bf16.mxu0 %v2243_v53  ;;  %v2263_v53 = vpack.c.bf16 %v404_v47, %v402_v46  ;;  %v168_v45 = vld [vmem:[%s5041_s1 + $0x438] sm:$0xff]  ;;  %v422_v46 = vld [vmem:[%s5041_s1 + $0xc28] sm:$0xff] }
  0x60   :  { %v424_v47 = vld [vmem:[%s5041_s1 + $0xc38] sm:$0xff] }
  0x61   :  { %1990 = vmatpush1.bf16.msra.mxu1 %v1989_v58  ;;  %v2009_v58 = vpack.c.bf16 %v147_v51, %v145_v25  ;;  %v2281_v25 = vpack.c.bf16 %v419_v43, %v417_v41  ;;  %v2027_v51 = vpack.c.bf16 %v168_v45, %v166_v44  ;;  %v181_v43 = vld [vmem:[%s5041_s1 + $0x4a0] sm:$0xff]  ;;  %v183_v44 = vld [vmem:[%s5041_s1 + $0x4b0] sm:$0xff] }
  0x62   :  { %2246 = vmatpush1.bf16.msra.mxu0 %v2245_v59  ;;  %1992 = vmatprep.subr.bf16.mxu1 %v1991_v60  ;;  %v2265_v59 = vpack.c.bf16 %v403_v28, %v401_v52  ;;  %v2011_v60 = vpack.c.bf16 %v152_v55, %v150_v54  ;;  %v167_v52 = vld [vmem:[%s5041_s1 + $0x430] sm:$0xff]  ;;  %v3600_v54 = vld [vmem:[%s5040_s0 + $0x18] sm:$0xff]  ;;  %v2283_v55 = vpack.c.bf16 %v424_v47, %v422_v46  ;;  %v437_v45 = vld [vmem:[%s5041_s1 + $0xca0] sm:$0xff] }
  0x63   :  { %2248 = vmatprep.subr.bf16.mxu0 %v2247_v1  ;;  %v2267_v1 = vpack.c.bf16 %v408_v57, %v406_v56  ;;  %v423_v56 = vld [vmem:[%s5041_s1 + $0xc30] sm:$0xff]  ;;  %v170_v57 = vld [vmem:[%s5041_s1 + $0x448] sm:$0xff] }
  0x64   :  { %v439_v47 = vld [vmem:[%s5041_s1 + $0xcb0] sm:$0xff] }
  0x65   :  { %1994 = vmatpush1.bf16.msra.mxu1 %v1993_v7  ;;  %v2013_v7 = vpack.c.bf16 %v151_v63, %v149_v62  ;;  %v428_v62 = vld [vmem:[%s5041_s1 + $0xc58] sm:$0xff] }
  0x66   :  { %2250 = vmatpush1.bf16.msra.mxu0 %v2249_v8  ;;  %1996 = vmatprep.subr.bf16.mxu1 %v1995_v9  ;;  %v2269_v8 = vpack.c.bf16 %v407_v2, %v405_v0  ;;  %v2015_v9 = vpack.c.bf16 %v156_v4, %v154_v3  ;;  %v169_v3 = vld [vmem:[%s5041_s1 + $0x440] sm:$0xff]  ;;  %v171_v4 = vld [vmem:[%s5041_s1 + $0x450] sm:$0xff] }
  0x67   :  { %2252 = vmatprep.subr.bf16.mxu0 %v2251_v14  ;;  %v2271_v14 = vpack.c.bf16 %v412_v6, %v410_v5  ;;  %v427_v6 = vld [vmem:[%s5041_s1 + $0xc50] sm:$0xff] }
  0x69   :  { %1998 = vmatpush1.bf16.msra.mxu1 %v1997_v20  ;;  %v2017_v20 = vpack.c.bf16 %v155_v12, %v153_v10  ;;  %v432_v10 = vld [vmem:[%s5041_s1 + $0xc78] sm:$0xff]  ;;  %v2033_v12 = vpack.c.bf16 %v171_v4, %v169_v3 }
  0x6a   :  { %2254 = vmatpush1.bf16.msra.mxu0 %v2253_v21  ;;  %2000 = vmatprep.subr.bf16.mxu1 %v1999_v22  ;;  %v2273_v21 = vpack.c.bf16 %v411_v15, %v409_v13  ;;  %v2019_v22 = vpack.c.bf16 %v160_v17, %v158_v16  ;;  %v173_v15 = vld [vmem:[%s5041_s1 + $0x460] sm:$0xff]  ;;  %v175_v16 = vld [vmem:[%s5041_s1 + $0x470] sm:$0xff] }
  0x6b   :  { %2256 = vmatprep.subr.bf16.mxu0 %v2255_v27  ;;  %v2275_v27 = vpack.c.bf16 %v416_v19, %v414_v18  ;;  %v429_v17 = vld [vmem:[%s5041_s1 + $0xc60] sm:$0xff]  ;;  %v431_v19 = vld [vmem:[%s5041_s1 + $0xc70] sm:$0xff] }
  0x6d   :  { %2002 = vmatpush1.bf16.msra.mxu1 %v2001_v36  ;;  %v2021_v36 = vpack.c.bf16 %v159_v24, %v157_v23  ;;  %v436_v23 = vld [vmem:[%s5041_s1 + $0xc98] sm:$0xff]  ;;  %v2037_v24 = vpack.c.bf16 %v175_v16, %v173_v15 }
  0x6e   :  { %2258 = vmatpush1.bf16.msra.mxu0 %v2257_v37  ;;  %2004 = vmatprep.subr.bf16.mxu1 %v2003_v38  ;;  %v2277_v37 = vpack.c.bf16 %v415_v29, %v413_v26  ;;  %v2023_v38 = vpack.c.bf16 %v164_v32, %v162_v31  ;;  %v2293_v26 = vpack.c.bf16 %v431_v19, %v429_v17  ;;  %v177_v29 = vld [vmem:[%s5041_s1 + $0x480] sm:$0xff]  ;;  %v179_v31 = vld [vmem:[%s5041_s1 + $0x490] sm:$0xff] }
  0x6f   :  { %2260 = vmatprep.subr.bf16.mxu0 %v2259_v42  ;;  %v2279_v42 = vpack.c.bf16 %v420_v35, %v418_v34  ;;  %v433_v32 = vld [vmem:[%s5041_s1 + $0xc80] sm:$0xff]  ;;  %v435_v35 = vld [vmem:[%s5041_s1 + $0xc90] sm:$0xff] }
  0x70   :  { %v2297_v41 = vpack.c.bf16 %v435_v35, %v433_v32  ;;  %v193_v17 = vld [vmem:[%s5041_s1 + $0x500] sm:$0xff] }
  0x71   :  { %2006 = vmatpush1.bf16.msra.mxu1 %v2005_v48  ;;  %v2025_v48 = vpack.c.bf16 %v163_v40, %v161_v39  ;;  %v440_v39 = vld [vmem:[%s5041_s1 + $0xcb8] sm:$0xff]  ;;  %v2041_v40 = vpack.c.bf16 %v179_v31, %v177_v29  ;;  %v449_v19 = vld [vmem:[%s5041_s1 + $0xd00] sm:$0xff] }
  0x72   :  { %2262 = vmatpush1.bf16.msra.mxu0 %v2261_v49  ;;  %2008 = vmatprep.subr.bf16.mxu1 %v2007_v50  ;;  %v165_v49 = vld [vmem:[%s5041_s1 + $0x420] sm:$0xff]  ;;  %v3585_v50 = vld [vmem:[%s5040_s0 + $0x8] sm:$0xff] }
  0x73   :  { %2264 = vmatprep.subr.bf16.mxu0 %v2263_v53  ;;  %v421_v53 = vld [vmem:[%s5041_s1 + $0xc20] sm:$0xff]  ;;  %v3595_v28 = vrot.slane %v3585_v50, %v3011_v11  ;;  %v2029_v0 = vpack.c.bf16 %v167_v52, %v165_v49  ;;  %v188_v49 = vld [vmem:[%s5041_s1 + $0x4d8] sm:$0xff]  ;;  %v2045_v52 = vpack.c.bf16 %v183_v44, %v181_v43 }
  0x74   :  { %v197_v32 = vld [vmem:[%s5041_s1 + $0x520] sm:$0xff] }
  0x75   :  { %2010 = vmatpush1.bf16.msra.mxu1 %v2009_v58  ;;  %v172_v58 = vld [vmem:[%s5041_s1 + $0x458] sm:$0xff]  ;;  %v759_v63 = vcombine.high %v3595_v28, %v3595_v28  ;;  %v453_v35 = vld [vmem:[%s5041_s1 + $0xd20] sm:$0xff] }
  0x76   :  { %2266 = vmatpush1.bf16.msra.mxu0 %v2265_v59  ;;  %2012 = vmatprep.subr.bf16.mxu1 %v2011_v60  ;;  %v3613_v59 = vrot.slane %v3600_v54, %v3011_v11  ;;  %v426_v60 = vld [vmem:[%s5041_s1 + $0xc48] sm:$0xff]  ;;  %v2031_v2 = vpack.c.bf16 %v172_v58, %v170_v57  ;;  %v187_v57 = vld [vmem:[%s5041_s1 + $0x4d0] sm:$0xff]  ;;  %v441_v58 = vld [vmem:[%s5041_s1 + $0xcc0] sm:$0xff] }
  0x77   :  { %2268 = vmatprep.subr.bf16.mxu0 %v2267_v1  ;;  %v2287_v5 = vpack.c.bf16 %v428_v62, %v426_v60  ;;  %v443_v62 = vld [vmem:[%s5041_s1 + $0xcd0] sm:$0xff] }
  0x78   :  { %v793_v1 = vcombine.high %v3613_v59, %v3613_v59  ;;  %v2305_v3 = vpack.c.bf16 %v443_v62, %v441_v58  ;;  %v205_v58 = vld [vmem:[%s5041_s1 + $0x560] sm:$0xff] }
  0x79   :  { %2014 = vmatpush1.bf16.msra.mxu1 %v2013_v7  ;;  %v174_v7 = vld [vmem:[%s5041_s1 + $0x468] sm:$0xff]  ;;  %v461_v62 = vld [vmem:[%s5041_s1 + $0xd60] sm:$0xff] }
  0x7a   :  { %2270 = vmatpush1.bf16.msra.mxu0 %v2269_v8  ;;  %2016 = vmatprep.subr.bf16.mxu1 %v2015_v9  ;;  %v176_v8 = vld [vmem:[%s5041_s1 + $0x478] sm:$0xff]  ;;  %v430_v9 = vld [vmem:[%s5041_s1 + $0xc68] sm:$0xff] }
  0x7b   :  { %2272 = vmatprep.subr.bf16.mxu0 %v2271_v14  ;;  %v2035_v14 = vpack.c.bf16 %v176_v8, %v174_v7  ;;  %v2291_v18 = vpack.c.bf16 %v432_v10, %v430_v9  ;;  %v447_v8 = vld [vmem:[%s5041_s1 + $0xcf0] sm:$0xff]  ;;  %v194_v9 = vld [vmem:[%s5041_s1 + $0x508] sm:$0xff]  ;;  %v196_v10 = vld [vmem:[%s5041_s1 + $0x518] sm:$0xff] }
  0x7c   :  { %v2055_v16 = vpack.c.bf16 %v196_v10, %v194_v9  ;;  %v467_v10 = vld [vmem:[%s5041_s1 + $0xd90] sm:$0xff] }
  0x7d   :  { %2018 = vmatpush1.bf16.msra.mxu1 %v2017_v20  ;;  %v178_v20 = vld [vmem:[%s5041_s1 + $0x488] sm:$0xff] }
  0x7e   :  { %2274 = vmatpush1.bf16.msra.mxu0 %v2273_v21  ;;  %2020 = vmatprep.subr.bf16.mxu1 %v2019_v22  ;;  %v180_v21 = vld [vmem:[%s5041_s1 + $0x498] sm:$0xff]  ;;  %v434_v22 = vld [vmem:[%s5041_s1 + $0xc88] sm:$0xff] }
  0x7f   :  { %2276 = vmatprep.subr.bf16.mxu0 %v2275_v27  ;;  %v2039_v27 = vpack.c.bf16 %v180_v21, %v178_v20  ;;  %v2295_v34 = vpack.c.bf16 %v436_v23, %v434_v22  ;;  %v451_v21 = vld [vmem:[%s5041_s1 + $0xd10] sm:$0xff]  ;;  %v198_v22 = vld [vmem:[%s5041_s1 + $0x528] sm:$0xff]  ;;  %v200_v23 = vld [vmem:[%s5041_s1 + $0x538] sm:$0xff] }
  0x80   :  { %v2313_v29 = vpack.c.bf16 %v451_v21, %v449_v19  ;;  %v2059_v31 = vpack.c.bf16 %v200_v23, %v198_v22  ;;  %v213_v19 = vld [vmem:[%s5041_s1 + $0x5a0] sm:$0xff]  ;;  %v471_v23 = vld [vmem:[%s5041_s1 + $0xdb0] sm:$0xff] }
  0x81   :  { %2022 = vmatpush1.bf16.msra.mxu1 %v2021_v36  ;;  %v182_v36 = vld [vmem:[%s5041_s1 + $0x4a8] sm:$0xff]  ;;  %v469_v21 = vld [vmem:[%s5041_s1 + $0xda0] sm:$0xff] }
  0x82   :  { %2278 = vmatpush1.bf16.msra.mxu0 %v2277_v37  ;;  %2024 = vmatprep.subr.bf16.mxu1 %v2023_v38  ;;  %v184_v37 = vld [vmem:[%s5041_s1 + $0x4b8] sm:$0xff]  ;;  %v438_v38 = vld [vmem:[%s5041_s1 + $0xca8] sm:$0xff] }
  0x83   :  { %2280 = vmatprep.subr.bf16.mxu0 %v2279_v42  ;;  %v2043_v42 = vpack.c.bf16 %v184_v37, %v182_v36  ;;  %v2299_v46 = vpack.c.bf16 %v440_v39, %v438_v38  ;;  %v455_v37 = vld [vmem:[%s5041_s1 + $0xd30] sm:$0xff]  ;;  %v202_v38 = vld [vmem:[%s5041_s1 + $0x548] sm:$0xff]  ;;  %v204_v39 = vld [vmem:[%s5041_s1 + $0x558] sm:$0xff] }
  0x84   :  { %980 = vmatmul.mubr.f32.vlgmr.msra.gmra.mrb[0].mxu1 %v3178_v30  ;;  %v2285_v30 = vpack.c.bf16 %v423_v56, %v421_v53  ;;  %v2301_v53 = vpack.c.bf16 %v439_v47, %v437_v45  ;;  %v185_v56 = vld [vmem:[%s5041_s1 + $0x4c0] sm:$0xff]  ;;  %v2317_v43 = vpack.c.bf16 %v455_v37, %v453_v35  ;;  %v2063_v44 = vpack.c.bf16 %v204_v39, %v202_v38  ;;  %v475_v39 = vld [vmem:[%s5041_s1 + $0xdd0] sm:$0xff] }
  0x85   :  { %2026 = vmatpush1.bf16.msra.mxu1 %v2025_v48  ;;  %1264 = vmatmul.mubr.f32.vlgmr.msra.gmra.mrb[0].mxu0 %v3187_v33  ;;  %v425_v33 = vld [vmem:[%s5041_s1 + $0xc40] sm:$0xff]  ;;  %v186_v48 = vld [vmem:[%s5041_s1 + $0x4c8] sm:$0xff] }
  0x86   :  { %2282 = vmatpush1.bf16.msra.mxu0 %v2281_v25  ;;  %2028 = vmatprep.subr.bf16.mxu1 %v2027_v51  ;;  %v2289_v13 = vpack.c.bf16 %v427_v6, %v425_v33  ;;  %v442_v25 = vld [vmem:[%s5041_s1 + $0xcc8] sm:$0xff]  ;;  %v444_v51 = vld [vmem:[%s5041_s1 + $0xcd8] sm:$0xff]  ;;  %v189_v33 = vld [vmem:[%s5041_s1 + $0x4e0] sm:$0xff] }
  0x87   :  { %2284 = vmatprep.subr.bf16.mxu0 %v2283_v55  ;;  %1050 = vmatprep.mubr.f32.mxu1 %v759_v63  ;;  %v2047_v55 = vpack.c.bf16 %v188_v49, %v186_v48  ;;  %v2303_v60 = vpack.c.bf16 %v444_v51, %v442_v25  ;;  %v190_v63 = vld [vmem:[%s5041_s1 + $0x4e8] sm:$0xff]  ;;  %v445_v6 = vld [vmem:[%s5041_s1 + $0xce0] sm:$0xff]  ;;  %v459_v49 = vld [vmem:[%s5041_s1 + $0xd50] sm:$0xff] }
  0x88   :  { %1334 = vmatprep.mubr.f32.mxu0 %v793_v1  ;;  %v446_v1 = vld [vmem:[%s5041_s1 + $0xce8] sm:$0xff]  ;;  %v2309_v15 = vpack.c.bf16 %v447_v8, %v445_v6  ;;  %v201_v45 = vld [vmem:[%s5041_s1 + $0x540] sm:$0xff]  ;;  %v208_v51 = vld [vmem:[%s5041_s1 + $0x578] sm:$0xff] }
  0x89   :  { %2030 = vmatpush1.bf16.msra.mxu1 %v2029_v0  ;;  %v192_v0 = vld [vmem:[%s5041_s1 + $0x4f8] sm:$0xff]  ;;  %v457_v47 = vld [vmem:[%s5041_s1 + $0xd40] sm:$0xff]  ;;  %v206_v25 = vld [vmem:[%s5041_s1 + $0x568] sm:$0xff] }
  0x8a   :  { %2286 = vmatpush1.bf16.msra.mxu0 %v2285_v30  ;;  %2032 = vmatprep.subr.bf16.mxu1 %v2031_v2  ;;  %v448_v30 = vld [vmem:[%s5041_s1 + $0xcf8] sm:$0xff]  ;;  %v2049_v2 = vpack.c.bf16 %v187_v57, %v185_v56  ;;  %v2051_v4 = vpack.c.bf16 %v192_v0, %v190_v63  ;;  %v2321_v56 = vpack.c.bf16 %v459_v49, %v457_v47  ;;  %v463_v0 = vld [vmem:[%s5041_s1 + $0xd70] sm:$0xff]  ;;  %v209_v6 = vld [vmem:[%s5041_s1 + $0x580] sm:$0xff] }
  0x8b   :  { %2288 = vmatprep.subr.bf16.mxu0 %v2287_v5  ;;  %v191_v5 = vld [vmem:[%s5041_s1 + $0x4f0] sm:$0xff]  ;;  %v2307_v7 = vpack.c.bf16 %v448_v30, %v446_v1  ;;  %v2067_v57 = vpack.c.bf16 %v208_v51, %v206_v25  ;;  %v210_v1 = vld [vmem:[%s5041_s1 + $0x588] sm:$0xff]  ;;  %v212_v30 = vld [vmem:[%s5041_s1 + $0x598] sm:$0xff] }
  0x8c   :  { %v465_v8 = vld [vmem:[%s5041_s1 + $0xd80] sm:$0xff]  ;;  %v479_v51 = vld [vmem:[%s5041_s1 + $0xdf0] sm:$0xff] }
  0x8d   :  { %2034 = vmatpush1.bf16.msra.mxu1 %v2033_v12  ;;  %v450_v12 = vld [vmem:[%s5041_s1 + $0xd08] sm:$0xff]  ;;  %v217_v35 = vld [vmem:[%s5041_s1 + $0x5c0] sm:$0xff] }
  0x8e   :  { %2290 = vmatpush1.bf16.msra.mxu0 %v2289_v13  ;;  %2036 = vmatprep.subr.bf16.mxu1 %v2035_v14  ;;  %v452_v13 = vld [vmem:[%s5041_s1 + $0xd18] sm:$0xff]  ;;  %v2053_v14 = vpack.c.bf16 %v191_v5, %v189_v33  ;;  %v2325_v33 = vpack.c.bf16 %v463_v0, %v461_v62  ;;  %v2071_v5 = vpack.c.bf16 %v212_v30, %v210_v1  ;;  %v473_v37 = vld [vmem:[%s5041_s1 + $0xdc0] sm:$0xff]  ;;  %v227_v0 = vld [vmem:[%s5041_s1 + $0x610] sm:$0xff] }
  0x8f   :  { %2292 = vmatprep.subr.bf16.mxu0 %v2291_v18  ;;  %v195_v18 = vld [vmem:[%s5041_s1 + $0x510] sm:$0xff]  ;;  %v2311_v20 = vpack.c.bf16 %v452_v13, %v450_v12  ;;  %v214_v12 = vld [vmem:[%s5041_s1 + $0x5a8] sm:$0xff]  ;;  %v216_v13 = vld [vmem:[%s5041_s1 + $0x5b8] sm:$0xff] }
  0x90   :  { %v221_v47 = vld [vmem:[%s5041_s1 + $0x5e0] sm:$0xff]  ;;  %v483_v30 = vld [vmem:[%s5041_s1 + $0xe10] sm:$0xff] }
  0x91   :  { %2038 = vmatpush1.bf16.msra.mxu1 %v2037_v24  ;;  %v454_v24 = vld [vmem:[%s5041_s1 + $0xd28] sm:$0xff]  ;;  %v477_v49 = vld [vmem:[%s5041_s1 + $0xde0] sm:$0xff] }
  0x92   :  { %2294 = vmatpush1.bf16.msra.mxu0 %v2293_v26  ;;  %2040 = vmatprep.subr.bf16.mxu1 %v2039_v27  ;;  %v456_v26 = vld [vmem:[%s5041_s1 + $0xd38] sm:$0xff]  ;;  %v2057_v27 = vpack.c.bf16 %v195_v18, %v193_v17  ;;  %v2329_v17 = vpack.c.bf16 %v467_v10, %v465_v8  ;;  %v2075_v18 = vpack.c.bf16 %v216_v13, %v214_v12  ;;  %v481_v1 = vld [vmem:[%s5041_s1 + $0xe00] sm:$0xff]  ;;  %v231_v12 = vld [vmem:[%s5041_s1 + $0x630] sm:$0xff] }
  0x93   :  { %2296 = vmatprep.subr.bf16.mxu0 %v2295_v34  ;;  %v199_v34 = vld [vmem:[%s5041_s1 + $0x530] sm:$0xff]  ;;  %v2315_v36 = vpack.c.bf16 %v456_v26, %v454_v24  ;;  %v218_v24 = vld [vmem:[%s5041_s1 + $0x5c8] sm:$0xff]  ;;  %v220_v26 = vld [vmem:[%s5041_s1 + $0x5d8] sm:$0xff]  ;;  %v2341_v62 = vpack.c.bf16 %v479_v51, %v477_v49  ;;  %v2345_v8 = vpack.c.bf16 %v483_v30, %v481_v1 }
  0x94   :  { %v229_v10 = vld [vmem:[%s5041_s1 + $0x620] sm:$0xff] }
  0x95   :  { %2042 = vmatpush1.bf16.msra.mxu1 %v2041_v40  ;;  %v458_v40 = vld [vmem:[%s5041_s1 + $0xd48] sm:$0xff]  ;;  %v485_v13 = vld [vmem:[%s5041_s1 + $0xe20] sm:$0xff] }
  0x96   :  { %2298 = vmatpush1.bf16.msra.mxu0 %v2297_v41  ;;  %2044 = vmatprep.subr.bf16.mxu1 %v2043_v42  ;;  %v460_v41 = vld [vmem:[%s5041_s1 + $0xd58] sm:$0xff]  ;;  %v2061_v42 = vpack.c.bf16 %v199_v34, %v197_v32  ;;  %v2333_v32 = vpack.c.bf16 %v471_v23, %v469_v21  ;;  %v2079_v34 = vpack.c.bf16 %v220_v26, %v218_v24 }
  0x97   :  { %2300 = vmatprep.subr.bf16.mxu0 %v2299_v46  ;;  %v203_v46 = vld [vmem:[%s5041_s1 + $0x550] sm:$0xff]  ;;  %v2319_v48 = vpack.c.bf16 %v460_v41, %v458_v40  ;;  %v222_v40 = vld [vmem:[%s5041_s1 + $0x5e8] sm:$0xff]  ;;  %v224_v41 = vld [vmem:[%s5041_s1 + $0x5f8] sm:$0xff] }
  0x99   :  { %2046 = vmatpush1.bf16.msra.mxu1 %v2045_v52  ;;  %v462_v52 = vld [vmem:[%s5041_s1 + $0xd68] sm:$0xff] }
  0x9a   :  { %2302 = vmatpush1.bf16.msra.mxu0 %v2301_v53  ;;  %2048 = vmatprep.subr.bf16.mxu1 %v2047_v55  ;;  %v464_v53 = vld [vmem:[%s5041_s1 + $0xd78] sm:$0xff]  ;;  %v2065_v55 = vpack.c.bf16 %v203_v46, %v201_v45  ;;  %v2337_v45 = vpack.c.bf16 %v475_v39, %v473_v37  ;;  %v2083_v46 = vpack.c.bf16 %v224_v41, %v222_v40 }
  0x9b   :  { %2304 = vmatprep.subr.bf16.mxu0 %v2303_v60  ;;  %v207_v60 = vld [vmem:[%s5041_s1 + $0x570] sm:$0xff]  ;;  %v2323_v63 = vpack.c.bf16 %v464_v53, %v462_v52  ;;  %v226_v52 = vld [vmem:[%s5041_s1 + $0x608] sm:$0xff]  ;;  %v228_v53 = vld [vmem:[%s5041_s1 + $0x618] sm:$0xff] }
  0x9d   :  { %2050 = vmatpush1.bf16.msra.mxu1 %v2049_v2  ;;  %v466_v2 = vld [vmem:[%s5041_s1 + $0xd88] sm:$0xff] }
  0x9e   :  { %2306 = vmatpush1.bf16.msra.mxu0 %v2305_v3  ;;  %2052 = vmatprep.subr.bf16.mxu1 %v2051_v4  ;;  %v468_v3 = vld [vmem:[%s5041_s1 + $0xd98] sm:$0xff]  ;;  %v2069_v4 = vpack.c.bf16 %v207_v60, %v205_v58  ;;  %v778_v58 = vcombine.high %v3600_v54, %v3600_v54 }
  0x9f   :  { %2308 = vmatprep.subr.bf16.mxu0 %v2307_v7  ;;  %v211_v7 = vld [vmem:[%s5041_s1 + $0x590] sm:$0xff]  ;;  %v2327_v9 = vpack.c.bf16 %v468_v3, %v466_v2  ;;  %v230_v2 = vld [vmem:[%s5041_s1 + $0x628] sm:$0xff]  ;;  %v232_v3 = vld [vmem:[%s5041_s1 + $0x638] sm:$0xff] }
  0xa1   :  { %2054 = vmatpush1.bf16.msra.mxu1 %v2053_v14  ;;  %v470_v14 = vld [vmem:[%s5041_s1 + $0xda8] sm:$0xff] }
  0xa2   :  { %2310 = vmatpush1.bf16.msra.mxu0 %v2309_v15  ;;  %2056 = vmatprep.subr.bf16.mxu1 %v2055_v16  ;;  %v472_v15 = vld [vmem:[%s5041_s1 + $0xdb8] sm:$0xff]  ;;  %v2073_v16 = vpack.c.bf16 %v211_v7, %v209_v6  ;;  %v3995_v6 = vrot.slane %v778_v58, %v3011_v11 }
  0xa3   :  { %2312 = vmatprep.subr.bf16.mxu0 %v2311_v20  ;;  %v215_v20 = vld [vmem:[%s5041_s1 + $0x5b0] sm:$0xff]  ;;  %v2331_v22 = vpack.c.bf16 %v472_v15, %v470_v14 }
  0xa4   :  { %v487_v15 = vld [vmem:[%s5041_s1 + $0xe30] sm:$0xff]  ;;  %v794_v21 = vcombine.high %v3995_v6, %v3995_v6 }
  0xa5   :  { %2058 = vmatpush1.bf16.msra.mxu1 %v2057_v27  ;;  %v474_v27 = vld [vmem:[%s5041_s1 + $0xdc8] sm:$0xff] }
  0xa6   :  { %2314 = vmatpush1.bf16.msra.mxu0 %v2313_v29  ;;  %2060 = vmatprep.subr.bf16.mxu1 %v2059_v31  ;;  %v476_v29 = vld [vmem:[%s5041_s1 + $0xdd8] sm:$0xff]  ;;  %v2077_v31 = vpack.c.bf16 %v215_v20, %v213_v19  ;;  %v490_v19 = vld [vmem:[%s5041_s1 + $0xe48] sm:$0xff] }
  0xa7   :  { %2316 = vmatprep.subr.bf16.mxu0 %v2315_v36  ;;  %v219_v36 = vld [vmem:[%s5041_s1 + $0x5d0] sm:$0xff]  ;;  %v2335_v38 = vpack.c.bf16 %v476_v29, %v474_v27  ;;  %v492_v20 = vld [vmem:[%s5041_s1 + $0xe58] sm:$0xff] }
  0xa9   :  { %2062 = vmatpush1.bf16.msra.mxu1 %v2061_v42  ;;  %v478_v42 = vld [vmem:[%s5041_s1 + $0xde8] sm:$0xff] }
  0xaa   :  { %2318 = vmatpush1.bf16.msra.mxu0 %v2317_v43  ;;  %2064 = vmatprep.subr.bf16.mxu1 %v2063_v44  ;;  %v480_v43 = vld [vmem:[%s5041_s1 + $0xdf8] sm:$0xff]  ;;  %v2081_v44 = vpack.c.bf16 %v219_v36, %v217_v35 }
  0xab   :  { %2320 = vmatprep.subr.bf16.mxu0 %v2319_v48  ;;  %v223_v48 = vld [vmem:[%s5041_s1 + $0x5f0] sm:$0xff]  ;;  %v2339_v25 = vpack.c.bf16 %v480_v43, %v478_v42 }
  0xac   :  { %v2085_v60 = vpack.c.bf16 %v223_v48, %v221_v47 }
  0xad   :  { %2066 = vmatpush1.bf16.msra.mxu1 %v2065_v55  ;;  %v744_v55 = vcombine.high %v3585_v50, %v3585_v50  ;;  %v225_v50 = vld [vmem:[%s5041_s1 + $0x600] sm:$0xff] }
  0xae   :  { %2322 = vmatpush1.bf16.msra.mxu0 %v2321_v56  ;;  %2068 = vmatprep.subr.bf16.mxu1 %v2067_v57  ;;  %v482_v56 = vld [vmem:[%s5041_s1 + $0xe08] sm:$0xff]  ;;  %v484_v57 = vld [vmem:[%s5041_s1 + $0xe18] sm:$0xff]  ;;  %v2089_v7 = vpack.c.bf16 %v227_v0, %v225_v50 }
  0xaf   :  { %2324 = vmatprep.subr.bf16.mxu0 %v2323_v63  ;;  %v2087_v63 = vpack.c.bf16 %v228_v53, %v226_v52  ;;  %v2343_v54 = vpack.c.bf16 %v484_v57, %v482_v56 }
  0xb1   :  { %2070 = vmatpush1.bf16.msra.mxu1 %v2069_v4  ;;  %v3986_v4 = vrot.slane %v744_v55, %v3011_v11 }
  0xb2   :  { %2326 = vmatpush1.bf16.msra.mxu0 %v2325_v33  ;;  %2072 = vmatprep.subr.bf16.mxu1 %v2071_v5  ;;  %v486_v33 = vld [vmem:[%s5041_s1 + $0xe28] sm:$0xff]  ;;  %v488_v5 = vld [vmem:[%s5041_s1 + $0xe38] sm:$0xff] }
  0xb3   :  { %2328 = vmatprep.subr.bf16.mxu0 %v2327_v9  ;;  %v2091_v9 = vpack.c.bf16 %v232_v3, %v230_v2  ;;  %v2347_v14 = vpack.c.bf16 %v488_v5, %v486_v33 }
  0xb5   :  { %2074 = vmatpush1.bf16.msra.mxu1 %v2073_v16  ;;  %v234_v16 = vld [vmem:[%s5041_s1 + $0x648] sm:$0xff] }
  0xb6   :  { %2330 = vmatpush1.bf16.msra.mxu0 %v2329_v17  ;;  %2076 = vmatprep.subr.bf16.mxu1 %v2075_v18  ;;  %v236_v17 = vld [vmem:[%s5041_s1 + $0x658] sm:$0xff]  ;;  %v760_v18 = vcombine.high %v3986_v4, %v3986_v4 }
  0xb7   :  { %2332 = vmatprep.subr.bf16.mxu0 %v2331_v22 }
  0xb9   :  { %2078 = vmatpush1.bf16.msra.mxu1 %v2077_v31 }
  0xba   :  { %2334 = vmatpush1.bf16.msra.mxu0 %v2333_v32  ;;  %2080 = vmatprep.subr.bf16.mxu1 %v2079_v34 }
  0xbb   :  { %2336 = vmatprep.subr.bf16.mxu0 %v2335_v38 }
  0xbd   :  { %2082 = vmatpush1.bf16.msra.mxu1 %v2081_v44 }
  0xbe   :  { %2338 = vmatpush1.bf16.msra.mxu0 %v2337_v45  ;;  %2084 = vmatprep.subr.bf16.mxu1 %v2083_v46 }
  0xbf   :  { %2340 = vmatprep.subr.bf16.mxu0 %v2339_v25 }
  0xc1   :  { %2086 = vmatpush1.bf16.msra.mxu1 %v2085_v60 }
  0xc2   :  { %2342 = vmatpush1.bf16.msra.mxu0 %v2341_v62  ;;  %2088 = vmatprep.subr.bf16.mxu1 %v2087_v63 }
  0xc3   :  { %2344 = vmatprep.subr.bf16.mxu0 %v2343_v54 }
  0xc4   :  { %1051 = vmatmul.mubr.f32.vlgmr.msra.gmra.mrb[0].mxu1 %v3595_v28 }
  0xc5   :  { %12 = vsyncpa [#allocation3], 0  ;;  %2090 = vmatpush1.bf16.msra.mxu1 %v2089_v7  ;;  %1335 = vmatmul.mubr.f32.vlgmr.msra.gmra.mrb[0].mxu0 %v3613_v59  ;;  %v2093_v22 = vpack.c.bf16 %v231_v12, %v229_v10  ;;  %v2349_v23 = vpack.c.bf16 %v487_v15, %v485_v13  ;;  %v2095_v28 = vpack.c.bf16 %v236_v17, %v234_v16  ;;  %v233_v24 = vld [vmem:[%s5041_s1 + $0x640] sm:$0xff]  ;;  %v235_v26 = vld [vmem:[%s5041_s1 + $0x650] sm:$0xff]  ;;  %vm841_vm0 = vcmask 130048   ;;  %s2691_s30 = smov [#allocation2]  }
  0xc6   :  { %2346 = vmatpush1.bf16.msra.mxu0 %v2345_v8  ;;  %2092 = vmatprep.subr.bf16.mxu1 %v2091_v9  ;;  %v489_v27 = vld [vmem:[%s5041_s1 + $0xe40] sm:$0xff]  ;;  %v2351_v29 = vpack.c.bf16 %v492_v20, %v490_v19  ;;  %v491_v59 = vld [vmem:[%s5041_s1 + $0xe50] sm:$0xff]  ;;  %v238_v31 = vld [vmem:[%s5041_s1 + $0x668] sm:$0xff]  ;;  %v2097_v36 = vpack.c.bf16 %v235_v26, %v233_v24  ;;  %vm1664_vm1 = vcmask 916480   ;;  %vm1761_vm2 = vcmask 1043456  }
  0xc7   :  { %2348 = vmatprep.subr.bf16.mxu0 %v2347_v14  ;;  %v240_v32 = vld [vmem:[%s5041_s1 + $0x678] sm:$0xff]  ;;  %1121 = vmatprep.mubr.f32.mxu1 %v760_v18  ;;  %v494_v34 = vld [vmem:[%s5041_s1 + $0xe68] sm:$0xff]  ;;  %v2353_v37 = vpack.c.bf16 %v491_v59, %v489_v27  ;;  %v237_v39 = vld [vmem:[%s5041_s1 + $0x660] sm:$0xff]  ;;  %vm2690_vm3 = vmmov 0   ;;  %vm1757_vm4 = vcmask 687104   ;;  %vm1835_vm5 = vcmask 74752  }
  0xc8   :  { %v496_v35 = vld [vmem:[%s5041_s1 + $0xe78] sm:$0xff]  ;;  %1405 = vmatprep.mubr.f32.mxu0 %v794_v21  ;;  %v2099_v38 = vpack.c.bf16 %v240_v32, %v238_v31  ;;  %v239_v40 = vld [vmem:[%s5041_s1 + $0x670] sm:$0xff]  ;;  %v493_v41 = vld [vmem:[%s5041_s1 + $0xe60] sm:$0xff] }
  0xc9   :  { %2094 = vmatpush1.bf16.msra.mxu1 %v2093_v22  ;;  %v2355_v42 = vpack.c.bf16 %v496_v35, %v494_v34  ;;  %v495_v43 = vld [vmem:[%s5041_s1 + $0xe70] sm:$0xff]  ;;  %v242_v44 = vld [vmem:[%s5041_s1 + $0x688] sm:$0xff]  ;;  %v244_v45 = vld [vmem:[%s5041_s1 + $0x698] sm:$0xff]  ;;  %v2101_v48 = vpack.c.bf16 %v239_v40, %v237_v39 }
  0xca   :  { %2350 = vmatpush1.bf16.msra.mxu0 %v2349_v23  ;;  %2096 = vmatprep.subr.bf16.mxu1 %v2095_v28  ;;  %v498_v46 = vld [vmem:[%s5041_s1 + $0xe88] sm:$0xff]  ;;  %v500_v47 = vld [vmem:[%s5041_s1 + $0xe98] sm:$0xff]  ;;  %v2357_v49 = vpack.c.bf16 %v495_v43, %v493_v41  ;;  %v2103_v25 = vpack.c.bf16 %v244_v45, %v242_v44  ;;  %v241_v51 = vld [vmem:[%s5041_s1 + $0x680] sm:$0xff] }
  0xcb   :  { %2352 = vmatprep.subr.bf16.mxu0 %v2351_v29  ;;  %v243_v52 = vld [vmem:[%s5041_s1 + $0x690] sm:$0xff]  ;;  %v497_v53 = vld [vmem:[%s5041_s1 + $0xe80] sm:$0xff]  ;;  %v2359_v55 = vpack.c.bf16 %v500_v47, %v498_v46  ;;  %v246_v57 = vld [vmem:[%s5041_s1 + $0x6a8] sm:$0xff] }
  0xcc   :  { %v499_v56 = vld [vmem:[%s5041_s1 + $0xe90] sm:$0xff]  ;;  %v248_v58 = vld [vmem:[%s5041_s1 + $0x6b8] sm:$0xff]  ;;  %v502_v60 = vld [vmem:[%s5041_s1 + $0xea8] sm:$0xff]  ;;  %v2105_v63 = vpack.c.bf16 %v243_v52, %v241_v51 }
  0xcd   :  { %2098 = vmatpush1.bf16.msra.mxu1 %v2097_v36  ;;  %v504_v62 = vld [vmem:[%s5041_s1 + $0xeb8] sm:$0xff]  ;;  %v2361_v50 = vpack.c.bf16 %v499_v56, %v497_v53  ;;  %v2107_v0 = vpack.c.bf16 %v248_v58, %v246_v57  ;;  %v245_v1 = vld [vmem:[%s5041_s1 + $0x6a0] sm:$0xff]  ;;  %v247_v54 = vld [vmem:[%s5041_s1 + $0x6b0] sm:$0xff] }
  0xce   :  { %2354 = vmatpush1.bf16.msra.mxu0 %v2353_v37  ;;  %2100 = vmatprep.subr.bf16.mxu1 %v2099_v38  ;;  %v501_v30 = vld [vmem:[%s5041_s1 + $0xea0] sm:$0xff]  ;;  %v2363_v2 = vpack.c.bf16 %v504_v62, %v502_v60  ;;  %v503_v3 = vld [vmem:[%s5041_s1 + $0xeb0] sm:$0xff]  ;;  %v250_v33 = vld [vmem:[%s5041_s1 + $0x6c8] sm:$0xff]  ;;  %v2109_v9 = vpack.c.bf16 %v247_v54, %v245_v1 }
  0xcf   :  { %2356 = vmatprep.subr.bf16.mxu0 %v2355_v42  ;;  %v252_v5 = vld [vmem:[%s5041_s1 + $0x6d8] sm:$0xff]  ;;  %v506_v7 = vld [vmem:[%s5041_s1 + $0xec8] sm:$0xff]  ;;  %v2365_v10 = vpack.c.bf16 %v503_v3, %v501_v30  ;;  %v249_v13 = vld [vmem:[%s5041_s1 + $0x6c0] sm:$0xff] }
  0xd0   :  { %v508_v8 = vld [vmem:[%s5041_s1 + $0xed8] sm:$0xff]  ;;  %v2111_v12 = vpack.c.bf16 %v252_v5, %v250_v33  ;;  %v251_v14 = vld [vmem:[%s5041_s1 + $0x6d0] sm:$0xff]  ;;  %v505_v15 = vld [vmem:[%s5041_s1 + $0xec0] sm:$0xff] }
  0xd1   :  { %2102 = vmatpush1.bf16.msra.mxu1 %v2101_v48  ;;  %v2367_v16 = vpack.c.bf16 %v508_v8, %v506_v7  ;;  %v507_v17 = vld [vmem:[%s5041_s1 + $0xed0] sm:$0xff]  ;;  %v254_v18 = vld [vmem:[%s5041_s1 + $0x6e8] sm:$0xff]  ;;  %v256_v19 = vld [vmem:[%s5041_s1 + $0x6f8] sm:$0xff]  ;;  %v2113_v22 = vpack.c.bf16 %v251_v14, %v249_v13 }
  0xd2   :  { %2358 = vmatpush1.bf16.msra.mxu0 %v2357_v49  ;;  %2104 = vmatprep.subr.bf16.mxu1 %v2103_v25  ;;  %v510_v20 = vld [vmem:[%s5041_s1 + $0xee8] sm:$0xff]  ;;  %v512_v21 = vld [vmem:[%s5041_s1 + $0xef8] sm:$0xff]  ;;  %v2369_v23 = vpack.c.bf16 %v507_v17, %v505_v15  ;;  %v2115_v28 = vpack.c.bf16 %v256_v19, %v254_v18  ;;  %v253_v24 = vld [vmem:[%s5041_s1 + $0x6e0] sm:$0xff] }
  0xd3   :  { %2360 = vmatprep.subr.bf16.mxu0 %v2359_v55  ;;  %v255_v26 = vld [vmem:[%s5041_s1 + $0x6f0] sm:$0xff]  ;;  %v509_v27 = vld [vmem:[%s5041_s1 + $0xee0] sm:$0xff]  ;;  %v2371_v29 = vpack.c.bf16 %v512_v21, %v510_v20  ;;  %v258_v31 = vld [vmem:[%s5041_s1 + $0x708] sm:$0xff] }
  0xd4   :  { %v511_v59 = vld [vmem:[%s5041_s1 + $0xef0] sm:$0xff]  ;;  %v260_v32 = vld [vmem:[%s5041_s1 + $0x718] sm:$0xff]  ;;  %v514_v34 = vld [vmem:[%s5041_s1 + $0xf08] sm:$0xff]  ;;  %v2117_v36 = vpack.c.bf16 %v255_v26, %v253_v24 }
  0xd5   :  { %2106 = vmatpush1.bf16.msra.mxu1 %v2105_v63  ;;  %v516_v35 = vld [vmem:[%s5041_s1 + $0xf18] sm:$0xff]  ;;  %v2373_v37 = vpack.c.bf16 %v511_v59, %v509_v27  ;;  %v2119_v38 = vpack.c.bf16 %v260_v32, %v258_v31  ;;  %v257_v39 = vld [vmem:[%s5041_s1 + $0x700] sm:$0xff]  ;;  %v259_v40 = vld [vmem:[%s5041_s1 + $0x710] sm:$0xff] }
  0xd6   :  { %2362 = vmatpush1.bf16.msra.mxu0 %v2361_v50  ;;  %2108 = vmatprep.subr.bf16.mxu1 %v2107_v0  ;;  %v513_v41 = vld [vmem:[%s5041_s1 + $0xf00] sm:$0xff]  ;;  %v2375_v42 = vpack.c.bf16 %v516_v35, %v514_v34  ;;  %v515_v43 = vld [vmem:[%s5041_s1 + $0xf10] sm:$0xff]  ;;  %v262_v44 = vld [vmem:[%s5041_s1 + $0x728] sm:$0xff]  ;;  %v2121_v48 = vpack.c.bf16 %v259_v40, %v257_v39 }
  0xd7   :  { %2364 = vmatprep.subr.bf16.mxu0 %v2363_v2  ;;  %v264_v45 = vld [vmem:[%s5041_s1 + $0x738] sm:$0xff]  ;;  %v518_v46 = vld [vmem:[%s5041_s1 + $0xf28] sm:$0xff]  ;;  %v2377_v49 = vpack.c.bf16 %v515_v43, %v513_v41  ;;  %v261_v51 = vld [vmem:[%s5041_s1 + $0x720] sm:$0xff] }
  0xd8   :  { %v520_v47 = vld [vmem:[%s5041_s1 + $0xf38] sm:$0xff]  ;;  %v2123_v25 = vpack.c.bf16 %v264_v45, %v262_v44  ;;  %v263_v52 = vld [vmem:[%s5041_s1 + $0x730] sm:$0xff]  ;;  %v517_v53 = vld [vmem:[%s5041_s1 + $0xf20] sm:$0xff] }
  0xd9   :  { %2110 = vmatpush1.bf16.msra.mxu1 %v2109_v9  ;;  %v2379_v55 = vpack.c.bf16 %v520_v47, %v518_v46  ;;  %v519_v56 = vld [vmem:[%s5041_s1 + $0xf30] sm:$0xff]  ;;  %v266_v57 = vld [vmem:[%s5041_s1 + $0x748] sm:$0xff]  ;;  %v268_v58 = vld [vmem:[%s5041_s1 + $0x758] sm:$0xff]  ;;  %v2125_v63 = vpack.c.bf16 %v263_v52, %v261_v51 }
  0xda   :  { %2366 = vmatpush1.bf16.msra.mxu0 %v2365_v10  ;;  %2112 = vmatprep.subr.bf16.mxu1 %v2111_v12  ;;  %v522_v60 = vld [vmem:[%s5041_s1 + $0xf48] sm:$0xff]  ;;  %v524_v62 = vld [vmem:[%s5041_s1 + $0xf58] sm:$0xff]  ;;  %v2381_v50 = vpack.c.bf16 %v519_v56, %v517_v53  ;;  %v2127_v0 = vpack.c.bf16 %v268_v58, %v266_v57  ;;  %v265_v1 = vld [vmem:[%s5041_s1 + $0x740] sm:$0xff] }
  0xdb   :  { %2368 = vmatprep.subr.bf16.mxu0 %v2367_v16  ;;  %v267_v54 = vld [vmem:[%s5041_s1 + $0x750] sm:$0xff]  ;;  %v521_v30 = vld [vmem:[%s5041_s1 + $0xf40] sm:$0xff]  ;;  %v2383_v2 = vpack.c.bf16 %v524_v62, %v522_v60  ;;  %v270_v33 = vld [vmem:[%s5041_s1 + $0x768] sm:$0xff] }
  0xdc   :  { %v523_v3 = vld [vmem:[%s5041_s1 + $0xf50] sm:$0xff]  ;;  %v272_v5 = vld [vmem:[%s5041_s1 + $0x778] sm:$0xff]  ;;  %v526_v7 = vld [vmem:[%s5041_s1 + $0xf68] sm:$0xff]  ;;  %v2129_v9 = vpack.c.bf16 %v267_v54, %v265_v1 }
  0xdd   :  { %2114 = vmatpush1.bf16.msra.mxu1 %v2113_v22  ;;  %v528_v8 = vld [vmem:[%s5041_s1 + $0xf78] sm:$0xff]  ;;  %v2385_v10 = vpack.c.bf16 %v523_v3, %v521_v30  ;;  %v2131_v12 = vpack.c.bf16 %v272_v5, %v270_v33  ;;  %v269_v13 = vld [vmem:[%s5041_s1 + $0x760] sm:$0xff]  ;;  %v271_v14 = vld [vmem:[%s5041_s1 + $0x770] sm:$0xff] }
  0xde   :  { %2370 = vmatpush1.bf16.msra.mxu0 %v2369_v23  ;;  %2116 = vmatprep.subr.bf16.mxu1 %v2115_v28  ;;  %v525_v15 = vld [vmem:[%s5041_s1 + $0xf60] sm:$0xff]  ;;  %v2387_v16 = vpack.c.bf16 %v528_v8, %v526_v7  ;;  %v527_v17 = vld [vmem:[%s5041_s1 + $0xf70] sm:$0xff]  ;;  %v274_v18 = vld [vmem:[%s5041_s1 + $0x788] sm:$0xff]  ;;  %v2133_v22 = vpack.c.bf16 %v271_v14, %v269_v13 }
  0xdf   :  { %2372 = vmatprep.subr.bf16.mxu0 %v2371_v29  ;;  %v276_v19 = vld [vmem:[%s5041_s1 + $0x798] sm:$0xff]  ;;  %v530_v20 = vld [vmem:[%s5041_s1 + $0xf88] sm:$0xff]  ;;  %v2389_v23 = vpack.c.bf16 %v527_v17, %v525_v15  ;;  %v273_v24 = vld [vmem:[%s5041_s1 + $0x780] sm:$0xff] }
  0xe0   :  { %v532_v21 = vld [vmem:[%s5041_s1 + $0xf98] sm:$0xff]  ;;  %v2135_v28 = vpack.c.bf16 %v276_v19, %v274_v18  ;;  %v275_v26 = vld [vmem:[%s5041_s1 + $0x790] sm:$0xff]  ;;  %v529_v27 = vld [vmem:[%s5041_s1 + $0xf80] sm:$0xff] }
  0xe1   :  { %2118 = vmatpush1.bf16.msra.mxu1 %v2117_v36  ;;  %v2391_v29 = vpack.c.bf16 %v532_v21, %v530_v20  ;;  %v531_v59 = vld [vmem:[%s5041_s1 + $0xf90] sm:$0xff]  ;;  %v278_v31 = vld [vmem:[%s5041_s1 + $0x7a8] sm:$0xff]  ;;  %v280_v32 = vld [vmem:[%s5041_s1 + $0x7b8] sm:$0xff]  ;;  %v2137_v36 = vpack.c.bf16 %v275_v26, %v273_v24 }
  0xe2   :  { %2374 = vmatpush1.bf16.msra.mxu0 %v2373_v37  ;;  %2120 = vmatprep.subr.bf16.mxu1 %v2119_v38  ;;  %v534_v34 = vld [vmem:[%s5041_s1 + $0xfa8] sm:$0xff]  ;;  %v536_v35 = vld [vmem:[%s5041_s1 + $0xfb8] sm:$0xff]  ;;  %v2393_v37 = vpack.c.bf16 %v531_v59, %v529_v27  ;;  %v2139_v38 = vpack.c.bf16 %v280_v32, %v278_v31  ;;  %v277_v39 = vld [vmem:[%s5041_s1 + $0x7a0] sm:$0xff] }
  0xe3   :  { %2376 = vmatprep.subr.bf16.mxu0 %v2375_v42  ;;  %v279_v40 = vld [vmem:[%s5041_s1 + $0x7b0] sm:$0xff]  ;;  %v533_v41 = vld [vmem:[%s5041_s1 + $0xfa0] sm:$0xff]  ;;  %v2395_v42 = vpack.c.bf16 %v536_v35, %v534_v34  ;;  %v282_v44 = vld [vmem:[%s5041_s1 + $0x7c8] sm:$0xff] }
  0xe4   :  { %v535_v43 = vld [vmem:[%s5041_s1 + $0xfb0] sm:$0xff]  ;;  %v284_v45 = vld [vmem:[%s5041_s1 + $0x7d8] sm:$0xff]  ;;  %v538_v46 = vld [vmem:[%s5041_s1 + $0xfc8] sm:$0xff] }
  0xe5   :  { %2122 = vmatpush1.bf16.msra.mxu1 %v2121_v48  ;;  %v540_v47 = vld [vmem:[%s5041_s1 + $0xfd8] sm:$0xff]  ;;  %v2141_v48 = vpack.c.bf16 %v279_v40, %v277_v39  ;;  %v281_v51 = vld [vmem:[%s5041_s1 + $0x7c0] sm:$0xff]  ;;  %v283_v52 = vld [vmem:[%s5041_s1 + $0x7d0] sm:$0xff] }
  0xe6   :  { %2378 = vmatpush1.bf16.msra.mxu0 %v2377_v49  ;;  %2124 = vmatprep.subr.bf16.mxu1 %v2123_v25  ;;  %v2397_v49 = vpack.c.bf16 %v535_v43, %v533_v41  ;;  %v2143_v25 = vpack.c.bf16 %v284_v45, %v282_v44  ;;  %v537_v53 = vld [vmem:[%s5041_s1 + $0xfc0] sm:$0xff]  ;;  %v539_v56 = vld [vmem:[%s5041_s1 + $0xfd0] sm:$0xff]  ;;  %v286_v57 = vld [vmem:[%s5041_s1 + $0x7e8] sm:$0xff] }
  0xe7   :  { %2380 = vmatprep.subr.bf16.mxu0 %v2379_v55  ;;  %v2399_v55 = vpack.c.bf16 %v540_v47, %v538_v46  ;;  %v288_v58 = vld [vmem:[%s5041_s1 + $0x7f8] sm:$0xff]  ;;  %v542_v60 = vld [vmem:[%s5041_s1 + $0xfe8] sm:$0xff]  ;;  %v287_v54 = vld [vmem:[%s5041_s1 + $0x7f0] sm:$0xff] }
  0xe8   :  { %v544_v62 = vld [vmem:[%s5041_s1 + $0xff8] sm:$0xff]  ;;  %v2147_v1 = vpack.c.bf16 %v288_v58, %v286_v57  ;;  %v541_v30 = vld [vmem:[%s5041_s1 + $0xfe0] sm:$0xff]  ;;  %v674_v5 = vld [vmem:[%s5041_s1 + $0x1408] sm:$0xff] }
  0xe9   :  { %2126 = vmatpush1.bf16.msra.mxu1 %v2125_v63  ;;  %v2145_v63 = vpack.c.bf16 %v283_v52, %v281_v51  ;;  %v2403_v3 = vpack.c.bf16 %v544_v62, %v542_v60  ;;  %v4354_v33 = vld [vmem:[%s5040_s0 + $0x20] sm:$0xff]  ;;  %v676_v7 = vld [vmem:[%s5041_s1 + $0x1418] sm:$0xff]  ;;  %v546_v8 = vld [vmem:[%s5041_s1 + $0x1008] sm:$0xff] }
  0xea   :  { %2382 = vmatpush1.bf16.msra.mxu0 %v2381_v50  ;;  %2128 = vmatprep.subr.bf16.mxu1 %v2127_v0  ;;  %v285_v50 = vld [vmem:[%s5041_s1 + $0x7e0] sm:$0xff]  ;;  %v2401_v0 = vpack.c.bf16 %v539_v56, %v537_v53  ;;  %v4370_v13 = vrot.slane %v4354_v33, %v3011_v11  ;;  %v2535_v14 = vpack.c.bf16 %v676_v7, %v674_v5  ;;  %v547_v19 = vld [vmem:[%s5041_s1 + $0x1010] sm:$0xff]  ;;  %v550_v20 = vld [vmem:[%s5041_s1 + $0x1028] sm:$0xff] }
  0xeb   :  { %2384 = vmatprep.subr.bf16.mxu0 %v2383_v2  ;;  %v543_v2 = vld [vmem:[%s5041_s1 + $0xff0] sm:$0xff]  ;;  %v673_v15 = vld [vmem:[%s5041_s1 + $0x1400] sm:$0xff]  ;;  %v552_v21 = vld [vmem:[%s5041_s1 + $0x1038] sm:$0xff] }
  0xec   :  { %v545_v18 = vld [vmem:[%s5041_s1 + $0x1000] sm:$0xff]  ;;  %v810_v27 = vcombine.high %v4370_v13, %v4370_v13  ;;  %v679_v59 = vld [vmem:[%s5041_s1 + $0x1430] sm:$0xff]  ;;  %v4410_v31 = vld.sshfl [vmem:[%s5040_s0 + $0x28] sm:$0x33 pattern:$0x76325410]  ;;  %v2411_v32 = vpack.c.bf16 %v552_v21, %v550_v20 }
  0xed   :  { %2130 = vmatpush1.bf16.msra.mxu1 %v2129_v9  ;;  %v548_v9 = vld [vmem:[%s5041_s1 + $0x1018] sm:$0xff]  ;;  %v2409_v26 = vpack.c.bf16 %v547_v19, %v545_v18  ;;  %v551_v34 = vld [vmem:[%s5041_s1 + $0x1030] sm:$0xff]  ;;  %v819_v40 = vcombine.high %v4410_v31, %v4410_v31  ;;  %v681_v44 = vld [vmem:[%s5041_s1 + $0x1440] sm:$0xff] }
  0xee   :  { %2386 = vmatpush1.bf16.msra.mxu0 %v2385_v10  ;;  %2132 = vmatprep.subr.bf16.mxu1 %v2131_v12  ;;  %v2149_v10 = vpack.c.bf16 %v287_v54, %v285_v50  ;;  %v2405_v12 = vpack.c.bf16 %v543_v2, %v541_v30  ;;  %v2407_v17 = vpack.c.bf16 %v548_v9, %v546_v8  ;;  %v556_v39 = vld [vmem:[%s5041_s1 + $0x1058] sm:$0xff]  ;;  %v683_v45 = vld [vmem:[%s5041_s1 + $0x1450] sm:$0xff]  ;;  %v686_v47 = vld [vmem:[%s5041_s1 + $0x1468] sm:$0xff] }
  0xef   :  { %2388 = vmatprep.subr.bf16.mxu0 %v2387_v16  ;;  %v675_v16 = vld [vmem:[%s5041_s1 + $0x1410] sm:$0xff]  ;;  %v2545_v51 = vpack.c.bf16 %v683_v45, %v681_v44  ;;  %v557_v53 = vld [vmem:[%s5041_s1 + $0x1060] sm:$0xff]  ;;  %v690_v62 = vld [vmem:[%s5041_s1 + $0x1488] sm:$0xff] }
  0xf0   :  { %v2537_v24 = vpack.c.bf16 %v675_v16, %v673_v15  ;;  %v555_v46 = vld [vmem:[%s5041_s1 + $0x1050] sm:$0xff]  ;;  %v685_v56 = vld [vmem:[%s5041_s1 + $0x1460] sm:$0xff]  ;;  %v562_v50 = vld [vmem:[%s5041_s1 + $0x1088] sm:$0xff] }
  0xf1   :  { %2134 = vmatpush1.bf16.msra.mxu1 %v2133_v22  ;;  %v678_v22 = vld [vmem:[%s5041_s1 + $0x1428] sm:$0xff]  ;;  %v687_v57 = vld [vmem:[%s5041_s1 + $0x1470] sm:$0xff]  ;;  %v561_v30 = vld [vmem:[%s5041_s1 + $0x1080] sm:$0xff] }
  0xf2   :  { %2390 = vmatpush1.bf16.msra.mxu0 %v2389_v23  ;;  %2136 = vmatprep.subr.bf16.mxu1 %v2135_v28  ;;  %v680_v23 = vld [vmem:[%s5041_s1 + $0x1438] sm:$0xff]  ;;  %v549_v28 = vld [vmem:[%s5041_s1 + $0x1020] sm:$0xff]  ;;  %v559_v60 = vld [vmem:[%s5041_s1 + $0x1070] sm:$0xff] }
  0xf3   :  { %2392 = vmatprep.subr.bf16.mxu0 %v2391_v29  ;;  %v677_v29 = vld [vmem:[%s5041_s1 + $0x1420] sm:$0xff]  ;;  %v2539_v35 = vpack.c.bf16 %v680_v23, %v678_v22  ;;  %v2421_v54 = vpack.c.bf16 %v559_v60, %v557_v53  ;;  %v691_v5 = vld [vmem:[%s5041_s1 + $0x1490] sm:$0xff]  ;;  %v694_v9 = vld [vmem:[%s5041_s1 + $0x14a8] sm:$0xff] }
  0xf4   :  { %v2541_v41 = vpack.c.bf16 %v679_v59, %v677_v29  ;;  %v563_v8 = vld [vmem:[%s5041_s1 + $0x1090] sm:$0xff]  ;;  %v693_v19 = vld [vmem:[%s5041_s1 + $0x14a0] sm:$0xff]  ;;  %v698_v23 = vld [vmem:[%s5041_s1 + $0x14c8] sm:$0xff] }
  0xf5   :  { %2138 = vmatpush1.bf16.msra.mxu1 %v2137_v36  ;;  %v682_v36 = vld [vmem:[%s5041_s1 + $0x1448] sm:$0xff]  ;;  %v2425_v16 = vpack.c.bf16 %v563_v8, %v561_v30  ;;  %v695_v20 = vld [vmem:[%s5041_s1 + $0x14b0] sm:$0xff]  ;;  %v569_v59 = vld [vmem:[%s5041_s1 + $0x10c0] sm:$0xff] }
  0xf6   :  { %2394 = vmatpush1.bf16.msra.mxu0 %v2393_v37  ;;  %2140 = vmatprep.subr.bf16.mxu1 %v2139_v38  ;;  %v684_v37 = vld [vmem:[%s5041_s1 + $0x1458] sm:$0xff]  ;;  %v554_v38 = vld [vmem:[%s5041_s1 + $0x1048] sm:$0xff]  ;;  %v567_v22 = vld [vmem:[%s5041_s1 + $0x10b0] sm:$0xff] }
  0xf7   :  { %2396 = vmatprep.subr.bf16.mxu0 %v2395_v42  ;;  %v2413_v42 = vpack.c.bf16 %v551_v34, %v549_v28  ;;  %v2543_v43 = vpack.c.bf16 %v684_v37, %v682_v36  ;;  %v700_v28 = vld [vmem:[%s5041_s1 + $0x14d8] sm:$0xff]  ;;  %v697_v34 = vld [vmem:[%s5041_s1 + $0x14c0] sm:$0xff]  ;;  %v571_v37 = vld [vmem:[%s5041_s1 + $0x10d0] sm:$0xff] }
  0xf8   :  { %v701_v45 = vld [vmem:[%s5041_s1 + $0x14e0] sm:$0xff] }
  0xf9   :  { %2142 = vmatpush1.bf16.msra.mxu1 %v2141_v48  ;;  %v688_v48 = vld [vmem:[%s5041_s1 + $0x1478] sm:$0xff]  ;;  %v577_v60 = vld [vmem:[%s5041_s1 + $0x1100] sm:$0xff] }
  0xfa   :  { %2398 = vmatpush1.bf16.msra.mxu0 %v2397_v49  ;;  %2144 = vmatprep.subr.bf16.mxu1 %v2143_v25  ;;  %v558_v49 = vld [vmem:[%s5041_s1 + $0x1068] sm:$0xff]  ;;  %v560_v25 = vld [vmem:[%s5041_s1 + $0x1078] sm:$0xff]  ;;  %v581_v30 = vld [vmem:[%s5041_s1 + $0x1120] sm:$0xff] }
  0xfb   :  { %2400 = vmatprep.subr.bf16.mxu0 %v2399_v55  ;;  %v2547_v55 = vpack.c.bf16 %v688_v48, %v686_v47  ;;  %v2419_v58 = vpack.c.bf16 %v560_v25, %v558_v49  ;;  %v575_v47 = vld [vmem:[%s5041_s1 + $0x10f0] sm:$0xff]  ;;  %v706_v48 = vld [vmem:[%s5041_s1 + $0x1508] sm:$0xff]  ;;  %v708_v49 = vld [vmem:[%s5041_s1 + $0x1518] sm:$0xff] }
  0xfc   :  { %v578_v25 = vld [vmem:[%s5041_s1 + $0x1108] sm:$0xff] }
  0xfd   :  { %2146 = vmatpush1.bf16.msra.mxu1 %v2145_v63  ;;  %v692_v63 = vld [vmem:[%s5041_s1 + $0x1498] sm:$0xff] }
  0xfe   :  { %2402 = vmatpush1.bf16.msra.mxu0 %v2401_v0  ;;  %2148 = vmatprep.subr.bf16.mxu1 %v2147_v1  ;;  %v564_v0 = vld [vmem:[%s5041_s1 + $0x1098] sm:$0xff]  ;;  %v2549_v1 = vpack.c.bf16 %v687_v57, %v685_v56  ;;  %v2551_v2 = vpack.c.bf16 %v692_v63, %v690_v62  ;;  %v705_v56 = vld [vmem:[%s5041_s1 + $0x1500] sm:$0xff]  ;;  %v707_v57 = vld [vmem:[%s5041_s1 + $0x1510] sm:$0xff] }
  0xff   :  { %2404 = vmatprep.subr.bf16.mxu0 %v2403_v3  ;;  %v689_v3 = vld [vmem:[%s5041_s1 + $0x1480] sm:$0xff]  ;;  %v2423_v7 = vpack.c.bf16 %v564_v0, %v562_v50  ;;  %v579_v62 = vld [vmem:[%s5041_s1 + $0x1110] sm:$0xff]  ;;  %v582_v63 = vld [vmem:[%s5041_s1 + $0x1128] sm:$0xff]  ;;  %v2569_v0 = vpack.c.bf16 %v707_v57, %v705_v56 }
 0x100   :  { %v2553_v15 = vpack.c.bf16 %v691_v5, %v689_v3  ;;  %v584_v50 = vld [vmem:[%s5041_s1 + $0x1138] sm:$0xff]  ;;  %v586_v3 = vld [vmem:[%s5041_s1 + $0x1148] sm:$0xff]  ;;  %v615_v56 = vld [vmem:[%s5041_s1 + $0x1230] sm:$0xff] }
 0x101   :  { %2150 = vmatpush1.bf16.msra.mxu1 %v2149_v10  ;;  %v696_v10 = vld [vmem:[%s5041_s1 + $0x14b8] sm:$0xff]  ;;  %v618_v57 = vld [vmem:[%s5041_s1 + $0x1248] sm:$0xff] }
 0x102   :  { %2406 = vmatpush1.bf16.msra.mxu0 %v2405_v12  ;;  %2536 = vmatprep.subr.bf16.mxu1 %v2535_v14  ;;  %v566_v12 = vld [vmem:[%s5041_s1 + $0x10a8] sm:$0xff]  ;;  %v568_v14 = vld [vmem:[%s5041_s1 + $0x10b8] sm:$0xff]  ;;  %v2555_v18 = vpack.c.bf16 %v696_v10, %v694_v9  ;;  %v585_v9 = vld [vmem:[%s5041_s1 + $0x1140] sm:$0xff] }
 0x103   :  { %2408 = vmatprep.subr.bf16.mxu0 %v2407_v17  ;;  %v565_v17 = vld [vmem:[%s5041_s1 + $0x10a0] sm:$0xff]  ;;  %v2427_v21 = vpack.c.bf16 %v568_v14, %v566_v12  ;;  %v588_v5 = vld [vmem:[%s5041_s1 + $0x1158] sm:$0xff]  ;;  %v587_v10 = vld [vmem:[%s5041_s1 + $0x1150] sm:$0xff] }
 0x104   :  { %1122 = vmatmul.mubr.f32.vlgmr.msra.gmra.mrb[0].mxu1 %v3986_v4  ;;  %v553_v4 = vld [vmem:[%s5041_s1 + $0x1040] sm:$0xff]  ;;  %v2429_v29 = vpack.c.bf16 %v567_v22, %v565_v17  ;;  %v2447_v8 = vpack.c.bf16 %v588_v5, %v586_v3  ;;  %v590_v12 = vld [vmem:[%s5041_s1 + $0x1168] sm:$0xff]  ;;  %v592_v14 = vld [vmem:[%s5041_s1 + $0x1178] sm:$0xff] }
 0x105   :  { %1406 = vmatmul.mubr.f32.vlgmr.msra.gmra.mrb[0].mxu0 %v3995_v6  ;;  %2538 = vmatpush1.bf16.msra.mxu1 %v2537_v24  ;;  %v2415_v6 = vpack.c.bf16 %v556_v39, %v554_v38  ;;  %v2417_v52 = vpack.c.bf16 %v555_v46, %v553_v4  ;;  %v570_v24 = vld [vmem:[%s5041_s1 + $0x10c8] sm:$0xff]  ;;  %v704_v39 = vld [vmem:[%s5041_s1 + $0x14f8] sm:$0xff]  ;;  %v2433_v4 = vpack.c.bf16 %v571_v37, %v569_v59  ;;  %v589_v17 = vld [vmem:[%s5041_s1 + $0x1160] sm:$0xff] }
 0x106   :  { %2410 = vmatpush1.bf16.msra.mxu0 %v2409_v26  ;;  %1476 = vmatprep.mubr.f32.mxu0 %v810_v27  ;;  %v572_v26 = vld [vmem:[%s5041_s1 + $0x10d8] sm:$0xff]  ;;  %v2557_v27 = vpack.c.bf16 %v695_v20, %v693_v19  ;;  %v702_v38 = vld [vmem:[%s5041_s1 + $0x14e8] sm:$0xff]  ;;  %v593_v22 = vld [vmem:[%s5041_s1 + $0x1180] sm:$0xff] }
 0x107   :  { %2412 = vmatprep.subr.bf16.mxu0 %v2411_v32  ;;  %2540 = vmatprep.subr.bf16.mxu1 %v2539_v35  ;;  %v2559_v32 = vpack.c.bf16 %v700_v28, %v698_v23  ;;  %v699_v35 = vld [vmem:[%s5041_s1 + $0x14d0] sm:$0xff]  ;;  %v2431_v36 = vpack.c.bf16 %v572_v26, %v570_v24  ;;  %v2563_v44 = vpack.c.bf16 %v704_v39, %v702_v38  ;;  %v594_v19 = vld [vmem:[%s5041_s1 + $0x1188] sm:$0xff]  ;;  %v600_v24 = vld [vmem:[%s5041_s1 + $0x11b8] sm:$0xff] }
 0x108   :  { %1852 = vmatprep.mubr.msk.f32.mxu1 %vm841_vm0, %v819_v40  ;;  %v574_v40 = vld [vmem:[%s5041_s1 + $0x10e8] sm:$0xff]  ;;  %v595_v23 = vld [vmem:[%s5041_s1 + $0x1190] sm:$0xff]  ;;  %v601_v37 = vld [vmem:[%s5041_s1 + $0x11c0] sm:$0xff] }
 0x109   :  { %2542 = vmatpush1.bf16.msra.mxu1 %v2541_v41  ;;  %v576_v41 = vld [vmem:[%s5041_s1 + $0x10f8] sm:$0xff]  ;;  %v598_v28 = vld [vmem:[%s5041_s1 + $0x11a8] sm:$0xff]  ;;  %v2457_v26 = vpack.c.bf16 %v595_v23, %v593_v22  ;;  %v599_v59 = vld [vmem:[%s5041_s1 + $0x11b0] sm:$0xff] }
 0x10a   :  { %2414 = vmatpush1.bf16.msra.mxu0 %v2413_v42  ;;  %2544 = vmatprep.subr.bf16.mxu1 %v2543_v43  ;;  %v2561_v42 = vpack.c.bf16 %v699_v35, %v697_v34  ;;  %v573_v43 = vld [vmem:[%s5041_s1 + $0x10e0] sm:$0xff]  ;;  %v2435_v46 = vpack.c.bf16 %v576_v41, %v574_v40  ;;  %v604_v34 = vld [vmem:[%s5041_s1 + $0x11d8] sm:$0xff]  ;;  %v603_v38 = vld [vmem:[%s5041_s1 + $0x11d0] sm:$0xff] }
 0x10b   :  { %2416 = vmatprep.subr.bf16.mxu0 %v2415_v6  ;;  %v703_v6 = vld [vmem:[%s5041_s1 + $0x14f0] sm:$0xff]  ;;  %v2437_v53 = vpack.c.bf16 %v575_v47, %v573_v43  ;;  %v606_v39 = vld [vmem:[%s5041_s1 + $0x11e8] sm:$0xff]  ;;  %v608_v40 = vld [vmem:[%s5041_s1 + $0x11f8] sm:$0xff]  ;;  %v2465_v41 = vpack.c.bf16 %v603_v38, %v601_v37 }
 0x10c   :  { %v605_v43 = vld [vmem:[%s5041_s1 + $0x11e0] sm:$0xff]  ;;  %v626_v3 = vld [vmem:[%s5041_s1 + $0x1288] sm:$0xff]  ;;  %v628_v5 = vld [vmem:[%s5041_s1 + $0x1298] sm:$0xff] }
 0x10d   :  { %2546 = vmatpush1.bf16.msra.mxu1 %v2545_v51  ;;  %v580_v51 = vld [vmem:[%s5041_s1 + $0x1118] sm:$0xff]  ;;  %v633_v22 = vld [vmem:[%s5041_s1 + $0x12c0] sm:$0xff]  ;;  %v635_v23 = vld [vmem:[%s5041_s1 + $0x12d0] sm:$0xff] }
 0x10e   :  { %2418 = vmatpush1.bf16.msra.mxu0 %v2417_v52  ;;  %2548 = vmatprep.subr.bf16.mxu1 %v2547_v55  ;;  %v2565_v52 = vpack.c.bf16 %v703_v6, %v701_v45  ;;  %v2567_v55 = vpack.c.bf16 %v708_v49, %v706_v48  ;;  %v610_v45 = vld [vmem:[%s5041_s1 + $0x1208] sm:$0xff]  ;;  %v612_v6 = vld [vmem:[%s5041_s1 + $0x1218] sm:$0xff]  ;;  %v609_v48 = vld [vmem:[%s5041_s1 + $0x1200] sm:$0xff] }
 0x10f   :  { %2420 = vmatprep.subr.bf16.mxu0 %v2419_v58  ;;  %v2439_v58 = vpack.c.bf16 %v580_v51, %v578_v25  ;;  %v2471_v47 = vpack.c.bf16 %v612_v6, %v610_v45  ;;  %v611_v49 = vld [vmem:[%s5041_s1 + $0x1210] sm:$0xff]  ;;  %v614_v25 = vld [vmem:[%s5041_s1 + $0x1228] sm:$0xff]  ;;  %v616_v51 = vld [vmem:[%s5041_s1 + $0x1238] sm:$0xff] }
 0x110   :  { %v637_v37 = vld [vmem:[%s5041_s1 + $0x12e0] sm:$0xff]  ;;  %v639_v38 = vld [vmem:[%s5041_s1 + $0x12f0] sm:$0xff] }
 0x111   :  { %2550 = vmatpush1.bf16.msra.mxu1 %v2549_v1  ;;  %v2441_v1 = vpack.c.bf16 %v579_v62, %v577_v60  ;;  %v641_v45 = vld [vmem:[%s5041_s1 + $0x1300] sm:$0xff]  ;;  %v643_v6 = vld [vmem:[%s5041_s1 + $0x1310] sm:$0xff] }
 0x112   :  { %2422 = vmatpush1.bf16.msra.mxu0 %v2421_v54  ;;  %2552 = vmatprep.subr.bf16.mxu1 %v2551_v2  ;;  %v2443_v54 = vpack.c.bf16 %v584_v50, %v582_v63  ;;  %v583_v2 = vld [vmem:[%s5041_s1 + $0x1130] sm:$0xff]  ;;  %v617_v63 = vld [vmem:[%s5041_s1 + $0x1240] sm:$0xff] }
 0x113   :  { %2424 = vmatprep.subr.bf16.mxu0 %v2423_v7  ;;  %v2445_v7 = vpack.c.bf16 %v583_v2, %v581_v30  ;;  %v619_v50 = vld [vmem:[%s5041_s1 + $0x1250] sm:$0xff]  ;;  %v621_v30 = vld [vmem:[%s5041_s1 + $0x1260] sm:$0xff] }
 0x114   :  { %v623_v2 = vld [vmem:[%s5041_s1 + $0x1270] sm:$0xff] }
 0x115   :  { %2554 = vmatpush1.bf16.msra.mxu1 %v2553_v15  ;;  %v2449_v15 = vpack.c.bf16 %v587_v10, %v585_v9  ;;  %v625_v9 = vld [vmem:[%s5041_s1 + $0x1280] sm:$0xff]  ;;  %v627_v10 = vld [vmem:[%s5041_s1 + $0x1290] sm:$0xff] }
 0x116   :  { %2426 = vmatpush1.bf16.msra.mxu0 %v2425_v16  ;;  %2556 = vmatprep.subr.bf16.mxu1 %v2555_v18  ;;  %v2451_v16 = vpack.c.bf16 %v592_v14, %v590_v12  ;;  %v591_v18 = vld [vmem:[%s5041_s1 + $0x1170] sm:$0xff]  ;;  %v630_v12 = vld [vmem:[%s5041_s1 + $0x12a8] sm:$0xff]  ;;  %v632_v14 = vld [vmem:[%s5041_s1 + $0x12b8] sm:$0xff] }
 0x117   :  { %2428 = vmatprep.subr.bf16.mxu0 %v2427_v21  ;;  %v2453_v20 = vpack.c.bf16 %v591_v18, %v589_v17  ;;  %v629_v17 = vld [vmem:[%s5041_s1 + $0x12a0] sm:$0xff]  ;;  %v631_v18 = vld [vmem:[%s5041_s1 + $0x12b0] sm:$0xff] }
 0x119   :  { %2558 = vmatpush1.bf16.msra.mxu1 %v2557_v27  ;;  %v2459_v27 = vpack.c.bf16 %v600_v24, %v598_v28  ;;  %v638_v28 = vld [vmem:[%s5041_s1 + $0x12e8] sm:$0xff]  ;;  %v640_v24 = vld [vmem:[%s5041_s1 + $0x12f8] sm:$0xff] }
 0x11a   :  { %2430 = vmatpush1.bf16.msra.mxu0 %v2429_v29  ;;  %2560 = vmatprep.subr.bf16.mxu1 %v2559_v32  ;;  %v597_v29 = vld [vmem:[%s5041_s1 + $0x11a0] sm:$0xff]  ;;  %v602_v32 = vld [vmem:[%s5041_s1 + $0x11c8] sm:$0xff] }
 0x11b   :  { %2432 = vmatprep.subr.bf16.mxu0 %v2431_v36  ;;  %v2461_v35 = vpack.c.bf16 %v599_v59, %v597_v29  ;;  %v2463_v36 = vpack.c.bf16 %v604_v34, %v602_v32  ;;  %v1629_v29 = vld [vmem:[%s5043_s3 + $0x10] sm:$0xff]  ;;  %v2497_v59 = vpack.c.bf16 %v635_v23, %v633_v22  ;;  %v2688_v32 = vmov 0.0|0.0   ;;  %v1642_v23 = vld [vmem:[%s5043_s3 + $0x78] sm:$0xff] }
 0x11c   :  { %v1641_v22 = vld [vmem:[%s5043_s3 + $0x70] sm:$0xff] }
 0x11d   :  { %2562 = vmatpush1.bf16.msra.mxu1 %v2561_v42  ;;  %v795_v42 = vcombine.high %v4354_v33, %v4354_v33 }
 0x11e   :  { %2434 = vmatpush1.bf16.msra.mxu0 %v2433_v4  ;;  %2564 = vmatprep.subr.bf16.mxu1 %v2563_v44  ;;  %v2467_v4 = vpack.c.bf16 %v608_v40, %v606_v39  ;;  %v607_v44 = vld [vmem:[%s5041_s1 + $0x11f0] sm:$0xff]  ;;  %v642_v39 = vld [vmem:[%s5041_s1 + $0x1308] sm:$0xff]  ;;  %v644_v40 = vld [vmem:[%s5041_s1 + $0x1318] sm:$0xff] }
 0x11f   :  { %2436 = vmatprep.subr.bf16.mxu0 %v2435_v46  ;;  %v2469_v33 = vpack.c.bf16 %v607_v44, %v605_v43  ;;  %v4682_v46 = vrot.slane %v795_v42, %v3011_v11  ;;  %v2473_v11 = vpack.c.bf16 %v611_v49, %v609_v48  ;;  %v1631_v42 = vld [vmem:[%s5043_s3 + $0x20] sm:$0xff]  ;;  %v2501_v43 = vpack.c.bf16 %v639_v38, %v637_v37  ;;  %v1633_v49 = vld [vmem:[%s5043_s3 + $0x30] sm:$0xff] }
 0x120   :  { %v2503_v44 = vpack.c.bf16 %v644_v40, %v642_v39  ;;  %v665_v39 = vld [vmem:[%s5041_s1 + $0x13c0] sm:$0xff]  ;;  %v667_v40 = vld [vmem:[%s5041_s1 + $0x13d0] sm:$0xff] }
 0x121   :  { %2566 = vmatpush1.bf16.msra.mxu1 %v2565_v52  ;;  %v811_v52 = vcombine.high %v4682_v46, %v4682_v46 }
 0x122   :  { %2438 = vmatpush1.bf16.msra.mxu0 %v2437_v53  ;;  %2568 = vmatprep.subr.bf16.mxu1 %v2567_v55  ;;  %v2475_v53 = vpack.c.bf16 %v616_v51, %v614_v25  ;;  %v613_v55 = vld [vmem:[%s5041_s1 + $0x1220] sm:$0xff]  ;;  %v1634_v25 = vld [vmem:[%s5043_s3 + $0x38] sm:$0xff]  ;;  %v2505_v51 = vpack.c.bf16 %v643_v6, %v641_v45  ;;  %v2529_v45 = vpack.c.bf16 %v667_v40, %v665_v39  ;;  %v1749_v39 = vld [vmem:[%s5045_s5 + $0x50] sm:$0xf] }
 0x123   :  { %2440 = vmatprep.subr.bf16.mxu0 %v2439_v58  ;;  %v620_v58 = vld [vmem:[%s5041_s1 + $0x1258] sm:$0xff]  ;;  %v2477_v60 = vpack.c.bf16 %v615_v56, %v613_v55  ;;  %v650_v55 = vld [vmem:[%s5041_s1 + $0x1348] sm:$0xff] }
 0x124   :  { %v2479_v62 = vpack.c.bf16 %v620_v58, %v618_v57  ;;  %v652_v56 = vld [vmem:[%s5041_s1 + $0x1358] sm:$0xff]  ;;  %v2581_v57 = vpack.c.bf16 %v1634_v25, %v1633_v49  ;;  %v1635_v58 = vld [vmem:[%s5043_s3 + $0x40] sm:$0xff]  ;;  %v1648_v25 = vld [vmem:[%s5043_s3 + $0xa8] sm:$0xff] }
 0x125   :  { %2570 = vmatpush1.bf16.msra.mxu1 %v2569_v0  ;;  %v622_v0 = vld [vmem:[%s5041_s1 + $0x1268] sm:$0xff]  ;;  %v1647_v49 = vld [vmem:[%s5043_s3 + $0xa0] sm:$0xff] }
 0x126   :  { %2442 = vmatpush1.bf16.msra.mxu0 %v2441_v1  ;;  %v2481_v1 = vpack.c.bf16 %v619_v50, %v617_v63  ;;  %2571 = vmatprep.subr.bf16.mxu1 %v2688_v32  ;;  %v2511_v63 = vpack.c.bf16 %v652_v56, %v650_v55  ;;  %v649_v50 = vld [vmem:[%s5041_s1 + $0x1340] sm:$0xff] }
 0x127   :  { %2444 = vmatprep.subr.bf16.mxu0 %v2443_v54  ;;  %v1651_v56 = vld [vmem:[%s5043_s3 + $0xc0] sm:$0xff] }
 0x128   :  { %1619 = vmatmul.mubr.f32.vlgmr.msra.gmra.mrb[2].mxu1 %v4410_v31  ;;  %v596_v31 = vld [vmem:[%s5041_s1 + $0x1198] sm:$0xff] }
 0x129   :  { %v2455_v21 = vpack.c.bf16 %v596_v31, %v594_v19  ;;  %v634_v19 = vld [vmem:[%s5041_s1 + $0x12c8] sm:$0xff]  ;;  %v636_v31 = vld [vmem:[%s5041_s1 + $0x12d8] sm:$0xff] }
 0x12a   :  { %2446 = vmatpush1.bf16.msra.mxu0 %v2445_v7  ;;  %v2485_v7 = vpack.c.bf16 %v623_v2, %v621_v30  ;;  %v1637_v30 = vld [vmem:[%s5043_s3 + $0x50] sm:$0xff]  ;;  %v1638_v2 = vld [vmem:[%s5043_s3 + $0x58] sm:$0xff] }
 0x12b   :  { %2448 = vmatprep.subr.bf16.mxu0 %v2447_v8  ;;  %v2487_v8 = vpack.c.bf16 %v628_v5, %v626_v3 }
 0x12e   :  { %2450 = vmatpush1.bf16.msra.mxu0 %v2449_v15  ;;  %v2489_v15 = vpack.c.bf16 %v627_v10, %v625_v9  ;;  %v658_v9 = vld [vmem:[%s5041_s1 + $0x1388] sm:$0xff]  ;;  %v660_v10 = vld [vmem:[%s5041_s1 + $0x1398] sm:$0xff] }
 0x12f   :  { %2452 = vmatprep.subr.bf16.mxu0 %v2451_v16  ;;  %v2491_v16 = vpack.c.bf16 %v632_v14, %v630_v12  ;;  %v2587_v12 = vpack.c.bf16 %v1638_v2, %v1637_v30  ;;  %v1639_v14 = vld [vmem:[%s5043_s3 + $0x60] sm:$0xff]  ;;  %v713_v2 = vsub.s32 0, %v2984_v61 }
 0x132   :  { %2454 = vmatpush1.bf16.msra.mxu0 %v2453_v20  ;;  %v2493_v20 = vpack.c.bf16 %v631_v18, %v629_v17  ;;  %v2519_v17 = vpack.c.bf16 %v660_v10, %v658_v9  ;;  %v657_v18 = vld [vmem:[%s5041_s1 + $0x1380] sm:$0xff] }
 0x133   :  { %2456 = vmatprep.subr.bf16.mxu0 %v2455_v21  ;;  %v2495_v21 = vpack.c.bf16 %v636_v31, %v634_v19  ;;  %v659_v19 = vld [vmem:[%s5041_s1 + $0x1390] sm:$0xff]  ;;  %v662_v31 = vld [vmem:[%s5041_s1 + $0x13a8] sm:$0xff] }
 0x136   :  { %2458 = vmatpush1.bf16.msra.mxu0 %v2457_v26  ;;  %v1627_v26 = vld [vmem:[%s5043_s3] sm:$0xff] }
 0x137   :  { %2460 = vmatprep.subr.bf16.mxu0 %v2459_v27  ;;  %v1628_v27 = vld [vmem:[%s5043_s3 + $0x8] sm:$0xff] }
 0x138   :  { %v2572_v34 = vpack.c.bf16 %v1628_v27, %v1627_v26  ;;  %v661_v26 = vld [vmem:[%s5041_s1 + $0x13a0] sm:$0xff]  ;;  %v663_v27 = vld [vmem:[%s5041_s1 + $0x13b0] sm:$0xff] }
 0x139   :  { %v2525_v37 = vpack.c.bf16 %v663_v27, %v661_v26  ;;  %v1744_v26 = vld [vmem:[%s5045_s5 + $0x28] sm:$0xff] }
 0x13a   :  { %2462 = vmatpush1.bf16.msra.mxu0 %v2461_v35  ;;  %v1630_v35 = vld [vmem:[%s5043_s3 + $0x18] sm:$0xff]  ;;  %2573 = vmatpush1.bf16.msra.mxu1 %v2572_v34  ;;  %v2593_v34 = vpack.c.bf16 %v1642_v23, %v1641_v22  ;;  %v1741_v22 = vld [vmem:[%s5045_s5 + $0x10] sm:$0xff] }
 0x13b   :  { %2464 = vmatprep.subr.bf16.mxu0 %v2463_v36  ;;  %v2499_v36 = vpack.c.bf16 %v640_v24, %v638_v28  ;;  %2574 = vmatprep.subr.bf16.mxu1 %v2688_v32  ;;  %v2521_v28 = vpack.c.bf16 %v659_v19, %v657_v18  ;;  %v1739_v18 = vld [vmem:[%s5045_s5] sm:$0xff]  ;;  %v1740_v19 = vld [vmem:[%s5045_s5 + $0x8] sm:$0xff]  ;;  %v1742_v23 = vld [vmem:[%s5045_s5 + $0x18] sm:$0xff] }
 0x13e   :  { %2466 = vmatpush1.bf16.msra.mxu0 %v2465_v41  ;;  %v2575_v41 = vpack.c.bf16 %v1630_v35, %v1629_v29  ;;  %v666_v29 = vld [vmem:[%s5041_s1 + $0x13c8] sm:$0xff]  ;;  %v1643_v35 = vld [vmem:[%s5043_s3 + $0x80] sm:$0xff] }
 0x13f   :  { %2468 = vmatprep.subr.bf16.mxu0 %v2467_v4  ;;  %v1632_v4 = vld [vmem:[%s5043_s3 + $0x28] sm:$0xff] }
 0x140   :  { %2576 = vmatpush1.bf16.msra.mxu1 %v2575_v41  ;;  %v2578_v48 = vpack.c.bf16 %v1632_v4, %v1631_v42  ;;  %v670_v41 = vld [vmem:[%s5041_s1 + $0x13e8] sm:$0xff]  ;;  %v672_v42 = vld [vmem:[%s5041_s1 + $0x13f8] sm:$0xff] }
 0x141   :  { %2577 = vmatprep.subr.bf16.mxu1 %v2688_v32  ;;  %v2531_v6 = vpack.c.bf16 %v672_v42, %v670_v41 }
 0x142   :  { %2470 = vmatpush1.bf16.msra.mxu0 %v2469_v33  ;;  %v646_v33 = vld [vmem:[%s5041_s1 + $0x1328] sm:$0xff] }
 0x143   :  { %2472 = vmatprep.subr.bf16.mxu0 %v2471_v47  ;;  %v648_v47 = vld [vmem:[%s5041_s1 + $0x1338] sm:$0xff] }
 0x144   :  { %2579 = vmatpush1.bf16.msra.mxu1 %v2578_v48 }
 0x145   :  { %1477 = vmatmul.mubr.f32.vlgmr.msra.gmra.mrb[0].mxu0 %v4370_v13  ;;  %v624_v13 = vld [vmem:[%s5041_s1 + $0x1278] sm:$0xff]  ;;  %2580 = vmatprep.subr.bf16.mxu1 %v2688_v32 }
 0x146   :  { %2474 = vmatpush1.bf16.msra.mxu0 %v2473_v11  ;;  %1547 = vmatprep.mubr.f32.mxu0 %v811_v52  ;;  %v2483_v54 = vpack.c.bf16 %v624_v13, %v622_v0  ;;  %v2507_v11 = vpack.c.bf16 %v648_v47, %v646_v33  ;;  %v645_v52 = vld [vmem:[%s5041_s1 + $0x1320] sm:$0xff]  ;;  %v651_v0 = vld [vmem:[%s5041_s1 + $0x1350] sm:$0xff]  ;;  %v654_v13 = vld [vmem:[%s5041_s1 + $0x1368] sm:$0xff] }
 0x147   :  { %2476 = vmatprep.subr.bf16.mxu0 %v2475_v53  ;;  %v647_v53 = vld [vmem:[%s5041_s1 + $0x1330] sm:$0xff]  ;;  %v2513_v3 = vpack.c.bf16 %v651_v0, %v649_v50  ;;  %v669_v33 = vld [vmem:[%s5041_s1 + $0x13e0] sm:$0xff] }
 0x148   :  { %2582 = vmatpush1.bf16.msra.mxu1 %v2581_v57  ;;  %v671_v47 = vld [vmem:[%s5041_s1 + $0x13f0] sm:$0xff]  ;;  %v1652_v57 = vld [vmem:[%s5043_s3 + $0xc8] sm:$0xff]  ;;  %v1655_v0 = vld [vmem:[%s5043_s3 + $0xe0] sm:$0xff] }
 0x149   :  { %2583 = vmatprep.subr.bf16.mxu1 %v2688_v32 }
 0x14a   :  { %2478 = vmatpush1.bf16.msra.mxu0 %v2477_v60  ;;  %v1636_v60 = vld [vmem:[%s5043_s3 + $0x48] sm:$0xff] }
 0x14b   :  { %2480 = vmatprep.subr.bf16.mxu0 %v2479_v62  ;;  %v2509_v62 = vpack.c.bf16 %v647_v53, %v645_v52  ;;  %v1649_v52 = vld [vmem:[%s5043_s3 + $0xb0] sm:$0xff]  ;;  %v1650_v53 = vld [vmem:[%s5043_s3 + $0xb8] sm:$0xff] }
 0x14c   :  { %v2605_v55 = vpack.c.bf16 %v1650_v53, %v1649_v52 }
 0x14e   :  { %2482 = vmatpush1.bf16.msra.mxu0 %v2481_v1  ;;  %v656_v1 = vld [vmem:[%s5041_s1 + $0x1378] sm:$0xff] }
 0x14f   :  { %2484 = vmatprep.subr.bf16.mxu0 %v2483_v54  ;;  %v2584_v54 = vpack.c.bf16 %v1636_v60, %v1635_v58  ;;  %v2515_v5 = vpack.c.bf16 %v656_v1, %v654_v13  ;;  %v2608_v58 = vpack.c.bf16 %v1652_v57, %v1651_v56  ;;  %v1656_v13 = vld [vmem:[%s5043_s3 + $0xe8] sm:$0xff] }
 0x150   :  { %v2614_v1 = vpack.c.bf16 %v1656_v13, %v1655_v0 }
 0x151   :  { %2585 = vmatpush1.bf16.msra.mxu1 %v2584_v54 }
 0x152   :  { %2486 = vmatpush1.bf16.msra.mxu0 %v2485_v7  ;;  %v653_v7 = vld [vmem:[%s5041_s1 + $0x1360] sm:$0xff]  ;;  %2586 = vmatprep.subr.bf16.mxu1 %v2688_v32 }
 0x153   :  { %2488 = vmatprep.subr.bf16.mxu0 %v2487_v8  ;;  %v655_v8 = vld [vmem:[%s5041_s1 + $0x1370] sm:$0xff] }
 0x155   :  { %2588 = vmatpush1.bf16.msra.mxu1 %v2587_v12 }
 0x156   :  { %2490 = vmatpush1.bf16.msra.mxu0 %v2489_v15  ;;  %v1640_v15 = vld [vmem:[%s5043_s3 + $0x68] sm:$0xff]  ;;  %2589 = vmatprep.subr.bf16.mxu1 %v2688_v32 }
 0x157   :  { %2492 = vmatprep.subr.bf16.mxu0 %v2491_v16  ;;  %v2517_v16 = vpack.c.bf16 %v655_v8, %v653_v7 }
 0x15a   :  { %2494 = vmatpush1.bf16.msra.mxu0 %v2493_v20  ;;  %v664_v20 = vld [vmem:[%s5041_s1 + $0x13b8] sm:$0xff] }
 0x15b   :  { %2496 = vmatprep.subr.bf16.mxu0 %v2495_v21  ;;  %v2590_v21 = vpack.c.bf16 %v1640_v15, %v1639_v14  ;;  %v2523_v24 = vpack.c.bf16 %v664_v20, %v662_v31  ;;  %v2617_v20 = vpack.c.bf16 %v1740_v19, %v1739_v18 }
 0x15d   :  { %2591 = vmatpush1.bf16.msra.mxu1 %v2590_v21 }
 0x15e   :  { %2498 = vmatpush1.bf16.msra.mxu0 %v2497_v59  ;;  %v668_v59 = vld [vmem:[%s5041_s1 + $0x13d8] sm:$0xff]  ;;  %2592 = vmatprep.subr.bf16.mxu1 %v2688_v32 }
 0x15f   :  { %2500 = vmatprep.subr.bf16.mxu0 %v2499_v36  ;;  %v1644_v36 = vld [vmem:[%s5043_s3 + $0x88] sm:$0xff]  ;;  %v2527_v38 = vpack.c.bf16 %v668_v59, %v666_v29  ;;  %v1745_v29 = vld [vmem:[%s5045_s5 + $0x30] sm:$0xff]  ;;  %v1746_v59 = vld [vmem:[%s5045_s5 + $0x38] sm:$0xff] }
 0x160   :  { %v2596_v4 = vpack.c.bf16 %v1644_v36, %v1643_v35  ;;  %v1747_v35 = vld [vmem:[%s5045_s5 + $0x40] sm:$0xff]  ;;  %v1748_v36 = vld [vmem:[%s5045_s5 + $0x48] sm:$0xff] }
 0x161   :  { %2594 = vmatpush1.bf16.msra.mxu1 %v2593_v34  ;;  %v2626_v34 = vpack.c.bf16 %v1746_v59, %v1745_v29 }
 0x162   :  { %2502 = vmatpush1.bf16.msra.mxu0 %v2501_v43  ;;  %2595 = vmatprep.subr.bf16.mxu1 %v2688_v32  ;;  %v1645_v43 = vld [vmem:[%s5043_s3 + $0x90] sm:$0xff] }
 0x163   :  { %2504 = vmatprep.subr.bf16.mxu0 %v2503_v44  ;;  %v1646_v44 = vld [vmem:[%s5043_s3 + $0x98] sm:$0xff] }
 0x164   :  { %v2599_v48 = vpack.c.bf16 %v1646_v44, %v1645_v43  ;;  %v1855_v43 = vld [vmem:[%s5046_s6] ss:$0 sm:$0xff] }
 0x165   :  { %2597 = vmatpush1.bf16.msra.mxu1 %v2596_v4 }
 0x166   :  { %2506 = vmatpush1.bf16.msra.mxu0 %v2505_v51  ;;  %2598 = vmatprep.subr.bf16.mxu1 %v2688_v32  ;;  %v2533_v51 = vpack.c.bf16 %v671_v47, %v669_v33 }
 0x167   :  { %2508 = vmatprep.subr.bf16.mxu0 %v2507_v11  ;;  %v2602_v11 = vpack.c.bf16 %v1648_v25, %v1647_v49 }
 0x169   :  { %2600 = vmatpush1.bf16.msra.mxu1 %v2599_v48 }
 0x16a   :  { %2510 = vmatpush1.bf16.msra.mxu0 %v2509_v62  ;;  %2601 = vmatprep.subr.bf16.mxu1 %v2688_v32  ;;  %v1654_v62 = vld [vmem:[%s5043_s3 + $0xd8] sm:$0xff] }
 0x16b   :  { %2512 = vmatprep.subr.bf16.mxu0 %v2511_v63 }
 0x16d   :  { %2603 = vmatpush1.bf16.msra.mxu1 %v2602_v11 }
 0x16e   :  { %2514 = vmatpush1.bf16.msra.mxu0 %v2513_v3  ;;  %2604 = vmatprep.subr.bf16.mxu1 %v2688_v32  ;;  %v709_v3 = vld [vmem:[%s5042_s2] sm:$0x3] }
 0x16f   :  { %2516 = vmatprep.subr.bf16.mxu0 %v2515_v5  ;;  %v717_v5 = vsub.s32 1, %v2984_v61  ;;  %v714_v7 = vrot.slane %v709_v3, %v713_v2 }
 0x171   :  { %2606 = vmatpush1.bf16.msra.mxu1 %v2605_v55  ;;  %v718_v8 = vrot.slane %v709_v3, %v717_v5 }
 0x172   :  { %2518 = vmatpush1.bf16.msra.mxu0 %v2517_v16  ;;  %2607 = vmatprep.subr.bf16.mxu1 %v2688_v32 }
 0x173   :  { %2520 = vmatprep.subr.bf16.mxu0 %v2519_v17 }
 0x175   :  { %2609 = vmatpush1.bf16.msra.mxu1 %v2608_v58 }
 0x176   :  { %2522 = vmatpush1.bf16.msra.mxu0 %v2521_v28  ;;  %2610 = vmatprep.subr.bf16.mxu1 %v2688_v32  ;;  %v2620_v28 = vpack.c.bf16 %v1742_v23, %v1741_v22 }
 0x177   :  { %2524 = vmatprep.subr.bf16.mxu0 %v2523_v24  ;;  %v1743_v24 = vld [vmem:[%s5045_s5 + $0x20] sm:$0xff]  ;;  %s1843_s5 = sshll.u32 %s2691_s30, 4  ;;  %s1844_s5 = int_to_ptr.vmem [resolvable:$true] %s1843_s5 }
 0x178   :  { %v2623_v27 = vpack.c.bf16 %v1744_v26, %v1743_v24  ;;  %p2668_p1 = scmp.lt.s32.totalorder %s1844_s5, %s1844_s5 }
 0x17a   :  { %2526 = vmatpush1.bf16.msra.mxu0 %v2525_v37  ;;  %v2629_v37 = vpack.c.bf16 %v1748_v36, %v1747_v35 }
 0x17b   :  { %2528 = vmatprep.subr.bf16.mxu0 %v2527_v38  ;;  %v2689_v38 = vmov 0.0  }
 0x17e   :  { %2530 = vmatpush1.bf16.msra.mxu0 %v2529_v45 }
 0x17f   :  { %2532 = vmatprep.subr.bf16.mxu0 %v2531_v6 }
 0x182   :  { %2534 = vmatpush1.bf16.msra.mxu0 %v2533_v51 }
 0x185   :  { %1548 = vmatmul.mubr.f32.vlgmr.msra.gmra.mrb[0].mxu0 %v4682_v46  ;;  %v1653_v46 = vld [vmem:[%s5043_s3 + $0xd0] sm:$0xff]  ;;  %s2663_s3 = scalar_lea.vmem %s1844_s5, 32 }
 0x186   :  { %v2611_v50 = vpack.c.bf16 %v1654_v62, %v1653_v46  ;;  %p2664_p0 = scmp.ne.s32.totalorder %s1844_s5, %s2663_s3  ;;  %p2669_p2 = scmp.lt.s32.totalorder %s2663_s3, %s2663_s3 }
 0x188   :  { %2612 = vmatpush1.bf16.msra.mxu1 %v2611_v50  ;;  %p2670_p3 = por %p2669_p2, %p2668_p1 }
 0x189   :  { %2613 = vmatprep.subr.bf16.mxu1 %v2688_v32 }
 0x18a   :  { %p2671_p4 = pnand %p2670_p3, %p2664_p0 }
 0x18c   :  { %2615 = vmatpush1.bf16.msra.mxu1 %v2614_v1 }
 0x18d   :  { %2616 = vmatprep.subr.bf16.mxu1 %v2688_v32 }
 0x1d7   :  { %v1123_v60 = vpop.f32.mrb[0].mxu1 }
 0x1d8   :  { %v1125_v63 = vpop.f32.mrb[1].mxu1  ;;  %v2631_v9 = vadd.f32 %v1123_v60, %v714_v7 }
 0x1d9   :  { %v2634_v10 = vadd.f32 %v1125_v63, %v718_v8 }
 0x1fb   :  { %v1620_v54 = vpop.f32.mrb[2].mxu1 }
 0x1fc   :  { %v1622_v30 = vpop.f32.mrb[3].mxu1 }
 0x258   :  { %v1549_v12 = vpop.f32.mrb[0].mxu0 }
 0x259   :  { %v2632_v14 = vadd.f32 %v2631_v9, %v1549_v12  ;;  %v1551_v15 = vpop.f32.mrb[1].mxu0 }
 0x25a   :  { %v2635_v16 = vadd.f32 %v2634_v10, %v1551_v15 }
 0x25b   :  { %v2633_v17 = vadd.f32 %v2632_v14, %v1620_v54 }
 0x25c   :  { %v2636_v31 = vadd.f32 %v2635_v16, %v1622_v30 }
 0x25d   :  { %v1625_v21 = vmax.f32 %v2633_v17, 0.0 }
 0x25e   :  { %v1626_v61 = vmax.f32 %v2636_v31, 0.0 }
 0x260   :  { %1854 = vmatprep.mubr.msk.f32.mxu1 %vm1664_vm1, %v1626_v61 }
 0x261   :  { %1733 = vmatmul.mubr.f32.vlgmr.msra.gmra.mrb[4].mxu1 %v1625_v21 }
 0x262   :  { %2618 = vmatpush3.bf16.msra.mxu1 %v2617_v20  ;;  %1892 = vmatprep.mubr.msk.f32.mxu1 %vm2690_vm3, %v2689_v38 }
 0x263   :  { %2619 = vmatprep.subr.bf16.mxu1 %v2688_v32 }
 0x266   :  { %2621 = vmatpush3.bf16.msra.mxu1 %v2620_v28 }
 0x267   :  { %2622 = vmatprep.subr.bf16.mxu1 %v2688_v32 }
 0x26a   :  { %2624 = vmatpush3.bf16.msra.mxu1 %v2623_v27 }
 0x26b   :  { %2625 = vmatprep.subr.bf16.mxu1 %v2688_v32 }
 0x26e   :  { %2627 = vmatpush3.bf16.msra.mxu1 %v2626_v34 }
 0x26f   :  { %2628 = vmatprep.subr.bf16.mxu1 %v2688_v32  ;;  %v1853_v32 = vld [vmem:[%s5044_s4] ss:$0 sm:$0xff] }
 0x272   :  { %2630 = vmatpush3.bf16.msra.mxu1 %v2629_v37 }
 0x273   :  { %1890 = vmatprep.subr.mxu1 %v2689_v38 }
 0x276   :  { %1891 = vmatpush3.msk.msra.mxu1 %vm1761_vm2, %v1749_v39 }
 0x334   :  { %v1734_v40 = vpop.f32.mrb[4].mxu1 }
 0x335   :  { %v1735_v41 = vadd.f32 %v1853_v32, %v1734_v40  ;;  %v1736_v42 = vpop.f32.mrb[5].mxu1 }
 0x337   :  { %v1738_v4 = vmax.f32 %v1735_v41, 0.0 }
 0x339   :  { %1893 = vmatmul.mubr.msk.f32.vlgmr.msra.gmra.mrb[6].mxu1 %vm1757_vm4, %v1738_v4 }
 0x40c   :  { %v1831_v44 = vpop.f32.mrb[6].mxu1 }
 0x40d   :  { %v1832_v45 = vadd.f32 %v1855_v43, %v1831_v44  ;;  %v1894_v6 = vpop.f32.mrb[7].mxu1 }
 0x40f   :  { %1836 = vst.msk [vmem:[#allocation2] sm:$0x3] %vm1835_vm5, %v1832_v45 }
 0x410   :  { %2674 = shalt.err (!%p2671_p4)
}
 0x411   :  { %s2675_s9 = scalar_lea.hbm %s5047_s7, 32 }
 0x412   :  { %p2676_p5 = scmp.ne.s32.totalorder %s5047_s7, %s2675_s9  ;;  %p2679_p6 = scmp.lt.u32.totalorder %s2675_s9, %s5047_s7 }
 0x414   :  { %p2681_p7 = pnand %p2679_p6, %p2676_p5 }
 0x416   :  { %2684 = shalt.err (!%p2681_p7)
}
 0x417   :  { %1846 = dma.vmem_to_hbm [thread:$0]  %s1844_s5, 32, %s5047_s7, [#allocation3]  }
 0x418   :  { %2685 = dma.done.wait [#allocation3], 32  }
 0x419   :  { %2686 = vsyncadd [#allocation3], 4294967264 }
 0x41a   :  { %1850 = vsyncpa [#allocation3], 1 }

</bundles_post_ra>
